<compile_context>
chip_gen: v7x
topology: tpu7x:2x2x1
jax: 0.10.0
libtpu: 0.0.40
codegen_flags: <defaults>
</compile_context>

<pallas_src>
import functools

import numpy as np
import jax
import jax.numpy as jnp
from jax import lax
from jax.experimental import pallas as pl
from jax.experimental.pallas import tpu as pltpu


def position_encoding(sentence_size, embedding_size):
    # identical to the PyTorch helper
    encoding = np.ones((embedding_size, sentence_size), dtype=np.float32)
    ls = sentence_size + 1
    le = embedding_size + 1
    for i in range(1, le):
        for j in range(1, ls):
            encoding[i - 1, j - 1] = (i - (le - 1) / 2) * (j - (ls - 1) / 2)
    encoding = 1 + 4 * encoding / embedding_size / sentence_size
    return np.transpose(encoding)


def _round_up(x, m):
    return ((x + m - 1) // m) * m


def memn2n_kernel(q_ids_ref, s_ids_ref, tab_ref, w_ref, b_ref, out_ref, *,
                  hops, memory_size, vocab_pad):
    """One batch tile: fused embedding gather, `hops` attention rounds, final FC.

    q_ids_ref : (TB, 3)       int32 query token ids
    s_ids_ref : (TB, 3*M)     int32 story token ids (story-major, word-minor)
    tab_ref   : (3*Vp, Dp)    f32 block-diagonal, encoding-scaled embedding table
                              tab[p*Vp + v, p*E:(p+1)*E] = emb[v] * enc[p*E:(p+1)*E]
    w_ref     : (Dp, C)       f32 fc weight (x @ W layout), zero-padded rows
    b_ref     : (1, C)        f32 fc bias
    out_ref   : (TB, C)       f32 logits
    """
    f32 = jnp.float32
    M = memory_size
    Vp = vocab_pad
    hp = jax.lax.Precision.HIGHEST

    iota_v = lax.broadcasted_iota(jnp.int32, (1, Vp), 1)                # (1, Vp)
    tab_parts = [tab_ref[p * Vp:(p + 1) * Vp, :] for p in range(3)]     # 3x (Vp, Dp)

    def embed3(ids, base):
        # Gather + concat + encoding-scale for the 3 word positions starting at
        # lane `base` of `ids`.  Exact one-hot (0/1) x table matmul on the MXU:
        # no HBM round-trip, no rounding (single non-zero term per output).
        out = None
        for p in range(3):
            oh = (ids[:, base + p:base + p + 1] == iota_v).astype(f32)  # (N, Vp)
            part = jnp.dot(oh, tab_parts[p],
                           preferred_element_type=f32, precision=hp)    # (N, Dp)
            out = part if out is None else out + part
        return out

    # u_0 = q_emb * enc (encoding already folded into the table).
    u = embed3(q_ids_ref[...], 0)                                        # (TB, Dp)
    s_ids = s_ids_ref[...]                                               # (TB, 3*M)
    # m = c = story embeddings * enc; computed once, reused across all hops.
    m_embs = [embed3(s_ids, 3 * s) for s in range(M)]                    # M x (TB, Dp)

    for _ in range(hops):                                                # static unroll
        # Attention scores: VPU multiply + lane (XLU) reduce per story.
        scores = [jnp.sum(m_embs[s] * u, axis=-1, keepdims=True)         # (TB, 1)
                  for s in range(M)]
        # Softmax over the M memory slots as an unrolled chain (no lane-sparse
        # cross-lane reductions); exact divide for the denominator.
        smax = scores[0]
        for s in range(1, M):
            smax = jnp.maximum(smax, scores[s])
        es = [jnp.exp(scores[s] - smax) for s in range(M)]
        den = es[0]
        for s in range(1, M):
            den = den + es[s]
        inv = 1.0 / den                                                   # (TB, 1)
        # o_k = sum_s probs[s] * m[s]  -- unrolled VPU multiply-adds.
        o = (es[0] * inv) * m_embs[0]
        for s in range(1, M):
            o = o + (es[s] * inv) * m_embs[s]
        u = u + o

    # fc(u_k); dropout is identity in eval mode.
    # TODO(synk): training-mode dropout (pltpu.prng_* Bernoulli mask) not implemented.
    logits = jnp.dot(u, w_ref[...], preferred_element_type=f32, precision=hp)
    out_ref[...] = (logits + b_ref[...]).astype(out_ref.dtype)


def memn2n_forward(queries, stories, emb_weight, enc, fc_w, fc_b, *, hops,
                   batch_tile=None):
    """queries: (B, 3) int32, stories: (B, M, 3) int32 -> logits (B, C)."""
    B = queries.shape[0]
    M = stories.shape[1]
    V, E = emb_weight.shape
    D3 = 3 * E
    C = fc_w.shape[0]

    Dp = _round_up(D3, 128)   # lane-aligned feature width
    Vp = _round_up(V, 128)    # lane-aligned vocab width (one-hot columns)

    f32 = jnp.float32
    enc_flat = enc.reshape(1, D3).astype(f32)

    # Block-diagonal embedding table with the position encoding folded in:
    # block p holds emb * enc[p*E:(p+1)*E] in columns [p*E, (p+1)*E).
    # TODO(synk): for large vocabularies (table >> VMEM) switch the in-kernel
    # lookup from one-hot matmul to a manual DMA gather of the needed rows.
    tab = emb_weight.astype(f32)
    blocks = []
    for p in range(3):
        blk = tab * enc_flat[:, p * E:(p + 1) * E]                        # (V, E)
        blk = jnp.pad(blk, ((0, Vp - V), (p * E, Dp - (p + 1) * E)))      # (Vp, Dp)
        blocks.append(blk)
    tab_enc = jnp.concatenate(blocks, axis=0)                             # (3*Vp, Dp)

    w_p = jnp.pad(fc_w.T.astype(f32), ((0, Dp - D3), (0, 0)))             # (Dp, C)
    b_p = fc_b.reshape(1, C).astype(f32)

    # ---- batch tiling -------------------------------------------------------
    if batch_tile is None:
        # With the gather fused, per-step HBM traffic is only ~108 B of ids and
        # 16 B of logits per row, so the step is compute-bound; TB=512 keeps
        # the live in-kernel f32 intermediates (~(M+6) x (TB, Dp) + one-hot
        # temps ~= 5 MiB) far below VMEM on every chip while compute per step
        # (>> 0.35 us) fully amortizes the fixed per-step overhead.
        tb = min(512, _round_up(B, 8))
    else:
        tb = batch_tile
    B_pad = _round_up(B, tb)

    q_ids = jnp.pad(queries.astype(jnp.int32), ((0, B_pad - B), (0, 0)))           # (B_pad, 3)
    s_ids = jnp.pad(stories.reshape(B, 3 * M).astype(jnp.int32),
                    ((0, B_pad - B), (0, 0)))                                       # (B_pad, 3M)
    grid = (B_pad // tb,)

    # ---- VMEM budget from actual per-tile working set ------------------------
    ids_tile_bytes = tb * (3 + 3 * M) * 4
    out_tile_bytes = tb * C * 4
    const_bytes = (3 * Vp * Dp + Dp * C + C) * 4
    # live in-kernel f32 values: M story embeddings + ~6 (tb, Dp) working arrays
    # (u, o, partial sums) + a few (tb, Vp) one-hot temporaries.
    interm_bytes = tb * Dp * 4 * (M + 6) + 4 * tb * Vp * 4
    vmem_bytes = int(2 * (ids_tile_bytes + out_tile_bytes) + 2 * const_bytes
                     + interm_bytes + (16 << 20))

    cost = pl.CostEstimate(
        flops=(2 * B_pad * (3 * M + 3) * Vp * Dp          # one-hot gather matmuls
               + 2 * hops * B_pad * (2 * M * Dp)          # scores + weighted story sum
               + 2 * B_pad * Dp * C),                     # final fc
        transcendentals=hops * B_pad * M,
        bytes_accessed=int(q_ids.size * 4 + s_ids.size * 4 + tab_enc.size * 4
                           + w_p.size * 4 + b_p.size * 4 + B_pad * C * 4),
    )

    out = pl.pallas_call(
        functools.partial(memn2n_kernel, hops=hops, memory_size=M, vocab_pad=Vp),
        out_shape=jax.ShapeDtypeStruct((B_pad, C), jnp.float32),
        grid=grid,
        in_specs=[
            pl.BlockSpec((tb, 3), lambda i: (i, 0)),          # query ids
            pl.BlockSpec((tb, 3 * M), lambda i: (i, 0)),      # story ids
            pl.BlockSpec((3 * Vp, Dp), lambda i: (0, 0)),     # enc-scaled table (resident)
            pl.BlockSpec((Dp, C), lambda i: (0, 0)),          # fc weight (resident)
            pl.BlockSpec((1, C), lambda i: (0, 0)),           # fc bias (resident)
        ],
        out_specs=pl.BlockSpec((tb, C), lambda i: (i, 0)),    # unpadded class axis
        compiler_params=pltpu.CompilerParams(
            dimension_semantics=("parallel",),                 # megacore-splittable
            vmem_limit_bytes=vmem_bytes),
        cost_estimate=cost,
    )(q_ids, s_ids, tab_enc, w_p, b_p)

    return out[:B, :]


def memn2n_reference(queries, stories, emb_weight, enc, fc_w, fc_b, *, hops):
    """Pure-JAX reference mirroring the PyTorch forward (eval mode)."""
    B = queries.shape[0]
    M = stories.shape[1]
    E = emb_weight.shape[1]
    D3 = 3 * E
    enc = enc.reshape(1, D3)
    u = emb_weight[queries].reshape(B, D3) * enc
    m = emb_weight[stories].reshape(B, M, D3) * enc[None]
    for _ in range(hops):
        dotted = jnp.sum(m * u[:, None, :], axis=-1)
        probs = jax.nn.softmax(dotted, axis=-1)
        o = jnp.sum(m * probs[:, :, None], axis=1)
        u = u + o
    return u @ fc_w.T + fc_b


if __name__ == "__main__":
    # Small config consistent with the module: sentence_size must be 3
    # (encoding is built over 3*embedding_dim and broadcast against 3E).
    batch_size = 2
    vocab_size = 50
    embedding_dim = 32
    sentence_size = 3
    memory_size = 8
    hops = 3
    num_classes = 4
    D3 = 3 * embedding_dim

    key = jax.random.PRNGKey(0)
    k_emb, k_w, k_b, k_q, k_s = jax.random.split(key, 5)

    # Deterministic parameter init (shapes from __init__).
    emb_weight = jax.random.normal(k_emb, (vocab_size, embedding_dim), jnp.float32)
    fc_w = (jax.random.uniform(k_w, (num_classes, D3), jnp.float32) - 0.5) * 2.0 / np.sqrt(D3)
    fc_b = (jax.random.uniform(k_b, (num_classes,), jnp.float32) - 0.5) * 2.0 / np.sqrt(D3)
    enc = jnp.asarray(position_encoding(1, sentence_size * embedding_dim))  # (1, 3E)

    # Integer inputs.
    queries = jax.random.randint(k_q, (batch_size, sentence_size), 0, vocab_size, jnp.int32)
    stories = jax.random.randint(k_s, (batch_size, memory_size, sentence_size), 0,
                                 vocab_size, jnp.int32)

    out = memn2n_forward(queries, stories, emb_weight, enc, fc_w, fc_b, hops=hops)
    out = jax.block_until_ready(out)

    ref = memn2n_reference(queries, stories, emb_weight, enc, fc_w, fc_b, hops=hops)
    # Exact softmax divide + f32 HIGHEST-precision dots -> tight tolerances.
    np.testing.assert_allclose(np.asarray(out), np.asarray(ref), rtol=5e-3, atol=5e-3)

    print("KERNEL_OK")
</pallas_src>

<mosaic_0001>
module attributes {stable_mosaic.version = 11 : i64} {
  func.func @memn2n_kernel(%arg0: i32, %arg1: memref<8x3xi32, #tpu.memory_space<vmem>>, %arg2: memref<8x24xi32, #tpu.memory_space<vmem>>, %arg3: memref<384x128xf32, #tpu.memory_space<vmem>>, %arg4: memref<128x4xf32, #tpu.memory_space<vmem>>, %arg5: memref<1x4xf32, #tpu.memory_space<vmem>>, %arg6: memref<8x4xf32, #tpu.memory_space<vmem>>) attributes {dimension_semantics = [#tpu.dimension_semantics<parallel>], iteration_bounds = array<i64: 1>, scalar_prefetch = 0 : i64, scratch_operands = 0 : i64, tpu.core_type = #tpu.core_type<tc>, window_params = [{transform_indices = @transform_0, window_bounds = array<i64: 8, 3>}, {transform_indices = @transform_1, window_bounds = array<i64: 8, 24>}, {pipeline_mode = #tpu.pipeline_mode<synchronous>, transform_indices = @transform_2, window_bounds = array<i64: 384, 128>}, {pipeline_mode = #tpu.pipeline_mode<synchronous>, transform_indices = @transform_3, window_bounds = array<i64: 128, 4>}, {pipeline_mode = #tpu.pipeline_mode<synchronous>, transform_indices = @transform_4, window_bounds = array<i64: 1, 4>}, {transform_indices = @transform_5, window_bounds = array<i64: 8, 4>}]} {
    %0 = tpu.iota {dimensions = array<i32: 1>} : vector<1x128xi32>
    %c0 = arith.constant 0 : index
    %c0_0 = arith.constant 0 : index
    %1 = vector.load %arg3[%c0, %c0_0] : memref<384x128xf32, #tpu.memory_space<vmem>>, vector<128x128xf32>
    %c128 = arith.constant 128 : index
    %c0_1 = arith.constant 0 : index
    %2 = vector.load %arg3[%c128, %c0_1] : memref<384x128xf32, #tpu.memory_space<vmem>>, vector<128x128xf32>
    %c256 = arith.constant 256 : index
    %c0_2 = arith.constant 0 : index
    %3 = vector.load %arg3[%c256, %c0_2] : memref<384x128xf32, #tpu.memory_space<vmem>>, vector<128x128xf32>
    %c0_3 = arith.constant 0 : index
    %c0_4 = arith.constant 0 : index
    %4 = vector.load %arg1[%c0_3, %c0_4] : memref<8x3xi32, #tpu.memory_space<vmem>>, vector<8x3xi32>
    %5 = vector.extract_strided_slice %4 {offsets = [0, 0], sizes = [8, 1], strides = [1, 1]} : vector<8x3xi32> to vector<8x1xi32>
    %6 = vector.broadcast %5 : vector<8x1xi32> to vector<8x128xi32>
    %7 = vector.broadcast %0 : vector<1x128xi32> to vector<8x128xi32>
    %8 = arith.cmpi eq, %6, %7 : vector<8x128xi32>
    %9 = arith.extui %8 : vector<8x128xi1> to vector<8x128xi32>
    %10 = arith.sitofp %9 : vector<8x128xi32> to vector<8x128xf32>
    %cst = arith.constant dense<0.000000e+00> : vector<8x128xf32>
    %11 = tpu.matmul %10, %1, %cst {dimension_numbers = #tpu.dot_dimension_numbers<[1], [0], [0], [1], [0, 0, 1, 1], [], []>, precision = #tpu.contract_precision<fp32>} : vector<8x128xf32>, vector<128x128xf32>, vector<8x128xf32> -> vector<8x128xf32>
    %12 = vector.extract_strided_slice %4 {offsets = [0, 1], sizes = [8, 1], strides = [1, 1]} : vector<8x3xi32> to vector<8x1xi32>
    %13 = vector.broadcast %12 : vector<8x1xi32> to vector<8x128xi32>
    %14 = vector.broadcast %0 : vector<1x128xi32> to vector<8x128xi32>
    %15 = arith.cmpi eq, %13, %14 : vector<8x128xi32>
    %16 = arith.extui %15 : vector<8x128xi1> to vector<8x128xi32>
    %17 = arith.sitofp %16 : vector<8x128xi32> to vector<8x128xf32>
    %cst_5 = arith.constant dense<0.000000e+00> : vector<8x128xf32>
    %18 = tpu.matmul %17, %2, %cst_5 {dimension_numbers = #tpu.dot_dimension_numbers<[1], [0], [0], [1], [0, 0, 1, 1], [], []>, precision = #tpu.contract_precision<fp32>} : vector<8x128xf32>, vector<128x128xf32>, vector<8x128xf32> -> vector<8x128xf32>
    %19 = arith.addf %11, %18 : vector<8x128xf32>
    %20 = vector.extract_strided_slice %4 {offsets = [0, 2], sizes = [8, 1], strides = [1, 1]} : vector<8x3xi32> to vector<8x1xi32>
    %21 = vector.broadcast %20 : vector<8x1xi32> to vector<8x128xi32>
    %22 = vector.broadcast %0 : vector<1x128xi32> to vector<8x128xi32>
    %23 = arith.cmpi eq, %21, %22 : vector<8x128xi32>
    %24 = arith.extui %23 : vector<8x128xi1> to vector<8x128xi32>
    %25 = arith.sitofp %24 : vector<8x128xi32> to vector<8x128xf32>
    %cst_6 = arith.constant dense<0.000000e+00> : vector<8x128xf32>
    %26 = tpu.matmul %25, %3, %cst_6 {dimension_numbers = #tpu.dot_dimension_numbers<[1], [0], [0], [1], [0, 0, 1, 1], [], []>, precision = #tpu.contract_precision<fp32>} : vector<8x128xf32>, vector<128x128xf32>, vector<8x128xf32> -> vector<8x128xf32>
    %27 = arith.addf %19, %26 : vector<8x128xf32>
    %c0_7 = arith.constant 0 : index
    %c0_8 = arith.constant 0 : index
    %28 = vector.load %arg2[%c0_7, %c0_8] : memref<8x24xi32, #tpu.memory_space<vmem>>, vector<8x24xi32>
    %29 = vector.extract_strided_slice %28 {offsets = [0, 0], sizes = [8, 1], strides = [1, 1]} : vector<8x24xi32> to vector<8x1xi32>
    %30 = vector.broadcast %29 : vector<8x1xi32> to vector<8x128xi32>
    %31 = vector.broadcast %0 : vector<1x128xi32> to vector<8x128xi32>
    %32 = arith.cmpi eq, %30, %31 : vector<8x128xi32>
    %33 = arith.extui %32 : vector<8x128xi1> to vector<8x128xi32>
    %34 = arith.sitofp %33 : vector<8x128xi32> to vector<8x128xf32>
    %cst_9 = arith.constant dense<0.000000e+00> : vector<8x128xf32>
    %35 = tpu.matmul %34, %1, %cst_9 {dimension_numbers = #tpu.dot_dimension_numbers<[1], [0], [0], [1], [0, 0, 1, 1], [], []>, precision = #tpu.contract_precision<fp32>} : vector<8x128xf32>, vector<128x128xf32>, vector<8x128xf32> -> vector<8x128xf32>
    %36 = vector.extract_strided_slice %28 {offsets = [0, 1], sizes = [8, 1], strides = [1, 1]} : vector<8x24xi32> to vector<8x1xi32>
    %37 = vector.broadcast %36 : vector<8x1xi32> to vector<8x128xi32>
    %38 = vector.broadcast %0 : vector<1x128xi32> to vector<8x128xi32>
    %39 = arith.cmpi eq, %37, %38 : vector<8x128xi32>
    %40 = arith.extui %39 : vector<8x128xi1> to vector<8x128xi32>
    %41 = arith.sitofp %40 : vector<8x128xi32> to vector<8x128xf32>
    %cst_10 = arith.constant dense<0.000000e+00> : vector<8x128xf32>
    %42 = tpu.matmul %41, %2, %cst_10 {dimension_numbers = #tpu.dot_dimension_numbers<[1], [0], [0], [1], [0, 0, 1, 1], [], []>, precision = #tpu.contract_precision<fp32>} : vector<8x128xf32>, vector<128x128xf32>, vector<8x128xf32> -> vector<8x128xf32>
    %43 = arith.addf %35, %42 : vector<8x128xf32>
    %44 = vector.extract_strided_slice %28 {offsets = [0, 2], sizes = [8, 1], strides = [1, 1]} : vector<8x24xi32> to vector<8x1xi32>
    %45 = vector.broadcast %44 : vector<8x1xi32> to vector<8x128xi32>
    %46 = vector.broadcast %0 : vector<1x128xi32> to vector<8x128xi32>
    %47 = arith.cmpi eq, %45, %46 : vector<8x128xi32>
    %48 = arith.extui %47 : vector<8x128xi1> to vector<8x128xi32>
    %49 = arith.sitofp %48 : vector<8x128xi32> to vector<8x128xf32>
    %cst_11 = arith.constant dense<0.000000e+00> : vector<8x128xf32>
    %50 = tpu.matmul %49, %3, %cst_11 {dimension_numbers = #tpu.dot_dimension_numbers<[1], [0], [0], [1], [0, 0, 1, 1], [], []>, precision = #tpu.contract_precision<fp32>} : vector<8x128xf32>, vector<128x128xf32>, vector<8x128xf32> -> vector<8x128xf32>
    %51 = arith.addf %43, %50 : vector<8x128xf32>
    %52 = vector.extract_strided_slice %28 {offsets = [0, 3], sizes = [8, 1], strides = [1, 1]} : vector<8x24xi32> to vector<8x1xi32>
    %53 = vector.broadcast %52 : vector<8x1xi32> to vector<8x128xi32>
    %54 = vector.broadcast %0 : vector<1x128xi32> to vector<8x128xi32>
    %55 = arith.cmpi eq, %53, %54 : vector<8x128xi32>
    %56 = arith.extui %55 : vector<8x128xi1> to vector<8x128xi32>
    %57 = arith.sitofp %56 : vector<8x128xi32> to vector<8x128xf32>
    %cst_12 = arith.constant dense<0.000000e+00> : vector<8x128xf32>
    %58 = tpu.matmul %57, %1, %cst_12 {dimension_numbers = #tpu.dot_dimension_numbers<[1], [0], [0], [1], [0, 0, 1, 1], [], []>, precision = #tpu.contract_precision<fp32>} : vector<8x128xf32>, vector<128x128xf32>, vector<8x128xf32> -> vector<8x128xf32>
    %59 = vector.extract_strided_slice %28 {offsets = [0, 4], sizes = [8, 1], strides = [1, 1]} : vector<8x24xi32> to vector<8x1xi32>
    %60 = vector.broadcast %59 : vector<8x1xi32> to vector<8x128xi32>
    %61 = vector.broadcast %0 : vector<1x128xi32> to vector<8x128xi32>
    %62 = arith.cmpi eq, %60, %61 : vector<8x128xi32>
    %63 = arith.extui %62 : vector<8x128xi1> to vector<8x128xi32>
    %64 = arith.sitofp %63 : vector<8x128xi32> to vector<8x128xf32>
    %cst_13 = arith.constant dense<0.000000e+00> : vector<8x128xf32>
    %65 = tpu.matmul %64, %2, %cst_13 {dimension_numbers = #tpu.dot_dimension_numbers<[1], [0], [0], [1], [0, 0, 1, 1], [], []>, precision = #tpu.contract_precision<fp32>} : vector<8x128xf32>, vector<128x128xf32>, vector<8x128xf32> -> vector<8x128xf32>
    %66 = arith.addf %58, %65 : vector<8x128xf32>
    %67 = vector.extract_strided_slice %28 {offsets = [0, 5], sizes = [8, 1], strides = [1, 1]} : vector<8x24xi32> to vector<8x1xi32>
    %68 = vector.broadcast %67 : vector<8x1xi32> to vector<8x128xi32>
    %69 = vector.broadcast %0 : vector<1x128xi32> to vector<8x128xi32>
    %70 = arith.cmpi eq, %68, %69 : vector<8x128xi32>
    %71 = arith.extui %70 : vector<8x128xi1> to vector<8x128xi32>
    %72 = arith.sitofp %71 : vector<8x128xi32> to vector<8x128xf32>
    %cst_14 = arith.constant dense<0.000000e+00> : vector<8x128xf32>
    %73 = tpu.matmul %72, %3, %cst_14 {dimension_numbers = #tpu.dot_dimension_numbers<[1], [0], [0], [1], [0, 0, 1, 1], [], []>, precision = #tpu.contract_precision<fp32>} : vector<8x128xf32>, vector<128x128xf32>, vector<8x128xf32> -> vector<8x128xf32>
    %74 = arith.addf %66, %73 : vector<8x128xf32>
    %75 = vector.extract_strided_slice %28 {offsets = [0, 6], sizes = [8, 1], strides = [1, 1]} : vector<8x24xi32> to vector<8x1xi32>
    %76 = vector.broadcast %75 : vector<8x1xi32> to vector<8x128xi32>
    %77 = vector.broadcast %0 : vector<1x128xi32> to vector<8x128xi32>
    %78 = arith.cmpi eq, %76, %77 : vector<8x128xi32>
    %79 = arith.extui %78 : vector<8x128xi1> to vector<8x128xi32>
    %80 = arith.sitofp %79 : vector<8x128xi32> to vector<8x128xf32>
    %cst_15 = arith.constant dense<0.000000e+00> : vector<8x128xf32>
    %81 = tpu.matmul %80, %1, %cst_15 {dimension_numbers = #tpu.dot_dimension_numbers<[1], [0], [0], [1], [0, 0, 1, 1], [], []>, precision = #tpu.contract_precision<fp32>} : vector<8x128xf32>, vector<128x128xf32>, vector<8x128xf32> -> vector<8x128xf32>
    %82 = vector.extract_strided_slice %28 {offsets = [0, 7], sizes = [8, 1], strides = [1, 1]} : vector<8x24xi32> to vector<8x1xi32>
    %83 = vector.broadcast %82 : vector<8x1xi32> to vector<8x128xi32>
    %84 = vector.broadcast %0 : vector<1x128xi32> to vector<8x128xi32>
    %85 = arith.cmpi eq, %83, %84 : vector<8x128xi32>
    %86 = arith.extui %85 : vector<8x128xi1> to vector<8x128xi32>
    %87 = arith.sitofp %86 : vector<8x128xi32> to vector<8x128xf32>
    %cst_16 = arith.constant dense<0.000000e+00> : vector<8x128xf32>
    %88 = tpu.matmul %87, %2, %cst_16 {dimension_numbers = #tpu.dot_dimension_numbers<[1], [0], [0], [1], [0, 0, 1, 1], [], []>, precision = #tpu.contract_precision<fp32>} : vector<8x128xf32>, vector<128x128xf32>, vector<8x128xf32> -> vector<8x128xf32>
    %89 = arith.addf %81, %88 : vector<8x128xf32>
    %90 = vector.extract_strided_slice %28 {offsets = [0, 8], sizes = [8, 1], strides = [1, 1]} : vector<8x24xi32> to vector<8x1xi32>
    %91 = vector.broadcast %90 : vector<8x1xi32> to vector<8x128xi32>
    %92 = vector.broadcast %0 : vector<1x128xi32> to vector<8x128xi32>
    %93 = arith.cmpi eq, %91, %92 : vector<8x128xi32>
    %94 = arith.extui %93 : vector<8x128xi1> to vector<8x128xi32>
    %95 = arith.sitofp %94 : vector<8x128xi32> to vector<8x128xf32>
    %cst_17 = arith.constant dense<0.000000e+00> : vector<8x128xf32>
    %96 = tpu.matmul %95, %3, %cst_17 {dimension_numbers = #tpu.dot_dimension_numbers<[1], [0], [0], [1], [0, 0, 1, 1], [], []>, precision = #tpu.contract_precision<fp32>} : vector<8x128xf32>, vector<128x128xf32>, vector<8x128xf32> -> vector<8x128xf32>
    %97 = arith.addf %89, %96 : vector<8x128xf32>
    %98 = vector.extract_strided_slice %28 {offsets = [0, 9], sizes = [8, 1], strides = [1, 1]} : vector<8x24xi32> to vector<8x1xi32>
    %99 = vector.broadcast %98 : vector<8x1xi32> to vector<8x128xi32>
    %100 = vector.broadcast %0 : vector<1x128xi32> to vector<8x128xi32>
    %101 = arith.cmpi eq, %99, %100 : vector<8x128xi32>
    %102 = arith.extui %101 : vector<8x128xi1> to vector<8x128xi32>
    %103 = arith.sitofp %102 : vector<8x128xi32> to vector<8x128xf32>
    %cst_18 = arith.constant dense<0.000000e+00> : vector<8x128xf32>
    %104 = tpu.matmul %103, %1, %cst_18 {dimension_numbers = #tpu.dot_dimension_numbers<[1], [0], [0], [1], [0, 0, 1, 1], [], []>, precision = #tpu.contract_precision<fp32>} : vector<8x128xf32>, vector<128x128xf32>, vector<8x128xf32> -> vector<8x128xf32>
    %105 = vector.extract_strided_slice %28 {offsets = [0, 10], sizes = [8, 1], strides = [1, 1]} : vector<8x24xi32> to vector<8x1xi32>
    %106 = vector.broadcast %105 : vector<8x1xi32> to vector<8x128xi32>
    %107 = vector.broadcast %0 : vector<1x128xi32> to vector<8x128xi32>
    %108 = arith.cmpi eq, %106, %107 : vector<8x128xi32>
    %109 = arith.extui %108 : vector<8x128xi1> to vector<8x128xi32>
    %110 = arith.sitofp %109 : vector<8x128xi32> to vector<8x128xf32>
    %cst_19 = arith.constant dense<0.000000e+00> : vector<8x128xf32>
    %111 = tpu.matmul %110, %2, %cst_19 {dimension_numbers = #tpu.dot_dimension_numbers<[1], [0], [0], [1], [0, 0, 1, 1], [], []>, precision = #tpu.contract_precision<fp32>} : vector<8x128xf32>, vector<128x128xf32>, vector<8x128xf32> -> vector<8x128xf32>
    %112 = arith.addf %104, %111 : vector<8x128xf32>
    %113 = vector.extract_strided_slice %28 {offsets = [0, 11], sizes = [8, 1], strides = [1, 1]} : vector<8x24xi32> to vector<8x1xi32>
    %114 = vector.broadcast %113 : vector<8x1xi32> to vector<8x128xi32>
    %115 = vector.broadcast %0 : vector<1x128xi32> to vector<8x128xi32>
    %116 = arith.cmpi eq, %114, %115 : vector<8x128xi32>
    %117 = arith.extui %116 : vector<8x128xi1> to vector<8x128xi32>
    %118 = arith.sitofp %117 : vector<8x128xi32> to vector<8x128xf32>
    %cst_20 = arith.constant dense<0.000000e+00> : vector<8x128xf32>
    %119 = tpu.matmul %118, %3, %cst_20 {dimension_numbers = #tpu.dot_dimension_numbers<[1], [0], [0], [1], [0, 0, 1, 1], [], []>, precision = #tpu.contract_precision<fp32>} : vector<8x128xf32>, vector<128x128xf32>, vector<8x128xf32> -> vector<8x128xf32>
    %120 = arith.addf %112, %119 : vector<8x128xf32>
    %121 = vector.extract_strided_slice %28 {offsets = [0, 12], sizes = [8, 1], strides = [1, 1]} : vector<8x24xi32> to vector<8x1xi32>
    %122 = vector.broadcast %121 : vector<8x1xi32> to vector<8x128xi32>
    %123 = vector.broadcast %0 : vector<1x128xi32> to vector<8x128xi32>
    %124 = arith.cmpi eq, %122, %123 : vector<8x128xi32>
    %125 = arith.extui %124 : vector<8x128xi1> to vector<8x128xi32>
    %126 = arith.sitofp %125 : vector<8x128xi32> to vector<8x128xf32>
    %cst_21 = arith.constant dense<0.000000e+00> : vector<8x128xf32>
    %127 = tpu.matmul %126, %1, %cst_21 {dimension_numbers = #tpu.dot_dimension_numbers<[1], [0], [0], [1], [0, 0, 1, 1], [], []>, precision = #tpu.contract_precision<fp32>} : vector<8x128xf32>, vector<128x128xf32>, vector<8x128xf32> -> vector<8x128xf32>
    %128 = vector.extract_strided_slice %28 {offsets = [0, 13], sizes = [8, 1], strides = [1, 1]} : vector<8x24xi32> to vector<8x1xi32>
    %129 = vector.broadcast %128 : vector<8x1xi32> to vector<8x128xi32>
    %130 = vector.broadcast %0 : vector<1x128xi32> to vector<8x128xi32>
    %131 = arith.cmpi eq, %129, %130 : vector<8x128xi32>
    %132 = arith.extui %131 : vector<8x128xi1> to vector<8x128xi32>
    %133 = arith.sitofp %132 : vector<8x128xi32> to vector<8x128xf32>
    %cst_22 = arith.constant dense<0.000000e+00> : vector<8x128xf32>
    %134 = tpu.matmul %133, %2, %cst_22 {dimension_numbers = #tpu.dot_dimension_numbers<[1], [0], [0], [1], [0, 0, 1, 1], [], []>, precision = #tpu.contract_precision<fp32>} : vector<8x128xf32>, vector<128x128xf32>, vector<8x128xf32> -> vector<8x128xf32>
    %135 = arith.addf %127, %134 : vector<8x128xf32>
    %136 = vector.extract_strided_slice %28 {offsets = [0, 14], sizes = [8, 1], strides = [1, 1]} : vector<8x24xi32> to vector<8x1xi32>
    %137 = vector.broadcast %136 : vector<8x1xi32> to vector<8x128xi32>
    %138 = vector.broadcast %0 : vector<1x128xi32> to vector<8x128xi32>
    %139 = arith.cmpi eq, %137, %138 : vector<8x128xi32>
    %140 = arith.extui %139 : vector<8x128xi1> to vector<8x128xi32>
    %141 = arith.sitofp %140 : vector<8x128xi32> to vector<8x128xf32>
    %cst_23 = arith.constant dense<0.000000e+00> : vector<8x128xf32>
    %142 = tpu.matmul %141, %3, %cst_23 {dimension_numbers = #tpu.dot_dimension_numbers<[1], [0], [0], [1], [0, 0, 1, 1], [], []>, precision = #tpu.contract_precision<fp32>} : vector<8x128xf32>, vector<128x128xf32>, vector<8x128xf32> -> vector<8x128xf32>
    %143 = arith.addf %135, %142 : vector<8x128xf32>
    %144 = vector.extract_strided_slice %28 {offsets = [0, 15], sizes = [8, 1], strides = [1, 1]} : vector<8x24xi32> to vector<8x1xi32>
    %145 = vector.broadcast %144 : vector<8x1xi32> to vector<8x128xi32>
    %146 = vector.broadcast %0 : vector<1x128xi32> to vector<8x128xi32>
    %147 = arith.cmpi eq, %145, %146 : vector<8x128xi32>
    %148 = arith.extui %147 : vector<8x128xi1> to vector<8x128xi32>
    %149 = arith.sitofp %148 : vector<8x128xi32> to vector<8x128xf32>
    %cst_24 = arith.constant dense<0.000000e+00> : vector<8x128xf32>
    %150 = tpu.matmul %149, %1, %cst_24 {dimension_numbers = #tpu.dot_dimension_numbers<[1], [0], [0], [1], [0, 0, 1, 1], [], []>, precision = #tpu.contract_precision<fp32>} : vector<8x128xf32>, vector<128x128xf32>, vector<8x128xf32> -> vector<8x128xf32>
    %151 = vector.extract_strided_slice %28 {offsets = [0, 16], sizes = [8, 1], strides = [1, 1]} : vector<8x24xi32> to vector<8x1xi32>
    %152 = vector.broadcast %151 : vector<8x1xi32> to vector<8x128xi32>
    %153 = vector.broadcast %0 : vector<1x128xi32> to vector<8x128xi32>
    %154 = arith.cmpi eq, %152, %153 : vector<8x128xi32>
    %155 = arith.extui %154 : vector<8x128xi1> to vector<8x128xi32>
    %156 = arith.sitofp %155 : vector<8x128xi32> to vector<8x128xf32>
    %cst_25 = arith.constant dense<0.000000e+00> : vector<8x128xf32>
    %157 = tpu.matmul %156, %2, %cst_25 {dimension_numbers = #tpu.dot_dimension_numbers<[1], [0], [0], [1], [0, 0, 1, 1], [], []>, precision = #tpu.contract_precision<fp32>} : vector<8x128xf32>, vector<128x128xf32>, vector<8x128xf32> -> vector<8x128xf32>
    %158 = arith.addf %150, %157 : vector<8x128xf32>
    %159 = vector.extract_strided_slice %28 {offsets = [0, 17], sizes = [8, 1], strides = [1, 1]} : vector<8x24xi32> to vector<8x1xi32>
    %160 = vector.broadcast %159 : vector<8x1xi32> to vector<8x128xi32>
    %161 = vector.broadcast %0 : vector<1x128xi32> to vector<8x128xi32>
    %162 = arith.cmpi eq, %160, %161 : vector<8x128xi32>
    %163 = arith.extui %162 : vector<8x128xi1> to vector<8x128xi32>
    %164 = arith.sitofp %163 : vector<8x128xi32> to vector<8x128xf32>
    %cst_26 = arith.constant dense<0.000000e+00> : vector<8x128xf32>
    %165 = tpu.matmul %164, %3, %cst_26 {dimension_numbers = #tpu.dot_dimension_numbers<[1], [0], [0], [1], [0, 0, 1, 1], [], []>, precision = #tpu.contract_precision<fp32>} : vector<8x128xf32>, vector<128x128xf32>, vector<8x128xf32> -> vector<8x128xf32>
    %166 = arith.addf %158, %165 : vector<8x128xf32>
    %167 = vector.extract_strided_slice %28 {offsets = [0, 18], sizes = [8, 1], strides = [1, 1]} : vector<8x24xi32> to vector<8x1xi32>
    %168 = vector.broadcast %167 : vector<8x1xi32> to vector<8x128xi32>
    %169 = vector.broadcast %0 : vector<1x128xi32> to vector<8x128xi32>
    %170 = arith.cmpi eq, %168, %169 : vector<8x128xi32>
    %171 = arith.extui %170 : vector<8x128xi1> to vector<8x128xi32>
    %172 = arith.sitofp %171 : vector<8x128xi32> to vector<8x128xf32>
    %cst_27 = arith.constant dense<0.000000e+00> : vector<8x128xf32>
    %173 = tpu.matmul %172, %1, %cst_27 {dimension_numbers = #tpu.dot_dimension_numbers<[1], [0], [0], [1], [0, 0, 1, 1], [], []>, precision = #tpu.contract_precision<fp32>} : vector<8x128xf32>, vector<128x128xf32>, vector<8x128xf32> -> vector<8x128xf32>
    %174 = vector.extract_strided_slice %28 {offsets = [0, 19], sizes = [8, 1], strides = [1, 1]} : vector<8x24xi32> to vector<8x1xi32>
    %175 = vector.broadcast %174 : vector<8x1xi32> to vector<8x128xi32>
    %176 = vector.broadcast %0 : vector<1x128xi32> to vector<8x128xi32>
    %177 = arith.cmpi eq, %175, %176 : vector<8x128xi32>
    %178 = arith.extui %177 : vector<8x128xi1> to vector<8x128xi32>
    %179 = arith.sitofp %178 : vector<8x128xi32> to vector<8x128xf32>
    %cst_28 = arith.constant dense<0.000000e+00> : vector<8x128xf32>
    %180 = tpu.matmul %179, %2, %cst_28 {dimension_numbers = #tpu.dot_dimension_numbers<[1], [0], [0], [1], [0, 0, 1, 1], [], []>, precision = #tpu.contract_precision<fp32>} : vector<8x128xf32>, vector<128x128xf32>, vector<8x128xf32> -> vector<8x128xf32>
    %181 = arith.addf %173, %180 : vector<8x128xf32>
    %182 = vector.extract_strided_slice %28 {offsets = [0, 20], sizes = [8, 1], strides = [1, 1]} : vector<8x24xi32> to vector<8x1xi32>
    %183 = vector.broadcast %182 : vector<8x1xi32> to vector<8x128xi32>
    %184 = vector.broadcast %0 : vector<1x128xi32> to vector<8x128xi32>
    %185 = arith.cmpi eq, %183, %184 : vector<8x128xi32>
    %186 = arith.extui %185 : vector<8x128xi1> to vector<8x128xi32>
    %187 = arith.sitofp %186 : vector<8x128xi32> to vector<8x128xf32>
    %cst_29 = arith.constant dense<0.000000e+00> : vector<8x128xf32>
    %188 = tpu.matmul %187, %3, %cst_29 {dimension_numbers = #tpu.dot_dimension_numbers<[1], [0], [0], [1], [0, 0, 1, 1], [], []>, precision = #tpu.contract_precision<fp32>} : vector<8x128xf32>, vector<128x128xf32>, vector<8x128xf32> -> vector<8x128xf32>
    %189 = arith.addf %181, %188 : vector<8x128xf32>
    %190 = vector.extract_strided_slice %28 {offsets = [0, 21], sizes = [8, 1], strides = [1, 1]} : vector<8x24xi32> to vector<8x1xi32>
    %191 = vector.broadcast %190 : vector<8x1xi32> to vector<8x128xi32>
    %192 = vector.broadcast %0 : vector<1x128xi32> to vector<8x128xi32>
    %193 = arith.cmpi eq, %191, %192 : vector<8x128xi32>
    %194 = arith.extui %193 : vector<8x128xi1> to vector<8x128xi32>
    %195 = arith.sitofp %194 : vector<8x128xi32> to vector<8x128xf32>
    %cst_30 = arith.constant dense<0.000000e+00> : vector<8x128xf32>
    %196 = tpu.matmul %195, %1, %cst_30 {dimension_numbers = #tpu.dot_dimension_numbers<[1], [0], [0], [1], [0, 0, 1, 1], [], []>, precision = #tpu.contract_precision<fp32>} : vector<8x128xf32>, vector<128x128xf32>, vector<8x128xf32> -> vector<8x128xf32>
    %197 = vector.extract_strided_slice %28 {offsets = [0, 22], sizes = [8, 1], strides = [1, 1]} : vector<8x24xi32> to vector<8x1xi32>
    %198 = vector.broadcast %197 : vector<8x1xi32> to vector<8x128xi32>
    %199 = vector.broadcast %0 : vector<1x128xi32> to vector<8x128xi32>
    %200 = arith.cmpi eq, %198, %199 : vector<8x128xi32>
    %201 = arith.extui %200 : vector<8x128xi1> to vector<8x128xi32>
    %202 = arith.sitofp %201 : vector<8x128xi32> to vector<8x128xf32>
    %cst_31 = arith.constant dense<0.000000e+00> : vector<8x128xf32>
    %203 = tpu.matmul %202, %2, %cst_31 {dimension_numbers = #tpu.dot_dimension_numbers<[1], [0], [0], [1], [0, 0, 1, 1], [], []>, precision = #tpu.contract_precision<fp32>} : vector<8x128xf32>, vector<128x128xf32>, vector<8x128xf32> -> vector<8x128xf32>
    %204 = arith.addf %196, %203 : vector<8x128xf32>
    %205 = vector.extract_strided_slice %28 {offsets = [0, 23], sizes = [8, 1], strides = [1, 1]} : vector<8x24xi32> to vector<8x1xi32>
    %206 = vector.broadcast %205 : vector<8x1xi32> to vector<8x128xi32>
    %207 = vector.broadcast %0 : vector<1x128xi32> to vector<8x128xi32>
    %208 = arith.cmpi eq, %206, %207 : vector<8x128xi32>
    %209 = arith.extui %208 : vector<8x128xi1> to vector<8x128xi32>
    %210 = arith.sitofp %209 : vector<8x128xi32> to vector<8x128xf32>
    %cst_32 = arith.constant dense<0.000000e+00> : vector<8x128xf32>
    %211 = tpu.matmul %210, %3, %cst_32 {dimension_numbers = #tpu.dot_dimension_numbers<[1], [0], [0], [1], [0, 0, 1, 1], [], []>, precision = #tpu.contract_precision<fp32>} : vector<8x128xf32>, vector<128x128xf32>, vector<8x128xf32> -> vector<8x128xf32>
    %212 = arith.addf %204, %211 : vector<8x128xf32>
    %213 = arith.mulf %51, %27 : vector<8x128xf32>
    %cst_33 = arith.constant dense<0.000000e+00> : vector<8xf32>
    %214 = vector.multi_reduction <add>, %213, %cst_33 [1] : vector<8x128xf32> to vector<8xf32>
    %215 = vector.shape_cast %214 : vector<8xf32> to vector<8x1xf32>
    %216 = arith.mulf %74, %27 : vector<8x128xf32>
    %cst_34 = arith.constant dense<0.000000e+00> : vector<8xf32>
    %217 = vector.multi_reduction <add>, %216, %cst_34 [1] : vector<8x128xf32> to vector<8xf32>
    %218 = vector.shape_cast %217 : vector<8xf32> to vector<8x1xf32>
    %219 = arith.mulf %97, %27 : vector<8x128xf32>
    %cst_35 = arith.constant dense<0.000000e+00> : vector<8xf32>
    %220 = vector.multi_reduction <add>, %219, %cst_35 [1] : vector<8x128xf32> to vector<8xf32>
    %221 = vector.shape_cast %220 : vector<8xf32> to vector<8x1xf32>
    %222 = arith.mulf %120, %27 : vector<8x128xf32>
    %cst_36 = arith.constant dense<0.000000e+00> : vector<8xf32>
    %223 = vector.multi_reduction <add>, %222, %cst_36 [1] : vector<8x128xf32> to vector<8xf32>
    %224 = vector.shape_cast %223 : vector<8xf32> to vector<8x1xf32>
    %225 = arith.mulf %143, %27 : vector<8x128xf32>
    %cst_37 = arith.constant dense<0.000000e+00> : vector<8xf32>
    %226 = vector.multi_reduction <add>, %225, %cst_37 [1] : vector<8x128xf32> to vector<8xf32>
    %227 = vector.shape_cast %226 : vector<8xf32> to vector<8x1xf32>
    %228 = arith.mulf %166, %27 : vector<8x128xf32>
    %cst_38 = arith.constant dense<0.000000e+00> : vector<8xf32>
    %229 = vector.multi_reduction <add>, %228, %cst_38 [1] : vector<8x128xf32> to vector<8xf32>
    %230 = vector.shape_cast %229 : vector<8xf32> to vector<8x1xf32>
    %231 = arith.mulf %189, %27 : vector<8x128xf32>
    %cst_39 = arith.constant dense<0.000000e+00> : vector<8xf32>
    %232 = vector.multi_reduction <add>, %231, %cst_39 [1] : vector<8x128xf32> to vector<8xf32>
    %233 = vector.shape_cast %232 : vector<8xf32> to vector<8x1xf32>
    %234 = arith.mulf %212, %27 : vector<8x128xf32>
    %cst_40 = arith.constant dense<0.000000e+00> : vector<8xf32>
    %235 = vector.multi_reduction <add>, %234, %cst_40 [1] : vector<8x128xf32> to vector<8xf32>
    %236 = vector.shape_cast %235 : vector<8xf32> to vector<8x1xf32>
    %237 = arith.maximumf %215, %218 : vector<8x1xf32>
    %238 = arith.maximumf %237, %221 : vector<8x1xf32>
    %239 = arith.maximumf %238, %224 : vector<8x1xf32>
    %240 = arith.maximumf %239, %227 : vector<8x1xf32>
    %241 = arith.maximumf %240, %230 : vector<8x1xf32>
    %242 = arith.maximumf %241, %233 : vector<8x1xf32>
    %243 = arith.maximumf %242, %236 : vector<8x1xf32>
    %244 = arith.subf %215, %243 : vector<8x1xf32>
    %245 = math.exp %244 : vector<8x1xf32>
    %246 = arith.subf %218, %243 : vector<8x1xf32>
    %247 = math.exp %246 : vector<8x1xf32>
    %248 = arith.subf %221, %243 : vector<8x1xf32>
    %249 = math.exp %248 : vector<8x1xf32>
    %250 = arith.subf %224, %243 : vector<8x1xf32>
    %251 = math.exp %250 : vector<8x1xf32>
    %252 = arith.subf %227, %243 : vector<8x1xf32>
    %253 = math.exp %252 : vector<8x1xf32>
    %254 = arith.subf %230, %243 : vector<8x1xf32>
    %255 = math.exp %254 : vector<8x1xf32>
    %256 = arith.subf %233, %243 : vector<8x1xf32>
    %257 = math.exp %256 : vector<8x1xf32>
    %258 = arith.subf %236, %243 : vector<8x1xf32>
    %259 = math.exp %258 : vector<8x1xf32>
    %260 = arith.addf %245, %247 : vector<8x1xf32>
    %261 = arith.addf %260, %249 : vector<8x1xf32>
    %262 = arith.addf %261, %251 : vector<8x1xf32>
    %263 = arith.addf %262, %253 : vector<8x1xf32>
    %264 = arith.addf %263, %255 : vector<8x1xf32>
    %265 = arith.addf %264, %257 : vector<8x1xf32>
    %266 = arith.addf %265, %259 : vector<8x1xf32>
    %cst_41 = arith.constant 1.000000e+00 : f32
    %267 = vector.broadcast %cst_41 : f32 to vector<8x1xf32>
    %268 = arith.divf %267, %266 : vector<8x1xf32>
    %269 = arith.mulf %245, %268 : vector<8x1xf32>
    %270 = vector.broadcast %269 : vector<8x1xf32> to vector<8x128xf32>
    %271 = arith.mulf %270, %51 : vector<8x128xf32>
    %272 = arith.mulf %247, %268 : vector<8x1xf32>
    %273 = vector.broadcast %272 : vector<8x1xf32> to vector<8x128xf32>
    %274 = arith.mulf %273, %74 : vector<8x128xf32>
    %275 = arith.addf %271, %274 : vector<8x128xf32>
    %276 = arith.mulf %249, %268 : vector<8x1xf32>
    %277 = vector.broadcast %276 : vector<8x1xf32> to vector<8x128xf32>
    %278 = arith.mulf %277, %97 : vector<8x128xf32>
    %279 = arith.addf %275, %278 : vector<8x128xf32>
    %280 = arith.mulf %251, %268 : vector<8x1xf32>
    %281 = vector.broadcast %280 : vector<8x1xf32> to vector<8x128xf32>
    %282 = arith.mulf %281, %120 : vector<8x128xf32>
    %283 = arith.addf %279, %282 : vector<8x128xf32>
    %284 = arith.mulf %253, %268 : vector<8x1xf32>
    %285 = vector.broadcast %284 : vector<8x1xf32> to vector<8x128xf32>
    %286 = arith.mulf %285, %143 : vector<8x128xf32>
    %287 = arith.addf %283, %286 : vector<8x128xf32>
    %288 = arith.mulf %255, %268 : vector<8x1xf32>
    %289 = vector.broadcast %288 : vector<8x1xf32> to vector<8x128xf32>
    %290 = arith.mulf %289, %166 : vector<8x128xf32>
    %291 = arith.addf %287, %290 : vector<8x128xf32>
    %292 = arith.mulf %257, %268 : vector<8x1xf32>
    %293 = vector.broadcast %292 : vector<8x1xf32> to vector<8x128xf32>
    %294 = arith.mulf %293, %189 : vector<8x128xf32>
    %295 = arith.addf %291, %294 : vector<8x128xf32>
    %296 = arith.mulf %259, %268 : vector<8x1xf32>
    %297 = vector.broadcast %296 : vector<8x1xf32> to vector<8x128xf32>
    %298 = arith.mulf %297, %212 : vector<8x128xf32>
    %299 = arith.addf %295, %298 : vector<8x128xf32>
    %300 = arith.addf %27, %299 : vector<8x128xf32>
    %301 = arith.mulf %51, %300 : vector<8x128xf32>
    %cst_42 = arith.constant dense<0.000000e+00> : vector<8xf32>
    %302 = vector.multi_reduction <add>, %301, %cst_42 [1] : vector<8x128xf32> to vector<8xf32>
    %303 = vector.shape_cast %302 : vector<8xf32> to vector<8x1xf32>
    %304 = arith.mulf %74, %300 : vector<8x128xf32>
    %cst_43 = arith.constant dense<0.000000e+00> : vector<8xf32>
    %305 = vector.multi_reduction <add>, %304, %cst_43 [1] : vector<8x128xf32> to vector<8xf32>
    %306 = vector.shape_cast %305 : vector<8xf32> to vector<8x1xf32>
    %307 = arith.mulf %97, %300 : vector<8x128xf32>
    %cst_44 = arith.constant dense<0.000000e+00> : vector<8xf32>
    %308 = vector.multi_reduction <add>, %307, %cst_44 [1] : vector<8x128xf32> to vector<8xf32>
    %309 = vector.shape_cast %308 : vector<8xf32> to vector<8x1xf32>
    %310 = arith.mulf %120, %300 : vector<8x128xf32>
    %cst_45 = arith.constant dense<0.000000e+00> : vector<8xf32>
    %311 = vector.multi_reduction <add>, %310, %cst_45 [1] : vector<8x128xf32> to vector<8xf32>
    %312 = vector.shape_cast %311 : vector<8xf32> to vector<8x1xf32>
    %313 = arith.mulf %143, %300 : vector<8x128xf32>
    %cst_46 = arith.constant dense<0.000000e+00> : vector<8xf32>
    %314 = vector.multi_reduction <add>, %313, %cst_46 [1] : vector<8x128xf32> to vector<8xf32>
    %315 = vector.shape_cast %314 : vector<8xf32> to vector<8x1xf32>
    %316 = arith.mulf %166, %300 : vector<8x128xf32>
    %cst_47 = arith.constant dense<0.000000e+00> : vector<8xf32>
    %317 = vector.multi_reduction <add>, %316, %cst_47 [1] : vector<8x128xf32> to vector<8xf32>
    %318 = vector.shape_cast %317 : vector<8xf32> to vector<8x1xf32>
    %319 = arith.mulf %189, %300 : vector<8x128xf32>
    %cst_48 = arith.constant dense<0.000000e+00> : vector<8xf32>
    %320 = vector.multi_reduction <add>, %319, %cst_48 [1] : vector<8x128xf32> to vector<8xf32>
    %321 = vector.shape_cast %320 : vector<8xf32> to vector<8x1xf32>
    %322 = arith.mulf %212, %300 : vector<8x128xf32>
    %cst_49 = arith.constant dense<0.000000e+00> : vector<8xf32>
    %323 = vector.multi_reduction <add>, %322, %cst_49 [1] : vector<8x128xf32> to vector<8xf32>
    %324 = vector.shape_cast %323 : vector<8xf32> to vector<8x1xf32>
    %325 = arith.maximumf %303, %306 : vector<8x1xf32>
    %326 = arith.maximumf %325, %309 : vector<8x1xf32>
    %327 = arith.maximumf %326, %312 : vector<8x1xf32>
    %328 = arith.maximumf %327, %315 : vector<8x1xf32>
    %329 = arith.maximumf %328, %318 : vector<8x1xf32>
    %330 = arith.maximumf %329, %321 : vector<8x1xf32>
    %331 = arith.maximumf %330, %324 : vector<8x1xf32>
    %332 = arith.subf %303, %331 : vector<8x1xf32>
    %333 = math.exp %332 : vector<8x1xf32>
    %334 = arith.subf %306, %331 : vector<8x1xf32>
    %335 = math.exp %334 : vector<8x1xf32>
    %336 = arith.subf %309, %331 : vector<8x1xf32>
    %337 = math.exp %336 : vector<8x1xf32>
    %338 = arith.subf %312, %331 : vector<8x1xf32>
    %339 = math.exp %338 : vector<8x1xf32>
    %340 = arith.subf %315, %331 : vector<8x1xf32>
    %341 = math.exp %340 : vector<8x1xf32>
    %342 = arith.subf %318, %331 : vector<8x1xf32>
    %343 = math.exp %342 : vector<8x1xf32>
    %344 = arith.subf %321, %331 : vector<8x1xf32>
    %345 = math.exp %344 : vector<8x1xf32>
    %346 = arith.subf %324, %331 : vector<8x1xf32>
    %347 = math.exp %346 : vector<8x1xf32>
    %348 = arith.addf %333, %335 : vector<8x1xf32>
    %349 = arith.addf %348, %337 : vector<8x1xf32>
    %350 = arith.addf %349, %339 : vector<8x1xf32>
    %351 = arith.addf %350, %341 : vector<8x1xf32>
    %352 = arith.addf %351, %343 : vector<8x1xf32>
    %353 = arith.addf %352, %345 : vector<8x1xf32>
    %354 = arith.addf %353, %347 : vector<8x1xf32>
    %cst_50 = arith.constant 1.000000e+00 : f32
    %355 = vector.broadcast %cst_50 : f32 to vector<8x1xf32>
    %356 = arith.divf %355, %354 : vector<8x1xf32>
    %357 = arith.mulf %333, %356 : vector<8x1xf32>
    %358 = vector.broadcast %357 : vector<8x1xf32> to vector<8x128xf32>
    %359 = arith.mulf %358, %51 : vector<8x128xf32>
    %360 = arith.mulf %335, %356 : vector<8x1xf32>
    %361 = vector.broadcast %360 : vector<8x1xf32> to vector<8x128xf32>
    %362 = arith.mulf %361, %74 : vector<8x128xf32>
    %363 = arith.addf %359, %362 : vector<8x128xf32>
    %364 = arith.mulf %337, %356 : vector<8x1xf32>
    %365 = vector.broadcast %364 : vector<8x1xf32> to vector<8x128xf32>
    %366 = arith.mulf %365, %97 : vector<8x128xf32>
    %367 = arith.addf %363, %366 : vector<8x128xf32>
    %368 = arith.mulf %339, %356 : vector<8x1xf32>
    %369 = vector.broadcast %368 : vector<8x1xf32> to vector<8x128xf32>
    %370 = arith.mulf %369, %120 : vector<8x128xf32>
    %371 = arith.addf %367, %370 : vector<8x128xf32>
    %372 = arith.mulf %341, %356 : vector<8x1xf32>
    %373 = vector.broadcast %372 : vector<8x1xf32> to vector<8x128xf32>
    %374 = arith.mulf %373, %143 : vector<8x128xf32>
    %375 = arith.addf %371, %374 : vector<8x128xf32>
    %376 = arith.mulf %343, %356 : vector<8x1xf32>
    %377 = vector.broadcast %376 : vector<8x1xf32> to vector<8x128xf32>
    %378 = arith.mulf %377, %166 : vector<8x128xf32>
    %379 = arith.addf %375, %378 : vector<8x128xf32>
    %380 = arith.mulf %345, %356 : vector<8x1xf32>
    %381 = vector.broadcast %380 : vector<8x1xf32> to vector<8x128xf32>
    %382 = arith.mulf %381, %189 : vector<8x128xf32>
    %383 = arith.addf %379, %382 : vector<8x128xf32>
    %384 = arith.mulf %347, %356 : vector<8x1xf32>
    %385 = vector.broadcast %384 : vector<8x1xf32> to vector<8x128xf32>
    %386 = arith.mulf %385, %212 : vector<8x128xf32>
    %387 = arith.addf %383, %386 : vector<8x128xf32>
    %388 = arith.addf %300, %387 : vector<8x128xf32>
    %389 = arith.mulf %51, %388 : vector<8x128xf32>
    %cst_51 = arith.constant dense<0.000000e+00> : vector<8xf32>
    %390 = vector.multi_reduction <add>, %389, %cst_51 [1] : vector<8x128xf32> to vector<8xf32>
    %391 = vector.shape_cast %390 : vector<8xf32> to vector<8x1xf32>
    %392 = arith.mulf %74, %388 : vector<8x128xf32>
    %cst_52 = arith.constant dense<0.000000e+00> : vector<8xf32>
    %393 = vector.multi_reduction <add>, %392, %cst_52 [1] : vector<8x128xf32> to vector<8xf32>
    %394 = vector.shape_cast %393 : vector<8xf32> to vector<8x1xf32>
    %395 = arith.mulf %97, %388 : vector<8x128xf32>
    %cst_53 = arith.constant dense<0.000000e+00> : vector<8xf32>
    %396 = vector.multi_reduction <add>, %395, %cst_53 [1] : vector<8x128xf32> to vector<8xf32>
    %397 = vector.shape_cast %396 : vector<8xf32> to vector<8x1xf32>
    %398 = arith.mulf %120, %388 : vector<8x128xf32>
    %cst_54 = arith.constant dense<0.000000e+00> : vector<8xf32>
    %399 = vector.multi_reduction <add>, %398, %cst_54 [1] : vector<8x128xf32> to vector<8xf32>
    %400 = vector.shape_cast %399 : vector<8xf32> to vector<8x1xf32>
    %401 = arith.mulf %143, %388 : vector<8x128xf32>
    %cst_55 = arith.constant dense<0.000000e+00> : vector<8xf32>
    %402 = vector.multi_reduction <add>, %401, %cst_55 [1] : vector<8x128xf32> to vector<8xf32>
    %403 = vector.shape_cast %402 : vector<8xf32> to vector<8x1xf32>
    %404 = arith.mulf %166, %388 : vector<8x128xf32>
    %cst_56 = arith.constant dense<0.000000e+00> : vector<8xf32>
    %405 = vector.multi_reduction <add>, %404, %cst_56 [1] : vector<8x128xf32> to vector<8xf32>
    %406 = vector.shape_cast %405 : vector<8xf32> to vector<8x1xf32>
    %407 = arith.mulf %189, %388 : vector<8x128xf32>
    %cst_57 = arith.constant dense<0.000000e+00> : vector<8xf32>
    %408 = vector.multi_reduction <add>, %407, %cst_57 [1] : vector<8x128xf32> to vector<8xf32>
    %409 = vector.shape_cast %408 : vector<8xf32> to vector<8x1xf32>
    %410 = arith.mulf %212, %388 : vector<8x128xf32>
    %cst_58 = arith.constant dense<0.000000e+00> : vector<8xf32>
    %411 = vector.multi_reduction <add>, %410, %cst_58 [1] : vector<8x128xf32> to vector<8xf32>
    %412 = vector.shape_cast %411 : vector<8xf32> to vector<8x1xf32>
    %413 = arith.maximumf %391, %394 : vector<8x1xf32>
    %414 = arith.maximumf %413, %397 : vector<8x1xf32>
    %415 = arith.maximumf %414, %400 : vector<8x1xf32>
    %416 = arith.maximumf %415, %403 : vector<8x1xf32>
    %417 = arith.maximumf %416, %406 : vector<8x1xf32>
    %418 = arith.maximumf %417, %409 : vector<8x1xf32>
    %419 = arith.maximumf %418, %412 : vector<8x1xf32>
    %420 = arith.subf %391, %419 : vector<8x1xf32>
    %421 = math.exp %420 : vector<8x1xf32>
    %422 = arith.subf %394, %419 : vector<8x1xf32>
    %423 = math.exp %422 : vector<8x1xf32>
    %424 = arith.subf %397, %419 : vector<8x1xf32>
    %425 = math.exp %424 : vector<8x1xf32>
    %426 = arith.subf %400, %419 : vector<8x1xf32>
    %427 = math.exp %426 : vector<8x1xf32>
    %428 = arith.subf %403, %419 : vector<8x1xf32>
    %429 = math.exp %428 : vector<8x1xf32>
    %430 = arith.subf %406, %419 : vector<8x1xf32>
    %431 = math.exp %430 : vector<8x1xf32>
    %432 = arith.subf %409, %419 : vector<8x1xf32>
    %433 = math.exp %432 : vector<8x1xf32>
    %434 = arith.subf %412, %419 : vector<8x1xf32>
    %435 = math.exp %434 : vector<8x1xf32>
    %436 = arith.addf %421, %423 : vector<8x1xf32>
    %437 = arith.addf %436, %425 : vector<8x1xf32>
    %438 = arith.addf %437, %427 : vector<8x1xf32>
    %439 = arith.addf %438, %429 : vector<8x1xf32>
    %440 = arith.addf %439, %431 : vector<8x1xf32>
    %441 = arith.addf %440, %433 : vector<8x1xf32>
    %442 = arith.addf %441, %435 : vector<8x1xf32>
    %cst_59 = arith.constant 1.000000e+00 : f32
    %443 = vector.broadcast %cst_59 : f32 to vector<8x1xf32>
    %444 = arith.divf %443, %442 : vector<8x1xf32>
    %445 = arith.mulf %421, %444 : vector<8x1xf32>
    %446 = vector.broadcast %445 : vector<8x1xf32> to vector<8x128xf32>
    %447 = arith.mulf %446, %51 : vector<8x128xf32>
    %448 = arith.mulf %423, %444 : vector<8x1xf32>
    %449 = vector.broadcast %448 : vector<8x1xf32> to vector<8x128xf32>
    %450 = arith.mulf %449, %74 : vector<8x128xf32>
    %451 = arith.addf %447, %450 : vector<8x128xf32>
    %452 = arith.mulf %425, %444 : vector<8x1xf32>
    %453 = vector.broadcast %452 : vector<8x1xf32> to vector<8x128xf32>
    %454 = arith.mulf %453, %97 : vector<8x128xf32>
    %455 = arith.addf %451, %454 : vector<8x128xf32>
    %456 = arith.mulf %427, %444 : vector<8x1xf32>
    %457 = vector.broadcast %456 : vector<8x1xf32> to vector<8x128xf32>
    %458 = arith.mulf %457, %120 : vector<8x128xf32>
    %459 = arith.addf %455, %458 : vector<8x128xf32>
    %460 = arith.mulf %429, %444 : vector<8x1xf32>
    %461 = vector.broadcast %460 : vector<8x1xf32> to vector<8x128xf32>
    %462 = arith.mulf %461, %143 : vector<8x128xf32>
    %463 = arith.addf %459, %462 : vector<8x128xf32>
    %464 = arith.mulf %431, %444 : vector<8x1xf32>
    %465 = vector.broadcast %464 : vector<8x1xf32> to vector<8x128xf32>
    %466 = arith.mulf %465, %166 : vector<8x128xf32>
    %467 = arith.addf %463, %466 : vector<8x128xf32>
    %468 = arith.mulf %433, %444 : vector<8x1xf32>
    %469 = vector.broadcast %468 : vector<8x1xf32> to vector<8x128xf32>
    %470 = arith.mulf %469, %189 : vector<8x128xf32>
    %471 = arith.addf %467, %470 : vector<8x128xf32>
    %472 = arith.mulf %435, %444 : vector<8x1xf32>
    %473 = vector.broadcast %472 : vector<8x1xf32> to vector<8x128xf32>
    %474 = arith.mulf %473, %212 : vector<8x128xf32>
    %475 = arith.addf %471, %474 : vector<8x128xf32>
    %476 = arith.addf %388, %475 : vector<8x128xf32>
    %c0_60 = arith.constant 0 : index
    %c0_61 = arith.constant 0 : index
    %477 = vector.load %arg4[%c0_60, %c0_61] : memref<128x4xf32, #tpu.memory_space<vmem>>, vector<128x4xf32>
    %cst_62 = arith.constant dense<0.000000e+00> : vector<8x4xf32>
    %478 = tpu.matmul %476, %477, %cst_62 {dimension_numbers = #tpu.dot_dimension_numbers<[1], [0], [0], [1], [0, 0, 1, 1], [], []>, precision = #tpu.contract_precision<fp32>} : vector<8x128xf32>, vector<128x4xf32>, vector<8x4xf32> -> vector<8x4xf32>
    %c0_63 = arith.constant 0 : index
    %c0_64 = arith.constant 0 : index
    %479 = vector.load %arg5[%c0_63, %c0_64] : memref<1x4xf32, #tpu.memory_space<vmem>>, vector<1x4xf32>
    %480 = vector.broadcast %479 : vector<1x4xf32> to vector<8x4xf32>
    %481 = arith.addf %478, %480 : vector<8x4xf32>
    %c0_65 = arith.constant 0 : index
    %c0_66 = arith.constant 0 : index
    %482 = vector.load %arg6[%c0_65, %c0_66] : memref<8x4xf32, #tpu.memory_space<vmem>>, vector<8x4xf32>
    tpu.vector_store %arg6[%c0_65, %c0_66], %481 {strides = array<i32>} : memref<8x4xf32, #tpu.memory_space<vmem>>, vector<8x4xf32>,
    return
  }
  func.func @transform_0(%arg0: i32) -> (i32, i32) {
    %c0_i32 = arith.constant 0 : i32
    %c0_i32_0 = arith.constant 0 : i32
    return %arg0, %c0_i32 : i32, i32
  }
  func.func @transform_1(%arg0: i32) -> (i32, i32) {
    %c0_i32 = arith.constant 0 : i32
    %c0_i32_0 = arith.constant 0 : i32
    return %arg0, %c0_i32 : i32, i32
  }
  func.func @transform_2(%arg0: i32) -> (i32, i32) {
    %c0_i32 = arith.constant 0 : i32
    %c0_i32_0 = arith.constant 0 : i32
    %c0_i32_1 = arith.constant 0 : i32
    return %c0_i32, %c0_i32_0 : i32, i32
  }
  func.func @transform_3(%arg0: i32) -> (i32, i32) {
    %c0_i32 = arith.constant 0 : i32
    %c0_i32_0 = arith.constant 0 : i32
    %c0_i32_1 = arith.constant 0 : i32
    return %c0_i32, %c0_i32_0 : i32, i32
  }
  func.func @transform_4(%arg0: i32) -> (i32, i32) {
    %c0_i32 = arith.constant 0 : i32
    %c0_i32_0 = arith.constant 0 : i32
    %c0_i32_1 = arith.constant 0 : i32
    return %c0_i32, %c0_i32_0 : i32, i32
  }
  func.func @transform_5(%arg0: i32) -> (i32, i32) {
    %c0_i32 = arith.constant 0 : i32
    %c0_i32_0 = arith.constant 0 : i32
    return %arg0, %c0_i32 : i32, i32
  }
}

</mosaic_0001>

<bundles_post_ra>
// kernel: tpu_custom_call.1
= control target key start
LH: loop header
LB: loop body
LE: loop exit
PB: predicated region body
PF: predicated region fallthrough
CT: control target
= control target key end

     0   :  { %10 = vsyncpa [#allocation3], 0  ;;  %s31830_s18 = smov [#allocation2]   ;;  %s37093_s0 = inlined_call_operand.vmem [shape: s32[8,3], index: 0, kind: input, shape index: {}]   ;;  %s37094_s1 = inlined_call_operand.vmem [shape: s32[8,24], index: 1, kind: input, shape index: {}]   ;;  %s37095_s2 = inlined_call_operand.hbm [shape: f32[384,128], index: 2, kind: input, shape index: {}]   ;;  %s37096_s3 = inlined_call_operand.vmem [shape: f32[128,4], index: 3, kind: input, shape index: {}]   ;;  %s37097_s4 = inlined_call_operand.vmem [shape: f32[1,4], index: 4, kind: input, shape index: {}]   ;;  %s37098_s5 = inlined_call_operand.vmem [shape: f32[8,4], index: 5, kind: output, shape index: {}]  }
   0x1   :  { %s20_s19 = sshll.u32 %s31830_s18, 4  ;;  %s31806_s22 = scalar_lea.hbm %s37095_s2, 6144  ;;  %s21_s19 = int_to_ptr.vmem [resolvable:$true] %s20_s19 }
   0x2   :  { %p31807_p0 = scmp.ne.s32.totalorder %s37095_s2, %s31806_s22  ;;  %p31810_p1 = scmp.lt.u32.totalorder %s31806_s22, %s37095_s2 }
   0x4   :  { %p31812_p2 = pnand %p31810_p1, %p31807_p0 }
   0x6   :  { %31815 = shalt.err (!%p31812_p2)
}
   0x7   :  { %s31816_s27 = scalar_lea.vmem %s21_s19, 6144  ;;  %p31821_p4 = scmp.lt.s32.totalorder %s21_s19, %s21_s19 }
   0x8   :  { %p31817_p3 = scmp.ne.s32.totalorder %s21_s19, %s31816_s27  ;;  %p31822_p5 = scmp.lt.s32.totalorder %s31816_s27, %s31816_s27 }
   0xa   :  { %p31823_p6 = por %p31822_p5, %p31821_p4 }
   0xc   :  { %p31824_p7 = pnand %p31823_p6, %p31817_p3 }
   0xe   :  { %31827 = shalt.err (!%p31824_p7)
}
   0xf   :  { %s31831_s28 = smov 128   ;;  %s31832_s29 = smov 8  }
  0x10   :  { %26 = dma.hbm_to_vmem [thread:$0]  %s37095_s2, 6144, %s21_s19, [#allocation3], %s31831_s28, %s31831_s28, %s31832_s29  }
  0x11   :  { %31828 = dma.done.wait [#allocation3], 6144  }
  0x12   :  { %31829 = vsyncadd [#allocation3], 4294961152  ;;  %v31833_v0 = vmov 0   ;;  %v37144_v1 = vmov 0.0|0.0   ;;  %v31909_v2 = vld [vmem:[%s37093_s0] sm:$0xff]  ;;  %v31911_v3 = vld [vmem:[#allocation2] sm:$0xff] }
  0x13   :  { %31723 = vset.pattern.permute.xlu0 %v31833_v0  ;;  %27488 = vmatprep.subr.bf16.mxu0 %v37144_v1  ;;  %v31913_v4 = vld [vmem:[#allocation2 + $0x8] sm:$0xff]  ;;  %v739_v5 = vand.u32 4294901760, %v31911_v3  ;;  %v31918_v7 = vld [vmem:[#allocation2 + $0x10] sm:$0xff]  ;;  %v31920_v8 = vld [vmem:[#allocation2 + $0x18] sm:$0xff]  ;;  %v37099_v30 = vmov 1   ;;  %vm31836_vm0 = vmmov 0  }
  0x14   :  { %27344 = vmatprep.subr.bf16.mxu1 %v37144_v1  ;;  %86 = vperm.xlu0 %31723, %v31909_v2   ;;  %v742_v6 = vand.u32 4294901760, %v31913_v4  ;;  %v31922_v9 = vld [vmem:[#allocation2 + $0x80] sm:$0xff]  ;;  %v745_v10 = vand.u32 4294901760, %v31918_v7  ;;  %v748_v11 = vand.u32 4294901760, %v31920_v8  ;;  %v31926_v12 = vld [vmem:[#allocation2 + $0x88] sm:$0xff]  ;;  %v31942_v20 = vld [vmem:[#allocation2 + $0x90] sm:$0xff] }
  0x15   :  { %v98_v13 = vand.u32 4294901760, %v31922_v9  ;;  %v31929_v14 = vld [vmem:[#allocation2 + $0x20] sm:$0xff]  ;;  %v31931_v15 = vld [vmem:[#allocation2 + $0x28] sm:$0xff]  ;;  %v101_v17 = vand.u32 4294901760, %v31926_v12  ;;  %v31944_v21 = vld [vmem:[#allocation2 + $0x98] sm:$0xff]  ;;  %v37111_v24 = vand.u32 4294901760, %v31942_v20 }
  0x16   :  { %v31937_v16 = vpack.c.bf16 %v742_v6, %v739_v5  ;;  %v751_v18 = vand.u32 4294901760, %v31929_v14  ;;  %v754_v19 = vand.u32 4294901760, %v31931_v15  ;;  %v31946_v22 = vld [vmem:[#allocation2 + $0x30] sm:$0xff]  ;;  %v31952_v23 = vpack.c.bf16 %v748_v11, %v745_v10  ;;  %v31956_v26 = vld [vmem:[#allocation2 + $0x38] sm:$0xff]  ;;  %v31959_v28 = vld [vmem:[#allocation2 + $0xa0] sm:$0xff] }
  0x17   :  { %v37110_v25 = vand.u32 4294901760, %v31944_v21  ;;  %v37107_v27 = vand.u32 4294901760, %v31946_v22  ;;  %v31961_v29 = vld [vmem:[#allocation2 + $0xa8] sm:$0xff]  ;;  %v31969_v31 = vpack.c.bf16 %v101_v17, %v98_v13  ;;  %v37106_v33 = vand.u32 4294901760, %v31956_v26  ;;  %v31979_v35 = vld [vmem:[#allocation2 + $0x40] sm:$0xff]  ;;  %v31983_v37 = vld [vmem:[#allocation2 + $0xb0] sm:$0xff] }
  0x18   :  { %37639 = vst [vmem:[#allocation5_spill] sm:$0xff] %v31937_v16  ;;  %37640 = vst [vmem:[#allocation6_spill] sm:$0xff] %v31952_v23  ;;  %31724 = vset.pattern.permute.xlu0 %v37099_v30  ;;  %27490 = vmatpush3.bf16.msra.mxu0 %v31937_v16  ;;  %v31975_v32 = vpack.c.bf16 %v754_v19, %v751_v18  ;;  %v37105_v34 = vand.u32 4294901760, %v31959_v28  ;;  %v31981_v36 = vld [vmem:[#allocation2 + $0x48] sm:$0xff]  ;;  %v37104_v39 = vand.u32 4294901760, %v31961_v29  ;;  %v37103_v40 = vand.u32 4294901760, %v31979_v35 }
  0x19   :  { %37641 = vst [vmem:[#allocation7_spill] sm:$0xff] %v31969_v31  ;;  %92 = vperm.xlu0 %31724, %v31909_v2   ;;  %27491 = vmatprep.subr.bf16.mxu0 %v37144_v1  ;;  %v31991_v38 = vpack.c.bf16 %v37110_v25, %v37111_v24  ;;  %v37100_v41 = vand.u32 4294901760, %v31981_v36  ;;  %v31996_v42 = vld [vmem:[#allocation2 + $0xb8] sm:$0xff]  ;;  %v31998_v43 = vld [vmem:[#allocation2 + $0x50] sm:$0xff]  ;;  %v32007_v45 = vpack.c.bf16 %v37106_v33, %v37107_v27  ;;  %v37102_v46 = vand.u32 4294901760, %v31983_v37  ;;  %v32012_v49 = vld [vmem:[#allocation2 + $0xc0] sm:$0xff] }
  0x1a   :  { %37642 = vst [vmem:[#allocation8_spill] sm:$0xff] %v31975_v32  ;;  %v32000_v44 = vld [vmem:[#allocation2 + $0x58] sm:$0xff]  ;;  %27346 = vmatpush3.bf16.msra.mxu1 %v31969_v31  ;;  %v37101_v47 = vand.u32 4294901760, %v31996_v42  ;;  %v37109_v48 = vand.u32 4294901760, %v31998_v43  ;;  %v32014_v50 = vld [vmem:[#allocation2 + $0xc8] sm:$0xff]  ;;  %v32016_v51 = vld [vmem:[#allocation2 + $0x60] sm:$0xff]  ;;  %v32023_v52 = vpack.c.bf16 %v37104_v39, %v37105_v34 }
  0x1b   :  { %37643 = vst [vmem:[#allocation9_spill] sm:$0xff] %v31991_v38  ;;  %37644 = vst [vmem:[#allocation10_spill] sm:$0xff] %v32007_v45  ;;  %27347 = vmatprep.subr.bf16.mxu1 %v37144_v1  ;;  %v32029_v53 = vpack.c.bf16 %v37100_v41, %v37103_v40  ;;  %v37108_v54 = vand.u32 4294901760, %v32000_v44  ;;  %v37113_v55 = vand.u32 4294901760, %v32012_v49  ;;  %v32033_v56 = vld [vmem:[#allocation2 + $0x68] sm:$0xff]  ;;  %v32035_v57 = vld [vmem:[#allocation2 + $0xd0] sm:$0xff] }
  0x1c   :  { %37645 = vst [vmem:[#allocation11_spill] sm:$0xff] %v32023_v52  ;;  %v32037_v58 = vld [vmem:[#allocation2 + $0xd8] sm:$0xff]  ;;  %27493 = vmatpush3.bf16.msra.mxu0 %v31952_v23  ;;  %v32044_v59 = vpack.c.bf16 %v37101_v47, %v37102_v46  ;;  %v37112_v60 = vand.u32 4294901760, %v32014_v50  ;;  %v37115_v61 = vand.u32 4294901760, %v32016_v51  ;;  %v37114_v62 = vand.u32 4294901760, %v32033_v56  ;;  %v32049_v63 = vld [vmem:[#allocation2 + $0x70] sm:$0xff] }
  0x1d   :  { %37646 = vst [vmem:[#allocation12_spill] sm:$0xff] %v32029_v53  ;;  %v32051_v30 = vld [vmem:[#allocation2 + $0x78] sm:$0xff]  ;;  %v32053_v41 = vld [vmem:[#allocation2 + $0xe0] sm:$0xff]  ;;  %27494 = vmatprep.subr.bf16.mxu0 %v37144_v1  ;;  %v32060_v47 = vpack.c.bf16 %v37108_v54, %v37109_v48  ;;  %v37128_v46 = vand.u32 4294901760, %v32035_v57  ;;  %v37116_v40 = vand.u32 4294901760, %v32037_v58  ;;  %v37118_v39 = vand.u32 4294901760, %v32049_v63  ;;  %31728 = vset.pattern.permute.xlu0 %v31833_v0 }
  0x1e   :  { %37647 = vst [vmem:[#allocation13_spill] sm:$0xff] %v32044_v59  ;;  %v32065_v34 = vld [vmem:[#allocation2 + $0xe8] sm:$0xff]  ;;  %v32067_v33 = vld [vmem:[#allocation2 + $0xf0] sm:$0xff]  ;;  %v32069_v27 = vld [vmem:[#allocation2 + $0xf8] sm:$0xff]  ;;  %27349 = vmatpush3.bf16.msra.mxu1 %v31991_v38  ;;  %v32077_v54 = vpack.c.bf16 %v37112_v60, %v37113_v55  ;;  %v32083_v48 = vpack.c.bf16 %v37114_v62, %v37115_v61  ;;  %v37117_v25 = vand.u32 4294901760, %v32051_v30  ;;  %v37120_v24 = vand.u32 4294901760, %v32053_v41 }
  0x1f   :  { %37648 = vst [vmem:[#allocation14_spill] sm:$0xff] %v32060_v47  ;;  %27350 = vmatprep.subr.bf16.mxu1 %v37144_v1  ;;  %v32092_v0 = vpack.c.bf16 %v37116_v40, %v37128_v46  ;;  %v37119_v60 = vand.u32 4294901760, %v32065_v34  ;;  %v32098_v55 = vsub.f32 %v31911_v3, %v739_v5  ;;  %v37121_v61 = vmov 0.0  }
  0x20   :  { %37649 = vst [vmem:[#allocation15_spill] sm:$0xff] %v32077_v54  ;;  %37650 = vst [vmem:[#allocation16_spill] sm:$0xff] %v32083_v48  ;;  %27496 = vmatpush3.bf16.msra.mxu0 %v31975_v32  ;;  %v32105_v62 = vpack.c.bf16 %v37117_v25, %v37118_v39  ;;  %21706 = vmatprep.mubr.msk.f32.mxu0 %vm31836_vm0, %v37121_v61  ;;  %v32112_v40 = vsub.f32 %v31913_v4, %v742_v6  ;;  %v37126_v3 = vand.u32 4294901760, %v32067_v33 }
  0x21   :  { %37651 = vst [vmem:[#allocation17_spill] sm:$0xff] %v32092_v0  ;;  %37652 = vst [vmem:[#allocation18_spill] sm:$0xff] %v32098_v55  ;;  %v37124_v5 = vand.u32 4294901760, %v32069_v27  ;;  %27497 = vmatprep.subr.bf16.mxu0 %v37144_v1  ;;  %v32121_v25 = vpack.c.bf16 %v37119_v60, %v37120_v24  ;;  %v37123_v39 = vand.u32 4294901760, %v32098_v55  ;;  %21496 = vmatprep.mubr.msk.f32.mxu1 %vm31836_vm0, %v37121_v61 }
  0x22   :  { %37653 = vst [vmem:[#allocation19_spill] sm:$0xff] %v32105_v62  ;;  %37654 = vst [vmem:[#allocation20_spill] sm:$0xff] %v32112_v40  ;;  %v32129_v4 = vsub.f32 %v31918_v7, %v745_v10  ;;  %v32134_v6 = vsub.f32 %v31920_v8, %v748_v11  ;;  %27352 = vmatpush3.bf16.msra.mxu1 %v32023_v52  ;;  %v37125_v60 = vand.u32 4294901760, %v32112_v40 }
  0x23   :  { %37655 = vst [vmem:[#allocation21_spill] sm:$0xff] %v32121_v25  ;;  %v32142_v24 = vpack.c.bf16 %v37124_v5, %v37126_v3  ;;  %v32147_v7 = vsub.f32 %v31922_v9, %v98_v13  ;;  %v32152_v8 = vsub.f32 %v31926_v12, %v101_v17  ;;  %27353 = vmatprep.subr.bf16.mxu1 %v37144_v1 }
  0x24   :  { %v833_v10 = vsub.f32 %v32098_v55, %v37123_v39  ;;  %v37127_v11 = vand.u32 4294901760, %v32129_v4  ;;  %v37129_v61 = vand.u32 4294901760, %v32134_v6  ;;  %v32163_v9 = vsub.f32 %v31929_v14, %v751_v18  ;;  %27499 = vmatpush3.bf16.msra.mxu0 %v32007_v45 }
  0x25   :  { %37656 = vst [vmem:[#allocation22_spill] sm:$0xff] %v32142_v24  ;;  %v840_v12 = vsub.f32 %v32112_v40, %v37125_v60  ;;  %v37132_v13 = vand.u32 4294901760, %v32147_v7  ;;  %v37133_v17 = vand.u32 4294901760, %v32152_v8  ;;  %v32174_v39 = vsub.f32 %v31931_v15, %v754_v19  ;;  %27500 = vmatprep.subr.bf16.mxu0 %v37144_v1 }
  0x26   :  { %v834_v5 = vand.u32 4294901760, %v833_v10  ;;  %v847_v14 = vsub.f32 %v32129_v4, %v37127_v11  ;;  %v854_v18 = vsub.f32 %v32134_v6, %v37129_v61  ;;  %v37136_v60 = vand.u32 4294901760, %v32163_v9  ;;  %27355 = vmatpush3.bf16.msra.mxu1 %v32044_v59 }
  0x27   :  { %v841_v3 = vand.u32 4294901760, %v840_v12  ;;  %v192_v15 = vsub.f32 %v32147_v7, %v37132_v13  ;;  %v199_v19 = vsub.f32 %v32152_v8, %v37133_v17  ;;  %v37141_v10 = vand.u32 4294901760, %v32174_v39  ;;  %27356 = vmatprep.subr.bf16.mxu1 %v37144_v1 }
  0x28   :  { %v848_v11 = vand.u32 4294901760, %v847_v14  ;;  %v855_v46 = vand.u32 4294901760, %v854_v18  ;;  %v861_v61 = vsub.f32 %v32163_v9, %v37136_v60  ;;  %v37657_v12 = vand.u32 4294901760, %v31942_v20  ;;  %27502 = vmatpush3.bf16.msra.mxu0 %v32029_v53 }
  0x29   :  { %v32202_v13 = vpack.c.bf16 %v841_v3, %v834_v5  ;;  %v193_v17 = vand.u32 4294901760, %v192_v15  ;;  %v200_v52 = vand.u32 4294901760, %v199_v19  ;;  %v868_v14 = vsub.f32 %v32174_v39, %v37141_v10  ;;  %27503 = vmatprep.subr.bf16.mxu0 %v37144_v1 }
  0x2a   :  { %v32199_v59 = vsub.f32 %v31942_v20, %v37657_v12  ;;  %v32208_v18 = vpack.c.bf16 %v855_v46, %v848_v11  ;;  %v862_v60 = vand.u32 4294901760, %v861_v61  ;;  %v37660_v20 = vand.u32 4294901760, %v31944_v21  ;;  %27358 = vmatpush3.bf16.msra.mxu1 %v32077_v54 }
  0x2b   :  { %37658 = vst [vmem:[#allocation23_spill] sm:$0xff] %v32202_v13  ;;  %v32217_v3 = vpack.c.bf16 %v200_v52, %v193_v17  ;;  %v869_v5 = vand.u32 4294901760, %v868_v14  ;;  %v37662_v15 = vand.u32 4294901760, %v31946_v22  ;;  %v37663_v46 = vand.u32 4294901760, %v31956_v26  ;;  %27359 = vmatprep.subr.bf16.mxu1 %v37144_v1 }
  0x2c   :  { %37659 = vst [vmem:[#allocation24_spill] sm:$0xff] %v32208_v18  ;;  %v37139_v45 = vand.u32 4294901760, %v32199_v59  ;;  %v32214_v12 = vsub.f32 %v31944_v21, %v37660_v20  ;;  %v37664_v11 = vand.u32 4294901760, %v31959_v28  ;;  %27505 = vmatpush3.bf16.msra.mxu0 %v32060_v47 }
  0x2d   :  { %37661 = vst [vmem:[#allocation25_spill] sm:$0xff] %v32217_v3  ;;  %v32222_v19 = vsub.f32 %v31946_v22, %v37662_v15  ;;  %v32227_v61 = vsub.f32 %v31956_v26, %v37663_v46  ;;  %v37665_v22 = vand.u32 4294901760, %v31961_v29  ;;  %v32245_v26 = vpack.c.bf16 %v869_v5, %v862_v60  ;;  %27506 = vmatprep.subr.bf16.mxu0 %v37144_v1 }
  0x2e   :  { %v206_v21 = vsub.f32 %v32199_v59, %v37139_v45  ;;  %v37140_v52 = vand.u32 4294901760, %v32214_v12  ;;  %v32237_v17 = vsub.f32 %v31959_v28, %v37664_v11  ;;  %v37667_v46 = vand.u32 4294901760, %v31979_v35  ;;  %27361 = vmatpush3.bf16.msra.mxu1 %v32092_v0 }
  0x2f   :  { %v32242_v14 = vsub.f32 %v31961_v29, %v37665_v22  ;;  %37666 = vst [vmem:[#allocation26_spill] sm:$0xff] %v32245_v26  ;;  %v37142_v20 = vand.u32 4294901760, %v32222_v19  ;;  %v37143_v15 = vand.u32 4294901760, %v32227_v61  ;;  %v37668_v22 = vand.u32 4294901760, %v31981_v36  ;;  %27362 = vmatprep.subr.bf16.mxu1 %v37144_v1 }
  0x30   :  { %v32252_v45 = vsub.f32 %v31979_v35, %v37667_v46  ;;  %v207_v28 = vand.u32 4294901760, %v206_v21  ;;  %v213_v29 = vsub.f32 %v32214_v12, %v37140_v52  ;;  %v37148_v11 = vand.u32 4294901760, %v32237_v17  ;;  %27508 = vmatpush3.bf16.msra.mxu0 %v32083_v48 }
  0x31   :  { %v37151_v60 = vand.u32 4294901760, %v32242_v14  ;;  %v875_v5 = vsub.f32 %v32222_v19, %v37142_v20  ;;  %v882_v35 = vsub.f32 %v32227_v61, %v37143_v15  ;;  %v32271_v46 = vsub.f32 %v31981_v36, %v37668_v22 }
  0x32   :  { %v214_v52 = vand.u32 4294901760, %v213_v29  ;;  %v220_v10 = vsub.f32 %v32237_v17, %v37148_v11  ;;  %v37669_v15 = vand.u32 4294901760, %v31983_v37  ;;  %v37670_v1 = vand.u32 4294901760, %v32252_v45  ;;  %27364 = vmatpush3.bf16.msra.mxu1 %v32121_v25 }
  0x33   :  { %v227_v20 = vsub.f32 %v32242_v14, %v37151_v60  ;;  %v876_v36 = vand.u32 4294901760, %v875_v5  ;;  %v883_v22 = vand.u32 4294901760, %v882_v35  ;;  %v37158_v0 = vand.u32 4294901760, %v32271_v46 }
  0x34   :  { %v32283_v21 = vsub.f32 %v31983_v37, %v37669_v15  ;;  %v889_v29 = vsub.f32 %v32252_v45, %v37670_v1  ;;  %v37671_v11 = vmov 0.0|0.0   ;;  %v32291_v54 = vpack.c.bf16 %v214_v52, %v207_v28 }
  0x35   :  { %27509 = vmatprep.subr.bf16.mxu0 %v37671_v11  ;;  %v221_v60 = vand.u32 4294901760, %v220_v10  ;;  %v228_v47 = vand.u32 4294901760, %v227_v20  ;;  %v32295_v37 = vpack.c.bf16 %v883_v22, %v876_v36  ;;  %v896_v5 = vsub.f32 %v32271_v46, %v37158_v0  ;;  %27365 = vmatprep.subr.bf16.mxu1 %v37671_v11 }
  0x36   :  { %37672 = vst [vmem:[#allocation27_spill] sm:$0xff] %v32291_v54  ;;  %v37156_v53 = vand.u32 4294901760, %v32283_v21  ;;  %v890_v15 = vand.u32 4294901760, %v889_v29  ;;  %v37674_v1 = vand.u32 4294901760, %v31996_v42  ;;  %v37677_v20 = vand.u32 4294901760, %v31998_v43  ;;  %27511 = vmatpush3.bf16.msra.mxu0 %v32105_v62  ;;  %27367 = vmatpush3.bf16.msra.mxu1 %v32142_v24 }
  0x37   :  { %37673 = vst [vmem:[#allocation28_spill] sm:$0xff] %v32295_v37  ;;  %v32306_v10 = vpack.c.bf16 %v228_v47, %v221_v60  ;;  %v37678_v36 = vand.u32 4294901760, %v32000_v44  ;;  %v37680_v60 = vand.u32 4294901760, %v32012_v49  ;;  %27512 = vmatprep.subr.bf16.mxu0 %v37671_v11  ;;  %27368 = vmatprep.subr.bf16.mxu1 %v37671_v11  ;;  %v37689_v24 = vand.u32 4294901760, %v32035_v57 }
  0x38   :  { %v32303_v35 = vsub.f32 %v31996_v42, %v37674_v1  ;;  %v234_v52 = vsub.f32 %v32283_v21, %v37156_v53  ;;  %v32314_v28 = vsub.f32 %v31998_v43, %v37677_v20  ;;  %v897_v42 = vand.u32 4294901760, %v896_v5 }
  0x39   :  { %37676 = vst [vmem:[#allocation30_spill] sm:$0xff] %v32306_v10  ;;  %v32319_v22 = vsub.f32 %v32000_v44, %v37678_v36  ;;  %v32326_v29 = vsub.f32 %v32012_v49, %v37680_v60  ;;  %v37682_v1 = vand.u32 4294901760, %v32014_v50  ;;  %v37684_v5 = vand.u32 4294901760, %v32016_v51 }
  0x3a   :  { %37675 = vst [vmem:[#allocation29_spill] sm:$0xff] %v32303_v35  ;;  %v37157_v47 = vand.u32 4294901760, %v32303_v35  ;;  %v235_v20 = vand.u32 4294901760, %v234_v52  ;;  %v37159_v44 = vand.u32 4294901760, %v32314_v28  ;;  %v32342_v49 = vpack.c.bf16 %v897_v42, %v890_v15 }
  0x3b   :  { %37679 = vst [vmem:[#allocation31_spill] sm:$0xff] %v32319_v22  ;;  %37681 = vst [vmem:[#allocation32_spill] sm:$0xff] %v32326_v29  ;;  %v32331_v43 = vsub.f32 %v32014_v50, %v37682_v1  ;;  %v37162_v36 = vand.u32 4294901760, %v32319_v22  ;;  %v32339_v53 = vsub.f32 %v32016_v51, %v37684_v5  ;;  %v37167_v60 = vand.u32 4294901760, %v32326_v29 }
  0x3c   :  { %37686 = vst [vmem:[#allocation35_spill] sm:$0xff] %v32342_v49  ;;  %v241_v50 = vsub.f32 %v32303_v35, %v37157_v47  ;;  %v903_v1 = vsub.f32 %v32314_v28, %v37159_v44  ;;  %v37687_v42 = vand.u32 4294901760, %v32033_v56 }
  0x3d   :  { %37683 = vst [vmem:[#allocation33_spill] sm:$0xff] %v32331_v43  ;;  %37685 = vst [vmem:[#allocation34_spill] sm:$0xff] %v32339_v53  ;;  %v37172_v52 = vand.u32 4294901760, %v32331_v43  ;;  %v910_v51 = vsub.f32 %v32319_v22, %v37162_v36  ;;  %v248_v0 = vsub.f32 %v32326_v29, %v37167_v60  ;;  %v32371_v36 = vsub.f32 %v32035_v57, %v37689_v24 }
  0x3e   :  { %v32360_v5 = vsub.f32 %v32033_v56, %v37687_v42  ;;  %v242_v47 = vand.u32 4294901760, %v241_v50  ;;  %v904_v15 = vand.u32 4294901760, %v903_v1  ;;  %v37691_v62 = vand.u32 4294901760, %v32339_v53 }
  0x3f   :  { %v255_v44 = vsub.f32 %v32331_v43, %v37172_v52  ;;  %37690 = vst [vmem:[#allocation37_spill] sm:$0xff] %v32371_v36  ;;  %v911_v25 = vand.u32 4294901760, %v910_v51  ;;  %v249_v60 = vand.u32 4294901760, %v248_v0  ;;  %v37178_v38 = vand.u32 4294901760, %v32371_v36 }
  0x40   :  { %37688 = vst [vmem:[#allocation36_spill] sm:$0xff] %v32360_v5  ;;  %v917_v56 = vsub.f32 %v32339_v53, %v37691_v62  ;;  %v37179_v50 = vand.u32 4294901760, %v32360_v5  ;;  %v32377_v42 = vpack.c.bf16 %v242_v47, %v235_v20  ;;  %v37694_v57 = vand.u32 4294901760, %v32037_v58 }
  0x41   :  { %v256_v48 = vand.u32 4294901760, %v255_v44  ;;  %v32380_v52 = vpack.c.bf16 %v911_v25, %v904_v15  ;;  %v262_v0 = vsub.f32 %v32371_v36, %v37178_v38  ;;  %v37697_v47 = vand.u32 4294901760, %v32049_v63 }
  0x42   :  { %37692 = vst [vmem:[#allocation38_spill] sm:$0xff] %v32377_v42  ;;  %v918_v32 = vand.u32 4294901760, %v917_v56  ;;  %v924_v24 = vsub.f32 %v32360_v5, %v37179_v50  ;;  %v32388_v1 = vsub.f32 %v32037_v58, %v37694_v57  ;;  %v37699_v20 = vand.u32 4294901760, %v32051_v30 }
  0x43   :  { %37693 = vst [vmem:[#allocation39_spill] sm:$0xff] %v32380_v52  ;;  %v32390_v62 = vpack.c.bf16 %v256_v48, %v249_v60  ;;  %v32398_v25 = vsub.f32 %v32049_v63, %v37697_v47  ;;  %v37701_v48 = vand.u32 4294901760, %v32053_v41  ;;  %v37703_v15 = vand.u32 4294901760, %v32065_v34 }
  0x44   :  { %37695 = vst [vmem:[#allocation40_spill] sm:$0xff] %v32388_v1  ;;  %v32403_v44 = vsub.f32 %v32051_v30, %v37699_v20  ;;  %v925_v51 = vand.u32 4294901760, %v924_v24  ;;  %v37175_v58 = vand.u32 4294901760, %v32388_v1  ;;  %v263_v63 = vand.u32 4294901760, %v262_v0 }
  0x45   :  { %37696 = vst [vmem:[#allocation41_spill] sm:$0xff] %v32390_v62  ;;  %37698 = vst [vmem:[#allocation42_spill] sm:$0xff] %v32398_v25  ;;  %v32409_v60 = vsub.f32 %v32053_v41, %v37701_v48  ;;  %v32414_v56 = vsub.f32 %v32065_v34, %v37703_v15  ;;  %v37176_v57 = vand.u32 4294901760, %v32398_v25 }
  0x46   :  { %37700 = vst [vmem:[#allocation43_spill] sm:$0xff] %v32403_v44  ;;  %v37177_v47 = vand.u32 4294901760, %v32403_v44  ;;  %v32418_v30 = vpack.c.bf16 %v925_v51, %v918_v32  ;;  %v269_v24 = vsub.f32 %v32388_v1, %v37175_v58  ;;  %v32433_v32 = vpack.c.bf16 %v32112_v40, %v32098_v55 }
  0x47   :  { %37702 = vst [vmem:[#allocation44_spill] sm:$0xff] %v32409_v60  ;;  %37704 = vst [vmem:[#allocation45_spill] sm:$0xff] %v32414_v56  ;;  %v37182_v20 = vand.u32 4294901760, %v32409_v60  ;;  %v37185_v41 = vand.u32 4294901760, %v32414_v56  ;;  %v931_v34 = vsub.f32 %v32398_v25, %v37176_v57  ;;  %v37707_v51 = vand.u32 4294901760, %v32067_v33 }
  0x48   :  { %37705 = vst [vmem:[#allocation46_spill] sm:$0xff] %v32418_v30  ;;  %v938_v0 = vsub.f32 %v32403_v44, %v37177_v47  ;;  %37706 = vst [vmem:[#allocation47_spill] sm:$0xff] %v32433_v32  ;;  %v270_v15 = vand.u32 4294901760, %v269_v24  ;;  %v37709_v47 = vand.u32 4294901760, %v32069_v27 }
  0x49   :  { %v32438_v48 = vsub.f32 %v32067_v33, %v37707_v51  ;;  %v276_v58 = vsub.f32 %v32409_v60, %v37182_v20  ;;  %v283_v57 = vsub.f32 %v32414_v56, %v37185_v41  ;;  %v932_v50 = vand.u32 4294901760, %v931_v34 }
  0x4a   :  { %v32449_v38 = vsub.f32 %v32069_v27, %v37709_v47  ;;  %v939_v40 = vand.u32 4294901760, %v938_v0  ;;  %v32454_v33 = vpack.c.bf16 %v32134_v6, %v32129_v4  ;;  %v32456_v24 = vpack.c.bf16 %v270_v15, %v263_v63 }
  0x4b   :  { %37708 = vst [vmem:[#allocation48_spill] sm:$0xff] %v32438_v48  ;;  %v37187_v55 = vand.u32 4294901760, %v32438_v48  ;;  %v277_v51 = vand.u32 4294901760, %v276_v58  ;;  %v284_v20 = vand.u32 4294901760, %v283_v57  ;;  %v32466_v47 = vpack.c.bf16 %v32152_v8, %v32147_v7 }
  0x4c   :  { %37710 = vst [vmem:[#allocation49_spill] sm:$0xff] %v32449_v38  ;;  %37711 = vst [vmem:[#allocation50_spill] sm:$0xff] %v32454_v33  ;;  %v37186_v31 = vand.u32 4294901760, %v32449_v38  ;;  %v32459_v41 = vpack.c.bf16 %v939_v40, %v932_v50  ;;  %v32475_v58 = vpack.c.bf16 %v32174_v39, %v32163_v9  ;;  %v32479_v50 = vpack.c.bf16 %v32214_v12, %v32199_v59 }
  0x4d   :  { %37712 = vst [vmem:[#allocation51_spill] sm:$0xff] %v32456_v24  ;;  %v290_v27 = vsub.f32 %v32438_v48, %v37187_v55  ;;  %37714 = vst [vmem:[#allocation53_spill] sm:$0xff] %v32466_v47  ;;  %v32468_v34 = vpack.c.bf16 %v284_v20, %v277_v51  ;;  %v32485_v20 = vpack.c.bf16 %v32227_v61, %v32222_v19 }
  0x4e   :  { %37713 = vst [vmem:[#allocation52_spill] sm:$0xff] %v32459_v41  ;;  %v297_v63 = vsub.f32 %v32449_v38, %v37186_v31  ;;  %37716 = vst [vmem:[#allocation55_spill] sm:$0xff] %v32475_v58  ;;  %v32489_v15 = vpack.c.bf16 %v32242_v14, %v32237_v17  ;;  %v32493_v51 = vpack.c.bf16 %v32271_v46, %v32252_v45  ;;  %v37189_v31 = vmov 2  }
  0x4f   :  { %37715 = vst [vmem:[#allocation54_spill] sm:$0xff] %v32468_v34  ;;  %v291_v40 = vand.u32 4294901760, %v290_v27  ;;  %37717 = vst [vmem:[#allocation56_spill] sm:$0xff] %v32479_v50  ;;  %v32497_v27 = vpack.c.bf16 %v32303_v35, %v32283_v21  ;;  %31725 = vset.pattern.permute.xlu1 %v37189_v31  ;;  %v32515_v55 = vpack.c.bf16 %v32388_v1, %v32371_v36  ;;  %v37727_v35 = vmov 1   ;;  %v32521_v31 = vld [vmem:[%s37094_s1] sm:$0xff] }
  0x50   :  { %v298_v57 = vand.u32 4294901760, %v297_v63  ;;  %37719 = vst [vmem:[#allocation58_spill] sm:$0xff] %v32485_v20  ;;  %37720 = vst [vmem:[#allocation59_spill] sm:$0xff] %v32489_v15  ;;  %v32502_v63 = vpack.c.bf16 %v32319_v22, %v32314_v28  ;;  %1380 = vperm.xlu1 %31725, %v31909_v2   ;;  %v32526_v2 = vpack.c.bf16 %v32403_v44, %v32398_v25  ;;  %2029 = vperm.xlu0 %31728, %v32521_v31   ;;  %v34_v1 = vlaneseq }
  0x51   :  { %37721 = vst [vmem:[#allocation60_spill] sm:$0xff] %v32493_v51  ;;  %37722 = vst [vmem:[#allocation61_spill] sm:$0xff] %v32497_v27  ;;  %v37732_v44 = vmov 0.0  }
  0x52   :  { %v32481_v0 = vpack.c.bf16 %v298_v57, %v291_v40  ;;  %37723 = vst [vmem:[#allocation62_spill] sm:$0xff] %v32502_v63  ;;  %v32507_v40 = vpack.c.bf16 %v32331_v43, %v32326_v29  ;;  %v32511_v57 = vpack.c.bf16 %v32360_v5, %v32339_v53  ;;  %37726 = vst [vmem:[#allocation65_spill] sm:$0xff] %v32515_v55  ;;  %v32537_v36 = vand.u32 127, %v34_v1 }
  0x53   :  { %37728 = vst [vmem:[#allocation66_spill] sm:$0xff] %v32521_v31  ;;  %37729 = vst [vmem:[#allocation67_spill] sm:$0xff] %v32526_v2  ;;  %v32531_v5 = vpack.c.bf16 %v32414_v56, %v32409_v60 }
  0x54   :  { %37718 = vst [vmem:[#allocation57_spill] sm:$0xff] %v32481_v0  ;;  %37724 = vst [vmem:[#allocation63_spill] sm:$0xff] %v32507_v40  ;;  %31726 = vset.pattern.permute.xlu1 %v37727_v35  ;;  %v32535_v35 = vpack.c.bf16 %v32449_v38, %v32438_v48 }
  0x55   :  { %37725 = vst [vmem:[#allocation64_spill] sm:$0xff] %v32511_v57  ;;  %2035 = vperm.xlu1 %31726, %v32521_v31   ;;  %37730 = vst [vmem:[#allocation68_spill] sm:$0xff] %v32531_v5 }
  0x56   :  { %37731 = vst [vmem:[#allocation69_spill] sm:$0xff] %v32535_v35 }
  0x93   :  { %v32539_v53 = vpop.permute.xlu0 %86 }
  0x94   :  { %vm88_vm1 = vcmp.eq.s32.totalorder %v32539_v53, %v32537_v36  ;;  %v32893_v53 = vld [vmem:[#allocation2 + $0x138] sm:$0xff] }
  0x95   :  { %v18499_v25 = vsel %vm88_vm1, 1.0, %v37732_v44 }
  0x96   :  { %v32547_v31 = vsub.f32 %v18499_v25, %v18499_v25 }
  0x98   :  { %v32549_v56 = vpop.permute.xlu0 %92  ;;  %v37207_v38 = vand.u32 4294901760, %v32547_v31 }
  0x99   :  { %vm94_vm2 = vcmp.eq.s32.totalorder %v32549_v56, %v32537_v36 }
  0x9a   :  { %v18500_v1 = vsel %vm94_vm2, 1.0, %v37732_v44  ;;  %v822_v48 = vsub.f32 %v32547_v31, %v37207_v38  ;;  %v37739_v38 = vld [vmem:[#allocation13_spill] sm:$0xff] }
  0x9b   :  { %v32561_v60 = vsub.f32 %v18500_v1, %v18500_v1  ;;  %v37735_v1 = vld [vmem:[#allocation9_spill] sm:$0xff] }
  0x9c   :  { %v823_v25 = vand.u32 4294901760, %v822_v48  ;;  %v37734_v48 = vld [vmem:[#allocation8_spill] sm:$0xff] }
  0x9d   :  { %v37206_v43 = vand.u32 4294901760, %v32561_v60 }
  0x9e   :  { %21707 = vmatmul.mubr.f32.vlgmr.msra.gmra.mrb[0].mxu0 %v823_v25  ;;  %v37736_v25 = vld [vmem:[#allocation10_spill] sm:$0xff] }
  0x9f   :  { %27514 = vmatpush3.bf16.msra.mxu0 %v32202_v13  ;;  %v181_v29 = vsub.f32 %v32561_v60, %v37206_v43  ;;  %21741 = vmatprep.mubr.msk.f32.mxu0 %vm31836_vm0, %v37732_v44  ;;  %v37738_v43 = vld [vmem:[#allocation12_spill] sm:$0xff]  ;;  %v32911_v13 = vld [vmem:[#allocation2 + $0x140] sm:$0xff] }
  0xa0   :  { %27515 = vmatprep.subr.bf16.mxu0 %v37671_v11 }
  0xa1   :  { %v182_v22 = vand.u32 4294901760, %v181_v29  ;;  %v37733_v29 = vld [vmem:[#allocation7_spill] sm:$0xff] }
  0xa3   :  { %27517 = vmatpush3.bf16.msra.mxu0 %v32208_v18  ;;  %21497 = vmatmul.mubr.f32.vlgmr.msra.gmra.mrb[0].mxu1 %v182_v22  ;;  %v37204_v22 = vmov 1.0   ;;  %v37263_v18 = vand.u32 4294901760, %v32893_v53 }
  0xa4   :  { %27370 = vmatpush3.bf16.msra.mxu1 %v32217_v3  ;;  %27518 = vmatprep.subr.bf16.mxu0 %v37671_v11 }
  0xa5   :  { %27371 = vmatprep.subr.bf16.mxu1 %v37671_v11  ;;  %21531 = vmatprep.mubr.msk.f32.mxu1 %vm31836_vm0, %v37732_v44 }
  0xa7   :  { %27520 = vmatpush3.bf16.msra.mxu0 %v32245_v26  ;;  %v37753_v26 = vand.u32 4294901760, %v32134_v6  ;;  %v37760_v6 = vand.u32 4294901760, %v32163_v9  ;;  %v37767_v9 = vand.u32 4294901760, %v32227_v61  ;;  %v37773_v61 = vand.u32 4294901760, %v32271_v46 }
  0xa8   :  { %27373 = vmatpush3.bf16.msra.mxu1 %v32291_v54  ;;  %27521 = vmatprep.subr.bf16.mxu0 %v37671_v11 }
  0xa9   :  { %27374 = vmatprep.subr.bf16.mxu1 %v37671_v11 }
  0xab   :  { %27523 = vmatpush3.bf16.msra.mxu0 %v32295_v37  ;;  %v37752_v37 = vand.u32 4294901760, %v32129_v4  ;;  %v37759_v4 = vand.u32 4294901760, %v32561_v60 }
  0xac   :  { %27376 = vmatpush3.bf16.msra.mxu1 %v32306_v10  ;;  %27524 = vmatprep.subr.bf16.mxu0 %v37671_v11 }
  0xad   :  { %27377 = vmatprep.subr.bf16.mxu1 %v37671_v11 }
  0xaf   :  { %27526 = vmatpush3.bf16.msra.mxu0 %v32342_v49  ;;  %v37751_v49 = vand.u32 4294901760, %v32547_v31 }
  0xb0   :  { %27379 = vmatpush3.bf16.msra.mxu1 %v32377_v42  ;;  %27527 = vmatprep.subr.bf16.mxu0 %v37671_v11 }
  0xb1   :  { %27380 = vmatprep.subr.bf16.mxu1 %v37671_v11 }
  0xb3   :  { %27529 = vmatpush3.bf16.msra.mxu0 %v32380_v52  ;;  %v37750_v52 = vld [vmem:[#allocation21_spill] sm:$0xff] }
  0xb4   :  { %27382 = vmatpush3.bf16.msra.mxu1 %v32390_v62  ;;  %27530 = vmatprep.subr.bf16.mxu0 %v37671_v11 }
  0xb5   :  { %27383 = vmatprep.subr.bf16.mxu1 %v37671_v11 }
  0xb7   :  { %27532 = vmatpush3.bf16.msra.mxu0 %v32418_v30 }
  0xb8   :  { %27385 = vmatpush3.bf16.msra.mxu1 %v32456_v24  ;;  %27533 = vmatprep.subr.bf16.mxu0 %v37671_v11 }
  0xb9   :  { %27386 = vmatprep.subr.bf16.mxu1 %v37671_v11 }
  0xbb   :  { %27535 = vmatpush3.bf16.msra.mxu0 %v32459_v41 }
  0xbc   :  { %27388 = vmatpush3.bf16.msra.mxu1 %v32468_v34  ;;  %27536 = vmatprep.subr.bf16.mxu0 %v37671_v11 }
  0xbd   :  { %27389 = vmatprep.subr.bf16.mxu1 %v37671_v11 }
  0xbe   :  { %21742 = vmatmul.mubr.msk.f32.vlgmr.msra.gmra.mrb[0].mxu0 %vm88_vm1, %v37204_v22 }
  0xbf   :  { %27538 = vmatpush3.bf16.msra.mxu0 %v32433_v32  ;;  %21776 = vmatprep.mubr.msk.f32.mxu0 %vm31836_vm0, %v37732_v44  ;;  %v37747_v32 = vld [vmem:[#allocation20_spill] sm:$0xff] }
  0xc0   :  { %27391 = vmatpush3.bf16.msra.mxu1 %v32481_v0  ;;  %27539 = vmatprep.subr.bf16.mxu0 %v37671_v11  ;;  %v37748_v41 = vand.u32 4294901760, %v37747_v32  ;;  %v37756_v32 = vand.u32 4294901760, %v32147_v7  ;;  %v37763_v7 = vand.u32 4294901760, %v32199_v59  ;;  %v37769_v59 = vand.u32 4294901760, %v32237_v17 }
  0xc1   :  { %27392 = vmatprep.subr.bf16.mxu1 %v37671_v11  ;;  %v37775_v17 = vand.u32 4294901760, %v32283_v21 }
  0xc3   :  { %27541 = vmatpush3.bf16.msra.mxu0 %v32454_v33  ;;  %21532 = vmatmul.mubr.msk.f32.vlgmr.msra.gmra.mrb[0].mxu1 %vm94_vm2, %v37204_v22  ;;  %v37737_v22 = vld [vmem:[#allocation11_spill] sm:$0xff] }
  0xc4   :  { %27394 = vmatpush3.bf16.msra.mxu1 %v32466_v47  ;;  %27542 = vmatprep.subr.bf16.mxu0 %v37671_v11 }
  0xc5   :  { %27395 = vmatprep.subr.bf16.mxu1 %v37671_v11  ;;  %21566 = vmatprep.mubr.msk.f32.mxu1 %vm31836_vm0, %v37732_v44 }
  0xc7   :  { %27544 = vmatpush3.bf16.msra.mxu0 %v32475_v58  ;;  %v37745_v58 = vld [vmem:[#allocation18_spill] sm:$0xff] }
  0xc8   :  { %27397 = vmatpush3.bf16.msra.mxu1 %v32479_v50  ;;  %27545 = vmatprep.subr.bf16.mxu0 %v37671_v11  ;;  %v37746_v33 = vand.u32 4294901760, %v37745_v58  ;;  %v32696_v58 = vpack.c.bf16 %v37753_v26, %v37752_v37  ;;  %v37761_v26 = vand.u32 4294901760, %v32174_v39  ;;  %v37766_v39 = vand.u32 4294901760, %v32222_v19 }
  0xc9   :  { %27398 = vmatprep.subr.bf16.mxu1 %v37671_v11  ;;  %v37772_v19 = vand.u32 4294901760, %v32252_v45  ;;  %v37779_v45 = vand.u32 4294901760, %v32314_v28  ;;  %v37789_v28 = vld [vmem:[#allocation34_spill] sm:$0xff] }
  0xca   :  { %v32684_v30 = vpack.c.bf16 %v37748_v41, %v37746_v33  ;;  %37754 = vst [vmem:[#allocation9_spill] sm:$0xff] %v32696_v58  ;;  %v37755_v41 = vld [vmem:[#allocation22_spill] sm:$0xff]  ;;  %v32716_v37 = vpack.c.bf16 %v37761_v26, %v37760_v6  ;;  %v37780_v26 = vld [vmem:[#allocation31_spill] sm:$0xff] }
  0xcb   :  { %27547 = vmatpush3.bf16.msra.mxu0 %v32485_v20  ;;  %v37744_v20 = vld [vmem:[#allocation19_spill] sm:$0xff]  ;;  %v37781_v46 = vand.u32 4294901760, %v37780_v26 }
  0xcc   :  { %27400 = vmatpush3.bf16.msra.mxu1 %v32489_v15  ;;  %27548 = vmatprep.subr.bf16.mxu0 %v37671_v11  ;;  %37749 = vst [vmem:[#allocation7_spill] sm:$0xff] %v32684_v30  ;;  %37762 = vst [vmem:[#allocation20_spill] sm:$0xff] %v32716_v37 }
  0xcd   :  { %27401 = vmatprep.subr.bf16.mxu1 %v37671_v11 }
  0xcf   :  { %27550 = vmatpush3.bf16.msra.mxu0 %v32493_v51  ;;  %v37743_v51 = vld [vmem:[#allocation17_spill] sm:$0xff]  ;;  %v32915_v56 = vpop.permute.xlu1 %1380 }
  0xd0   :  { %27403 = vmatpush3.bf16.msra.mxu1 %v32497_v27  ;;  %27551 = vmatprep.subr.bf16.mxu0 %v37671_v11  ;;  %vm1382_vm3 = vcmp.eq.s32.totalorder %v32915_v56, %v32537_v36  ;;  %v37910_v56 = vld [vmem:[#allocation5_spill] sm:$0xff] }
  0xd1   :  { %27404 = vmatprep.subr.bf16.mxu1 %v37671_v11 }
  0xd3   :  { %27553 = vmatpush3.bf16.msra.mxu0 %v32502_v63  ;;  %v37742_v63 = vld [vmem:[#allocation16_spill] sm:$0xff] }
  0xd4   :  { %27406 = vmatpush3.bf16.msra.mxu1 %v32507_v40  ;;  %27554 = vmatprep.subr.bf16.mxu0 %v37671_v11 }
  0xd5   :  { %27407 = vmatprep.subr.bf16.mxu1 %v37671_v11 }
  0xd7   :  { %27556 = vmatpush3.bf16.msra.mxu0 %v32511_v57  ;;  %v37741_v57 = vld [vmem:[#allocation15_spill] sm:$0xff] }
  0xd8   :  { %27409 = vmatpush3.bf16.msra.mxu1 %v32515_v55  ;;  %27557 = vmatprep.subr.bf16.mxu0 %v37671_v11 }
  0xd9   :  { %27410 = vmatprep.subr.bf16.mxu1 %v37671_v11 }
  0xdb   :  { %27559 = vmatpush3.bf16.msra.mxu0 %v32526_v2  ;;  %v37740_v2 = vld [vmem:[#allocation14_spill] sm:$0xff] }
  0xdc   :  { %27412 = vmatpush3.bf16.msra.mxu1 %v32531_v5  ;;  %27560 = vmatprep.subr.bf16.mxu0 %v37671_v11 }
  0xdd   :  { %27413 = vmatprep.subr.bf16.mxu1 %v37671_v11 }
  0xde   :  { %21777 = vmatmul.mubr.f32.vlgmr.msra.gmra.mrb[0].mxu0 %v32547_v31  ;;  %v37757_v31 = vand.u32 4294901760, %v32152_v8  ;;  %v37764_v8 = vand.u32 4294901760, %v32214_v12  ;;  %v37770_v12 = vand.u32 4294901760, %v32242_v14 }
  0xdf   :  { %27562 = vmatpush3.bf16.msra.mxu0 %v31937_v16  ;;  %21811 = vmatprep.mubr.msk.f32.mxu0 %vm31836_vm0, %v37732_v44 }
  0xe0   :  { %27415 = vmatpush3.bf16.msra.mxu1 %v32535_v35  ;;  %27563 = vmatprep.subr.bf16.mxu0 %v37671_v11  ;;  %v32724_v33 = vpack.c.bf16 %v37764_v8, %v37763_v7  ;;  %v32766_v7 = vpack.c.bf16 %v37781_v46, %v37779_v45  ;;  %v37783_v8 = vld [vmem:[#allocation32_spill] sm:$0xff]  ;;  %v37794_v45 = vld [vmem:[#allocation37_spill] sm:$0xff] }
  0xe1   :  { %27416 = vmatprep.subr.bf16.mxu1 %v37671_v11  ;;  %v37784_v21 = vand.u32 4294901760, %v37783_v8  ;;  %v37795_v26 = vand.u32 4294901760, %v37794_v45  ;;  %v37796_v46 = vld [vmem:[#allocation40_spill] sm:$0xff] }
  0xe2   :  { %37765 = vst [vmem:[#allocation70_spill] sm:$0xff] %v32724_v33  ;;  %37782 = vst [vmem:[#allocation31_spill] sm:$0xff] %v32766_v7  ;;  %v37797_v8 = vand.u32 4294901760, %v37796_v46  ;;  %v37809_v46 = vld [vmem:[#allocation48_spill] sm:$0xff] }
  0xe3   :  { %27565 = vmatpush3.bf16.msra.mxu0 %v31952_v23  ;;  %21567 = vmatmul.mubr.f32.vlgmr.msra.gmra.mrb[0].mxu1 %v32561_v60  ;;  %v32734_v60 = vpack.c.bf16 %v37767_v9, %v37766_v39  ;;  %v37785_v39 = vld [vmem:[#allocation33_spill] sm:$0xff] }
  0xe4   :  { %27418 = vmatpush3.bf16.msra.mxu1 %v37733_v29  ;;  %27566 = vmatprep.subr.bf16.mxu0 %v37671_v11  ;;  %v37786_v9 = vand.u32 4294901760, %v37785_v39  ;;  %v37799_v39 = vld [vmem:[#allocation42_spill] sm:$0xff] }
  0xe5   :  { %27419 = vmatprep.subr.bf16.mxu1 %v37671_v11  ;;  %21601 = vmatprep.mubr.msk.f32.mxu1 %vm31836_vm0, %v37732_v44  ;;  %37768 = vst [vmem:[#allocation71_spill] sm:$0xff] %v32734_v60 }
  0xe7   :  { %27568 = vmatpush3.bf16.msra.mxu0 %v37734_v48 }
  0xe8   :  { %27421 = vmatpush3.bf16.msra.mxu1 %v37735_v1  ;;  %27569 = vmatprep.subr.bf16.mxu0 %v37671_v11 }
  0xe9   :  { %27422 = vmatprep.subr.bf16.mxu1 %v37671_v11 }
  0xeb   :  { %27571 = vmatpush3.bf16.msra.mxu0 %v37736_v25 }
  0xec   :  { %27424 = vmatpush3.bf16.msra.mxu1 %v37737_v22  ;;  %27572 = vmatprep.subr.bf16.mxu0 %v37671_v11 }
  0xed   :  { %27425 = vmatprep.subr.bf16.mxu1 %v37671_v11 }
  0xef   :  { %27574 = vmatpush3.bf16.msra.mxu0 %v37738_v43 }
  0xf0   :  { %27427 = vmatpush3.bf16.msra.mxu1 %v37739_v38  ;;  %27575 = vmatprep.subr.bf16.mxu0 %v37671_v11 }
  0xf1   :  { %27428 = vmatprep.subr.bf16.mxu1 %v37671_v11 }
  0xf3   :  { %27577 = vmatpush3.bf16.msra.mxu0 %v37740_v2 }
  0xf4   :  { %27430 = vmatpush3.bf16.msra.mxu1 %v37741_v57  ;;  %27578 = vmatprep.subr.bf16.mxu0 %v37671_v11 }
  0xf5   :  { %27431 = vmatprep.subr.bf16.mxu1 %v37671_v11 }
  0xf7   :  { %27580 = vmatpush3.bf16.msra.mxu0 %v37742_v63 }
  0xf8   :  { %27433 = vmatpush3.bf16.msra.mxu1 %v37743_v51  ;;  %27581 = vmatprep.subr.bf16.mxu0 %v37671_v11 }
  0xf9   :  { %27434 = vmatprep.subr.bf16.mxu1 %v37671_v11 }
  0xfb   :  { %27583 = vmatpush3.bf16.msra.mxu0 %v37744_v20 }
  0xfc   :  { %27436 = vmatpush3.bf16.msra.mxu1 %v37750_v52  ;;  %27584 = vmatprep.subr.bf16.mxu0 %v37671_v11 }
  0xfd   :  { %27437 = vmatprep.subr.bf16.mxu1 %v37671_v11 }
  0xfe   :  { %21812 = vmatmul.mubr.f32.vlgmr.msra.gmra.mrb[0].mxu0 %v37751_v49  ;;  %v32706_v49 = vpack.c.bf16 %v37757_v31, %v37756_v32  ;;  %v32742_v32 = vpack.c.bf16 %v37770_v12, %v37769_v59  ;;  %v32750_v31 = vpack.c.bf16 %v37773_v61, %v37772_v19  ;;  %v32774_v59 = vpack.c.bf16 %v37786_v9, %v37784_v21  ;;  %v37788_v19 = vld [vmem:[#allocation66_spill] sm:$0xff] }
  0xff   :  { %27586 = vmatpush3.bf16.msra.mxu0 %v32684_v30  ;;  %21846 = vmatprep.mubr.msk.f32.mxu0 %vm31836_vm0, %v37732_v44  ;;  %v31840_v12 = vmov 4   ;;  %v37790_v61 = vand.u32 4294901760, %v37789_v28  ;;  %v32791_v21 = vpack.c.bf16 %v37797_v8, %v37795_v26  ;;  %v37800_v9 = vand.u32 4294901760, %v37799_v39  ;;  %v37811_v39 = vld [vmem:[#allocation49_spill] sm:$0xff] }
 0x100   :  { %27439 = vmatpush3.bf16.msra.mxu1 %v37755_v41  ;;  %27587 = vmatprep.subr.bf16.mxu0 %v37671_v11  ;;  %37758 = vst [vmem:[#allocation18_spill] sm:$0xff] %v32706_v49  ;;  %37771 = vst [vmem:[#allocation72_spill] sm:$0xff] %v32742_v32  ;;  %v37810_v8 = vand.u32 4294901760, %v37809_v46  ;;  %v32859_v46 = vld [vmem:[#allocation2 + $0x110] sm:$0xff] }
 0x101   :  { %27440 = vmatprep.subr.bf16.mxu1 %v37671_v11  ;;  %37774 = vst [vmem:[#allocation73_spill] sm:$0xff] %v32750_v31  ;;  %37787 = vst [vmem:[#allocation32_spill] sm:$0xff] %v32774_v59  ;;  %31727 = vset.pattern.permute.xlu1 %v31840_v12  ;;  %v37801_v12 = vld [vmem:[#allocation43_spill] sm:$0xff] }
 0x102   :  { %3977 = vperm.xlu1 %31727, %v37788_v19   ;;  %37798 = vst [vmem:[#allocation66_spill] sm:$0xff] %v32791_v21  ;;  %v37802_v19 = vand.u32 4294901760, %v37801_v12 }
 0x103   :  { %27589 = vmatpush3.bf16.msra.mxu0 %v32696_v58  ;;  %21602 = vmatmul.mubr.f32.vlgmr.msra.gmra.mrb[0].mxu1 %v37759_v4  ;;  %v37776_v4 = vld [vmem:[#allocation29_spill] sm:$0xff]  ;;  %v32891_v58 = vld [vmem:[#allocation2 + $0x130] sm:$0xff] }
 0x104   :  { %27442 = vmatpush3.bf16.msra.mxu1 %v32706_v49  ;;  %27590 = vmatprep.subr.bf16.mxu0 %v37671_v11  ;;  %v37777_v14 = vand.u32 4294901760, %v37776_v4  ;;  %v32799_v28 = vpack.c.bf16 %v37802_v19, %v37800_v9  ;;  %v37812_v9 = vand.u32 4294901760, %v37811_v39  ;;  %v37814_v19 = vmov 1.0  }
 0x105   :  { %27443 = vmatprep.subr.bf16.mxu1 %v37671_v11  ;;  %21636 = vmatprep.mubr.msk.f32.mxu1 %vm31836_vm0, %v37732_v44  ;;  %v37264_v30 = vand.u32 4294901760, %v32891_v58 }
 0x106   :  { %v32758_v6 = vpack.c.bf16 %v37777_v14, %v37775_v17  ;;  %v37791_v17 = vld [vmem:[#allocation36_spill] sm:$0xff]  ;;  %37803 = vst [vmem:[#allocation34_spill] sm:$0xff] %v32799_v28  ;;  %v32817_v12 = vpack.c.bf16 %v37812_v9, %v37810_v8  ;;  %v1392_v9 = vand.u32 4294901760, %v32859_v46 }
 0x107   :  { %27592 = vmatpush3.bf16.msra.mxu0 %v32716_v37  ;;  %v37792_v4 = vand.u32 4294901760, %v37791_v17  ;;  %v32861_v8 = vld [vmem:[#allocation2 + $0x118] sm:$0xff] }
 0x108   :  { %27445 = vmatpush3.bf16.msra.mxu1 %v32724_v33  ;;  %27593 = vmatprep.subr.bf16.mxu0 %v37671_v11  ;;  %37778 = vst [vmem:[#allocation29_spill] sm:$0xff] %v32758_v6  ;;  %37813 = vst [vmem:[#allocation37_spill] sm:$0xff] %v32817_v12 }
 0x109   :  { %27446 = vmatprep.subr.bf16.mxu1 %v37671_v11  ;;  %v32783_v14 = vpack.c.bf16 %v37792_v4, %v37790_v61  ;;  %v37804_v61 = vld [vmem:[#allocation44_spill] sm:$0xff]  ;;  %v37806_v4 = vld [vmem:[#allocation45_spill] sm:$0xff] }
 0x10a   :  { %v37805_v17 = vand.u32 4294901760, %v37804_v61  ;;  %v37807_v45 = vand.u32 4294901760, %v37806_v4  ;;  %v68_v61 = vld [vmem:[#allocation2 + $0x100] sm:$0xff] }
 0x10b   :  { %27595 = vmatpush3.bf16.msra.mxu0 %v32734_v60  ;;  %37793 = vst [vmem:[#allocation33_spill] sm:$0xff] %v32783_v14  ;;  %v1386_v4 = vand.u32 4294901760, %v68_v61 }
 0x10c   :  { %27448 = vmatpush3.bf16.msra.mxu1 %v32742_v32  ;;  %27596 = vmatprep.subr.bf16.mxu0 %v37671_v11  ;;  %v32807_v26 = vpack.c.bf16 %v37807_v45, %v37805_v17  ;;  %v69_v17 = vld [vmem:[#allocation2 + $0x108] sm:$0xff] }
 0x10d   :  { %27449 = vmatprep.subr.bf16.mxu1 %v37671_v11  ;;  %v1389_v45 = vand.u32 4294901760, %v69_v17 }
 0x10e   :  { %37808 = vst [vmem:[#allocation36_spill] sm:$0xff] %v32807_v26 }
 0x10f   :  { %27598 = vmatpush3.bf16.msra.mxu0 %v32750_v31  ;;  %v32865_v39 = vpack.c.bf16 %v1389_v45, %v1386_v4 }
 0x110   :  { %27451 = vmatpush3.bf16.msra.mxu1 %v32758_v6  ;;  %27599 = vmatprep.subr.bf16.mxu0 %v37671_v11 }
 0x111   :  { %27452 = vmatprep.subr.bf16.mxu1 %v37671_v11 }
 0x113   :  { %27601 = vmatpush3.bf16.msra.mxu0 %v32766_v7  ;;  %v32873_v7 = vld [vmem:[#allocation2 + $0x128] sm:$0xff] }
 0x114   :  { %27454 = vmatpush3.bf16.msra.mxu1 %v32774_v59  ;;  %27602 = vmatprep.subr.bf16.mxu0 %v37671_v11  ;;  %v37258_v37 = vand.u32 4294901760, %v32873_v7  ;;  %v37821_v59 = vand.u32 4294901760, %v32861_v8 }
 0x115   :  { %27455 = vmatprep.subr.bf16.mxu1 %v37671_v11 }
 0x116   :  { %v32989_v6 = vsub.f32 %v32861_v8, %v37821_v59  ;;  %v37827_v59 = vand.u32 4294901760, %v32873_v7 }
 0x117   :  { %27604 = vmatpush3.bf16.msra.mxu0 %v32783_v14  ;;  %v32871_v14 = vld [vmem:[#allocation2 + $0x120] sm:$0xff] }
 0x118   :  { %27457 = vmatpush3.bf16.msra.mxu1 %v32791_v21  ;;  %27605 = vmatprep.subr.bf16.mxu0 %v37671_v11  ;;  %v37259_v60 = vand.u32 4294901760, %v32871_v14  ;;  %v32975_v21 = vsub.f32 %v32859_v46, %v1392_v9 }
 0x119   :  { %27458 = vmatprep.subr.bf16.mxu1 %v37671_v11 }
 0x11b   :  { %27607 = vmatpush3.bf16.msra.mxu0 %v32799_v28  ;;  %v37250_v28 = vand.u32 4294901760, %v32861_v8 }
 0x11c   :  { %27460 = vmatpush3.bf16.msra.mxu1 %v32807_v26  ;;  %27608 = vmatprep.subr.bf16.mxu0 %v37671_v11 }
 0x11d   :  { %27461 = vmatprep.subr.bf16.mxu1 %v37671_v11  ;;  %v32883_v31 = vpack.c.bf16 %v37250_v28, %v1392_v9  ;;  %v32905_v28 = vpack.c.bf16 %v37258_v37, %v37259_v60  ;;  %v32925_v37 = vpack.c.bf16 %v37263_v18, %v37264_v30  ;;  %v18507_v18 = vsel %vm1382_vm3, 1.0, %v37732_v44  ;;  %v32942_v30 = vld [vmem:[#allocation2 + $0x160] sm:$0xff]  ;;  %v32946_v60 = vpop.permute.xlu1 %2035 }
 0x11e   :  { %21847 = vmatmul.mubr.msk.f32.vlgmr.msra.gmra.mrb[0].mxu0 %vm88_vm1, %v37814_v19  ;;  %vm2037_vm4 = vcmp.eq.s32.totalorder %v32946_v60, %v32537_v36  ;;  %v33490_v60 = vpop.permute.xlu0 %2029 }
 0x11f   :  { %27610 = vmatpush3.bf16.msra.mxu0 %v31937_v16  ;;  %21881 = vmatprep.mubr.msk.f32.mxu0 %vm31836_vm0, %v37732_v44  ;;  %37815 = vst [vmem:[#allocation40_spill] sm:$0xff] %v32925_v37  ;;  %v18512_v46 = vsel %vm2037_vm4, 1.0, %v37732_v44  ;;  %vm2031_vm6 = vcmp.eq.s32.totalorder %v33490_v60, %v32537_v36 }
 0x120   :  { %27463 = vmatpush3.bf16.msra.mxu1 %v32817_v12  ;;  %27611 = vmatprep.subr.bf16.mxu0 %v37671_v11 }
 0x121   :  { %27464 = vmatprep.subr.bf16.mxu1 %v37671_v11 }
 0x123   :  { %27613 = vmatpush3.bf16.msra.mxu0 %v31952_v23  ;;  %21637 = vmatmul.mubr.msk.f32.vlgmr.msra.gmra.mrb[0].mxu1 %vm94_vm2, %v37814_v19  ;;  %v37816_v23 = vand.u32 4294901760, %v32911_v13 }
 0x124   :  { %27466 = vmatpush3.bf16.msra.mxu1 %v37733_v29  ;;  %27614 = vmatprep.subr.bf16.mxu0 %v37671_v11 }
 0x125   :  { %27467 = vmatprep.subr.bf16.mxu1 %v37671_v11  ;;  %21671 = vmatprep.mubr.msk.f32.mxu1 %vm31836_vm0, %v37732_v44 }
 0x127   :  { %27616 = vmatpush3.bf16.msra.mxu0 %v37734_v48  ;;  %v32950_v48 = vsub.f32 %v69_v17, %v1389_v45 }
 0x128   :  { %27469 = vmatpush3.bf16.msra.mxu1 %v37735_v1  ;;  %27617 = vmatprep.subr.bf16.mxu0 %v37671_v11 }
 0x129   :  { %27470 = vmatprep.subr.bf16.mxu1 %v37671_v11  ;;  %v37825_v33 = vand.u32 4294901760, %v32950_v48 }
 0x12b   :  { %27619 = vmatpush3.bf16.msra.mxu0 %v37736_v25  ;;  %v32948_v25 = vsub.f32 %v68_v61, %v1386_v4  ;;  %v32964_v61 = vsub.f32 %v18507_v18, %v18507_v18  ;;  %v32984_v4 = vld [vmem:[#allocation2 + $0x178] sm:$0xff]  ;;  %v1487_v9 = vsub.f32 %v32950_v48, %v37825_v33 }
 0x12c   :  { %27472 = vmatpush3.bf16.msra.mxu1 %v37737_v22  ;;  %27620 = vmatprep.subr.bf16.mxu0 %v37671_v11  ;;  %v37832_v49 = vand.u32 4294901760, %v32984_v4 }
 0x12d   :  { %27473 = vmatprep.subr.bf16.mxu1 %v37671_v11  ;;  %v37828_v33 = vand.u32 4294901760, %v32964_v61 }
 0x12f   :  { %27622 = vmatpush3.bf16.msra.mxu0 %v37738_v43  ;;  %v32935_v43 = vld [vmem:[#allocation2 + $0x158] sm:$0xff] }
 0x130   :  { %27475 = vmatpush3.bf16.msra.mxu1 %v37739_v38  ;;  %27623 = vmatprep.subr.bf16.mxu0 %v37671_v11  ;;  %v37819_v18 = vand.u32 4294901760, %v32935_v43 }
 0x131   :  { %27476 = vmatprep.subr.bf16.mxu1 %v37671_v11 }
 0x133   :  { %27625 = vmatpush3.bf16.msra.mxu0 %v37740_v2  ;;  %v32933_v2 = vld [vmem:[#allocation2 + $0x150] sm:$0xff] }
 0x134   :  { %27478 = vmatpush3.bf16.msra.mxu1 %v37741_v57  ;;  %27626 = vmatprep.subr.bf16.mxu0 %v37671_v11  ;;  %v37281_v26 = vand.u32 4294901760, %v32933_v2 }
 0x135   :  { %27479 = vmatprep.subr.bf16.mxu1 %v37671_v11 }
 0x136   :  { %v32982_v17 = vpack.c.bf16 %v37819_v18, %v37281_v26  ;;  %v37822_v18 = vand.u32 4294901760, %v32942_v30 }
 0x137   :  { %27628 = vmatpush3.bf16.msra.mxu0 %v37742_v63  ;;  %v32944_v63 = vld [vmem:[#allocation2 + $0x168] sm:$0xff] }
 0x138   :  { %27481 = vmatpush3.bf16.msra.mxu1 %v37743_v51  ;;  %27629 = vmatprep.subr.bf16.mxu0 %v37671_v11  ;;  %37820 = vst [vmem:[#allocation43_spill] sm:$0xff] %v32982_v17  ;;  %v37823_v26 = vand.u32 4294901760, %v32944_v63 }
 0x139   :  { %27482 = vmatprep.subr.bf16.mxu1 %v37671_v11 }
 0x13a   :  { %v33003_v45 = vpack.c.bf16 %v37823_v26, %v37822_v18  ;;  %v37826_v18 = vand.u32 4294901760, %v32871_v14  ;;  %v37829_v26 = vand.u32 4294901760, %v32891_v58 }
 0x13b   :  { %27631 = vmatpush3.bf16.msra.mxu0 %v37744_v20  ;;  %v32913_v20 = vld [vmem:[#allocation2 + $0x148] sm:$0xff] }
 0x13c   :  { %27484 = vmatpush3.bf16.msra.mxu1 %v37750_v52  ;;  %27632 = vmatprep.subr.bf16.mxu0 %v37671_v11  ;;  %v37817_v16 = vand.u32 4294901760, %v32913_v20  ;;  %37824 = vst [vmem:[#allocation44_spill] sm:$0xff] %v33003_v45  ;;  %v33021_v8 = vsub.f32 %v32871_v14, %v37826_v18  ;;  %v33037_v14 = vsub.f32 %v32891_v58, %v37829_v26  ;;  %v37830_v18 = vand.u32 4294901760, %v32893_v53 }
 0x13d   :  { %27485 = vmatprep.subr.bf16.mxu1 %v37671_v11  ;;  %v37835_v26 = vand.u32 4294901760, %v32989_v6 }
 0x13e   :  { %21882 = vmatmul.mubr.msk.f32.vlgmr.msra.gmra.mrb[0].mxu0 %vm88_vm1, %v37814_v19  ;;  %v32957_v12 = vpack.c.bf16 %v37817_v16, %v37816_v23  ;;  %v32970_v16 = vld [vmem:[#allocation2 + $0x170] sm:$0xff]  ;;  %v37289_v23 = vand.u32 4294901760, %v32948_v25 }
 0x13f   :  { %27634 = vmatpush3.bf16.msra.mxu0 %v32865_v39  ;;  %21916 = vmatprep.mubr.msk.f32.mxu0 %vm31836_vm0, %v37732_v44 }
 0x140   :  { %27487 = vmatpush3.bf16.msra.mxu1 %v37755_v41  ;;  %27635 = vmatprep.subr.bf16.mxu0 %v37671_v11  ;;  %37818 = vst [vmem:[#allocation42_spill] sm:$0xff] %v32957_v12  ;;  %v1480_v32 = vsub.f32 %v32948_v25, %v37289_v23  ;;  %v33026_v23 = vsub.f32 %v32873_v7, %v37827_v59  ;;  %v37831_v59 = vand.u32 4294901760, %v32970_v16 }
 0x141   :  { %27776 = vmatprep.subr.bf16.mxu1 %v37671_v11  ;;  %v33042_v7 = vsub.f32 %v32893_v53, %v37830_v18  ;;  %v1501_v53 = vsub.f32 %v32989_v6, %v37835_v26  ;;  %v37837_v26 = vand.u32 4294901760, %v32911_v13 }
 0x143   :  { %27637 = vmatpush3.bf16.msra.mxu0 %v32883_v31  ;;  %21672 = vmatmul.mubr.msk.f32.vlgmr.msra.gmra.mrb[0].mxu1 %vm94_vm2, %v37814_v19  ;;  %v33070_v18 = vsub.f32 %v32911_v13, %v37837_v26 }
 0x144   :  { %27778 = vmatpush3.bf16.msra.mxu1 %v37733_v29  ;;  %27638 = vmatprep.subr.bf16.mxu0 %v37671_v11 }
 0x145   :  { %27779 = vmatprep.subr.bf16.mxu1 %v37671_v11  ;;  %22126 = vmatprep.mubr.msk.f32.mxu1 %vm31836_vm0, %v37732_v44  ;;  %v37311_v26 = vand.u32 4294901760, %v33070_v18 }
 0x147   :  { %27640 = vmatpush3.bf16.msra.mxu0 %v32905_v28 }
 0x148   :  { %27781 = vmatpush3.bf16.msra.mxu1 %v37735_v1  ;;  %27641 = vmatprep.subr.bf16.mxu0 %v37671_v11 }
 0x149   :  { %27782 = vmatprep.subr.bf16.mxu1 %v37671_v11 }
 0x14b   :  { %27643 = vmatpush3.bf16.msra.mxu0 %v32925_v37  ;;  %v37838_v37 = vand.u32 4294901760, %v32913_v20 }
 0x14c   :  { %27784 = vmatpush3.bf16.msra.mxu1 %v37737_v22  ;;  %27644 = vmatprep.subr.bf16.mxu0 %v37671_v11 }
 0x14d   :  { %27785 = vmatprep.subr.bf16.mxu1 %v37671_v11  ;;  %v33075_v58 = vsub.f32 %v32913_v20, %v37838_v37  ;;  %v37842_v20 = vand.u32 4294901760, %v33037_v14 }
 0x14f   :  { %27646 = vmatpush3.bf16.msra.mxu0 %v32957_v12  ;;  %v1488_v12 = vand.u32 4294901760, %v1487_v9  ;;  %v1522_v37 = vsub.f32 %v33037_v14, %v37842_v20 }
 0x150   :  { %27787 = vmatpush3.bf16.msra.mxu1 %v37739_v38  ;;  %27647 = vmatprep.subr.bf16.mxu0 %v37671_v11  ;;  %v33015_v38 = vsub.f32 %v18512_v46, %v18512_v46  ;;  %v1469_v46 = vsub.f32 %v32964_v61, %v37828_v33  ;;  %v37834_v33 = vand.u32 4294901760, %v32975_v21 }
 0x151   :  { %27788 = vmatprep.subr.bf16.mxu1 %v37671_v11 }
 0x152   :  { %v1494_v22 = vsub.f32 %v32975_v21, %v37834_v33 }
 0x153   :  { %27649 = vmatpush3.bf16.msra.mxu0 %v32982_v17  ;;  %v1481_v17 = vand.u32 4294901760, %v1480_v32  ;;  %v37839_v32 = vand.u32 4294901760, %v33015_v38 }
 0x154   :  { %27790 = vmatpush3.bf16.msra.mxu1 %v37741_v57  ;;  %27650 = vmatprep.subr.bf16.mxu0 %v37671_v11  ;;  %v33048_v57 = vpack.c.bf16 %v37832_v49, %v37831_v59  ;;  %v1470_v49 = vand.u32 4294901760, %v1469_v46  ;;  %v1495_v33 = vand.u32 4294901760, %v1494_v22  ;;  %v1502_v46 = vand.u32 4294901760, %v1501_v53 }
 0x155   :  { %27791 = vmatprep.subr.bf16.mxu1 %v37671_v11  ;;  %v33065_v59 = vpack.c.bf16 %v1488_v12, %v1481_v17  ;;  %v2124_v9 = vsub.f32 %v33015_v38, %v37839_v32  ;;  %v37840_v12 = vand.u32 4294901760, %v33021_v8  ;;  %v37841_v17 = vand.u32 4294901760, %v33026_v23 }
 0x156   :  { %37833 = vst [vmem:[#allocation45_spill] sm:$0xff] %v33048_v57  ;;  %v37843_v53 = vand.u32 4294901760, %v33042_v7  ;;  %v33109_v20 = vpack.c.bf16 %v1502_v46, %v1495_v33 }
 0x157   :  { %27652 = vmatpush3.bf16.msra.mxu0 %v33003_v45  ;;  %37836 = vst [vmem:[#allocation48_spill] sm:$0xff] %v33065_v59  ;;  %v1508_v22 = vsub.f32 %v33021_v8, %v37840_v12  ;;  %v1515_v13 = vsub.f32 %v33026_v23, %v37841_v17  ;;  %v37304_v12 = vand.u32 4294901760, %v33075_v58  ;;  %v37844_v17 = vand.u32 4294901760, %v32933_v2 }
 0x158   :  { %27793 = vmatpush3.bf16.msra.mxu1 %v37743_v51  ;;  %27653 = vmatprep.subr.bf16.mxu0 %v37671_v11  ;;  %v1529_v32 = vsub.f32 %v33042_v7, %v37843_v53  ;;  %37846 = vst [vmem:[#allocation49_spill] sm:$0xff] %v33109_v20  ;;  %v2125_v53 = vand.u32 4294901760, %v2124_v9 }
 0x159   :  { %27794 = vmatprep.subr.bf16.mxu1 %v37671_v11  ;;  %v1516_v45 = vand.u32 4294901760, %v1515_v13 }
 0x15b   :  { %27655 = vmatpush3.bf16.msra.mxu0 %v33048_v57  ;;  %v37845_v57 = vand.u32 4294901760, %v32935_v43 }
 0x15c   :  { %27796 = vmatpush3.bf16.msra.mxu1 %v37750_v52  ;;  %27656 = vmatprep.subr.bf16.mxu0 %v37671_v11  ;;  %v33101_v52 = vsub.f32 %v32933_v2, %v37844_v17  ;;  %v1523_v2 = vand.u32 4294901760, %v1522_v37  ;;  %v1530_v17 = vand.u32 4294901760, %v1529_v32  ;;  %v37849_v37 = vand.u32 4294901760, %v32944_v63 }
 0x15d   :  { %27797 = vmatprep.subr.bf16.mxu1 %v37671_v11  ;;  %v33106_v51 = vsub.f32 %v32935_v43, %v37845_v57  ;;  %v1536_v43 = vsub.f32 %v33070_v18, %v37311_v26  ;;  %v1543_v57 = vsub.f32 %v33075_v58, %v37304_v12  ;;  %v37866_v26 = vld [vmem:[#allocation11_spill] sm:$0xff] }
 0x15e   :  { %21917 = vmatmul.mubr.f32.vlgmr.msra.gmra.mrb[0].mxu0 %v1470_v49  ;;  %v1509_v49 = vand.u32 4294901760, %v1508_v22  ;;  %v37306_v9 = vand.u32 4294901760, %v33101_v52  ;;  %v37848_v22 = vand.u32 4294901760, %v32942_v30  ;;  %v33135_v32 = vsub.f32 %v32944_v63, %v37849_v37 }
 0x15f   :  { %27658 = vmatpush3.bf16.msra.mxu0 %v33065_v59  ;;  %21951 = vmatprep.mubr.msk.f32.mxu0 %vm31836_vm0, %v37732_v44  ;;  %v37305_v33 = vand.u32 4294901760, %v33106_v51  ;;  %v33140_v12 = vpack.c.bf16 %v1530_v17, %v1523_v2  ;;  %v37851_v17 = vand.u32 4294901760, %v32970_v16 }
 0x160   :  { %27799 = vmatpush3.bf16.msra.mxu1 %v37755_v41  ;;  %27659 = vmatprep.subr.bf16.mxu0 %v37671_v11  ;;  %v33125_v46 = vpack.c.bf16 %v1516_v45, %v1509_v49  ;;  %v33130_v13 = vsub.f32 %v32942_v30, %v37848_v22  ;;  %v1537_v45 = vand.u32 4294901760, %v1536_v43  ;;  %v1550_v30 = vsub.f32 %v33101_v52, %v37306_v9 }
 0x161   :  { %27800 = vmatprep.subr.bf16.mxu1 %v37671_v11  ;;  %37850 = vst [vmem:[#allocation75_spill] sm:$0xff] %v33140_v12  ;;  %v1557_v63 = vsub.f32 %v33106_v51, %v37305_v33  ;;  %v37307_v2 = vand.u32 4294901760, %v33135_v32  ;;  %v33156_v22 = vsub.f32 %v32970_v16, %v37851_v17  ;;  %v37852_v43 = vand.u32 4294901760, %v32984_v4 }
 0x162   :  { %37847 = vst [vmem:[#allocation74_spill] sm:$0xff] %v33125_v46  ;;  %v37310_v49 = vand.u32 4294901760, %v33130_v13  ;;  %v1551_v33 = vand.u32 4294901760, %v1550_v30 }
 0x163   :  { %27661 = vmatpush3.bf16.msra.mxu0 %v33109_v20  ;;  %22127 = vmatmul.mubr.f32.vlgmr.msra.gmra.mrb[2].mxu1 %v2125_v53  ;;  %v1544_v53 = vand.u32 4294901760, %v1543_v57  ;;  %v33161_v57 = vsub.f32 %v32984_v4, %v37852_v43  ;;  %v1558_v9 = vand.u32 4294901760, %v1557_v63  ;;  %v1571_v4 = vsub.f32 %v33135_v32, %v37307_v2 }
 0x164   :  { %27802 = vmatpush3.bf16.msra.mxu1 %v32217_v3  ;;  %27662 = vmatprep.subr.bf16.mxu0 %v37671_v11  ;;  %v1564_v16 = vsub.f32 %v33130_v13, %v37310_v49  ;;  %v37309_v17 = vand.u32 4294901760, %v33156_v22  ;;  %v37865_v49 = vld [vmem:[#allocation40_spill] sm:$0xff] }
 0x165   :  { %27803 = vmatprep.subr.bf16.mxu1 %v37671_v11  ;;  %22161 = vmatprep.mubr.msk.f32.mxu1 %vm31836_vm0, %v37732_v44  ;;  %v33166_v37 = vpack.c.bf16 %v1544_v53, %v1537_v45  ;;  %v37308_v43 = vand.u32 4294901760, %v33161_v57  ;;  %v33180_v45 = vpack.c.bf16 %v1558_v9, %v1551_v33  ;;  %v1572_v30 = vand.u32 4294901760, %v1571_v4 }
 0x166   :  { %v1565_v53 = vand.u32 4294901760, %v1564_v16  ;;  %v1578_v63 = vsub.f32 %v33156_v22, %v37309_v17  ;;  %v33275_v17 = vpack.c.bf16 %v33161_v57, %v33156_v22 }
 0x167   :  { %27664 = vmatpush3.bf16.msra.mxu0 %v33125_v46  ;;  %37853 = vst [vmem:[#allocation76_spill] sm:$0xff] %v33166_v37  ;;  %37854 = vst [vmem:[#allocation77_spill] sm:$0xff] %v33180_v45  ;;  %v1585_v2 = vsub.f32 %v33161_v57, %v37308_v43  ;;  %v33267_v43 = vpack.c.bf16 %v33135_v32, %v33130_v13  ;;  %v37880_v46 = vand.u32 4294901760, %v32989_v6 }
 0x168   :  { %27805 = vmatpush3.bf16.msra.mxu1 %v32291_v54  ;;  %27665 = vmatprep.subr.bf16.mxu0 %v37671_v11  ;;  %v33193_v9 = vpack.c.bf16 %v1572_v30, %v1565_v53  ;;  %v1579_v33 = vand.u32 4294901760, %v1578_v63  ;;  %v33219_v53 = vpack.c.bf16 %v32989_v6, %v32975_v21  ;;  %v33233_v30 = vpack.c.bf16 %v33026_v23, %v33021_v8 }
 0x169   :  { %27806 = vmatprep.subr.bf16.mxu1 %v37671_v11  ;;  %v1586_v16 = vand.u32 4294901760, %v1585_v2  ;;  %v33207_v2 = vpack.c.bf16 %v32950_v48, %v32948_v25  ;;  %v33243_v63 = vpack.c.bf16 %v33042_v7, %v33037_v14  ;;  %37863 = vst [vmem:[#allocation86_spill] sm:$0xff] %v33267_v43  ;;  %37864 = vst [vmem:[#allocation87_spill] sm:$0xff] %v33275_v17  ;;  %v37884_v6 = vand.u32 4294901760, %v33026_v23  ;;  %v37890_v23 = vld [vmem:[#allocation70_spill] sm:$0xff] }
 0x16a   :  { %37855 = vst [vmem:[#allocation78_spill] sm:$0xff] %v33193_v9  ;;  %37858 = vst [vmem:[#allocation81_spill] sm:$0xff] %v33219_v53 }
 0x16b   :  { %27667 = vmatpush3.bf16.msra.mxu0 %v33140_v12  ;;  %v33199_v4 = vpack.c.bf16 %v1586_v16, %v1579_v33  ;;  %37857 = vst [vmem:[#allocation80_spill] sm:$0xff] %v33207_v2  ;;  %37859 = vst [vmem:[#allocation82_spill] sm:$0xff] %v33233_v30  ;;  %v33251_v33 = vpack.c.bf16 %v33075_v58, %v33070_v18  ;;  %v33259_v16 = vpack.c.bf16 %v33106_v51, %v33101_v52 }
 0x16c   :  { %27808 = vmatpush3.bf16.msra.mxu1 %v32306_v10  ;;  %27668 = vmatprep.subr.bf16.mxu0 %v37671_v11  ;;  %37860 = vst [vmem:[#allocation83_spill] sm:$0xff] %v33243_v63  ;;  %v37879_v12 = vand.u32 4294901760, %v32975_v21  ;;  %v37883_v21 = vand.u32 4294901760, %v33021_v8 }
 0x16d   :  { %27809 = vmatprep.subr.bf16.mxu1 %v37671_v11  ;;  %37856 = vst [vmem:[#allocation79_spill] sm:$0xff] %v33199_v4  ;;  %37861 = vst [vmem:[#allocation84_spill] sm:$0xff] %v33251_v33 }
 0x16e   :  { %37862 = vst [vmem:[#allocation85_spill] sm:$0xff] %v33259_v16 }
 0x16f   :  { %27670 = vmatpush3.bf16.msra.mxu0 %v33166_v37  ;;  %v37878_v37 = vand.u32 4294901760, %v32964_v61 }
 0x170   :  { %27811 = vmatpush3.bf16.msra.mxu1 %v32377_v42  ;;  %27671 = vmatprep.subr.bf16.mxu0 %v37671_v11 }
 0x171   :  { %27812 = vmatprep.subr.bf16.mxu1 %v37671_v11 }
 0x173   :  { %27673 = vmatpush3.bf16.msra.mxu0 %v33180_v45  ;;  %v37877_v45 = vld [vmem:[#allocation21_spill] sm:$0xff] }
 0x174   :  { %27814 = vmatpush3.bf16.msra.mxu1 %v32390_v62  ;;  %27674 = vmatprep.subr.bf16.mxu0 %v37671_v11 }
 0x175   :  { %27815 = vmatprep.subr.bf16.mxu1 %v37671_v11 }
 0x177   :  { %27676 = vmatpush3.bf16.msra.mxu0 %v33193_v9 }
 0x178   :  { %27817 = vmatpush3.bf16.msra.mxu1 %v32456_v24  ;;  %27677 = vmatprep.subr.bf16.mxu0 %v37671_v11 }
 0x179   :  { %27818 = vmatprep.subr.bf16.mxu1 %v37671_v11 }
 0x17b   :  { %27679 = vmatpush3.bf16.msra.mxu0 %v33199_v4  ;;  %v37875_v4 = vand.u32 4294901760, %v32950_v48  ;;  %v37882_v48 = vand.u32 4294901760, %v33015_v38 }
 0x17c   :  { %27820 = vmatpush3.bf16.msra.mxu1 %v32468_v34  ;;  %27680 = vmatprep.subr.bf16.mxu0 %v37671_v11 }
 0x17d   :  { %27821 = vmatprep.subr.bf16.mxu1 %v37671_v11 }
 0x17e   :  { %21952 = vmatmul.mubr.msk.f32.vlgmr.msra.gmra.mrb[0].mxu0 %vm1382_vm3, %v37814_v19 }
 0x17f   :  { %27682 = vmatpush3.bf16.msra.mxu0 %v33207_v2  ;;  %21986 = vmatprep.mubr.msk.f32.mxu0 %vm31836_vm0, %v37732_v44  ;;  %v37874_v2 = vand.u32 4294901760, %v32948_v25  ;;  %v33335_v25 = vpack.c.bf16 %v37880_v46, %v37879_v12  ;;  %v37886_v12 = vld [vmem:[#allocation18_spill] sm:$0xff]  ;;  %v37888_v46 = vand.u32 4294901760, %v33042_v7  ;;  %v37896_v7 = vand.u32 4294901760, %v33106_v51 }
 0x180   :  { %27823 = vmatpush3.bf16.msra.mxu1 %v32481_v0  ;;  %27683 = vmatprep.subr.bf16.mxu0 %v37671_v11  ;;  %v37900_v51 = vand.u32 4294901760, %v33135_v32  ;;  %v37908_v32 = vld [vmem:[#allocation36_spill] sm:$0xff] }
 0x181   :  { %27824 = vmatprep.subr.bf16.mxu1 %v37671_v11  ;;  %v33323_v9 = vpack.c.bf16 %v37875_v4, %v37874_v2  ;;  %37881 = vst [vmem:[#allocation11_spill] sm:$0xff] %v33335_v25  ;;  %v37892_v4 = vand.u32 4294901760, %v33075_v58  ;;  %v31841_v58 = vmov 3  }
 0x182   :  { %31729 = vset.pattern.permute.xlu1 %v31841_v58  ;;  %v37911_v58 = vld [vmem:[#allocation6_spill] sm:$0xff] }
 0x183   :  { %27685 = vmatpush3.bf16.msra.mxu0 %v33219_v53  ;;  %22162 = vmatmul.mubr.msk.f32.vlgmr.msra.gmra.mrb[2].mxu1 %vm2037_vm4, %v37814_v19  ;;  %v37873_v53 = vld [vmem:[#allocation45_spill] sm:$0xff]  ;;  %37876 = vst [vmem:[#allocation40_spill] sm:$0xff] %v33323_v9 }
 0x184   :  { %27826 = vmatpush3.bf16.msra.mxu1 %v32466_v47  ;;  %27686 = vmatprep.subr.bf16.mxu0 %v37671_v11 }
 0x185   :  { %27827 = vmatprep.subr.bf16.mxu1 %v37671_v11  ;;  %22196 = vmatprep.mubr.msk.f32.mxu1 %vm31836_vm0, %v37732_v44 }
 0x187   :  { %27688 = vmatpush3.bf16.msra.mxu0 %v33233_v30  ;;  %v37872_v30 = vld [vmem:[#allocation17_spill] sm:$0xff] }
 0x188   :  { %27829 = vmatpush3.bf16.msra.mxu1 %v32479_v50  ;;  %27689 = vmatprep.subr.bf16.mxu0 %v37671_v11 }
 0x189   :  { %27830 = vmatprep.subr.bf16.mxu1 %v37671_v11 }
 0x18b   :  { %27691 = vmatpush3.bf16.msra.mxu0 %v33243_v63  ;;  %v37871_v63 = vld [vmem:[#allocation44_spill] sm:$0xff] }
 0x18c   :  { %27832 = vmatpush3.bf16.msra.mxu1 %v32489_v15  ;;  %27692 = vmatprep.subr.bf16.mxu0 %v37671_v11 }
 0x18d   :  { %27833 = vmatprep.subr.bf16.mxu1 %v37671_v11 }
 0x18f   :  { %27694 = vmatpush3.bf16.msra.mxu0 %v33251_v33  ;;  %v37870_v33 = vld [vmem:[#allocation15_spill] sm:$0xff] }
 0x190   :  { %27835 = vmatpush3.bf16.msra.mxu1 %v32497_v27  ;;  %27695 = vmatprep.subr.bf16.mxu0 %v37671_v11 }
 0x191   :  { %27836 = vmatprep.subr.bf16.mxu1 %v37671_v11 }
 0x193   :  { %27697 = vmatpush3.bf16.msra.mxu0 %v33259_v16  ;;  %v37869_v16 = vld [vmem:[#allocation43_spill] sm:$0xff] }
 0x194   :  { %27838 = vmatpush3.bf16.msra.mxu1 %v32507_v40  ;;  %27698 = vmatprep.subr.bf16.mxu0 %v37671_v11 }
 0x195   :  { %27839 = vmatprep.subr.bf16.mxu1 %v37671_v11 }
 0x197   :  { %27700 = vmatpush3.bf16.msra.mxu0 %v33267_v43  ;;  %v37868_v43 = vld [vmem:[#allocation13_spill] sm:$0xff] }
 0x198   :  { %27841 = vmatpush3.bf16.msra.mxu1 %v32515_v55  ;;  %27701 = vmatprep.subr.bf16.mxu0 %v37671_v11 }
 0x199   :  { %27842 = vmatprep.subr.bf16.mxu1 %v37671_v11 }
 0x19b   :  { %27703 = vmatpush3.bf16.msra.mxu0 %v33275_v17  ;;  %v37867_v17 = vld [vmem:[#allocation42_spill] sm:$0xff] }
 0x19c   :  { %27844 = vmatpush3.bf16.msra.mxu1 %v32531_v5  ;;  %27704 = vmatprep.subr.bf16.mxu0 %v37671_v11 }
 0x19d   :  { %27845 = vmatprep.subr.bf16.mxu1 %v37671_v11 }
 0x19e   :  { %21987 = vmatmul.mubr.f32.vlgmr.msra.gmra.mrb[0].mxu0 %v32964_v61  ;;  %v33349_v61 = vpack.c.bf16 %v37884_v6, %v37883_v21  ;;  %v37898_v6 = vld [vmem:[#allocation29_spill] sm:$0xff] }
 0x19f   :  { %27706 = vmatpush3.bf16.msra.mxu0 %v32865_v39  ;;  %22021 = vmatprep.mubr.msk.f32.mxu0 %vm31836_vm0, %v37732_v44 }
 0x1a0   :  { %27847 = vmatpush3.bf16.msra.mxu1 %v32535_v35  ;;  %27707 = vmatprep.subr.bf16.mxu0 %v37671_v11  ;;  %37885 = vst [vmem:[#allocation42_spill] sm:$0xff] %v33349_v61 }
 0x1a1   :  { %27848 = vmatprep.subr.bf16.mxu1 %v37671_v11 }
 0x1a3   :  { %27709 = vmatpush3.bf16.msra.mxu0 %v32883_v31  ;;  %22197 = vmatmul.mubr.f32.vlgmr.msra.gmra.mrb[2].mxu1 %v33015_v38  ;;  %v37887_v38 = vand.u32 4294901760, %v33037_v14  ;;  %v37895_v14 = vand.u32 4294901760, %v33101_v52  ;;  %v37899_v52 = vand.u32 4294901760, %v33130_v13  ;;  %v37907_v13 = vld [vmem:[#allocation66_spill] sm:$0xff] }
 0x1a4   :  { %27850 = vmatpush3.bf16.msra.mxu1 %v37733_v29  ;;  %27710 = vmatprep.subr.bf16.mxu0 %v37671_v11 }
 0x1a5   :  { %27851 = vmatprep.subr.bf16.mxu1 %v37671_v11  ;;  %22231 = vmatprep.mubr.msk.f32.mxu1 %vm31836_vm0, %v37732_v44  ;;  %v33361_v8 = vpack.c.bf16 %v37888_v46, %v37887_v38  ;;  %v33381_v21 = vpack.c.bf16 %v37896_v7, %v37895_v14  ;;  %v33397_v38 = vpack.c.bf16 %v37900_v51, %v37899_v52  ;;  %v37902_v46 = vld [vmem:[#allocation32_spill] sm:$0xff]  ;;  %v37905_v14 = vand.u32 4294901760, %v33161_v57  ;;  %v33480_v57 = vpop.permute.xlu1 %3977 }
 0x1a6   :  { %vm3979_vm5 = vcmp.eq.s32.totalorder %v33480_v57, %v32537_v36  ;;  %v37912_v51 = vld [vmem:[#allocation8_spill] sm:$0xff] }
 0x1a7   :  { %27712 = vmatpush3.bf16.msra.mxu0 %v32905_v28  ;;  %37889 = vst [vmem:[#allocation13_spill] sm:$0xff] %v33361_v8  ;;  %37897 = vst [vmem:[#allocation15_spill] sm:$0xff] %v33381_v21  ;;  %v18524_v52 = vsel %vm3979_vm5, 1.0, %v37732_v44 }
 0x1a8   :  { %27853 = vmatpush3.bf16.msra.mxu1 %v37735_v1  ;;  %27713 = vmatprep.subr.bf16.mxu0 %v37671_v11  ;;  %37901 = vst [vmem:[#allocation17_spill] sm:$0xff] %v33397_v38 }
 0x1a9   :  { %27854 = vmatprep.subr.bf16.mxu1 %v37671_v11 }
 0x1ab   :  { %27715 = vmatpush3.bf16.msra.mxu0 %v37865_v49 }
 0x1ac   :  { %27856 = vmatpush3.bf16.msra.mxu1 %v37866_v26  ;;  %27716 = vmatprep.subr.bf16.mxu0 %v37671_v11 }
 0x1ad   :  { %27857 = vmatprep.subr.bf16.mxu1 %v37671_v11 }
 0x1af   :  { %27718 = vmatpush3.bf16.msra.mxu0 %v37867_v17 }
 0x1b0   :  { %27859 = vmatpush3.bf16.msra.mxu1 %v37868_v43  ;;  %27719 = vmatprep.subr.bf16.mxu0 %v37671_v11 }
 0x1b1   :  { %27860 = vmatprep.subr.bf16.mxu1 %v37671_v11 }
 0x1b3   :  { %27721 = vmatpush3.bf16.msra.mxu0 %v37869_v16 }
 0x1b4   :  { %27862 = vmatpush3.bf16.msra.mxu1 %v37870_v33  ;;  %27722 = vmatprep.subr.bf16.mxu0 %v37671_v11 }
 0x1b5   :  { %27863 = vmatprep.subr.bf16.mxu1 %v37671_v11 }
 0x1b7   :  { %27724 = vmatpush3.bf16.msra.mxu0 %v37871_v63 }
 0x1b8   :  { %27865 = vmatpush3.bf16.msra.mxu1 %v37872_v30  ;;  %27725 = vmatprep.subr.bf16.mxu0 %v37671_v11 }
 0x1b9   :  { %27866 = vmatprep.subr.bf16.mxu1 %v37671_v11 }
 0x1bb   :  { %27727 = vmatpush3.bf16.msra.mxu0 %v37873_v53 }
 0x1bc   :  { %27868 = vmatpush3.bf16.msra.mxu1 %v37877_v45  ;;  %27728 = vmatprep.subr.bf16.mxu0 %v37671_v11 }
 0x1bd   :  { %27869 = vmatprep.subr.bf16.mxu1 %v37671_v11 }
 0x1be   :  { %22022 = vmatmul.mubr.f32.vlgmr.msra.gmra.mrb[0].mxu0 %v37878_v37  ;;  %v37891_v37 = vand.u32 4294901760, %v33070_v18  ;;  %v33389_v18 = vld [vmem:[%s37094_s1] sm:$0xff] }
 0x1bf   :  { %27730 = vmatpush3.bf16.msra.mxu0 %v33323_v9  ;;  %22056 = vmatprep.mubr.msk.f32.mxu0 %vm31836_vm0, %v37732_v44  ;;  %v37916_v9 = vld [vmem:[#allocation16_spill] sm:$0xff] }
 0x1c0   :  { %27871 = vmatpush3.bf16.msra.mxu1 %v37755_v41  ;;  %27731 = vmatprep.subr.bf16.mxu0 %v37671_v11  ;;  %v33371_v2 = vpack.c.bf16 %v37892_v4, %v37891_v37  ;;  %v37903_v37 = vmov 2   ;;  %v37904_v4 = vand.u32 4294901760, %v33156_v22  ;;  %v37909_v22 = vld [vmem:[#allocation37_spill] sm:$0xff] }
 0x1c1   :  { %27872 = vmatprep.subr.bf16.mxu1 %v37671_v11  ;;  %3971 = vperm.xlu1 %31729, %v33389_v18  }
 0x1c2   :  { %37893 = vst [vmem:[#allocation43_spill] sm:$0xff] %v33371_v2  ;;  %v33408_v7 = vpack.c.bf16 %v37905_v14, %v37904_v4  ;;  %v37913_v4 = vld [vmem:[#allocation10_spill] sm:$0xff]  ;;  %v18511_v14 = vsel %vm2031_vm6, 1.0, %v37732_v44 }
 0x1c3   :  { %27733 = vmatpush3.bf16.msra.mxu0 %v33335_v25  ;;  %22232 = vmatmul.mubr.f32.vlgmr.msra.gmra.mrb[2].mxu1 %v37882_v48  ;;  %v37894_v48 = vld [vmem:[#allocation72_spill] sm:$0xff]  ;;  %v37915_v25 = vld [vmem:[#allocation14_spill] sm:$0xff] }
 0x1c4   :  { %27874 = vmatpush3.bf16.msra.mxu1 %v37886_v12  ;;  %27734 = vmatprep.subr.bf16.mxu0 %v37671_v11  ;;  %37906 = vst [vmem:[#allocation88_spill] sm:$0xff] %v33408_v7 }
 0x1c5   :  { %27875 = vmatprep.subr.bf16.mxu1 %v37671_v11  ;;  %22266 = vmatprep.mubr.msk.f32.mxu1 %vm31836_vm0, %v37732_v44 }
 0x1c6   :  { %31730 = vset.pattern.permute.xlu1 %v37903_v37  ;;  %v33502_v37 = vsub.f32 %v18524_v52, %v18524_v52  ;;  %v37914_v52 = vld [vmem:[#allocation12_spill] sm:$0xff] }
 0x1c7   :  { %27736 = vmatpush3.bf16.msra.mxu0 %v33349_v61  ;;  %3323 = vperm.xlu1 %31730, %v33389_v18  }
 0x1c8   :  { %27877 = vmatpush3.bf16.msra.mxu1 %v37890_v23  ;;  %27737 = vmatprep.subr.bf16.mxu0 %v37671_v11 }
 0x1c9   :  { %27878 = vmatprep.subr.bf16.mxu1 %v37671_v11 }
 0x1cb   :  { %27739 = vmatpush3.bf16.msra.mxu0 %v33361_v8 }
 0x1cc   :  { %27880 = vmatpush3.bf16.msra.mxu1 %v37894_v48  ;;  %27740 = vmatprep.subr.bf16.mxu0 %v37671_v11 }
 0x1cd   :  { %27881 = vmatprep.subr.bf16.mxu1 %v37671_v11 }
 0x1cf   :  { %27742 = vmatpush3.bf16.msra.mxu0 %v33371_v2 }
 0x1d0   :  { %27883 = vmatpush3.bf16.msra.mxu1 %v37898_v6  ;;  %27743 = vmatprep.subr.bf16.mxu0 %v37671_v11 }
 0x1d1   :  { %27884 = vmatprep.subr.bf16.mxu1 %v37671_v11 }
 0x1d3   :  { %27745 = vmatpush3.bf16.msra.mxu0 %v33381_v21 }
 0x1d4   :  { %27886 = vmatpush3.bf16.msra.mxu1 %v37902_v46  ;;  %27746 = vmatprep.subr.bf16.mxu0 %v37671_v11 }
 0x1d5   :  { %27887 = vmatprep.subr.bf16.mxu1 %v37671_v11 }
 0x1d7   :  { %27748 = vmatpush3.bf16.msra.mxu0 %v33397_v38  ;;  %v33514_v38 = vsub.f32 %v18511_v14, %v18511_v14 }
 0x1d8   :  { %27889 = vmatpush3.bf16.msra.mxu1 %v37907_v13  ;;  %27749 = vmatprep.subr.bf16.mxu0 %v37671_v11 }
 0x1d9   :  { %27890 = vmatprep.subr.bf16.mxu1 %v37671_v11  ;;  %v37357_v8 = vand.u32 4294901760, %v33514_v38 }
 0x1db   :  { %27751 = vmatpush3.bf16.msra.mxu0 %v33408_v7  ;;  %v37354_v7 = vand.u32 4294901760, %v33502_v37 }
 0x1dc   :  { %27892 = vmatpush3.bf16.msra.mxu1 %v37908_v32  ;;  %27752 = vmatprep.subr.bf16.mxu0 %v37671_v11 }
 0x1dd   :  { %27893 = vmatprep.subr.bf16.mxu1 %v37671_v11  ;;  %v4066_v21 = vsub.f32 %v33502_v37, %v37354_v7  ;;  %v2765_v7 = vsub.f32 %v33514_v38, %v37357_v8  ;;  %v37918_v8 = vld [vmem:[#allocation23_spill] sm:$0xff] }
 0x1de   :  { %22057 = vmatmul.mubr.msk.f32.vlgmr.msra.gmra.mrb[0].mxu0 %vm1382_vm3, %v37814_v19 }
 0x1df   :  { %27754 = vmatpush3.bf16.msra.mxu0 %v32865_v39  ;;  %22091 = vmatprep.mubr.msk.f32.mxu0 %vm31836_vm0, %v37732_v44  ;;  %v4067_v14 = vand.u32 4294901760, %v4066_v21  ;;  %v37917_v21 = vld [vmem:[#allocation19_spill] sm:$0xff] }
 0x1e0   :  { %27895 = vmatpush3.bf16.msra.mxu1 %v37909_v22  ;;  %27755 = vmatprep.subr.bf16.mxu0 %v37671_v11 }
 0x1e1   :  { %27896 = vmatprep.subr.bf16.mxu1 %v37671_v11 }
 0x1e3   :  { %27757 = vmatpush3.bf16.msra.mxu0 %v32883_v31  ;;  %22267 = vmatmul.mubr.msk.f32.vlgmr.msra.gmra.mrb[2].mxu1 %vm2037_vm4, %v37814_v19 }
 0x1e4   :  { %27898 = vmatpush3.bf16.msra.mxu1 %v37733_v29  ;;  %27758 = vmatprep.subr.bf16.mxu0 %v37671_v11 }
 0x1e5   :  { %27899 = vmatprep.subr.bf16.mxu1 %v37671_v11  ;;  %22301 = vmatprep.mubr.msk.f32.mxu1 %vm31836_vm0, %v37732_v44 }
 0x1e7   :  { %27760 = vmatpush3.bf16.msra.mxu0 %v32905_v28 }
 0x1e8   :  { %27901 = vmatpush3.bf16.msra.mxu1 %v37735_v1  ;;  %27761 = vmatprep.subr.bf16.mxu0 %v37671_v11 }
 0x1e9   :  { %27902 = vmatprep.subr.bf16.mxu1 %v37671_v11 }
 0x1eb   :  { %27763 = vmatpush3.bf16.msra.mxu0 %v37865_v49 }
 0x1ec   :  { %27904 = vmatpush3.bf16.msra.mxu1 %v37866_v26  ;;  %27764 = vmatprep.subr.bf16.mxu0 %v37671_v11 }
 0x1ed   :  { %27905 = vmatprep.subr.bf16.mxu1 %v37671_v11 }
 0x1ef   :  { %27766 = vmatpush3.bf16.msra.mxu0 %v37867_v17 }
 0x1f0   :  { %27907 = vmatpush3.bf16.msra.mxu1 %v37868_v43  ;;  %27767 = vmatprep.subr.bf16.mxu0 %v37671_v11 }
 0x1f1   :  { %27908 = vmatprep.subr.bf16.mxu1 %v37671_v11 }
 0x1f3   :  { %27769 = vmatpush3.bf16.msra.mxu0 %v37869_v16 }
 0x1f4   :  { %27910 = vmatpush3.bf16.msra.mxu1 %v37870_v33  ;;  %27770 = vmatprep.subr.bf16.mxu0 %v37671_v11 }
 0x1f5   :  { %27911 = vmatprep.subr.bf16.mxu1 %v37671_v11 }
 0x1f7   :  { %27772 = vmatpush3.bf16.msra.mxu0 %v37871_v63 }
 0x1f8   :  { %27913 = vmatpush3.bf16.msra.mxu1 %v37872_v30  ;;  %27773 = vmatprep.subr.bf16.mxu0 %v37671_v11 }
 0x1f9   :  { %27914 = vmatprep.subr.bf16.mxu1 %v37671_v11 }
 0x1fb   :  { %27775 = vmatpush3.bf16.msra.mxu0 %v37873_v53 }
 0x1fc   :  { %27916 = vmatpush3.bf16.msra.mxu1 %v37877_v45  ;;  %28208 = vmatprep.subr.bf16.mxu0 %v37671_v11 }
 0x1fd   :  { %27917 = vmatprep.subr.bf16.mxu1 %v37671_v11 }
 0x1fe   :  { %22092 = vmatmul.mubr.msk.f32.vlgmr.msra.gmra.mrb[0].mxu0 %vm1382_vm3, %v37814_v19 }
 0x1ff   :  { %28210 = vmatpush3.bf16.msra.mxu0 %v37733_v29  ;;  %22756 = vmatprep.mubr.msk.f32.mxu0 %vm31836_vm0, %v37732_v44 }
 0x200   :  { %27919 = vmatpush3.bf16.msra.mxu1 %v37755_v41  ;;  %28211 = vmatprep.subr.bf16.mxu0 %v37671_v11 }
 0x201   :  { %27920 = vmatprep.subr.bf16.mxu1 %v37671_v11 }
 0x203   :  { %28213 = vmatpush3.bf16.msra.mxu0 %v37735_v1  ;;  %22302 = vmatmul.mubr.msk.f32.vlgmr.msra.gmra.mrb[2].mxu1 %vm2037_vm4, %v37814_v19 }
 0x204   :  { %27922 = vmatpush3.bf16.msra.mxu1 %v37910_v56  ;;  %28214 = vmatprep.subr.bf16.mxu0 %v37671_v11 }
 0x205   :  { %27923 = vmatprep.subr.bf16.mxu1 %v37671_v11  ;;  %22336 = vmatprep.mubr.msk.f32.mxu1 %vm31836_vm0, %v37732_v44 }
 0x207   :  { %28216 = vmatpush3.bf16.msra.mxu0 %v37866_v26 }
 0x208   :  { %27925 = vmatpush3.bf16.msra.mxu1 %v37911_v58  ;;  %28217 = vmatprep.subr.bf16.mxu0 %v37671_v11 }
 0x209   :  { %27926 = vmatprep.subr.bf16.mxu1 %v37671_v11 }
 0x20b   :  { %28219 = vmatpush3.bf16.msra.mxu0 %v37868_v43 }
 0x20c   :  { %27928 = vmatpush3.bf16.msra.mxu1 %v37912_v51  ;;  %28220 = vmatprep.subr.bf16.mxu0 %v37671_v11 }
 0x20d   :  { %27929 = vmatprep.subr.bf16.mxu1 %v37671_v11 }
 0x20f   :  { %28222 = vmatpush3.bf16.msra.mxu0 %v37870_v33 }
 0x210   :  { %27931 = vmatpush3.bf16.msra.mxu1 %v37913_v4  ;;  %28223 = vmatprep.subr.bf16.mxu0 %v37671_v11 }
 0x211   :  { %27932 = vmatprep.subr.bf16.mxu1 %v37671_v11 }
 0x213   :  { %28225 = vmatpush3.bf16.msra.mxu0 %v37872_v30 }
 0x214   :  { %27934 = vmatpush3.bf16.msra.mxu1 %v37914_v52  ;;  %28226 = vmatprep.subr.bf16.mxu0 %v37671_v11 }
 0x215   :  { %27935 = vmatprep.subr.bf16.mxu1 %v37671_v11 }
 0x216   :  { %v33522_v2 = vpop.f32.mrb[0].mxu1 }
 0x217   :  { %28228 = vmatpush3.bf16.msra.mxu0 %v37877_v45  ;;  %v21673_v61 = vpop.f32.mrb[1].mxu1 }
 0x218   :  { %27937 = vmatpush3.bf16.msra.mxu1 %v37915_v25  ;;  %28229 = vmatprep.subr.bf16.mxu0 %v37671_v11  ;;  %v2766_v61 = vand.u32 4294901760, %v2765_v7  ;;  %v37919_v7 = vld [vmem:[#allocation24_spill] sm:$0xff] }
 0x219   :  { %27938 = vmatprep.subr.bf16.mxu1 %v37671_v11 }
 0x21b   :  { %28231 = vmatpush3.bf16.msra.mxu0 %v37755_v41 }
 0x21c   :  { %27940 = vmatpush3.bf16.msra.mxu1 %v37916_v9  ;;  %28232 = vmatprep.subr.bf16.mxu0 %v37671_v11 }
 0x21d   :  { %27941 = vmatprep.subr.bf16.mxu1 %v37671_v11 }
 0x21e   :  { %22757 = vmatmul.mubr.f32.vlgmr.msra.gmra.mrb[2].mxu0 %v4067_v14  ;;  %v37920_v14 = vld [vmem:[#allocation26_spill] sm:$0xff] }
 0x21f   :  { %28234 = vmatpush3.bf16.msra.mxu0 %v32217_v3  ;;  %22791 = vmatprep.mubr.msk.f32.mxu0 %vm31836_vm0, %v37732_v44 }
 0x220   :  { %27943 = vmatpush3.bf16.msra.mxu1 %v37917_v21  ;;  %28235 = vmatprep.subr.bf16.mxu0 %v37671_v11 }
 0x221   :  { %27944 = vmatprep.subr.bf16.mxu1 %v37671_v11 }
 0x223   :  { %28237 = vmatpush3.bf16.msra.mxu0 %v32291_v54  ;;  %22337 = vmatmul.mubr.f32.vlgmr.msra.gmra.mrb[2].mxu1 %v2766_v61  ;;  %v37921_v61 = vld [vmem:[#allocation28_spill] sm:$0xff]  ;;  %v37936_v54 = vld [vmem:[#allocation7_spill] sm:$0xff] }
 0x224   :  { %27946 = vmatpush3.bf16.msra.mxu1 %v37918_v8  ;;  %28238 = vmatprep.subr.bf16.mxu0 %v37671_v11 }
 0x225   :  { %27947 = vmatprep.subr.bf16.mxu1 %v37671_v11  ;;  %22371 = vmatprep.mubr.msk.f32.mxu1 %vm31836_vm0, %v37732_v44 }
 0x227   :  { %28240 = vmatpush3.bf16.msra.mxu0 %v32306_v10  ;;  %v37922_v10 = vld [vmem:[#allocation35_spill] sm:$0xff] }
 0x228   :  { %27949 = vmatpush3.bf16.msra.mxu1 %v37919_v7  ;;  %28241 = vmatprep.subr.bf16.mxu0 %v37671_v11 }
 0x229   :  { %27950 = vmatprep.subr.bf16.mxu1 %v37671_v11 }
 0x22b   :  { %28243 = vmatpush3.bf16.msra.mxu0 %v32377_v42  ;;  %v37923_v42 = vld [vmem:[#allocation39_spill] sm:$0xff] }
 0x22c   :  { %27952 = vmatpush3.bf16.msra.mxu1 %v37920_v14  ;;  %28244 = vmatprep.subr.bf16.mxu0 %v37671_v11 }
 0x22d   :  { %27953 = vmatprep.subr.bf16.mxu1 %v37671_v11 }
 0x22f   :  { %28246 = vmatpush3.bf16.msra.mxu0 %v32390_v62  ;;  %v37924_v62 = vld [vmem:[#allocation46_spill] sm:$0xff] }
 0x230   :  { %27955 = vmatpush3.bf16.msra.mxu1 %v37921_v61  ;;  %28247 = vmatprep.subr.bf16.mxu0 %v37671_v11 }
 0x231   :  { %27956 = vmatprep.subr.bf16.mxu1 %v37671_v11 }
 0x233   :  { %28249 = vmatpush3.bf16.msra.mxu0 %v32456_v24  ;;  %v37929_v24 = vld [vmem:[#allocation58_spill] sm:$0xff] }
 0x234   :  { %27958 = vmatpush3.bf16.msra.mxu1 %v37922_v10  ;;  %28250 = vmatprep.subr.bf16.mxu0 %v37671_v11 }
 0x235   :  { %27959 = vmatprep.subr.bf16.mxu1 %v37671_v11 }
 0x237   :  { %28252 = vmatpush3.bf16.msra.mxu0 %v32468_v34  ;;  %v37925_v34 = vld [vmem:[#allocation52_spill] sm:$0xff] }
 0x238   :  { %27961 = vmatpush3.bf16.msra.mxu1 %v37923_v42  ;;  %28253 = vmatprep.subr.bf16.mxu0 %v37671_v11 }
 0x239   :  { %27962 = vmatprep.subr.bf16.mxu1 %v37671_v11 }
 0x23b   :  { %28255 = vmatpush3.bf16.msra.mxu0 %v32481_v0  ;;  %v37926_v0 = vld [vmem:[#allocation47_spill] sm:$0xff] }
 0x23c   :  { %27964 = vmatpush3.bf16.msra.mxu1 %v37924_v62  ;;  %28256 = vmatprep.subr.bf16.mxu0 %v37671_v11 }
 0x23d   :  { %27965 = vmatprep.subr.bf16.mxu1 %v37671_v11 }
 0x23e   :  { %22792 = vmatmul.mubr.msk.f32.vlgmr.msra.gmra.mrb[2].mxu0 %vm3979_vm5, %v37814_v19 }
 0x23f   :  { %28258 = vmatpush3.bf16.msra.mxu0 %v32466_v47  ;;  %22826 = vmatprep.mubr.msk.f32.mxu0 %vm31836_vm0, %v37732_v44  ;;  %v37927_v47 = vld [vmem:[#allocation50_spill] sm:$0xff] }
 0x240   :  { %27967 = vmatpush3.bf16.msra.mxu1 %v37925_v34  ;;  %28259 = vmatprep.subr.bf16.mxu0 %v37671_v11  ;;  %v33758_v57 = vpop.permute.xlu1 %3971 }
 0x241   :  { %27968 = vmatprep.subr.bf16.mxu1 %v37671_v11  ;;  %vm3973_vm7 = vcmp.eq.s32.totalorder %v33758_v57, %v32537_v36  ;;  %v31846_v57 = vmov 9  }
 0x243   :  { %28261 = vmatpush3.bf16.msra.mxu0 %v32479_v50  ;;  %22372 = vmatmul.mubr.msk.f32.vlgmr.msra.gmra.mrb[2].mxu1 %vm2031_vm6, %v37814_v19  ;;  %v37928_v50 = vld [vmem:[#allocation55_spill] sm:$0xff] }
 0x244   :  { %27970 = vmatpush3.bf16.msra.mxu1 %v37926_v0  ;;  %28262 = vmatprep.subr.bf16.mxu0 %v37671_v11 }
 0x245   :  { %27971 = vmatprep.subr.bf16.mxu1 %v37671_v11  ;;  %22406 = vmatprep.mubr.msk.f32.mxu1 %vm31836_vm0, %v37732_v44 }
 0x246   :  { %v33768_v60 = vpop.permute.xlu1 %3323 }
 0x247   :  { %28264 = vmatpush3.bf16.msra.mxu0 %v32489_v15  ;;  %v37930_v15 = vld [vmem:[#allocation60_spill] sm:$0xff]  ;;  %vm3325_vm8 = vcmp.eq.s32.totalorder %v33768_v60, %v32537_v36 }
 0x248   :  { %27973 = vmatpush3.bf16.msra.mxu1 %v37927_v47  ;;  %28265 = vmatprep.subr.bf16.mxu0 %v37671_v11  ;;  %v34045_v60 = vld [vmem:[%s37094_s1] sm:$0xff] }
 0x249   :  { %27974 = vmatprep.subr.bf16.mxu1 %v37671_v11 }
 0x24b   :  { %28267 = vmatpush3.bf16.msra.mxu0 %v32497_v27  ;;  %v37931_v27 = vld [vmem:[#allocation62_spill] sm:$0xff] }
 0x24c   :  { %27976 = vmatpush3.bf16.msra.mxu1 %v37928_v50  ;;  %28268 = vmatprep.subr.bf16.mxu0 %v37671_v11 }
 0x24d   :  { %27977 = vmatprep.subr.bf16.mxu1 %v37671_v11 }
 0x24f   :  { %28270 = vmatpush3.bf16.msra.mxu0 %v32507_v40  ;;  %v37932_v40 = vld [vmem:[#allocation64_spill] sm:$0xff] }
 0x250   :  { %27979 = vmatpush3.bf16.msra.mxu1 %v37929_v24  ;;  %28271 = vmatprep.subr.bf16.mxu0 %v37671_v11 }
 0x251   :  { %27980 = vmatprep.subr.bf16.mxu1 %v37671_v11 }
 0x253   :  { %28273 = vmatpush3.bf16.msra.mxu0 %v32515_v55  ;;  %v37935_v55 = vand.u32 4294901760, %v33514_v38 }
 0x254   :  { %27982 = vmatpush3.bf16.msra.mxu1 %v37930_v15  ;;  %28274 = vmatprep.subr.bf16.mxu0 %v37671_v11 }
 0x255   :  { %27983 = vmatprep.subr.bf16.mxu1 %v37671_v11 }
 0x257   :  { %28276 = vmatpush3.bf16.msra.mxu0 %v32531_v5  ;;  %v37933_v5 = vld [vmem:[#allocation67_spill] sm:$0xff] }
 0x258   :  { %27985 = vmatpush3.bf16.msra.mxu1 %v37931_v27  ;;  %28277 = vmatprep.subr.bf16.mxu0 %v37671_v11 }
 0x259   :  { %27986 = vmatprep.subr.bf16.mxu1 %v37671_v11 }
 0x25b   :  { %28279 = vmatpush3.bf16.msra.mxu0 %v32535_v35  ;;  %v37934_v35 = vand.u32 4294901760, %v33502_v37 }
 0x25c   :  { %27988 = vmatpush3.bf16.msra.mxu1 %v37932_v40  ;;  %28280 = vmatprep.subr.bf16.mxu0 %v37671_v11 }
 0x25d   :  { %27989 = vmatprep.subr.bf16.mxu1 %v37671_v11 }
 0x25e   :  { %22827 = vmatmul.mubr.f32.vlgmr.msra.gmra.mrb[2].mxu0 %v33502_v37  ;;  %v31842_v37 = vmov 5  }
 0x25f   :  { %28282 = vmatpush3.bf16.msra.mxu0 %v37733_v29  ;;  %22861 = vmatprep.mubr.msk.f32.mxu0 %vm31836_vm0, %v37732_v44 }
 0x260   :  { %27991 = vmatpush3.bf16.msra.mxu1 %v37933_v5  ;;  %28283 = vmatprep.subr.bf16.mxu0 %v37671_v11 }
 0x261   :  { %27992 = vmatprep.subr.bf16.mxu1 %v37671_v11  ;;  %31731 = vset.pattern.permute.xlu0 %v31842_v37  ;;  %v37942_v37 = vld [vmem:[#allocation33_spill] sm:$0xff] }
 0x262   :  { %5265 = vperm.xlu0 %31731, %v33389_v18  }
 0x263   :  { %28285 = vmatpush3.bf16.msra.mxu0 %v37735_v1  ;;  %22407 = vmatmul.mubr.f32.vlgmr.msra.gmra.mrb[2].mxu1 %v33514_v38  ;;  %v37939_v38 = vld [vmem:[#allocation71_spill] sm:$0xff] }
 0x264   :  { %27994 = vmatpush3.bf16.msra.mxu1 %v37910_v56  ;;  %28286 = vmatprep.subr.bf16.mxu0 %v37671_v11 }
 0x265   :  { %27995 = vmatprep.subr.bf16.mxu1 %v37671_v11  ;;  %22441 = vmatprep.mubr.msk.f32.mxu1 %vm31836_vm0, %v37732_v44 }
 0x267   :  { %28288 = vmatpush3.bf16.msra.mxu0 %v37866_v26 }
 0x268   :  { %27997 = vmatpush3.bf16.msra.mxu1 %v37911_v58  ;;  %28289 = vmatprep.subr.bf16.mxu0 %v37671_v11 }
 0x269   :  { %27998 = vmatprep.subr.bf16.mxu1 %v37671_v11 }
 0x26b   :  { %28291 = vmatpush3.bf16.msra.mxu0 %v37868_v43 }
 0x26c   :  { %28000 = vmatpush3.bf16.msra.mxu1 %v37912_v51  ;;  %28292 = vmatprep.subr.bf16.mxu0 %v37671_v11 }
 0x26d   :  { %28001 = vmatprep.subr.bf16.mxu1 %v37671_v11 }
 0x26f   :  { %28294 = vmatpush3.bf16.msra.mxu0 %v37870_v33 }
 0x270   :  { %28003 = vmatpush3.bf16.msra.mxu1 %v37913_v4  ;;  %28295 = vmatprep.subr.bf16.mxu0 %v37671_v11 }
 0x271   :  { %28004 = vmatprep.subr.bf16.mxu1 %v37671_v11 }
 0x273   :  { %28297 = vmatpush3.bf16.msra.mxu0 %v37872_v30 }
 0x274   :  { %28006 = vmatpush3.bf16.msra.mxu1 %v37914_v52  ;;  %28298 = vmatprep.subr.bf16.mxu0 %v37671_v11 }
 0x275   :  { %28007 = vmatprep.subr.bf16.mxu1 %v37671_v11 }
 0x277   :  { %28300 = vmatpush3.bf16.msra.mxu0 %v37877_v45 }
 0x278   :  { %28009 = vmatpush3.bf16.msra.mxu1 %v37915_v25  ;;  %28301 = vmatprep.subr.bf16.mxu0 %v37671_v11 }
 0x279   :  { %28010 = vmatprep.subr.bf16.mxu1 %v37671_v11 }
 0x27b   :  { %28303 = vmatpush3.bf16.msra.mxu0 %v37755_v41 }
 0x27c   :  { %28012 = vmatpush3.bf16.msra.mxu1 %v37916_v9  ;;  %28304 = vmatprep.subr.bf16.mxu0 %v37671_v11 }
 0x27d   :  { %28013 = vmatprep.subr.bf16.mxu1 %v37671_v11 }
 0x27e   :  { %22862 = vmatmul.mubr.f32.vlgmr.msra.gmra.mrb[2].mxu0 %v37934_v35  ;;  %v37937_v35 = vld [vmem:[#allocation9_spill] sm:$0xff] }
 0x27f   :  { %28306 = vmatpush3.bf16.msra.mxu0 %v37886_v12  ;;  %22896 = vmatprep.mubr.msk.f32.mxu0 %vm31836_vm0, %v37732_v44 }
 0x280   :  { %28015 = vmatpush3.bf16.msra.mxu1 %v37917_v21  ;;  %28307 = vmatprep.subr.bf16.mxu0 %v37671_v11 }
 0x281   :  { %28016 = vmatprep.subr.bf16.mxu1 %v37671_v11 }
 0x283   :  { %28309 = vmatpush3.bf16.msra.mxu0 %v37890_v23  ;;  %22442 = vmatmul.mubr.f32.vlgmr.msra.gmra.mrb[2].mxu1 %v37935_v55  ;;  %v37938_v55 = vld [vmem:[#allocation20_spill] sm:$0xff] }
 0x284   :  { %28018 = vmatpush3.bf16.msra.mxu1 %v37936_v54  ;;  %28310 = vmatprep.subr.bf16.mxu0 %v37671_v11 }
 0x285   :  { %28019 = vmatprep.subr.bf16.mxu1 %v37671_v11  ;;  %22476 = vmatprep.mubr.msk.f32.mxu1 %vm31836_vm0, %v37732_v44 }
 0x287   :  { %28312 = vmatpush3.bf16.msra.mxu0 %v37894_v48  ;;  %v31843_v48 = vmov 7  }
 0x288   :  { %28021 = vmatpush3.bf16.msra.mxu1 %v37937_v35  ;;  %28313 = vmatprep.subr.bf16.mxu0 %v37671_v11 }
 0x289   :  { %28022 = vmatprep.subr.bf16.mxu1 %v37671_v11  ;;  %31732 = vset.pattern.permute.xlu1 %v31843_v48  ;;  %v37943_v48 = vld [vmem:[#allocation34_spill] sm:$0xff] }
 0x28a   :  { %5919 = vperm.xlu1 %31732, %v33389_v18  }
 0x28b   :  { %28315 = vmatpush3.bf16.msra.mxu0 %v37898_v6  ;;  %v37940_v6 = vld [vmem:[#allocation73_spill] sm:$0xff] }
 0x28c   :  { %28024 = vmatpush3.bf16.msra.mxu1 %v37938_v55  ;;  %28316 = vmatprep.subr.bf16.mxu0 %v37671_v11 }
 0x28d   :  { %28025 = vmatprep.subr.bf16.mxu1 %v37671_v11 }
 0x28f   :  { %28318 = vmatpush3.bf16.msra.mxu0 %v37902_v46  ;;  %v37941_v46 = vld [vmem:[#allocation31_spill] sm:$0xff] }
 0x290   :  { %28027 = vmatpush3.bf16.msra.mxu1 %v37939_v38  ;;  %28319 = vmatprep.subr.bf16.mxu0 %v37671_v11 }
 0x291   :  { %28028 = vmatprep.subr.bf16.mxu1 %v37671_v11 }
 0x293   :  { %28321 = vmatpush3.bf16.msra.mxu0 %v37907_v13  ;;  %v18519_v13 = vsel %vm3325_vm8, 1.0, %v37732_v44 }
 0x294   :  { %28030 = vmatpush3.bf16.msra.mxu1 %v37940_v6  ;;  %28322 = vmatprep.subr.bf16.mxu0 %v37671_v11 }
 0x295   :  { %28031 = vmatprep.subr.bf16.mxu1 %v37671_v11 }
 0x297   :  { %28324 = vmatpush3.bf16.msra.mxu0 %v37908_v32 }
 0x298   :  { %28033 = vmatpush3.bf16.msra.mxu1 %v37941_v46  ;;  %28325 = vmatprep.subr.bf16.mxu0 %v37671_v11 }
 0x299   :  { %28034 = vmatprep.subr.bf16.mxu1 %v37671_v11 }
 0x29b   :  { %28327 = vmatpush3.bf16.msra.mxu0 %v37909_v22  ;;  %v18523_v22 = vsel %vm3973_vm7, 1.0, %v37732_v44 }
 0x29c   :  { %28036 = vmatpush3.bf16.msra.mxu1 %v37942_v37  ;;  %28328 = vmatprep.subr.bf16.mxu0 %v37671_v11  ;;  %v33780_v32 = vsub.f32 %v18523_v22, %v18523_v22 }
 0x29d   :  { %28037 = vmatprep.subr.bf16.mxu1 %v37671_v11 }
 0x29e   :  { %22897 = vmatmul.mubr.msk.f32.vlgmr.msra.gmra.mrb[2].mxu0 %vm3979_vm5, %v37814_v19  ;;  %v37401_v22 = vand.u32 4294901760, %v33780_v32 }
 0x29f   :  { %28330 = vmatpush3.bf16.msra.mxu0 %v37733_v29  ;;  %22931 = vmatprep.mubr.msk.f32.mxu0 %vm31836_vm0, %v37732_v44 }
 0x2a0   :  { %28039 = vmatpush3.bf16.msra.mxu1 %v37943_v48  ;;  %28331 = vmatprep.subr.bf16.mxu0 %v37671_v11 }
 0x2a1   :  { %28040 = vmatprep.subr.bf16.mxu1 %v37671_v11 }
 0x2a3   :  { %28333 = vmatpush3.bf16.msra.mxu0 %v37735_v1  ;;  %22477 = vmatmul.mubr.msk.f32.vlgmr.msra.gmra.mrb[2].mxu1 %vm2031_vm6, %v37814_v19 }
 0x2a4   :  { %28042 = vmatpush3.bf16.msra.mxu1 %v37910_v56  ;;  %28334 = vmatprep.subr.bf16.mxu0 %v37671_v11 }
 0x2a5   :  { %28043 = vmatprep.subr.bf16.mxu1 %v37671_v11  ;;  %22511 = vmatprep.mubr.msk.f32.mxu1 %vm31836_vm0, %v37732_v44 }
 0x2a7   :  { %28336 = vmatpush3.bf16.msra.mxu0 %v37866_v26 }
 0x2a8   :  { %28045 = vmatpush3.bf16.msra.mxu1 %v37911_v58  ;;  %28337 = vmatprep.subr.bf16.mxu0 %v37671_v11 }
 0x2a9   :  { %28046 = vmatprep.subr.bf16.mxu1 %v37671_v11 }
 0x2ab   :  { %28339 = vmatpush3.bf16.msra.mxu0 %v37868_v43 }
 0x2ac   :  { %28048 = vmatpush3.bf16.msra.mxu1 %v37912_v51  ;;  %28340 = vmatprep.subr.bf16.mxu0 %v37671_v11 }
 0x2ad   :  { %28049 = vmatprep.subr.bf16.mxu1 %v37671_v11 }
 0x2af   :  { %28342 = vmatpush3.bf16.msra.mxu0 %v37870_v33 }
 0x2b0   :  { %28051 = vmatpush3.bf16.msra.mxu1 %v37913_v4  ;;  %28343 = vmatprep.subr.bf16.mxu0 %v37671_v11 }
 0x2b1   :  { %28052 = vmatprep.subr.bf16.mxu1 %v37671_v11 }
 0x2b3   :  { %28345 = vmatpush3.bf16.msra.mxu0 %v37872_v30 }
 0x2b4   :  { %28054 = vmatpush3.bf16.msra.mxu1 %v37914_v52  ;;  %28346 = vmatprep.subr.bf16.mxu0 %v37671_v11 }
 0x2b5   :  { %28055 = vmatprep.subr.bf16.mxu1 %v37671_v11 }
 0x2b7   :  { %28348 = vmatpush3.bf16.msra.mxu0 %v37877_v45  ;;  %v4707_v45 = vsub.f32 %v33780_v32, %v37401_v22  ;;  %v37949_v22 = vld [vmem:[#allocation79_spill] sm:$0xff] }
 0x2b8   :  { %28057 = vmatpush3.bf16.msra.mxu1 %v37915_v25  ;;  %28349 = vmatprep.subr.bf16.mxu0 %v37671_v11 }
 0x2b9   :  { %28058 = vmatprep.subr.bf16.mxu1 %v37671_v11 }
 0x2bb   :  { %28351 = vmatpush3.bf16.msra.mxu0 %v37755_v41  ;;  %v33795_v41 = vsub.f32 %v18519_v13, %v18519_v13 }
 0x2bc   :  { %28060 = vmatpush3.bf16.msra.mxu1 %v37916_v9  ;;  %28352 = vmatprep.subr.bf16.mxu0 %v37671_v11 }
 0x2bd   :  { %28061 = vmatprep.subr.bf16.mxu1 %v37671_v11 }
 0x2be   :  { %22932 = vmatmul.mubr.msk.f32.vlgmr.msra.gmra.mrb[2].mxu0 %vm3979_vm5, %v37814_v19 }
 0x2bf   :  { %28354 = vmatpush3.bf16.msra.mxu0 %v37910_v56  ;;  %22966 = vmatprep.mubr.msk.f32.mxu0 %vm31836_vm0, %v37732_v44 }
 0x2c0   :  { %28063 = vmatpush3.bf16.msra.mxu1 %v37917_v21  ;;  %28355 = vmatprep.subr.bf16.mxu0 %v37671_v11 }
 0x2c1   :  { %28064 = vmatprep.subr.bf16.mxu1 %v37671_v11 }
 0x2c3   :  { %28357 = vmatpush3.bf16.msra.mxu0 %v37911_v58  ;;  %22512 = vmatmul.mubr.msk.f32.vlgmr.msra.gmra.mrb[2].mxu1 %vm2031_vm6, %v37814_v19 }
 0x2c4   :  { %28066 = vmatpush3.bf16.msra.mxu1 %v32865_v39  ;;  %28358 = vmatprep.subr.bf16.mxu0 %v37671_v11 }
 0x2c5   :  { %28067 = vmatprep.subr.bf16.mxu1 %v37671_v11  ;;  %22546 = vmatprep.mubr.msk.f32.mxu1 %vm31836_vm0, %v37732_v44 }
 0x2c7   :  { %28360 = vmatpush3.bf16.msra.mxu0 %v37912_v51 }
 0x2c8   :  { %28069 = vmatpush3.bf16.msra.mxu1 %v32883_v31  ;;  %28361 = vmatprep.subr.bf16.mxu0 %v37671_v11 }
 0x2c9   :  { %28070 = vmatprep.subr.bf16.mxu1 %v37671_v11 }
 0x2cb   :  { %28363 = vmatpush3.bf16.msra.mxu0 %v37913_v4 }
 0x2cc   :  { %28072 = vmatpush3.bf16.msra.mxu1 %v32905_v28  ;;  %28364 = vmatprep.subr.bf16.mxu0 %v37671_v11 }
 0x2cd   :  { %28073 = vmatprep.subr.bf16.mxu1 %v37671_v11 }
 0x2cf   :  { %28366 = vmatpush3.bf16.msra.mxu0 %v37914_v52 }
 0x2d0   :  { %28075 = vmatpush3.bf16.msra.mxu1 %v37865_v49  ;;  %28367 = vmatprep.subr.bf16.mxu0 %v37671_v11 }
 0x2d1   :  { %v2022_v23 = vpop.f32.mrb[0].mxu0  ;;  %28076 = vmatprep.subr.bf16.mxu1 %v37671_v11 }
 0x2d2   :  { %v33791_v12 = vadd.f32 %v2022_v23, %v33522_v2  ;;  %v22093_v3 = vpop.f32.mrb[1].mxu0  ;;  %v37400_v23 = vand.u32 4294901760, %v33795_v41 }
 0x2d3   :  { %28369 = vmatpush3.bf16.msra.mxu0 %v37915_v25  ;;  %v4708_v3 = vand.u32 4294901760, %v4707_v45  ;;  %v37944_v45 = vld [vmem:[#allocation74_spill] sm:$0xff] }
 0x2d4   :  { %28078 = vmatpush3.bf16.msra.mxu1 %v37867_v17  ;;  %28370 = vmatprep.subr.bf16.mxu0 %v37671_v11  ;;  %v3412_v2 = vsub.f32 %v33795_v41, %v37400_v23  ;;  %v37948_v23 = vld [vmem:[#allocation78_spill] sm:$0xff] }
 0x2d5   :  { %28079 = vmatprep.subr.bf16.mxu1 %v37671_v11 }
 0x2d6   :  { %v3413_v13 = vand.u32 4294901760, %v3412_v2  ;;  %v37946_v2 = vld [vmem:[#allocation76_spill] sm:$0xff] }
 0x2d7   :  { %28372 = vmatpush3.bf16.msra.mxu0 %v37916_v9 }
 0x2d8   :  { %28081 = vmatpush3.bf16.msra.mxu1 %v37869_v16  ;;  %28373 = vmatprep.subr.bf16.mxu0 %v37671_v11 }
 0x2d9   :  { %28082 = vmatprep.subr.bf16.mxu1 %v37671_v11 }
 0x2db   :  { %28375 = vmatpush3.bf16.msra.mxu0 %v37917_v21 }
 0x2dc   :  { %28084 = vmatpush3.bf16.msra.mxu1 %v37871_v63  ;;  %28376 = vmatprep.subr.bf16.mxu0 %v37671_v11 }
 0x2dd   :  { %28085 = vmatprep.subr.bf16.mxu1 %v37671_v11 }
 0x2de   :  { %22967 = vmatmul.mubr.f32.vlgmr.msra.gmra.mrb[2].mxu0 %v4708_v3  ;;  %v37945_v3 = vld [vmem:[#allocation75_spill] sm:$0xff] }
 0x2df   :  { %28378 = vmatpush3.bf16.msra.mxu0 %v37918_v8  ;;  %23001 = vmatprep.mubr.msk.f32.mxu0 %vm31836_vm0, %v37732_v44 }
 0x2e0   :  { %28087 = vmatpush3.bf16.msra.mxu1 %v37873_v53  ;;  %28379 = vmatprep.subr.bf16.mxu0 %v37671_v11 }
 0x2e1   :  { %28088 = vmatprep.subr.bf16.mxu1 %v37671_v11 }
 0x2e3   :  { %28381 = vmatpush3.bf16.msra.mxu0 %v37919_v7  ;;  %22547 = vmatmul.mubr.f32.vlgmr.msra.gmra.mrb[2].mxu1 %v3413_v13  ;;  %v37947_v13 = vld [vmem:[#allocation77_spill] sm:$0xff]  ;;  %v37969_v7 = vld [vmem:[#allocation22_spill] sm:$0xff] }
 0x2e4   :  { %28090 = vmatpush3.bf16.msra.mxu1 %v33065_v59  ;;  %28382 = vmatprep.subr.bf16.mxu0 %v37671_v11 }
 0x2e5   :  { %28091 = vmatprep.subr.bf16.mxu1 %v37671_v11  ;;  %22581 = vmatprep.mubr.msk.f32.mxu1 %vm31836_vm0, %v37732_v44 }
 0x2e7   :  { %28384 = vmatpush3.bf16.msra.mxu0 %v37920_v14  ;;  %v37968_v14 = vld [vmem:[#allocation21_spill] sm:$0xff] }
 0x2e8   :  { %28093 = vmatpush3.bf16.msra.mxu1 %v33109_v20  ;;  %28385 = vmatprep.subr.bf16.mxu0 %v37671_v11 }
 0x2e9   :  { %28094 = vmatprep.subr.bf16.mxu1 %v37671_v11 }
 0x2eb   :  { %28387 = vmatpush3.bf16.msra.mxu0 %v37921_v61  ;;  %v31849_v61 = vmov 16  }
 0x2ec   :  { %28096 = vmatpush3.bf16.msra.mxu1 %v37944_v45  ;;  %28388 = vmatprep.subr.bf16.mxu0 %v37671_v11 }
 0x2ed   :  { %28097 = vmatprep.subr.bf16.mxu1 %v37671_v11 }
 0x2ef   :  { %28390 = vmatpush3.bf16.msra.mxu0 %v37922_v10 }
 0x2f0   :  { %28099 = vmatpush3.bf16.msra.mxu1 %v37945_v3  ;;  %28391 = vmatprep.subr.bf16.mxu0 %v37671_v11 }
 0x2f1   :  { %28100 = vmatprep.subr.bf16.mxu1 %v37671_v11 }
 0x2f3   :  { %28393 = vmatpush3.bf16.msra.mxu0 %v37923_v42  ;;  %v37960_v42 = vld [vmem:[#allocation40_spill] sm:$0xff] }
 0x2f4   :  { %28102 = vmatpush3.bf16.msra.mxu1 %v37946_v2  ;;  %28394 = vmatprep.subr.bf16.mxu0 %v37671_v11 }
 0x2f5   :  { %28103 = vmatprep.subr.bf16.mxu1 %v37671_v11 }
 0x2f7   :  { %28396 = vmatpush3.bf16.msra.mxu0 %v37924_v62  ;;  %v37953_v62 = vld [vmem:[#allocation83_spill] sm:$0xff] }
 0x2f8   :  { %28105 = vmatpush3.bf16.msra.mxu1 %v37947_v13  ;;  %28397 = vmatprep.subr.bf16.mxu0 %v37671_v11 }
 0x2f9   :  { %28106 = vmatprep.subr.bf16.mxu1 %v37671_v11 }
 0x2fb   :  { %28399 = vmatpush3.bf16.msra.mxu0 %v37925_v34  ;;  %v37950_v34 = vld [vmem:[#allocation80_spill] sm:$0xff] }
 0x2fc   :  { %28108 = vmatpush3.bf16.msra.mxu1 %v37948_v23  ;;  %28400 = vmatprep.subr.bf16.mxu0 %v37671_v11 }
 0x2fd   :  { %28109 = vmatprep.subr.bf16.mxu1 %v37671_v11 }
 0x2fe   :  { %23002 = vmatmul.mubr.msk.f32.vlgmr.msra.gmra.mrb[2].mxu0 %vm3973_vm7, %v37814_v19 }
 0x2ff   :  { %28402 = vmatpush3.bf16.msra.mxu0 %v37926_v0  ;;  %23036 = vmatprep.mubr.msk.f32.mxu0 %vm31836_vm0, %v37732_v44  ;;  %v37951_v0 = vld [vmem:[#allocation81_spill] sm:$0xff] }
 0x300   :  { %28111 = vmatpush3.bf16.msra.mxu1 %v37949_v22  ;;  %28403 = vmatprep.subr.bf16.mxu0 %v37671_v11 }
 0x301   :  { %28112 = vmatprep.subr.bf16.mxu1 %v37671_v11 }
 0x303   :  { %28405 = vmatpush3.bf16.msra.mxu0 %v37927_v47  ;;  %22582 = vmatmul.mubr.msk.f32.vlgmr.msra.gmra.mrb[2].mxu1 %vm3325_vm8, %v37814_v19  ;;  %v37952_v47 = vld [vmem:[#allocation82_spill] sm:$0xff] }
 0x304   :  { %28114 = vmatpush3.bf16.msra.mxu1 %v37950_v34  ;;  %28406 = vmatprep.subr.bf16.mxu0 %v37671_v11 }
 0x305   :  { %28115 = vmatprep.subr.bf16.mxu1 %v37671_v11  ;;  %22616 = vmatprep.mubr.msk.f32.mxu1 %vm31836_vm0, %v37732_v44 }
 0x307   :  { %28408 = vmatpush3.bf16.msra.mxu0 %v37928_v50  ;;  %v37954_v50 = vld [vmem:[#allocation84_spill] sm:$0xff] }
 0x308   :  { %28117 = vmatpush3.bf16.msra.mxu1 %v37951_v0  ;;  %28409 = vmatprep.subr.bf16.mxu0 %v37671_v11 }
 0x309   :  { %28118 = vmatprep.subr.bf16.mxu1 %v37671_v11 }
 0x30b   :  { %28411 = vmatpush3.bf16.msra.mxu0 %v37929_v24  ;;  %v37955_v24 = vld [vmem:[#allocation85_spill] sm:$0xff] }
 0x30c   :  { %28120 = vmatpush3.bf16.msra.mxu1 %v37952_v47  ;;  %28412 = vmatprep.subr.bf16.mxu0 %v37671_v11 }
 0x30d   :  { %28121 = vmatprep.subr.bf16.mxu1 %v37671_v11 }
 0x30f   :  { %28414 = vmatpush3.bf16.msra.mxu0 %v37930_v15  ;;  %v37956_v15 = vld [vmem:[#allocation86_spill] sm:$0xff] }
 0x310   :  { %28123 = vmatpush3.bf16.msra.mxu1 %v37953_v62  ;;  %28415 = vmatprep.subr.bf16.mxu0 %v37671_v11 }
 0x311   :  { %28124 = vmatprep.subr.bf16.mxu1 %v37671_v11 }
 0x313   :  { %28417 = vmatpush3.bf16.msra.mxu0 %v37931_v27  ;;  %v37959_v27 = vand.u32 4294901760, %v33795_v41 }
 0x314   :  { %28126 = vmatpush3.bf16.msra.mxu1 %v37954_v50  ;;  %28418 = vmatprep.subr.bf16.mxu0 %v37671_v11 }
 0x315   :  { %28127 = vmatprep.subr.bf16.mxu1 %v37671_v11 }
 0x317   :  { %28420 = vmatpush3.bf16.msra.mxu0 %v37932_v40  ;;  %v37957_v40 = vld [vmem:[#allocation87_spill] sm:$0xff] }
 0x318   :  { %28129 = vmatpush3.bf16.msra.mxu1 %v37955_v24  ;;  %28421 = vmatprep.subr.bf16.mxu0 %v37671_v11 }
 0x319   :  { %28130 = vmatprep.subr.bf16.mxu1 %v37671_v11 }
 0x31b   :  { %28423 = vmatpush3.bf16.msra.mxu0 %v37933_v5  ;;  %v37958_v5 = vand.u32 4294901760, %v33780_v32 }
 0x31c   :  { %28132 = vmatpush3.bf16.msra.mxu1 %v37956_v15  ;;  %28424 = vmatprep.subr.bf16.mxu0 %v37671_v11 }
 0x31d   :  { %28133 = vmatprep.subr.bf16.mxu1 %v37671_v11 }
 0x31e   :  { %23037 = vmatmul.mubr.f32.vlgmr.msra.gmra.mrb[2].mxu0 %v33780_v32  ;;  %v31844_v32 = vmov 10  }
 0x31f   :  { %28426 = vmatpush3.bf16.msra.mxu0 %v37910_v56  ;;  %23071 = vmatprep.mubr.msk.f32.mxu0 %vm31836_vm0, %v37732_v44 }
 0x320   :  { %28135 = vmatpush3.bf16.msra.mxu1 %v37957_v40  ;;  %28427 = vmatprep.subr.bf16.mxu0 %v37671_v11 }
 0x321   :  { %28136 = vmatprep.subr.bf16.mxu1 %v37671_v11  ;;  %31733 = vset.pattern.permute.xlu1 %v31844_v32  ;;  %v37966_v32 = vld [vmem:[#allocation17_spill] sm:$0xff] }
 0x322   :  { %7861 = vperm.xlu1 %31733, %v33389_v18  }
 0x323   :  { %28429 = vmatpush3.bf16.msra.mxu0 %v37911_v58  ;;  %22617 = vmatmul.mubr.f32.vlgmr.msra.gmra.mrb[2].mxu1 %v33795_v41  ;;  %v37963_v41 = vld [vmem:[#allocation13_spill] sm:$0xff] }
 0x324   :  { %28138 = vmatpush3.bf16.msra.mxu1 %v32865_v39  ;;  %28430 = vmatprep.subr.bf16.mxu0 %v37671_v11 }
 0x325   :  { %28139 = vmatprep.subr.bf16.mxu1 %v37671_v11  ;;  %22651 = vmatprep.mubr.msk.f32.mxu1 %vm31836_vm0, %v37732_v44 }
 0x326   :  { %31735 = vset.pattern.permute.xlu1 %v31846_v57 }
 0x327   :  { %28432 = vmatpush3.bf16.msra.mxu0 %v37912_v51  ;;  %7855 = vperm.xlu1 %31735, %v34045_v60  }
 0x328   :  { %28141 = vmatpush3.bf16.msra.mxu1 %v32883_v31  ;;  %28433 = vmatprep.subr.bf16.mxu0 %v37671_v11 }
 0x329   :  { %28142 = vmatprep.subr.bf16.mxu1 %v37671_v11 }
 0x32b   :  { %28435 = vmatpush3.bf16.msra.mxu0 %v37913_v4 }
 0x32c   :  { %28144 = vmatpush3.bf16.msra.mxu1 %v32905_v28  ;;  %28436 = vmatprep.subr.bf16.mxu0 %v37671_v11 }
 0x32d   :  { %28145 = vmatprep.subr.bf16.mxu1 %v37671_v11 }
 0x32f   :  { %28438 = vmatpush3.bf16.msra.mxu0 %v37914_v52 }
 0x330   :  { %28147 = vmatpush3.bf16.msra.mxu1 %v37865_v49  ;;  %28439 = vmatprep.subr.bf16.mxu0 %v37671_v11 }
 0x331   :  { %28148 = vmatprep.subr.bf16.mxu1 %v37671_v11 }
 0x333   :  { %28441 = vmatpush3.bf16.msra.mxu0 %v37915_v25 }
 0x334   :  { %28150 = vmatpush3.bf16.msra.mxu1 %v37867_v17  ;;  %28442 = vmatprep.subr.bf16.mxu0 %v37671_v11 }
 0x335   :  { %28151 = vmatprep.subr.bf16.mxu1 %v37671_v11 }
 0x337   :  { %28444 = vmatpush3.bf16.msra.mxu0 %v37916_v9 }
 0x338   :  { %28153 = vmatpush3.bf16.msra.mxu1 %v37869_v16  ;;  %28445 = vmatprep.subr.bf16.mxu0 %v37671_v11 }
 0x339   :  { %28154 = vmatprep.subr.bf16.mxu1 %v37671_v11 }
 0x33b   :  { %28447 = vmatpush3.bf16.msra.mxu0 %v37917_v21 }
 0x33c   :  { %28156 = vmatpush3.bf16.msra.mxu1 %v37871_v63  ;;  %28448 = vmatprep.subr.bf16.mxu0 %v37671_v11 }
 0x33d   :  { %28157 = vmatprep.subr.bf16.mxu1 %v37671_v11 }
 0x33e   :  { %23072 = vmatmul.mubr.f32.vlgmr.msra.gmra.mrb[2].mxu0 %v37958_v5  ;;  %v37961_v5 = vld [vmem:[#allocation11_spill] sm:$0xff] }
 0x33f   :  { %28450 = vmatpush3.bf16.msra.mxu0 %v37936_v54  ;;  %23106 = vmatprep.mubr.msk.f32.mxu0 %vm31836_vm0, %v37732_v44 }
 0x340   :  { %28159 = vmatpush3.bf16.msra.mxu1 %v37873_v53  ;;  %28451 = vmatprep.subr.bf16.mxu0 %v37671_v11 }
 0x341   :  { %28160 = vmatprep.subr.bf16.mxu1 %v37671_v11 }
 0x343   :  { %28453 = vmatpush3.bf16.msra.mxu0 %v37937_v35  ;;  %22652 = vmatmul.mubr.f32.vlgmr.msra.gmra.mrb[2].mxu1 %v37959_v27  ;;  %v37962_v27 = vld [vmem:[#allocation42_spill] sm:$0xff] }
 0x344   :  { %28162 = vmatpush3.bf16.msra.mxu1 %v37960_v42  ;;  %28454 = vmatprep.subr.bf16.mxu0 %v37671_v11 }
 0x345   :  { %28163 = vmatprep.subr.bf16.mxu1 %v37671_v11  ;;  %22686 = vmatprep.mubr.msk.f32.mxu1 %vm31836_vm0, %v37732_v44 }
 0x347   :  { %28456 = vmatpush3.bf16.msra.mxu0 %v37938_v55  ;;  %v31845_v55 = vmov 6  }
 0x348   :  { %28165 = vmatpush3.bf16.msra.mxu1 %v37961_v5  ;;  %28457 = vmatprep.subr.bf16.mxu0 %v37671_v11 }
 0x349   :  { %28166 = vmatprep.subr.bf16.mxu1 %v37671_v11  ;;  %31734 = vset.pattern.permute.xlu0 %v31845_v55  ;;  %v37967_v55 = vld [vmem:[#allocation88_spill] sm:$0xff] }
 0x34a   :  { %5913 = vperm.xlu0 %31734, %v33389_v18   ;;  %v34037_v18 = vpop.permute.xlu0 %5265 }
 0x34b   :  { %28459 = vmatpush3.bf16.msra.mxu0 %v37939_v38  ;;  %v37964_v38 = vld [vmem:[#allocation43_spill] sm:$0xff]  ;;  %vm5267_vm9 = vcmp.eq.s32.totalorder %v34037_v18, %v32537_v36 }
 0x34c   :  { %28168 = vmatpush3.bf16.msra.mxu1 %v37962_v27  ;;  %28460 = vmatprep.subr.bf16.mxu0 %v37671_v11  ;;  %v18531_v57 = vsel %vm5267_vm9, 1.0, %v37732_v44 }
 0x34d   :  { %28169 = vmatprep.subr.bf16.mxu1 %v37671_v11 }
 0x34f   :  { %28462 = vmatpush3.bf16.msra.mxu0 %v37940_v6  ;;  %v37965_v6 = vld [vmem:[#allocation15_spill] sm:$0xff] }
 0x350   :  { %28171 = vmatpush3.bf16.msra.mxu1 %v37963_v41  ;;  %28463 = vmatprep.subr.bf16.mxu0 %v37671_v11 }
 0x351   :  { %28172 = vmatprep.subr.bf16.mxu1 %v37671_v11 }
 0x353   :  { %28465 = vmatpush3.bf16.msra.mxu0 %v37941_v46  ;;  %v34065_v46 = vsub.f32 %v18531_v57, %v18531_v57 }
 0x354   :  { %28174 = vmatpush3.bf16.msra.mxu1 %v37964_v38  ;;  %28466 = vmatprep.subr.bf16.mxu0 %v37671_v11 }
 0x355   :  { %28175 = vmatprep.subr.bf16.mxu1 %v37671_v11  ;;  %v37423_v54 = vand.u32 4294901760, %v34065_v46 }
 0x357   :  { %28468 = vmatpush3.bf16.msra.mxu0 %v37942_v37  ;;  %v31847_v37 = vmov 8   ;;  %v5354_v10 = vsub.f32 %v34065_v46, %v37423_v54 }
 0x358   :  { %28177 = vmatpush3.bf16.msra.mxu1 %v37965_v6  ;;  %28469 = vmatprep.subr.bf16.mxu0 %v37671_v11 }
 0x359   :  { %28178 = vmatprep.subr.bf16.mxu1 %v37671_v11  ;;  %31736 = vset.pattern.permute.xlu1 %v31847_v37  ;;  %v31848_v37 = vmov 13  }
 0x35a   :  { %7207 = vperm.xlu1 %31736, %v34045_v60  }
 0x35b   :  { %28471 = vmatpush3.bf16.msra.mxu0 %v37943_v48  ;;  %v34053_v48 = vpop.permute.xlu1 %5919 }
 0x35c   :  { %28180 = vmatpush3.bf16.msra.mxu1 %v37966_v32  ;;  %28472 = vmatprep.subr.bf16.mxu0 %v37671_v11  ;;  %vm5921_vm10 = vcmp.eq.s32.totalorder %v34053_v48, %v32537_v36 }
 0x35d   :  { %28181 = vmatprep.subr.bf16.mxu1 %v37671_v11  ;;  %v18536_v35 = vsel %vm5921_vm10, 1.0, %v37732_v44 }
 0x35e   :  { %23107 = vmatmul.mubr.msk.f32.vlgmr.msra.gmra.mrb[2].mxu0 %vm3973_vm7, %v37814_v19  ;;  %31738 = vset.pattern.permute.xlu1 %v31848_v37  ;;  %v34078_v57 = vsub.f32 %v18536_v35, %v18536_v35  ;;  %v5355_v35 = vand.u32 4294901760, %v5354_v10 }
 0x35f   :  { %28474 = vmatpush3.bf16.msra.mxu0 %v37910_v56  ;;  %23141 = vmatprep.mubr.msk.f32.mxu0 %vm31836_vm0, %v37732_v44 }
 0x360   :  { %28183 = vmatpush3.bf16.msra.mxu1 %v37967_v55  ;;  %28475 = vmatprep.subr.bf16.mxu0 %v37671_v11  ;;  %v37426_v37 = vand.u32 4294901760, %v34078_v57 }
 0x361   :  { %28184 = vmatprep.subr.bf16.mxu1 %v37671_v11  ;;  %9803 = vperm.xlu1 %31738, %v34045_v60  }
 0x362   :  { %v6008_v54 = vsub.f32 %v34078_v57, %v37426_v37  ;;  %v31851_v37 = vmov 14  }
 0x363   :  { %28477 = vmatpush3.bf16.msra.mxu0 %v37911_v58  ;;  %22687 = vmatmul.mubr.msk.f32.vlgmr.msra.gmra.mrb[2].mxu1 %vm3325_vm8, %v37814_v19 }
 0x364   :  { %28186 = vmatpush3.bf16.msra.mxu1 %v32865_v39  ;;  %28478 = vmatprep.subr.bf16.mxu0 %v37671_v11  ;;  %v6009_v10 = vand.u32 4294901760, %v6008_v54  ;;  %v37971_v54 = vld [vmem:[#allocation27_spill] sm:$0xff] }
 0x365   :  { %28187 = vmatprep.subr.bf16.mxu1 %v37671_v11  ;;  %22721 = vmatprep.mubr.msk.f32.mxu1 %vm31836_vm0, %v37732_v44 }
 0x366   :  { %31739 = vset.pattern.permute.xlu1 %v31849_v61  ;;  %v31850_v61 = vmov 15  }
 0x367   :  { %28480 = vmatpush3.bf16.msra.mxu0 %v37912_v51  ;;  %11745 = vperm.xlu1 %31739, %v34045_v60  }
 0x368   :  { %28189 = vmatpush3.bf16.msra.mxu1 %v32883_v31  ;;  %28481 = vmatprep.subr.bf16.mxu0 %v37671_v11 }
 0x369   :  { %28190 = vmatprep.subr.bf16.mxu1 %v37671_v11 }
 0x36b   :  { %28483 = vmatpush3.bf16.msra.mxu0 %v37913_v4  ;;  %31741 = vset.pattern.permute.xlu1 %v31850_v61  ;;  %v37972_v61 = vld [vmem:[#allocation30_spill] sm:$0xff] }
 0x36c   :  { %28192 = vmatpush3.bf16.msra.mxu1 %v32905_v28  ;;  %28484 = vmatprep.subr.bf16.mxu0 %v37671_v11 }
 0x36d   :  { %28193 = vmatprep.subr.bf16.mxu1 %v37671_v11  ;;  %11739 = vperm.xlu1 %31741, %v34045_v60  }
 0x36f   :  { %28486 = vmatpush3.bf16.msra.mxu0 %v37914_v52 }
 0x370   :  { %28195 = vmatpush3.bf16.msra.mxu1 %v37865_v49  ;;  %28487 = vmatprep.subr.bf16.mxu0 %v37671_v11 }
 0x371   :  { %28196 = vmatprep.subr.bf16.mxu1 %v37671_v11  ;;  %31742 = vset.pattern.permute.xlu1 %v31851_v37  ;;  %v31852_v37 = vmov 19  }
 0x372   :  { %11091 = vperm.xlu1 %31742, %v34045_v60  }
 0x373   :  { %28489 = vmatpush3.bf16.msra.mxu0 %v37915_v25 }
 0x374   :  { %28198 = vmatpush3.bf16.msra.mxu1 %v37867_v17  ;;  %28490 = vmatprep.subr.bf16.mxu0 %v37671_v11 }
 0x375   :  { %28199 = vmatprep.subr.bf16.mxu1 %v37671_v11 }
 0x376   :  { %31744 = vset.pattern.permute.xlu1 %v31852_v37  ;;  %v37974_v37 = vld [vmem:[#allocation41_spill] sm:$0xff] }
 0x377   :  { %28492 = vmatpush3.bf16.msra.mxu0 %v37916_v9  ;;  %13687 = vperm.xlu1 %31744, %v34045_v60  }
 0x378   :  { %28201 = vmatpush3.bf16.msra.mxu1 %v37869_v16  ;;  %28493 = vmatprep.subr.bf16.mxu0 %v37671_v11 }
 0x379   :  { %28202 = vmatprep.subr.bf16.mxu1 %v37671_v11 }
 0x37b   :  { %28495 = vmatpush3.bf16.msra.mxu0 %v37917_v21 }
 0x37c   :  { %28204 = vmatpush3.bf16.msra.mxu1 %v37871_v63  ;;  %28496 = vmatprep.subr.bf16.mxu0 %v37671_v11 }
 0x37d   :  { %28205 = vmatprep.subr.bf16.mxu1 %v37671_v11 }
 0x37e   :  { %23142 = vmatmul.mubr.msk.f32.vlgmr.msra.gmra.mrb[2].mxu0 %vm3973_vm7, %v37814_v19 }
 0x37f   :  { %28498 = vmatpush3.bf16.msra.mxu0 %v32865_v39  ;;  %23176 = vmatprep.mubr.msk.f32.mxu0 %vm31836_vm0, %v37732_v44 }
 0x380   :  { %28207 = vmatpush3.bf16.msra.mxu1 %v37873_v53  ;;  %28499 = vmatprep.subr.bf16.mxu0 %v37671_v11 }
 0x381   :  { %28640 = vmatprep.subr.bf16.mxu1 %v37671_v11 }
 0x383   :  { %22722 = vmatmul.mubr.msk.f32.vlgmr.msra.gmra.mrb[2].mxu1 %vm3325_vm8, %v37814_v19  ;;  %28501 = vmatpush3.bf16.msra.mxu0 %v32883_v31 }
 0x384   :  { %28642 = vmatpush3.bf16.msra.mxu1 %v37733_v29  ;;  %28502 = vmatprep.subr.bf16.mxu0 %v37671_v11 }
 0x385   :  { %28643 = vmatprep.subr.bf16.mxu1 %v37671_v11  ;;  %23386 = vmatprep.mubr.msk.f32.mxu1 %vm31836_vm0, %v37732_v44 }
 0x387   :  { %28504 = vmatpush3.bf16.msra.mxu0 %v32905_v28 }
 0x388   :  { %28645 = vmatpush3.bf16.msra.mxu1 %v37735_v1  ;;  %28505 = vmatprep.subr.bf16.mxu0 %v37671_v11 }
 0x389   :  { %28646 = vmatprep.subr.bf16.mxu1 %v37671_v11 }
 0x38b   :  { %28507 = vmatpush3.bf16.msra.mxu0 %v37865_v49 }
 0x38c   :  { %28648 = vmatpush3.bf16.msra.mxu1 %v37866_v26  ;;  %28508 = vmatprep.subr.bf16.mxu0 %v37671_v11 }
 0x38d   :  { %28649 = vmatprep.subr.bf16.mxu1 %v37671_v11 }
 0x38f   :  { %28510 = vmatpush3.bf16.msra.mxu0 %v37867_v17 }
 0x390   :  { %28651 = vmatpush3.bf16.msra.mxu1 %v37868_v43  ;;  %28511 = vmatprep.subr.bf16.mxu0 %v37671_v11 }
 0x391   :  { %28652 = vmatprep.subr.bf16.mxu1 %v37671_v11 }
 0x393   :  { %28513 = vmatpush3.bf16.msra.mxu0 %v37869_v16 }
 0x394   :  { %28654 = vmatpush3.bf16.msra.mxu1 %v37870_v33  ;;  %28514 = vmatprep.subr.bf16.mxu0 %v37671_v11 }
 0x395   :  { %28655 = vmatprep.subr.bf16.mxu1 %v37671_v11 }
 0x397   :  { %28516 = vmatpush3.bf16.msra.mxu0 %v37871_v63 }
 0x398   :  { %28657 = vmatpush3.bf16.msra.mxu1 %v37872_v30  ;;  %28517 = vmatprep.subr.bf16.mxu0 %v37671_v11 }
 0x399   :  { %28658 = vmatprep.subr.bf16.mxu1 %v37671_v11 }
 0x39b   :  { %28519 = vmatpush3.bf16.msra.mxu0 %v37873_v53 }
 0x39c   :  { %28660 = vmatpush3.bf16.msra.mxu1 %v37968_v14  ;;  %28520 = vmatprep.subr.bf16.mxu0 %v37671_v11 }
 0x39d   :  { %28661 = vmatprep.subr.bf16.mxu1 %v37671_v11 }
 0x39e   :  { %23177 = vmatmul.mubr.f32.vlgmr.msra.gmra.mrb[2].mxu0 %v5355_v35  ;;  %v37970_v35 = vld [vmem:[#allocation25_spill] sm:$0xff] }
 0x39f   :  { %28522 = vmatpush3.bf16.msra.mxu0 %v33065_v59  ;;  %23211 = vmatprep.mubr.msk.f32.mxu0 %vm31836_vm0, %v37732_v44 }
 0x3a0   :  { %28663 = vmatpush3.bf16.msra.mxu1 %v37969_v7  ;;  %28523 = vmatprep.subr.bf16.mxu0 %v37671_v11 }
 0x3a1   :  { %28664 = vmatprep.subr.bf16.mxu1 %v37671_v11  ;;  %v34326_v18 = vpop.permute.xlu1 %7861 }
 0x3a2   :  { %vm7863_vm11 = vcmp.eq.s32.totalorder %v34326_v18, %v32537_v36 }
 0x3a3   :  { %28525 = vmatpush3.bf16.msra.mxu0 %v33109_v20  ;;  %23387 = vmatmul.mubr.f32.vlgmr.msra.gmra.mrb[4].mxu1 %v6009_v10  ;;  %v31853_v10 = vmov 22  }
 0x3a4   :  { %28666 = vmatpush3.bf16.msra.mxu1 %v37970_v35  ;;  %28526 = vmatprep.subr.bf16.mxu0 %v37671_v11 }
 0x3a5   :  { %28667 = vmatprep.subr.bf16.mxu1 %v37671_v11  ;;  %23421 = vmatprep.mubr.msk.f32.mxu1 %vm31836_vm0, %v37732_v44 }
 0x3a6   :  { %31745 = vset.pattern.permute.xlu1 %v31853_v10  ;;  %v37975_v10 = vld [vmem:[#allocation51_spill] sm:$0xff]  ;;  %v34611_v18 = vpop.permute.xlu1 %7855 }
 0x3a7   :  { %28528 = vmatpush3.bf16.msra.mxu0 %v37944_v45  ;;  %v37973_v45 = vld [vmem:[#allocation38_spill] sm:$0xff]  ;;  %15629 = vperm.xlu1 %31745, %v34045_v60   ;;  %vm7857_vm13 = vcmp.eq.s32.totalorder %v34611_v18, %v32537_v36 }
 0x3a8   :  { %28669 = vmatpush3.bf16.msra.mxu1 %v37971_v54  ;;  %28529 = vmatprep.subr.bf16.mxu0 %v37671_v11 }
 0x3a9   :  { %28670 = vmatprep.subr.bf16.mxu1 %v37671_v11 }
 0x3ab   :  { %28531 = vmatpush3.bf16.msra.mxu0 %v37945_v3  ;;  %v31854_v3 = vmov 21  }
 0x3ac   :  { %28672 = vmatpush3.bf16.msra.mxu1 %v37972_v61  ;;  %28532 = vmatprep.subr.bf16.mxu0 %v37671_v11 }
 0x3ad   :  { %28673 = vmatprep.subr.bf16.mxu1 %v37671_v11  ;;  %31747 = vset.pattern.permute.xlu1 %v31854_v3  ;;  %v37977_v3 = vld [vmem:[#allocation57_spill] sm:$0xff] }
 0x3ae   :  { %15623 = vperm.xlu1 %31747, %v34045_v60  }
 0x3af   :  { %28534 = vmatpush3.bf16.msra.mxu0 %v37946_v2  ;;  %v31855_v2 = vmov 20  }
 0x3b0   :  { %28675 = vmatpush3.bf16.msra.mxu1 %v37973_v45  ;;  %28535 = vmatprep.subr.bf16.mxu0 %v37671_v11 }
 0x3b1   :  { %28676 = vmatprep.subr.bf16.mxu1 %v37671_v11 }
 0x3b2   :  { %31748 = vset.pattern.permute.xlu1 %v31855_v2  ;;  %v37978_v2 = vld [vmem:[#allocation53_spill] sm:$0xff] }
 0x3b3   :  { %28537 = vmatpush3.bf16.msra.mxu0 %v37947_v13  ;;  %14975 = vperm.xlu1 %31748, %v34045_v60   ;;  %v37976_v13 = vld [vmem:[#allocation54_spill] sm:$0xff] }
 0x3b4   :  { %28678 = vmatpush3.bf16.msra.mxu1 %v37974_v37  ;;  %28538 = vmatprep.subr.bf16.mxu0 %v37671_v11 }
 0x3b5   :  { %28679 = vmatprep.subr.bf16.mxu1 %v37671_v11 }
 0x3b7   :  { %28540 = vmatpush3.bf16.msra.mxu0 %v37948_v23  ;;  %v37988_v23 = vld [vmem:[#allocation18_spill] sm:$0xff] }
 0x3b8   :  { %28681 = vmatpush3.bf16.msra.mxu1 %v37975_v10  ;;  %28541 = vmatprep.subr.bf16.mxu0 %v37671_v11 }
 0x3b9   :  { %28682 = vmatprep.subr.bf16.mxu1 %v37671_v11 }
 0x3bb   :  { %28543 = vmatpush3.bf16.msra.mxu0 %v37949_v22  ;;  %v37981_v22 = vld [vmem:[#allocation61_spill] sm:$0xff] }
 0x3bc   :  { %28684 = vmatpush3.bf16.msra.mxu1 %v37976_v13  ;;  %28544 = vmatprep.subr.bf16.mxu0 %v37671_v11 }
 0x3bd   :  { %28685 = vmatprep.subr.bf16.mxu1 %v37671_v11 }
 0x3be   :  { %23212 = vmatmul.mubr.msk.f32.vlgmr.msra.gmra.mrb[2].mxu0 %vm5267_vm9, %v37814_v19 }
 0x3bf   :  { %28546 = vmatpush3.bf16.msra.mxu0 %v37950_v34  ;;  %23246 = vmatprep.mubr.msk.f32.mxu0 %vm31836_vm0, %v37732_v44  ;;  %v37979_v34 = vld [vmem:[#allocation56_spill] sm:$0xff] }
 0x3c0   :  { %28687 = vmatpush3.bf16.msra.mxu1 %v37977_v3  ;;  %28547 = vmatprep.subr.bf16.mxu0 %v37671_v11 }
 0x3c1   :  { %28688 = vmatprep.subr.bf16.mxu1 %v37671_v11 }
 0x3c3   :  { %28549 = vmatpush3.bf16.msra.mxu0 %v37951_v0  ;;  %23422 = vmatmul.mubr.msk.f32.vlgmr.msra.gmra.mrb[4].mxu1 %vm5921_vm10, %v37814_v19  ;;  %v37980_v0 = vld [vmem:[#allocation59_spill] sm:$0xff] }
 0x3c4   :  { %28690 = vmatpush3.bf16.msra.mxu1 %v37978_v2  ;;  %28550 = vmatprep.subr.bf16.mxu0 %v37671_v11 }
 0x3c5   :  { %28691 = vmatprep.subr.bf16.mxu1 %v37671_v11  ;;  %23456 = vmatprep.mubr.msk.f32.mxu1 %vm31836_vm0, %v37732_v44 }
 0x3c7   :  { %28552 = vmatpush3.bf16.msra.mxu0 %v37952_v47  ;;  %v37982_v47 = vld [vmem:[#allocation63_spill] sm:$0xff] }
 0x3c8   :  { %28693 = vmatpush3.bf16.msra.mxu1 %v37979_v34  ;;  %28553 = vmatprep.subr.bf16.mxu0 %v37671_v11 }
 0x3c9   :  { %28694 = vmatprep.subr.bf16.mxu1 %v37671_v11  ;;  %v34336_v48 = vpop.permute.xlu0 %5913 }
 0x3ca   :  { %vm5915_vm12 = vcmp.eq.s32.totalorder %v34336_v48, %v32537_v36  ;;  %v18547_v48 = vsel %vm7857_vm13, 1.0, %v37732_v44 }
 0x3cb   :  { %28555 = vmatpush3.bf16.msra.mxu0 %v37953_v62  ;;  %v37983_v62 = vld [vmem:[#allocation65_spill] sm:$0xff] }
 0x3cc   :  { %28696 = vmatpush3.bf16.msra.mxu1 %v37980_v0  ;;  %28556 = vmatprep.subr.bf16.mxu0 %v37671_v11 }
 0x3cd   :  { %28697 = vmatprep.subr.bf16.mxu1 %v37671_v11 }
 0x3cf   :  { %28558 = vmatpush3.bf16.msra.mxu0 %v37954_v50  ;;  %v37984_v50 = vld [vmem:[#allocation68_spill] sm:$0xff] }
 0x3d0   :  { %28699 = vmatpush3.bf16.msra.mxu1 %v37981_v22  ;;  %28559 = vmatprep.subr.bf16.mxu0 %v37671_v11 }
 0x3d1   :  { %28700 = vmatprep.subr.bf16.mxu1 %v37671_v11 }
 0x3d3   :  { %28561 = vmatpush3.bf16.msra.mxu0 %v37955_v24  ;;  %v37987_v24 = vand.u32 4294901760, %v34078_v57 }
 0x3d4   :  { %28702 = vmatpush3.bf16.msra.mxu1 %v37982_v47  ;;  %28562 = vmatprep.subr.bf16.mxu0 %v37671_v11 }
 0x3d5   :  { %28703 = vmatprep.subr.bf16.mxu1 %v37671_v11 }
 0x3d7   :  { %28564 = vmatpush3.bf16.msra.mxu0 %v37956_v15  ;;  %v37985_v15 = vld [vmem:[#allocation69_spill] sm:$0xff] }
 0x3d8   :  { %28705 = vmatpush3.bf16.msra.mxu1 %v37983_v62  ;;  %28565 = vmatprep.subr.bf16.mxu0 %v37671_v11 }
 0x3d9   :  { %28706 = vmatprep.subr.bf16.mxu1 %v37671_v11 }
 0x3db   :  { %28567 = vmatpush3.bf16.msra.mxu0 %v37957_v40  ;;  %v37986_v40 = vand.u32 4294901760, %v34065_v46 }
 0x3dc   :  { %28708 = vmatpush3.bf16.msra.mxu1 %v37984_v50  ;;  %28568 = vmatprep.subr.bf16.mxu0 %v37671_v11 }
 0x3dd   :  { %28709 = vmatprep.subr.bf16.mxu1 %v37671_v11 }
 0x3de   :  { %23247 = vmatmul.mubr.f32.vlgmr.msra.gmra.mrb[2].mxu0 %v34065_v46  ;;  %v37991_v46 = vld [vmem:[#allocation29_spill] sm:$0xff] }
 0x3df   :  { %28570 = vmatpush3.bf16.msra.mxu0 %v32865_v39  ;;  %23281 = vmatprep.mubr.msk.f32.mxu0 %vm31836_vm0, %v37732_v44 }
 0x3e0   :  { %28711 = vmatpush3.bf16.msra.mxu1 %v37985_v15  ;;  %28571 = vmatprep.subr.bf16.mxu0 %v37671_v11 }
 0x3e1   :  { %28712 = vmatprep.subr.bf16.mxu1 %v37671_v11 }
 0x3e3   :  { %28573 = vmatpush3.bf16.msra.mxu0 %v32883_v31  ;;  %23457 = vmatmul.mubr.f32.vlgmr.msra.gmra.mrb[4].mxu1 %v34078_v57  ;;  %v37992_v57 = vld [vmem:[#allocation32_spill] sm:$0xff] }
 0x3e4   :  { %28714 = vmatpush3.bf16.msra.mxu1 %v37733_v29  ;;  %28574 = vmatprep.subr.bf16.mxu0 %v37671_v11 }
 0x3e5   :  { %28715 = vmatprep.subr.bf16.mxu1 %v37671_v11  ;;  %23491 = vmatprep.mubr.msk.f32.mxu1 %vm31836_vm0, %v37732_v44 }
 0x3e7   :  { %28576 = vmatpush3.bf16.msra.mxu0 %v32905_v28 }
 0x3e8   :  { %28717 = vmatpush3.bf16.msra.mxu1 %v37735_v1  ;;  %28577 = vmatprep.subr.bf16.mxu0 %v37671_v11 }
 0x3e9   :  { %28718 = vmatprep.subr.bf16.mxu1 %v37671_v11 }
 0x3eb   :  { %28579 = vmatpush3.bf16.msra.mxu0 %v37865_v49 }
 0x3ec   :  { %28720 = vmatpush3.bf16.msra.mxu1 %v37866_v26  ;;  %28580 = vmatprep.subr.bf16.mxu0 %v37671_v11 }
 0x3ed   :  { %28721 = vmatprep.subr.bf16.mxu1 %v37671_v11 }
 0x3ef   :  { %28582 = vmatpush3.bf16.msra.mxu0 %v37867_v17 }
 0x3f0   :  { %28723 = vmatpush3.bf16.msra.mxu1 %v37868_v43  ;;  %28583 = vmatprep.subr.bf16.mxu0 %v37671_v11 }
 0x3f1   :  { %28724 = vmatprep.subr.bf16.mxu1 %v37671_v11 }
 0x3f3   :  { %28585 = vmatpush3.bf16.msra.mxu0 %v37869_v16 }
 0x3f4   :  { %28726 = vmatpush3.bf16.msra.mxu1 %v37870_v33  ;;  %28586 = vmatprep.subr.bf16.mxu0 %v37671_v11 }
 0x3f5   :  { %28727 = vmatprep.subr.bf16.mxu1 %v37671_v11 }
 0x3f7   :  { %28588 = vmatpush3.bf16.msra.mxu0 %v37871_v63 }
 0x3f8   :  { %28729 = vmatpush3.bf16.msra.mxu1 %v37872_v30  ;;  %28589 = vmatprep.subr.bf16.mxu0 %v37671_v11 }
 0x3f9   :  { %28730 = vmatprep.subr.bf16.mxu1 %v37671_v11 }
 0x3fb   :  { %28591 = vmatpush3.bf16.msra.mxu0 %v37873_v53 }
 0x3fc   :  { %28732 = vmatpush3.bf16.msra.mxu1 %v37968_v14  ;;  %28592 = vmatprep.subr.bf16.mxu0 %v37671_v11 }
 0x3fd   :  { %28733 = vmatprep.subr.bf16.mxu1 %v37671_v11 }
 0x3fe   :  { %23282 = vmatmul.mubr.f32.vlgmr.msra.gmra.mrb[2].mxu0 %v37986_v40  ;;  %v37989_v40 = vld [vmem:[#allocation70_spill] sm:$0xff] }
 0x3ff   :  { %28594 = vmatpush3.bf16.msra.mxu0 %v37960_v42  ;;  %23316 = vmatprep.mubr.msk.f32.mxu0 %vm31836_vm0, %v37732_v44 }
 0x400   :  { %28735 = vmatpush3.bf16.msra.mxu1 %v37969_v7  ;;  %28595 = vmatprep.subr.bf16.mxu0 %v37671_v11 }
 0x401   :  { %28736 = vmatprep.subr.bf16.mxu1 %v37671_v11 }
 0x403   :  { %28597 = vmatpush3.bf16.msra.mxu0 %v37961_v5  ;;  %23492 = vmatmul.mubr.f32.vlgmr.msra.gmra.mrb[4].mxu1 %v37987_v24  ;;  %v37990_v24 = vld [vmem:[#allocation72_spill] sm:$0xff] }
 0x404   :  { %28738 = vmatpush3.bf16.msra.mxu1 %v37988_v23  ;;  %28598 = vmatprep.subr.bf16.mxu0 %v37671_v11 }
 0x405   :  { %28739 = vmatprep.subr.bf16.mxu1 %v37671_v11  ;;  %23526 = vmatprep.mubr.msk.f32.mxu1 %vm31836_vm0, %v37732_v44 }
 0x407   :  { %28600 = vmatpush3.bf16.msra.mxu0 %v37962_v27  ;;  %v18535_v27 = vsel %vm5915_vm12, 1.0, %v37732_v44 }
 0x408   :  { %28741 = vmatpush3.bf16.msra.mxu1 %v37989_v40  ;;  %28601 = vmatprep.subr.bf16.mxu0 %v37671_v11  ;;  %v34360_v42 = vsub.f32 %v18535_v27, %v18535_v27 }
 0x409   :  { %28742 = vmatprep.subr.bf16.mxu1 %v37671_v11 }
 0x40b   :  { %28603 = vmatpush3.bf16.msra.mxu0 %v37963_v41  ;;  %v37993_v41 = vld [vmem:[#allocation66_spill] sm:$0xff] }
 0x40c   :  { %28744 = vmatpush3.bf16.msra.mxu1 %v37990_v24  ;;  %28604 = vmatprep.subr.bf16.mxu0 %v37671_v11 }
 0x40d   :  { %28745 = vmatprep.subr.bf16.mxu1 %v37671_v11 }
 0x40f   :  { %28606 = vmatpush3.bf16.msra.mxu0 %v37964_v38  ;;  %v37994_v38 = vld [vmem:[#allocation36_spill] sm:$0xff] }
 0x410   :  { %28747 = vmatpush3.bf16.msra.mxu1 %v37991_v46  ;;  %28607 = vmatprep.subr.bf16.mxu0 %v37671_v11 }
 0x411   :  { %28748 = vmatprep.subr.bf16.mxu1 %v37671_v11 }
 0x413   :  { %28609 = vmatpush3.bf16.msra.mxu0 %v37965_v6 }
 0x414   :  { %28750 = vmatpush3.bf16.msra.mxu1 %v37992_v57  ;;  %28610 = vmatprep.subr.bf16.mxu0 %v37671_v11 }
 0x415   :  { %28751 = vmatprep.subr.bf16.mxu1 %v37671_v11 }
 0x417   :  { %28612 = vmatpush3.bf16.msra.mxu0 %v37966_v32  ;;  %v37995_v32 = vld [vmem:[#allocation37_spill] sm:$0xff] }
 0x418   :  { %28753 = vmatpush3.bf16.msra.mxu1 %v37993_v41  ;;  %28613 = vmatprep.subr.bf16.mxu0 %v37671_v11 }
 0x419   :  { %28754 = vmatprep.subr.bf16.mxu1 %v37671_v11 }
 0x41b   :  { %28615 = vmatpush3.bf16.msra.mxu0 %v37967_v55  ;;  %v18548_v55 = vsel %vm7863_vm11, 1.0, %v37732_v44 }
 0x41c   :  { %28756 = vmatpush3.bf16.msra.mxu1 %v37994_v38  ;;  %28616 = vmatprep.subr.bf16.mxu0 %v37671_v11  ;;  %v34348_v6 = vsub.f32 %v18548_v55, %v18548_v55 }
 0x41d   :  { %28757 = vmatprep.subr.bf16.mxu1 %v37671_v11 }
 0x41e   :  { %23317 = vmatmul.mubr.msk.f32.vlgmr.msra.gmra.mrb[2].mxu0 %vm5267_vm9, %v37814_v19  ;;  %v37455_v5 = vand.u32 4294901760, %v34348_v6 }
 0x41f   :  { %28618 = vmatpush3.bf16.msra.mxu0 %v32865_v39  ;;  %23351 = vmatprep.mubr.msk.f32.mxu0 %vm31836_vm0, %v37732_v44 }
 0x420   :  { %28759 = vmatpush3.bf16.msra.mxu1 %v37995_v32  ;;  %28619 = vmatprep.subr.bf16.mxu0 %v37671_v11  ;;  %v7950_v20 = vsub.f32 %v34348_v6, %v37455_v5 }
 0x421   :  { %28760 = vmatprep.subr.bf16.mxu1 %v37671_v11 }
 0x423   :  { %28621 = vmatpush3.bf16.msra.mxu0 %v32883_v31  ;;  %23527 = vmatmul.mubr.msk.f32.vlgmr.msra.gmra.mrb[4].mxu1 %vm5921_vm10, %v37814_v19 }
 0x424   :  { %28762 = vmatpush3.bf16.msra.mxu1 %v37733_v29  ;;  %28622 = vmatprep.subr.bf16.mxu0 %v37671_v11 }
 0x425   :  { %28763 = vmatprep.subr.bf16.mxu1 %v37671_v11  ;;  %23561 = vmatprep.mubr.msk.f32.mxu1 %vm31836_vm0, %v37732_v44 }
 0x427   :  { %28624 = vmatpush3.bf16.msra.mxu0 %v32905_v28 }
 0x428   :  { %28765 = vmatpush3.bf16.msra.mxu1 %v37735_v1  ;;  %28625 = vmatprep.subr.bf16.mxu0 %v37671_v11 }
 0x429   :  { %28766 = vmatprep.subr.bf16.mxu1 %v37671_v11 }
 0x42b   :  { %28627 = vmatpush3.bf16.msra.mxu0 %v37865_v49 }
 0x42c   :  { %28768 = vmatpush3.bf16.msra.mxu1 %v37866_v26  ;;  %28628 = vmatprep.subr.bf16.mxu0 %v37671_v11 }
 0x42d   :  { %28769 = vmatprep.subr.bf16.mxu1 %v37671_v11 }
 0x42f   :  { %28630 = vmatpush3.bf16.msra.mxu0 %v37867_v17 }
 0x430   :  { %28771 = vmatpush3.bf16.msra.mxu1 %v37868_v43  ;;  %28631 = vmatprep.subr.bf16.mxu0 %v37671_v11 }
 0x431   :  { %28772 = vmatprep.subr.bf16.mxu1 %v37671_v11 }
 0x433   :  { %28633 = vmatpush3.bf16.msra.mxu0 %v37869_v16 }
 0x434   :  { %28774 = vmatpush3.bf16.msra.mxu1 %v37870_v33  ;;  %28634 = vmatprep.subr.bf16.mxu0 %v37671_v11 }
 0x435   :  { %28775 = vmatprep.subr.bf16.mxu1 %v37671_v11 }
 0x437   :  { %28636 = vmatpush3.bf16.msra.mxu0 %v37871_v63  ;;  %v7951_v63 = vand.u32 4294901760, %v7950_v20  ;;  %v31856_v20 = vmov 11  }
 0x438   :  { %28777 = vmatpush3.bf16.msra.mxu1 %v37872_v30  ;;  %28637 = vmatprep.subr.bf16.mxu0 %v37671_v11 }
 0x439   :  { %28778 = vmatprep.subr.bf16.mxu1 %v37671_v11  ;;  %31737 = vset.pattern.permute.xlu0 %v31856_v20  ;;  %v37999_v20 = vld [vmem:[#allocation28_spill] sm:$0xff] }
 0x43a   :  { %9149 = vperm.xlu0 %31737, %v34045_v60  }
 0x43b   :  { %28639 = vmatpush3.bf16.msra.mxu0 %v37873_v53  ;;  %v37456_v53 = vand.u32 4294901760, %v34360_v42 }
 0x43c   :  { %28780 = vmatpush3.bf16.msra.mxu1 %v37968_v14  ;;  %29072 = vmatprep.subr.bf16.mxu0 %v37671_v11 }
 0x43d   :  { %28781 = vmatprep.subr.bf16.mxu1 %v37671_v11 }
 0x43e   :  { %23352 = vmatmul.mubr.msk.f32.vlgmr.msra.gmra.mrb[2].mxu0 %vm5267_vm9, %v37814_v19 }
 0x43f   :  { %29074 = vmatpush3.bf16.msra.mxu0 %v37733_v29  ;;  %24016 = vmatprep.mubr.msk.f32.mxu0 %vm31836_vm0, %v37732_v44 }
 0x440   :  { %28783 = vmatpush3.bf16.msra.mxu1 %v37969_v7  ;;  %29075 = vmatprep.subr.bf16.mxu0 %v37671_v11 }
 0x441   :  { %28784 = vmatprep.subr.bf16.mxu1 %v37671_v11 }
 0x443   :  { %29077 = vmatpush3.bf16.msra.mxu0 %v37735_v1  ;;  %23562 = vmatmul.mubr.msk.f32.vlgmr.msra.gmra.mrb[4].mxu1 %vm5921_vm10, %v37814_v19 }
 0x444   :  { %28786 = vmatpush3.bf16.msra.mxu1 %v37910_v56  ;;  %29078 = vmatprep.subr.bf16.mxu0 %v37671_v11 }
 0x445   :  { %28787 = vmatprep.subr.bf16.mxu1 %v37671_v11  ;;  %23596 = vmatprep.mubr.msk.f32.mxu1 %vm31836_vm0, %v37732_v44 }
 0x447   :  { %29080 = vmatpush3.bf16.msra.mxu0 %v37866_v26 }
 0x448   :  { %28789 = vmatpush3.bf16.msra.mxu1 %v37911_v58  ;;  %29081 = vmatprep.subr.bf16.mxu0 %v37671_v11 }
 0x449   :  { %28790 = vmatprep.subr.bf16.mxu1 %v37671_v11 }
 0x44b   :  { %29083 = vmatpush3.bf16.msra.mxu0 %v37868_v43 }
 0x44c   :  { %28792 = vmatpush3.bf16.msra.mxu1 %v37912_v51  ;;  %29084 = vmatprep.subr.bf16.mxu0 %v37671_v11 }
 0x44d   :  { %28793 = vmatprep.subr.bf16.mxu1 %v37671_v11 }
 0x44f   :  { %29086 = vmatpush3.bf16.msra.mxu0 %v37870_v33 }
 0x450   :  { %28795 = vmatpush3.bf16.msra.mxu1 %v37913_v4  ;;  %29087 = vmatprep.subr.bf16.mxu0 %v37671_v11 }
 0x451   :  { %28796 = vmatprep.subr.bf16.mxu1 %v37671_v11 }
 0x453   :  { %29089 = vmatpush3.bf16.msra.mxu0 %v37872_v30 }
 0x454   :  { %28798 = vmatpush3.bf16.msra.mxu1 %v37914_v52  ;;  %29090 = vmatprep.subr.bf16.mxu0 %v37671_v11 }
 0x455   :  { %28799 = vmatprep.subr.bf16.mxu1 %v37671_v11 }
 0x456   :  { %v34365_v55 = vpop.f32.mrb[2].mxu1 }
 0x457   :  { %37996 = vst [vmem:[#allocation5_spill] sm:$0xff] %v34365_v55  ;;  %v22723_v59 = vpop.f32.mrb[3].mxu1  ;;  %29092 = vmatpush3.bf16.msra.mxu0 %v37968_v14  ;;  %v17564_v27 = vmul.f32 %v33791_v12, %v34365_v55  ;;  %v38001_v55 = vld [vmem:[#allocation39_spill] sm:$0xff] }
 0x458   :  { %28801 = vmatpush3.bf16.msra.mxu1 %v37915_v25  ;;  %29093 = vmatprep.subr.bf16.mxu0 %v37671_v11  ;;  %v6649_v59 = vsub.f32 %v34360_v42, %v37456_v53  ;;  %v31860_v53 = vmov 23  }
 0x459   :  { %17565 = vadd.xlane.f32.xlu1 %v17564_v27  ;;  %28802 = vmatprep.subr.bf16.mxu1 %v37671_v11  ;;  %v37997_v27 = vld [vmem:[#allocation24_spill] sm:$0xff] }
 0x45a   :  { %v6650_v5 = vand.u32 4294901760, %v6649_v59  ;;  %v37998_v59 = vld [vmem:[#allocation26_spill] sm:$0xff] }
 0x45b   :  { %29095 = vmatpush3.bf16.msra.mxu0 %v37969_v7 }
 0x45c   :  { %28804 = vmatpush3.bf16.msra.mxu1 %v37916_v9  ;;  %29096 = vmatprep.subr.bf16.mxu0 %v37671_v11 }
 0x45d   :  { %28805 = vmatprep.subr.bf16.mxu1 %v37671_v11 }
 0x45e   :  { %24017 = vmatmul.mubr.f32.vlgmr.msra.gmra.mrb[4].mxu0 %v7951_v63  ;;  %v31857_v63 = vmov 12  }
 0x45f   :  { %29098 = vmatpush3.bf16.msra.mxu0 %v37970_v35  ;;  %24051 = vmatprep.mubr.msk.f32.mxu0 %vm31836_vm0, %v37732_v44 }
 0x460   :  { %28807 = vmatpush3.bf16.msra.mxu1 %v37917_v21  ;;  %29099 = vmatprep.subr.bf16.mxu0 %v37671_v11 }
 0x461   :  { %28808 = vmatprep.subr.bf16.mxu1 %v37671_v11  ;;  %31740 = vset.pattern.permute.xlu0 %v31857_v63  ;;  %v31859_v63 = vmov 18  }
 0x462   :  { %9797 = vperm.xlu0 %31740, %v34045_v60  }
 0x463   :  { %29101 = vmatpush3.bf16.msra.mxu0 %v37971_v54  ;;  %23597 = vmatmul.mubr.f32.vlgmr.msra.gmra.mrb[4].mxu1 %v6650_v5  ;;  %v31858_v5 = vmov 17  }
 0x464   :  { %28810 = vmatpush3.bf16.msra.mxu1 %v37918_v8  ;;  %29102 = vmatprep.subr.bf16.mxu0 %v37671_v11 }
 0x465   :  { %28811 = vmatprep.subr.bf16.mxu1 %v37671_v11  ;;  %23631 = vmatprep.mubr.msk.f32.mxu1 %vm31836_vm0, %v37732_v44 }
 0x466   :  { %31743 = vset.pattern.permute.xlu0 %v31858_v5  ;;  %v38000_v5 = vld [vmem:[#allocation35_spill] sm:$0xff] }
 0x467   :  { %29104 = vmatpush3.bf16.msra.mxu0 %v37972_v61  ;;  %13033 = vperm.xlu0 %31743, %v34045_v60  }
 0x468   :  { %28813 = vmatpush3.bf16.msra.mxu1 %v37997_v27  ;;  %29105 = vmatprep.subr.bf16.mxu0 %v37671_v11 }
 0x469   :  { %28814 = vmatprep.subr.bf16.mxu1 %v37671_v11 }
 0x46b   :  { %29107 = vmatpush3.bf16.msra.mxu0 %v37973_v45  ;;  %31746 = vset.pattern.permute.xlu0 %v31859_v63  ;;  %v38002_v63 = vld [vmem:[#allocation46_spill] sm:$0xff] }
 0x46c   :  { %28816 = vmatpush3.bf16.msra.mxu1 %v37998_v59  ;;  %29108 = vmatprep.subr.bf16.mxu0 %v37671_v11 }
 0x46d   :  { %28817 = vmatprep.subr.bf16.mxu1 %v37671_v11  ;;  %13681 = vperm.xlu0 %31746, %v34045_v60  }
 0x46f   :  { %29110 = vmatpush3.bf16.msra.mxu0 %v37974_v37 }
 0x470   :  { %28819 = vmatpush3.bf16.msra.mxu1 %v37999_v20  ;;  %29111 = vmatprep.subr.bf16.mxu0 %v37671_v11 }
 0x471   :  { %28820 = vmatprep.subr.bf16.mxu1 %v37671_v11  ;;  %31749 = vset.pattern.permute.xlu0 %v31860_v53  ;;  %v38003_v53 = vld [vmem:[#allocation52_spill] sm:$0xff] }
 0x472   :  { %16917 = vperm.xlu0 %31749, %v34045_v60   ;;  %v38004_v60 = vld [vmem:[#allocation47_spill] sm:$0xff] }
 0x473   :  { %29113 = vmatpush3.bf16.msra.mxu0 %v37975_v10 }
 0x474   :  { %28822 = vmatpush3.bf16.msra.mxu1 %v38000_v5  ;;  %29114 = vmatprep.subr.bf16.mxu0 %v37671_v11 }
 0x475   :  { %28823 = vmatprep.subr.bf16.mxu1 %v37671_v11 }
 0x477   :  { %29116 = vmatpush3.bf16.msra.mxu0 %v37976_v13  ;;  %v38014_v13 = vld [vmem:[#allocation7_spill] sm:$0xff] }
 0x478   :  { %28825 = vmatpush3.bf16.msra.mxu1 %v38001_v55  ;;  %29117 = vmatprep.subr.bf16.mxu0 %v37671_v11 }
 0x479   :  { %28826 = vmatprep.subr.bf16.mxu1 %v37671_v11 }
 0x47b   :  { %29119 = vmatpush3.bf16.msra.mxu0 %v37977_v3  ;;  %v38007_v3 = vld [vmem:[#allocation58_spill] sm:$0xff] }
 0x47c   :  { %28828 = vmatpush3.bf16.msra.mxu1 %v38002_v63  ;;  %29120 = vmatprep.subr.bf16.mxu0 %v37671_v11 }
 0x47d   :  { %28829 = vmatprep.subr.bf16.mxu1 %v37671_v11 }
 0x47e   :  { %24052 = vmatmul.mubr.msk.f32.vlgmr.msra.gmra.mrb[4].mxu0 %vm7863_vm11, %v37814_v19 }
 0x47f   :  { %29122 = vmatpush3.bf16.msra.mxu0 %v37978_v2  ;;  %24086 = vmatprep.mubr.msk.f32.mxu0 %vm31836_vm0, %v37732_v44  ;;  %v38005_v2 = vld [vmem:[#allocation50_spill] sm:$0xff] }
 0x480   :  { %28831 = vmatpush3.bf16.msra.mxu1 %v38003_v53  ;;  %29123 = vmatprep.subr.bf16.mxu0 %v37671_v11 }
 0x481   :  { %28832 = vmatprep.subr.bf16.mxu1 %v37671_v11 }
 0x483   :  { %29125 = vmatpush3.bf16.msra.mxu0 %v37979_v34  ;;  %23632 = vmatmul.mubr.msk.f32.vlgmr.msra.gmra.mrb[4].mxu1 %vm5915_vm12, %v37814_v19  ;;  %v38006_v34 = vld [vmem:[#allocation55_spill] sm:$0xff] }
 0x484   :  { %28834 = vmatpush3.bf16.msra.mxu1 %v38004_v60  ;;  %29126 = vmatprep.subr.bf16.mxu0 %v37671_v11 }
 0x485   :  { %28835 = vmatprep.subr.bf16.mxu1 %v37671_v11  ;;  %23666 = vmatprep.mubr.msk.f32.mxu1 %vm31836_vm0, %v37732_v44 }
 0x487   :  { %29128 = vmatpush3.bf16.msra.mxu0 %v37980_v0  ;;  %v38008_v0 = vld [vmem:[#allocation60_spill] sm:$0xff] }
 0x488   :  { %28837 = vmatpush3.bf16.msra.mxu1 %v38005_v2  ;;  %29129 = vmatprep.subr.bf16.mxu0 %v37671_v11 }
 0x489   :  { %28838 = vmatprep.subr.bf16.mxu1 %v37671_v11 }
 0x48b   :  { %29131 = vmatpush3.bf16.msra.mxu0 %v37981_v22  ;;  %v38009_v22 = vld [vmem:[#allocation62_spill] sm:$0xff] }
 0x48c   :  { %28840 = vmatpush3.bf16.msra.mxu1 %v38006_v34  ;;  %29132 = vmatprep.subr.bf16.mxu0 %v37671_v11 }
 0x48d   :  { %28841 = vmatprep.subr.bf16.mxu1 %v37671_v11 }
 0x48f   :  { %29134 = vmatpush3.bf16.msra.mxu0 %v37982_v47  ;;  %v38010_v47 = vld [vmem:[#allocation64_spill] sm:$0xff] }
 0x490   :  { %28843 = vmatpush3.bf16.msra.mxu1 %v38007_v3  ;;  %29135 = vmatprep.subr.bf16.mxu0 %v37671_v11 }
 0x491   :  { %28844 = vmatprep.subr.bf16.mxu1 %v37671_v11 }
 0x493   :  { %29137 = vmatpush3.bf16.msra.mxu0 %v37983_v62  ;;  %v38013_v62 = vand.u32 4294901760, %v34360_v42 }
 0x494   :  { %28846 = vmatpush3.bf16.msra.mxu1 %v38008_v0  ;;  %29138 = vmatprep.subr.bf16.mxu0 %v37671_v11 }
 0x495   :  { %28847 = vmatprep.subr.bf16.mxu1 %v37671_v11 }
 0x497   :  { %29140 = vmatpush3.bf16.msra.mxu0 %v37984_v50  ;;  %v38011_v50 = vld [vmem:[#allocation67_spill] sm:$0xff] }
 0x498   :  { %28849 = vmatpush3.bf16.msra.mxu1 %v38009_v22  ;;  %29141 = vmatprep.subr.bf16.mxu0 %v37671_v11 }
 0x499   :  { %28850 = vmatprep.subr.bf16.mxu1 %v37671_v11 }
 0x49b   :  { %29143 = vmatpush3.bf16.msra.mxu0 %v37985_v15  ;;  %v38012_v15 = vand.u32 4294901760, %v34348_v6 }
 0x49c   :  { %28852 = vmatpush3.bf16.msra.mxu1 %v38010_v47  ;;  %29144 = vmatprep.subr.bf16.mxu0 %v37671_v11 }
 0x49d   :  { %28853 = vmatprep.subr.bf16.mxu1 %v37671_v11 }
 0x49e   :  { %24087 = vmatmul.mubr.f32.vlgmr.msra.gmra.mrb[4].mxu0 %v34348_v6  ;;  %v38018_v6 = vld [vmem:[#allocation73_spill] sm:$0xff] }
 0x49f   :  { %29146 = vmatpush3.bf16.msra.mxu0 %v37733_v29  ;;  %24121 = vmatprep.mubr.msk.f32.mxu0 %vm31836_vm0, %v37732_v44 }
 0x4a0   :  { %28855 = vmatpush3.bf16.msra.mxu1 %v38011_v50  ;;  %29147 = vmatprep.subr.bf16.mxu0 %v37671_v11 }
 0x4a1   :  { %28856 = vmatprep.subr.bf16.mxu1 %v37671_v11 }
 0x4a3   :  { %29149 = vmatpush3.bf16.msra.mxu0 %v37735_v1  ;;  %23667 = vmatmul.mubr.f32.vlgmr.msra.gmra.mrb[4].mxu1 %v34360_v42  ;;  %v38016_v42 = vld [vmem:[#allocation20_spill] sm:$0xff] }
 0x4a4   :  { %28858 = vmatpush3.bf16.msra.mxu1 %v37910_v56  ;;  %29150 = vmatprep.subr.bf16.mxu0 %v37671_v11 }
 0x4a5   :  { %28859 = vmatprep.subr.bf16.mxu1 %v37671_v11  ;;  %23701 = vmatprep.mubr.msk.f32.mxu1 %vm31836_vm0, %v37732_v44 }
 0x4a7   :  { %29152 = vmatpush3.bf16.msra.mxu0 %v37866_v26 }
 0x4a8   :  { %28861 = vmatpush3.bf16.msra.mxu1 %v37911_v58  ;;  %29153 = vmatprep.subr.bf16.mxu0 %v37671_v11 }
 0x4a9   :  { %28862 = vmatprep.subr.bf16.mxu1 %v37671_v11 }
 0x4ab   :  { %29155 = vmatpush3.bf16.msra.mxu0 %v37868_v43 }
 0x4ac   :  { %28864 = vmatpush3.bf16.msra.mxu1 %v37912_v51  ;;  %29156 = vmatprep.subr.bf16.mxu0 %v37671_v11 }
 0x4ad   :  { %28865 = vmatprep.subr.bf16.mxu1 %v37671_v11 }
 0x4af   :  { %29158 = vmatpush3.bf16.msra.mxu0 %v37870_v33 }
 0x4b0   :  { %28867 = vmatpush3.bf16.msra.mxu1 %v37913_v4  ;;  %29159 = vmatprep.subr.bf16.mxu0 %v37671_v11 }
 0x4b1   :  { %28868 = vmatprep.subr.bf16.mxu1 %v37671_v11 }
 0x4b3   :  { %29161 = vmatpush3.bf16.msra.mxu0 %v37872_v30 }
 0x4b4   :  { %28870 = vmatpush3.bf16.msra.mxu1 %v37914_v52  ;;  %29162 = vmatprep.subr.bf16.mxu0 %v37671_v11 }
 0x4b5   :  { %28871 = vmatprep.subr.bf16.mxu1 %v37671_v11 }
 0x4b7   :  { %29164 = vmatpush3.bf16.msra.mxu0 %v37968_v14 }
 0x4b8   :  { %28873 = vmatpush3.bf16.msra.mxu1 %v37915_v25  ;;  %29165 = vmatprep.subr.bf16.mxu0 %v37671_v11 }
 0x4b9   :  { %28874 = vmatprep.subr.bf16.mxu1 %v37671_v11  ;;  %v34889_v18 = vpop.permute.xlu0 %9149 }
 0x4ba   :  { %vm9151_vm15 = vcmp.eq.s32.totalorder %v34889_v18, %v32537_v36 }
 0x4bb   :  { %29167 = vmatpush3.bf16.msra.mxu0 %v37969_v7 }
 0x4bc   :  { %28876 = vmatpush3.bf16.msra.mxu1 %v37916_v9  ;;  %29168 = vmatprep.subr.bf16.mxu0 %v37671_v11 }
 0x4bd   :  { %28877 = vmatprep.subr.bf16.mxu1 %v37671_v11 }
 0x4be   :  { %24122 = vmatmul.mubr.f32.vlgmr.msra.gmra.mrb[4].mxu0 %v38012_v15  ;;  %v38015_v15 = vld [vmem:[#allocation9_spill] sm:$0xff] }
 0x4bf   :  { %29170 = vmatpush3.bf16.msra.mxu0 %v37988_v23  ;;  %24156 = vmatprep.mubr.msk.f32.mxu0 %vm31836_vm0, %v37732_v44 }
 0x4c0   :  { %28879 = vmatpush3.bf16.msra.mxu1 %v37917_v21  ;;  %29171 = vmatprep.subr.bf16.mxu0 %v37671_v11 }
 0x4c1   :  { %28880 = vmatprep.subr.bf16.mxu1 %v37671_v11 }
 0x4c3   :  { %29173 = vmatpush3.bf16.msra.mxu0 %v37989_v40  ;;  %23702 = vmatmul.mubr.f32.vlgmr.msra.gmra.mrb[4].mxu1 %v38013_v62  ;;  %v38017_v62 = vld [vmem:[#allocation71_spill] sm:$0xff] }
 0x4c4   :  { %28882 = vmatpush3.bf16.msra.mxu1 %v38014_v13  ;;  %29174 = vmatprep.subr.bf16.mxu0 %v37671_v11 }
 0x4c5   :  { %28883 = vmatprep.subr.bf16.mxu1 %v37671_v11  ;;  %23736 = vmatprep.mubr.msk.f32.mxu1 %vm31836_vm0, %v37732_v44 }
 0x4c7   :  { %29176 = vmatpush3.bf16.msra.mxu0 %v37990_v24 }
 0x4c8   :  { %28885 = vmatpush3.bf16.msra.mxu1 %v38015_v15  ;;  %29177 = vmatprep.subr.bf16.mxu0 %v37671_v11 }
 0x4c9   :  { %28886 = vmatprep.subr.bf16.mxu1 %v37671_v11 }
 0x4cb   :  { %29179 = vmatpush3.bf16.msra.mxu0 %v37991_v46  ;;  %v38019_v46 = vld [vmem:[#allocation31_spill] sm:$0xff] }
 0x4cc   :  { %28888 = vmatpush3.bf16.msra.mxu1 %v38016_v42  ;;  %29180 = vmatprep.subr.bf16.mxu0 %v37671_v11 }
 0x4cd   :  { %28889 = vmatprep.subr.bf16.mxu1 %v37671_v11 }
 0x4cf   :  { %29182 = vmatpush3.bf16.msra.mxu0 %v37992_v57  ;;  %v38020_v57 = vld [vmem:[#allocation33_spill] sm:$0xff] }
 0x4d0   :  { %28891 = vmatpush3.bf16.msra.mxu1 %v38017_v62  ;;  %29183 = vmatprep.subr.bf16.mxu0 %v37671_v11 }
 0x4d1   :  { %28892 = vmatprep.subr.bf16.mxu1 %v37671_v11 }
 0x4d3   :  { %29185 = vmatpush3.bf16.msra.mxu0 %v37993_v41  ;;  %v34631_v41 = vsub.f32 %v18547_v48, %v18547_v48 }
 0x4d4   :  { %28894 = vmatpush3.bf16.msra.mxu1 %v38018_v6  ;;  %29186 = vmatprep.subr.bf16.mxu0 %v37671_v11 }
 0x4d5   :  { %28895 = vmatprep.subr.bf16.mxu1 %v37671_v11  ;;  %v37482_v23 = vand.u32 4294901760, %v34631_v41 }
 0x4d7   :  { %29188 = vmatpush3.bf16.msra.mxu0 %v37994_v38  ;;  %v38021_v38 = vld [vmem:[#allocation34_spill] sm:$0xff]  ;;  %v8591_v45 = vsub.f32 %v34631_v41, %v37482_v23 }
 0x4d8   :  { %28897 = vmatpush3.bf16.msra.mxu1 %v38019_v46  ;;  %29189 = vmatprep.subr.bf16.mxu0 %v37671_v11 }
 0x4d9   :  { %28898 = vmatprep.subr.bf16.mxu1 %v37671_v11 }
 0x4db   :  { %29191 = vmatpush3.bf16.msra.mxu0 %v37995_v32  ;;  %v34624_v32 = vpop.permute.xlu1 %7207 }
 0x4dc   :  { %28900 = vmatpush3.bf16.msra.mxu1 %v38020_v57  ;;  %29192 = vmatprep.subr.bf16.mxu0 %v37671_v11  ;;  %vm7209_vm14 = vcmp.eq.s32.totalorder %v34624_v32, %v32537_v36  ;;  %v18555_v32 = vsel %vm9151_vm15, 1.0, %v37732_v44 }
 0x4dd   :  { %28901 = vmatprep.subr.bf16.mxu1 %v37671_v11  ;;  %v18543_v24 = vsel %vm7209_vm14, 1.0, %v37732_v44 }
 0x4de   :  { %24157 = vmatmul.mubr.msk.f32.vlgmr.msra.gmra.mrb[4].mxu0 %vm7863_vm11, %v37814_v19  ;;  %v34646_v37 = vsub.f32 %v18543_v24, %v18543_v24  ;;  %v8592_v24 = vand.u32 4294901760, %v8591_v45  ;;  %v38024_v45 = vld [vmem:[#allocation45_spill] sm:$0xff] }
 0x4df   :  { %29194 = vmatpush3.bf16.msra.mxu0 %v37733_v29  ;;  %24191 = vmatprep.mubr.msk.f32.mxu0 %vm31836_vm0, %v37732_v44 }
 0x4e0   :  { %28903 = vmatpush3.bf16.msra.mxu1 %v38021_v38  ;;  %29195 = vmatprep.subr.bf16.mxu0 %v37671_v11 }
 0x4e1   :  { %28904 = vmatprep.subr.bf16.mxu1 %v37671_v11 }
 0x4e3   :  { %29197 = vmatpush3.bf16.msra.mxu0 %v37735_v1  ;;  %23737 = vmatmul.mubr.msk.f32.vlgmr.msra.gmra.mrb[4].mxu1 %vm5915_vm12, %v37814_v19 }
 0x4e4   :  { %28906 = vmatpush3.bf16.msra.mxu1 %v37910_v56  ;;  %29198 = vmatprep.subr.bf16.mxu0 %v37671_v11 }
 0x4e5   :  { %28907 = vmatprep.subr.bf16.mxu1 %v37671_v11  ;;  %23771 = vmatprep.mubr.msk.f32.mxu1 %vm31836_vm0, %v37732_v44 }
 0x4e7   :  { %29200 = vmatpush3.bf16.msra.mxu0 %v37866_v26 }
 0x4e8   :  { %28909 = vmatpush3.bf16.msra.mxu1 %v37911_v58  ;;  %29201 = vmatprep.subr.bf16.mxu0 %v37671_v11 }
 0x4e9   :  { %28910 = vmatprep.subr.bf16.mxu1 %v37671_v11 }
 0x4eb   :  { %29203 = vmatpush3.bf16.msra.mxu0 %v37868_v43 }
 0x4ec   :  { %28912 = vmatpush3.bf16.msra.mxu1 %v37912_v51  ;;  %29204 = vmatprep.subr.bf16.mxu0 %v37671_v11 }
 0x4ed   :  { %28913 = vmatprep.subr.bf16.mxu1 %v37671_v11 }
 0x4ef   :  { %29206 = vmatpush3.bf16.msra.mxu0 %v37870_v33 }
 0x4f0   :  { %28915 = vmatpush3.bf16.msra.mxu1 %v37913_v4  ;;  %29207 = vmatprep.subr.bf16.mxu0 %v37671_v11 }
 0x4f1   :  { %28916 = vmatprep.subr.bf16.mxu1 %v37671_v11 }
 0x4f3   :  { %29209 = vmatpush3.bf16.msra.mxu0 %v37872_v30 }
 0x4f4   :  { %28918 = vmatpush3.bf16.msra.mxu1 %v37914_v52  ;;  %29210 = vmatprep.subr.bf16.mxu0 %v37671_v11 }
 0x4f5   :  { %28919 = vmatprep.subr.bf16.mxu1 %v37671_v11 }
 0x4f7   :  { %29212 = vmatpush3.bf16.msra.mxu0 %v37968_v14 }
 0x4f8   :  { %28921 = vmatpush3.bf16.msra.mxu1 %v37915_v25  ;;  %29213 = vmatprep.subr.bf16.mxu0 %v37671_v11 }
 0x4f9   :  { %28922 = vmatprep.subr.bf16.mxu1 %v37671_v11 }
 0x4fb   :  { %29215 = vmatpush3.bf16.msra.mxu0 %v37969_v7 }
 0x4fc   :  { %28924 = vmatpush3.bf16.msra.mxu1 %v37916_v9  ;;  %29216 = vmatprep.subr.bf16.mxu0 %v37671_v11 }
 0x4fd   :  { %28925 = vmatprep.subr.bf16.mxu1 %v37671_v11 }
 0x4fe   :  { %24192 = vmatmul.mubr.msk.f32.vlgmr.msra.gmra.mrb[4].mxu0 %vm7863_vm11, %v37814_v19 }
 0x4ff   :  { %29218 = vmatpush3.bf16.msra.mxu0 %v37910_v56  ;;  %24226 = vmatprep.mubr.msk.f32.mxu0 %vm31836_vm0, %v37732_v44 }
 0x500   :  { %28927 = vmatpush3.bf16.msra.mxu1 %v37917_v21  ;;  %29219 = vmatprep.subr.bf16.mxu0 %v37671_v11 }
 0x501   :  { %28928 = vmatprep.subr.bf16.mxu1 %v37671_v11 }
 0x503   :  { %29221 = vmatpush3.bf16.msra.mxu0 %v37911_v58  ;;  %23772 = vmatmul.mubr.msk.f32.vlgmr.msra.gmra.mrb[4].mxu1 %vm5915_vm12, %v37814_v19 }
 0x504   :  { %28930 = vmatpush3.bf16.msra.mxu1 %v32865_v39  ;;  %29222 = vmatprep.subr.bf16.mxu0 %v37671_v11 }
 0x505   :  { %28931 = vmatprep.subr.bf16.mxu1 %v37671_v11  ;;  %23806 = vmatprep.mubr.msk.f32.mxu1 %vm31836_vm0, %v37732_v44 }
 0x507   :  { %29224 = vmatpush3.bf16.msra.mxu0 %v37912_v51 }
 0x508   :  { %28933 = vmatpush3.bf16.msra.mxu1 %v32883_v31  ;;  %29225 = vmatprep.subr.bf16.mxu0 %v37671_v11 }
 0x509   :  { %28934 = vmatprep.subr.bf16.mxu1 %v37671_v11 }
 0x50b   :  { %29227 = vmatpush3.bf16.msra.mxu0 %v37913_v4 }
 0x50c   :  { %28936 = vmatpush3.bf16.msra.mxu1 %v32905_v28  ;;  %29228 = vmatprep.subr.bf16.mxu0 %v37671_v11 }
 0x50d   :  { %28937 = vmatprep.subr.bf16.mxu1 %v37671_v11 }
 0x50f   :  { %29230 = vmatpush3.bf16.msra.mxu0 %v37914_v52 }
 0x510   :  { %28939 = vmatpush3.bf16.msra.mxu1 %v37865_v49  ;;  %29231 = vmatprep.subr.bf16.mxu0 %v37671_v11 }
 0x511   :  { %v34640_v40 = vpop.f32.mrb[2].mxu0  ;;  %28940 = vmatprep.subr.bf16.mxu1 %v37671_v11 }
 0x512   :  { %38022 = vst [vmem:[#allocation6_spill] sm:$0xff] %v34640_v40  ;;  %v23353_v10 = vpop.f32.mrb[3].mxu0  ;;  %v17567_v48 = vmul.f32 %v33791_v12, %v34640_v40  ;;  %v38023_v40 = vld [vmem:[#allocation44_spill] sm:$0xff] }
 0x513   :  { %29233 = vmatpush3.bf16.msra.mxu0 %v37915_v25  ;;  %v37483_v10 = vand.u32 4294901760, %v34646_v37 }
 0x514   :  { %28942 = vmatpush3.bf16.msra.mxu1 %v37867_v17  ;;  %17568 = vadd.xlane.f32.xlu0 %v17567_v48 }
 0x515   :  { %29234 = vmatprep.subr.bf16.mxu0 %v37671_v11  ;;  %28943 = vmatprep.subr.bf16.mxu1 %v37671_v11  ;;  %v7296_v48 = vsub.f32 %v34646_v37, %v37483_v10  ;;  %v38025_v10 = vld [vmem:[#allocation48_spill] sm:$0xff] }
 0x517   :  { %29236 = vmatpush3.bf16.msra.mxu0 %v37916_v9  ;;  %v7297_v23 = vand.u32 4294901760, %v7296_v48  ;;  %v38028_v48 = vld [vmem:[#allocation75_spill] sm:$0xff] }
 0x518   :  { %28945 = vmatpush3.bf16.msra.mxu1 %v37869_v16  ;;  %29237 = vmatprep.subr.bf16.mxu0 %v37671_v11 }
 0x519   :  { %28946 = vmatprep.subr.bf16.mxu1 %v37671_v11 }
 0x51b   :  { %29239 = vmatpush3.bf16.msra.mxu0 %v37917_v21 }
 0x51c   :  { %28948 = vmatpush3.bf16.msra.mxu1 %v38023_v40  ;;  %29240 = vmatprep.subr.bf16.mxu0 %v37671_v11 }
 0x51d   :  { %28949 = vmatprep.subr.bf16.mxu1 %v37671_v11 }
 0x51e   :  { %24227 = vmatmul.mubr.f32.vlgmr.msra.gmra.mrb[4].mxu0 %v8592_v24  ;;  %v38026_v24 = vld [vmem:[#allocation49_spill] sm:$0xff] }
 0x51f   :  { %29242 = vmatpush3.bf16.msra.mxu0 %v37918_v8  ;;  %24261 = vmatprep.mubr.msk.f32.mxu0 %vm31836_vm0, %v37732_v44 }
 0x520   :  { %28951 = vmatpush3.bf16.msra.mxu1 %v38024_v45  ;;  %29243 = vmatprep.subr.bf16.mxu0 %v37671_v11 }
 0x521   :  { %28952 = vmatprep.subr.bf16.mxu1 %v37671_v11 }
 0x523   :  { %29245 = vmatpush3.bf16.msra.mxu0 %v37997_v27  ;;  %23807 = vmatmul.mubr.f32.vlgmr.msra.gmra.mrb[4].mxu1 %v7297_v23  ;;  %v38027_v23 = vld [vmem:[#allocation74_spill] sm:$0xff]  ;;  %v38043_v27 = vld [vmem:[#allocation40_spill] sm:$0xff] }
 0x524   :  { %28954 = vmatpush3.bf16.msra.mxu1 %v38025_v10  ;;  %29246 = vmatprep.subr.bf16.mxu0 %v37671_v11 }
 0x525   :  { %28955 = vmatprep.subr.bf16.mxu1 %v37671_v11  ;;  %23841 = vmatprep.mubr.msk.f32.mxu1 %vm31836_vm0, %v37732_v44 }
 0x527   :  { %29248 = vmatpush3.bf16.msra.mxu0 %v37998_v59  ;;  %v38029_v59 = vld [vmem:[#allocation76_spill] sm:$0xff] }
 0x528   :  { %28957 = vmatpush3.bf16.msra.mxu1 %v38026_v24  ;;  %29249 = vmatprep.subr.bf16.mxu0 %v37671_v11 }
 0x529   :  { %28958 = vmatprep.subr.bf16.mxu1 %v37671_v11 }
 0x52b   :  { %29251 = vmatpush3.bf16.msra.mxu0 %v37999_v20  ;;  %v38030_v20 = vld [vmem:[#allocation77_spill] sm:$0xff] }
 0x52c   :  { %28960 = vmatpush3.bf16.msra.mxu1 %v38027_v23  ;;  %29252 = vmatprep.subr.bf16.mxu0 %v37671_v11 }
 0x52d   :  { %28961 = vmatprep.subr.bf16.mxu1 %v37671_v11 }
 0x52f   :  { %29254 = vmatpush3.bf16.msra.mxu0 %v38000_v5  ;;  %v38031_v5 = vld [vmem:[#allocation78_spill] sm:$0xff] }
 0x530   :  { %28963 = vmatpush3.bf16.msra.mxu1 %v38028_v48  ;;  %29255 = vmatprep.subr.bf16.mxu0 %v37671_v11 }
 0x531   :  { %28964 = vmatprep.subr.bf16.mxu1 %v37671_v11 }
 0x533   :  { %29257 = vmatpush3.bf16.msra.mxu0 %v38001_v55  ;;  %v38036_v55 = vld [vmem:[#allocation83_spill] sm:$0xff] }
 0x534   :  { %28966 = vmatpush3.bf16.msra.mxu1 %v38029_v59  ;;  %29258 = vmatprep.subr.bf16.mxu0 %v37671_v11 }
 0x535   :  { %28967 = vmatprep.subr.bf16.mxu1 %v37671_v11 }
 0x537   :  { %29260 = vmatpush3.bf16.msra.mxu0 %v38002_v63  ;;  %v38032_v63 = vld [vmem:[#allocation79_spill] sm:$0xff] }
 0x538   :  { %28969 = vmatpush3.bf16.msra.mxu1 %v38030_v20  ;;  %29261 = vmatprep.subr.bf16.mxu0 %v37671_v11 }
 0x539   :  { %28970 = vmatprep.subr.bf16.mxu1 %v37671_v11 }
 0x53b   :  { %29263 = vmatpush3.bf16.msra.mxu0 %v38003_v53  ;;  %v38033_v53 = vld [vmem:[#allocation80_spill] sm:$0xff] }
 0x53c   :  { %28972 = vmatpush3.bf16.msra.mxu1 %v38031_v5  ;;  %29264 = vmatprep.subr.bf16.mxu0 %v37671_v11 }
 0x53d   :  { %28973 = vmatprep.subr.bf16.mxu1 %v37671_v11 }
 0x53e   :  { %24262 = vmatmul.mubr.msk.f32.vlgmr.msra.gmra.mrb[4].mxu0 %vm7857_vm13, %v37814_v19 }
 0x53f   :  { %29266 = vmatpush3.bf16.msra.mxu0 %v38004_v60  ;;  %24296 = vmatprep.mubr.msk.f32.mxu0 %vm31836_vm0, %v37732_v44  ;;  %v38034_v60 = vld [vmem:[#allocation81_spill] sm:$0xff] }
 0x540   :  { %28975 = vmatpush3.bf16.msra.mxu1 %v38032_v63  ;;  %29267 = vmatprep.subr.bf16.mxu0 %v37671_v11 }
 0x541   :  { %28976 = vmatprep.subr.bf16.mxu1 %v37671_v11 }
 0x543   :  { %29269 = vmatpush3.bf16.msra.mxu0 %v38005_v2  ;;  %23842 = vmatmul.mubr.msk.f32.vlgmr.msra.gmra.mrb[4].mxu1 %vm7209_vm14, %v37814_v19  ;;  %v38035_v2 = vld [vmem:[#allocation82_spill] sm:$0xff] }
 0x544   :  { %28978 = vmatpush3.bf16.msra.mxu1 %v38033_v53  ;;  %29270 = vmatprep.subr.bf16.mxu0 %v37671_v11 }
 0x545   :  { %28979 = vmatprep.subr.bf16.mxu1 %v37671_v11  ;;  %23876 = vmatprep.mubr.msk.f32.mxu1 %vm31836_vm0, %v37732_v44 }
 0x547   :  { %29272 = vmatpush3.bf16.msra.mxu0 %v38006_v34  ;;  %v38037_v34 = vld [vmem:[#allocation84_spill] sm:$0xff] }
 0x548   :  { %28981 = vmatpush3.bf16.msra.mxu1 %v38034_v60  ;;  %29273 = vmatprep.subr.bf16.mxu0 %v37671_v11 }
 0x549   :  { %28982 = vmatprep.subr.bf16.mxu1 %v37671_v11 }
 0x54b   :  { %29275 = vmatpush3.bf16.msra.mxu0 %v38007_v3  ;;  %v38038_v3 = vld [vmem:[#allocation85_spill] sm:$0xff] }
 0x54c   :  { %28984 = vmatpush3.bf16.msra.mxu1 %v38035_v2  ;;  %29276 = vmatprep.subr.bf16.mxu0 %v37671_v11 }
 0x54d   :  { %28985 = vmatprep.subr.bf16.mxu1 %v37671_v11 }
 0x54f   :  { %29278 = vmatpush3.bf16.msra.mxu0 %v38008_v0  ;;  %v38039_v0 = vld [vmem:[#allocation86_spill] sm:$0xff] }
 0x550   :  { %28987 = vmatpush3.bf16.msra.mxu1 %v38036_v55  ;;  %29279 = vmatprep.subr.bf16.mxu0 %v37671_v11 }
 0x551   :  { %28988 = vmatprep.subr.bf16.mxu1 %v37671_v11 }
 0x553   :  { %29281 = vmatpush3.bf16.msra.mxu0 %v38009_v22  ;;  %v38042_v22 = vand.u32 4294901760, %v34646_v37 }
 0x554   :  { %28990 = vmatpush3.bf16.msra.mxu1 %v38037_v34  ;;  %29282 = vmatprep.subr.bf16.mxu0 %v37671_v11 }
 0x555   :  { %28991 = vmatprep.subr.bf16.mxu1 %v37671_v11 }
 0x557   :  { %29284 = vmatpush3.bf16.msra.mxu0 %v38010_v47  ;;  %v38040_v47 = vld [vmem:[#allocation87_spill] sm:$0xff] }
 0x558   :  { %28993 = vmatpush3.bf16.msra.mxu1 %v38038_v3  ;;  %29285 = vmatprep.subr.bf16.mxu0 %v37671_v11 }
 0x559   :  { %28994 = vmatprep.subr.bf16.mxu1 %v37671_v11 }
 0x55b   :  { %29287 = vmatpush3.bf16.msra.mxu0 %v38011_v50  ;;  %v38041_v50 = vand.u32 4294901760, %v34631_v41 }
 0x55c   :  { %28996 = vmatpush3.bf16.msra.mxu1 %v38039_v0  ;;  %29288 = vmatprep.subr.bf16.mxu0 %v37671_v11 }
 0x55d   :  { %28997 = vmatprep.subr.bf16.mxu1 %v37671_v11 }
 0x55e   :  { %24297 = vmatmul.mubr.f32.vlgmr.msra.gmra.mrb[4].mxu0 %v34631_v41  ;;  %v38046_v41 = vld [vmem:[#allocation13_spill] sm:$0xff] }
 0x55f   :  { %29290 = vmatpush3.bf16.msra.mxu0 %v37910_v56  ;;  %24331 = vmatprep.mubr.msk.f32.mxu0 %vm31836_vm0, %v37732_v44 }
 0x560   :  { %28999 = vmatpush3.bf16.msra.mxu1 %v38040_v47  ;;  %29291 = vmatprep.subr.bf16.mxu0 %v37671_v11 }
 0x561   :  { %29000 = vmatprep.subr.bf16.mxu1 %v37671_v11 }
 0x563   :  { %29293 = vmatpush3.bf16.msra.mxu0 %v37911_v58  ;;  %23877 = vmatmul.mubr.f32.vlgmr.msra.gmra.mrb[4].mxu1 %v34646_v37  ;;  %v38047_v37 = vld [vmem:[#allocation43_spill] sm:$0xff] }
 0x564   :  { %29002 = vmatpush3.bf16.msra.mxu1 %v32865_v39  ;;  %29294 = vmatprep.subr.bf16.mxu0 %v37671_v11 }
 0x565   :  { %29003 = vmatprep.subr.bf16.mxu1 %v37671_v11  ;;  %23911 = vmatprep.mubr.msk.f32.mxu1 %vm31836_vm0, %v37732_v44 }
 0x567   :  { %29296 = vmatpush3.bf16.msra.mxu0 %v37912_v51 }
 0x568   :  { %29005 = vmatpush3.bf16.msra.mxu1 %v32883_v31  ;;  %29297 = vmatprep.subr.bf16.mxu0 %v37671_v11 }
 0x569   :  { %29006 = vmatprep.subr.bf16.mxu1 %v37671_v11 }
 0x56b   :  { %29299 = vmatpush3.bf16.msra.mxu0 %v37913_v4 }
 0x56c   :  { %29008 = vmatpush3.bf16.msra.mxu1 %v32905_v28  ;;  %29300 = vmatprep.subr.bf16.mxu0 %v37671_v11 }
 0x56d   :  { %29009 = vmatprep.subr.bf16.mxu1 %v37671_v11 }
 0x56f   :  { %29302 = vmatpush3.bf16.msra.mxu0 %v37914_v52 }
 0x570   :  { %29011 = vmatpush3.bf16.msra.mxu1 %v37865_v49  ;;  %29303 = vmatprep.subr.bf16.mxu0 %v37671_v11 }
 0x571   :  { %29012 = vmatprep.subr.bf16.mxu1 %v37671_v11 }
 0x573   :  { %29305 = vmatpush3.bf16.msra.mxu0 %v37915_v25 }
 0x574   :  { %29014 = vmatpush3.bf16.msra.mxu1 %v37867_v17  ;;  %29306 = vmatprep.subr.bf16.mxu0 %v37671_v11 }
 0x575   :  { %29015 = vmatprep.subr.bf16.mxu1 %v37671_v11 }
 0x577   :  { %29308 = vmatpush3.bf16.msra.mxu0 %v37916_v9 }
 0x578   :  { %29017 = vmatpush3.bf16.msra.mxu1 %v37869_v16  ;;  %29309 = vmatprep.subr.bf16.mxu0 %v37671_v11 }
 0x579   :  { %29018 = vmatprep.subr.bf16.mxu1 %v37671_v11 }
 0x57b   :  { %29311 = vmatpush3.bf16.msra.mxu0 %v37917_v21 }
 0x57c   :  { %29020 = vmatpush3.bf16.msra.mxu1 %v38023_v40  ;;  %29312 = vmatprep.subr.bf16.mxu0 %v37671_v11 }
 0x57d   :  { %29021 = vmatprep.subr.bf16.mxu1 %v37671_v11 }
 0x57e   :  { %24332 = vmatmul.mubr.f32.vlgmr.msra.gmra.mrb[4].mxu0 %v38041_v50  ;;  %v38044_v50 = vld [vmem:[#allocation11_spill] sm:$0xff] }
 0x57f   :  { %29314 = vmatpush3.bf16.msra.mxu0 %v38014_v13  ;;  %24366 = vmatprep.mubr.msk.f32.mxu0 %vm31836_vm0, %v37732_v44 }
 0x580   :  { %29023 = vmatpush3.bf16.msra.mxu1 %v38024_v45  ;;  %29315 = vmatprep.subr.bf16.mxu0 %v37671_v11 }
 0x581   :  { %29024 = vmatprep.subr.bf16.mxu1 %v37671_v11 }
 0x583   :  { %29317 = vmatpush3.bf16.msra.mxu0 %v38015_v15  ;;  %23912 = vmatmul.mubr.f32.vlgmr.msra.gmra.mrb[4].mxu1 %v38042_v22  ;;  %v38045_v22 = vld [vmem:[#allocation42_spill] sm:$0xff] }
 0x584   :  { %29026 = vmatpush3.bf16.msra.mxu1 %v38043_v27  ;;  %29318 = vmatprep.subr.bf16.mxu0 %v37671_v11 }
 0x585   :  { %29027 = vmatprep.subr.bf16.mxu1 %v37671_v11  ;;  %23946 = vmatprep.mubr.msk.f32.mxu1 %vm31836_vm0, %v37732_v44 }
 0x587   :  { %29320 = vmatpush3.bf16.msra.mxu0 %v38016_v42 }
 0x588   :  { %29029 = vmatpush3.bf16.msra.mxu1 %v38044_v50  ;;  %29321 = vmatprep.subr.bf16.mxu0 %v37671_v11 }
 0x589   :  { %29030 = vmatprep.subr.bf16.mxu1 %v37671_v11 }
 0x58b   :  { %29323 = vmatpush3.bf16.msra.mxu0 %v38017_v62  ;;  %v38048_v62 = vld [vmem:[#allocation15_spill] sm:$0xff] }
 0x58c   :  { %29032 = vmatpush3.bf16.msra.mxu1 %v38045_v22  ;;  %29324 = vmatprep.subr.bf16.mxu0 %v37671_v11 }
 0x58d   :  { %29033 = vmatprep.subr.bf16.mxu1 %v37671_v11 }
 0x58f   :  { %29326 = vmatpush3.bf16.msra.mxu0 %v38018_v6  ;;  %v38049_v6 = vld [vmem:[#allocation17_spill] sm:$0xff] }
 0x590   :  { %29035 = vmatpush3.bf16.msra.mxu1 %v38046_v41  ;;  %29327 = vmatprep.subr.bf16.mxu0 %v37671_v11 }
 0x591   :  { %29036 = vmatprep.subr.bf16.mxu1 %v37671_v11 }
 0x593   :  { %29329 = vmatpush3.bf16.msra.mxu0 %v38019_v46  ;;  %v34909_v46 = vsub.f32 %v18555_v32, %v18555_v32 }
 0x594   :  { %29038 = vmatpush3.bf16.msra.mxu1 %v38047_v37  ;;  %29330 = vmatprep.subr.bf16.mxu0 %v37671_v11 }
 0x595   :  { %29039 = vmatprep.subr.bf16.mxu1 %v37671_v11  ;;  %v37509_v15 = vand.u32 4294901760, %v34909_v46 }
 0x597   :  { %29332 = vmatpush3.bf16.msra.mxu0 %v38020_v57  ;;  %v38050_v57 = vld [vmem:[#allocation88_spill] sm:$0xff]  ;;  %v9238_v32 = vsub.f32 %v34909_v46, %v37509_v15 }
 0x598   :  { %29041 = vmatpush3.bf16.msra.mxu1 %v38048_v62  ;;  %29333 = vmatprep.subr.bf16.mxu0 %v37671_v11 }
 0x599   :  { %29042 = vmatprep.subr.bf16.mxu1 %v37671_v11 }
 0x59b   :  { %29335 = vmatpush3.bf16.msra.mxu0 %v38021_v38  ;;  %v34902_v38 = vpop.permute.xlu1 %9803 }
 0x59c   :  { %29044 = vmatpush3.bf16.msra.mxu1 %v38049_v6  ;;  %29336 = vmatprep.subr.bf16.mxu0 %v37671_v11  ;;  %vm9805_vm1 = vcmp.eq.s32.totalorder %v34902_v38, %v32537_v36 }
 0x59d   :  { %29045 = vmatprep.subr.bf16.mxu1 %v37671_v11  ;;  %v18560_v42 = vsel %vm9805_vm1, 1.0, %v37732_v44 }
 0x59e   :  { %24367 = vmatmul.mubr.msk.f32.vlgmr.msra.gmra.mrb[4].mxu0 %vm7857_vm13, %v37814_v19  ;;  %v34920_v13 = vsub.f32 %v18560_v42, %v18560_v42  ;;  %v9239_v42 = vand.u32 4294901760, %v9238_v32  ;;  %v38053_v32 = vld [vmem:[#allocation51_spill] sm:$0xff] }
 0x59f   :  { %29338 = vmatpush3.bf16.msra.mxu0 %v37910_v56  ;;  %24401 = vmatprep.mubr.msk.f32.mxu0 %vm31836_vm0, %v37732_v44  ;;  %v35163_v18 = vpop.permute.xlu1 %11745 }
 0x5a0   :  { %29047 = vmatpush3.bf16.msra.mxu1 %v38050_v57  ;;  %29339 = vmatprep.subr.bf16.mxu0 %v37671_v11  ;;  %v37510_v8 = vand.u32 4294901760, %v34920_v13  ;;  %vm11747_vm2 = vcmp.eq.s32.totalorder %v35163_v18, %v32537_v36 }
 0x5a1   :  { %29048 = vmatprep.subr.bf16.mxu1 %v37671_v11  ;;  %v18572_v38 = vsel %vm11747_vm2, 1.0, %v37732_v44 }
 0x5a3   :  { %29341 = vmatpush3.bf16.msra.mxu0 %v37911_v58  ;;  %23947 = vmatmul.mubr.msk.f32.vlgmr.msra.gmra.mrb[4].mxu1 %vm7209_vm14, %v37814_v19  ;;  %v35441_v18 = vpop.permute.xlu1 %11739 }
 0x5a4   :  { %29050 = vmatpush3.bf16.msra.mxu1 %v32865_v39  ;;  %29342 = vmatprep.subr.bf16.mxu0 %v37671_v11  ;;  %vm11741_vm4 = vcmp.eq.s32.totalorder %v35441_v18, %v32537_v36 }
 0x5a5   :  { %29051 = vmatprep.subr.bf16.mxu1 %v37671_v11  ;;  %23981 = vmatprep.mubr.msk.f32.mxu1 %vm31836_vm0, %v37732_v44 }
 0x5a7   :  { %29344 = vmatpush3.bf16.msra.mxu0 %v37912_v51 }
 0x5a8   :  { %29053 = vmatpush3.bf16.msra.mxu1 %v32883_v31  ;;  %29345 = vmatprep.subr.bf16.mxu0 %v37671_v11 }
 0x5a9   :  { %29054 = vmatprep.subr.bf16.mxu1 %v37671_v11 }
 0x5ab   :  { %29347 = vmatpush3.bf16.msra.mxu0 %v37913_v4 }
 0x5ac   :  { %29056 = vmatpush3.bf16.msra.mxu1 %v32905_v28  ;;  %29348 = vmatprep.subr.bf16.mxu0 %v37671_v11 }
 0x5ad   :  { %29057 = vmatprep.subr.bf16.mxu1 %v37671_v11 }
 0x5af   :  { %29350 = vmatpush3.bf16.msra.mxu0 %v37914_v52 }
 0x5b0   :  { %29059 = vmatpush3.bf16.msra.mxu1 %v37865_v49  ;;  %29351 = vmatprep.subr.bf16.mxu0 %v37671_v11 }
 0x5b1   :  { %29060 = vmatprep.subr.bf16.mxu1 %v37671_v11 }
 0x5b3   :  { %29353 = vmatpush3.bf16.msra.mxu0 %v37915_v25 }
 0x5b4   :  { %29062 = vmatpush3.bf16.msra.mxu1 %v37867_v17  ;;  %29354 = vmatprep.subr.bf16.mxu0 %v37671_v11 }
 0x5b5   :  { %29063 = vmatprep.subr.bf16.mxu1 %v37671_v11 }
 0x5b7   :  { %29356 = vmatpush3.bf16.msra.mxu0 %v37916_v9 }
 0x5b8   :  { %29065 = vmatpush3.bf16.msra.mxu1 %v37869_v16  ;;  %29357 = vmatprep.subr.bf16.mxu0 %v37671_v11 }
 0x5b9   :  { %29066 = vmatprep.subr.bf16.mxu1 %v37671_v11 }
 0x5bb   :  { %29359 = vmatpush3.bf16.msra.mxu0 %v37917_v21  ;;  %v9892_v21 = vsub.f32 %v34920_v13, %v37510_v8  ;;  %v38055_v8 = vld [vmem:[#allocation57_spill] sm:$0xff] }
 0x5bc   :  { %29068 = vmatpush3.bf16.msra.mxu1 %v38023_v40  ;;  %29360 = vmatprep.subr.bf16.mxu0 %v37671_v11 }
 0x5bd   :  { %29069 = vmatprep.subr.bf16.mxu1 %v37671_v11  ;;  %v9893_v15 = vand.u32 4294901760, %v9892_v21  ;;  %v38051_v21 = vld [vmem:[#allocation38_spill] sm:$0xff] }
 0x5be   :  { %24402 = vmatmul.mubr.msk.f32.vlgmr.msra.gmra.mrb[4].mxu0 %vm7857_vm13, %v37814_v19 }
 0x5bf   :  { %29362 = vmatpush3.bf16.msra.mxu0 %v32865_v39  ;;  %24436 = vmatprep.mubr.msk.f32.mxu0 %vm31836_vm0, %v37732_v44 }
 0x5c0   :  { %29071 = vmatpush3.bf16.msra.mxu1 %v38024_v45  ;;  %29363 = vmatprep.subr.bf16.mxu0 %v37671_v11 }
 0x5c1   :  { %29504 = vmatprep.subr.bf16.mxu1 %v37671_v11 }
 0x5c3   :  { %23982 = vmatmul.mubr.msk.f32.vlgmr.msra.gmra.mrb[4].mxu1 %vm7209_vm14, %v37814_v19  ;;  %29365 = vmatpush3.bf16.msra.mxu0 %v32883_v31 }
 0x5c4   :  { %29506 = vmatpush3.bf16.msra.mxu1 %v37733_v29  ;;  %29366 = vmatprep.subr.bf16.mxu0 %v37671_v11 }
 0x5c5   :  { %29507 = vmatprep.subr.bf16.mxu1 %v37671_v11  ;;  %24646 = vmatprep.mubr.msk.f32.mxu1 %vm31836_vm0, %v37732_v44 }
 0x5c7   :  { %29368 = vmatpush3.bf16.msra.mxu0 %v32905_v28 }
 0x5c8   :  { %29509 = vmatpush3.bf16.msra.mxu1 %v37735_v1  ;;  %29369 = vmatprep.subr.bf16.mxu0 %v37671_v11 }
 0x5c9   :  { %29510 = vmatprep.subr.bf16.mxu1 %v37671_v11 }
 0x5cb   :  { %29371 = vmatpush3.bf16.msra.mxu0 %v37865_v49 }
 0x5cc   :  { %29512 = vmatpush3.bf16.msra.mxu1 %v37866_v26  ;;  %29372 = vmatprep.subr.bf16.mxu0 %v37671_v11 }
 0x5cd   :  { %29513 = vmatprep.subr.bf16.mxu1 %v37671_v11 }
 0x5cf   :  { %29374 = vmatpush3.bf16.msra.mxu0 %v37867_v17 }
 0x5d0   :  { %29515 = vmatpush3.bf16.msra.mxu1 %v37868_v43  ;;  %29375 = vmatprep.subr.bf16.mxu0 %v37671_v11 }
 0x5d1   :  { %29516 = vmatprep.subr.bf16.mxu1 %v37671_v11 }
 0x5d3   :  { %29377 = vmatpush3.bf16.msra.mxu0 %v37869_v16 }
 0x5d4   :  { %29518 = vmatpush3.bf16.msra.mxu1 %v37870_v33  ;;  %29378 = vmatprep.subr.bf16.mxu0 %v37671_v11 }
 0x5d5   :  { %29519 = vmatprep.subr.bf16.mxu1 %v37671_v11 }
 0x5d7   :  { %29380 = vmatpush3.bf16.msra.mxu0 %v38023_v40 }
 0x5d8   :  { %29521 = vmatpush3.bf16.msra.mxu1 %v37872_v30  ;;  %29381 = vmatprep.subr.bf16.mxu0 %v37671_v11 }
 0x5d9   :  { %29522 = vmatprep.subr.bf16.mxu1 %v37671_v11 }
 0x5db   :  { %29383 = vmatpush3.bf16.msra.mxu0 %v38024_v45 }
 0x5dc   :  { %29524 = vmatpush3.bf16.msra.mxu1 %v37968_v14  ;;  %29384 = vmatprep.subr.bf16.mxu0 %v37671_v11 }
 0x5dd   :  { %29525 = vmatprep.subr.bf16.mxu1 %v37671_v11 }
 0x5de   :  { %24437 = vmatmul.mubr.f32.vlgmr.msra.gmra.mrb[4].mxu0 %v9239_v42  ;;  %v38054_v42 = vld [vmem:[#allocation54_spill] sm:$0xff] }
 0x5df   :  { %29386 = vmatpush3.bf16.msra.mxu0 %v38025_v10  ;;  %24471 = vmatprep.mubr.msk.f32.mxu0 %vm31836_vm0, %v37732_v44 }
 0x5e0   :  { %29527 = vmatpush3.bf16.msra.mxu1 %v37969_v7  ;;  %29387 = vmatprep.subr.bf16.mxu0 %v37671_v11 }
 0x5e1   :  { %29528 = vmatprep.subr.bf16.mxu1 %v37671_v11 }
 0x5e3   :  { %29389 = vmatpush3.bf16.msra.mxu0 %v38026_v24  ;;  %24647 = vmatmul.mubr.f32.vlgmr.msra.gmra.mrb[6].mxu1 %v9893_v15  ;;  %v38052_v15 = vld [vmem:[#allocation41_spill] sm:$0xff] }
 0x5e4   :  { %29530 = vmatpush3.bf16.msra.mxu1 %v37970_v35  ;;  %29390 = vmatprep.subr.bf16.mxu0 %v37671_v11 }
 0x5e5   :  { %29531 = vmatprep.subr.bf16.mxu1 %v37671_v11  ;;  %24681 = vmatprep.mubr.msk.f32.mxu1 %vm31836_vm0, %v37732_v44 }
 0x5e7   :  { %29392 = vmatpush3.bf16.msra.mxu0 %v38027_v23 }
 0x5e8   :  { %29533 = vmatpush3.bf16.msra.mxu1 %v37971_v54  ;;  %29393 = vmatprep.subr.bf16.mxu0 %v37671_v11 }
 0x5e9   :  { %29534 = vmatprep.subr.bf16.mxu1 %v37671_v11 }
 0x5eb   :  { %29395 = vmatpush3.bf16.msra.mxu0 %v38028_v48 }
 0x5ec   :  { %29536 = vmatpush3.bf16.msra.mxu1 %v37972_v61  ;;  %29396 = vmatprep.subr.bf16.mxu0 %v37671_v11 }
 0x5ed   :  { %29537 = vmatprep.subr.bf16.mxu1 %v37671_v11 }
 0x5ef   :  { %29398 = vmatpush3.bf16.msra.mxu0 %v38029_v59 }
 0x5f0   :  { %29539 = vmatpush3.bf16.msra.mxu1 %v38051_v21  ;;  %29399 = vmatprep.subr.bf16.mxu0 %v37671_v11 }
 0x5f1   :  { %29540 = vmatprep.subr.bf16.mxu1 %v37671_v11 }
 0x5f3   :  { %29401 = vmatpush3.bf16.msra.mxu0 %v38030_v20  ;;  %v38066_v20 = vld [vmem:[#allocation18_spill] sm:$0xff] }
 0x5f4   :  { %29542 = vmatpush3.bf16.msra.mxu1 %v38052_v15  ;;  %29402 = vmatprep.subr.bf16.mxu0 %v37671_v11 }
 0x5f5   :  { %29543 = vmatprep.subr.bf16.mxu1 %v37671_v11 }
 0x5f7   :  { %29404 = vmatpush3.bf16.msra.mxu0 %v38031_v5  ;;  %v38059_v5 = vld [vmem:[#allocation61_spill] sm:$0xff] }
 0x5f8   :  { %29545 = vmatpush3.bf16.msra.mxu1 %v38053_v32  ;;  %29405 = vmatprep.subr.bf16.mxu0 %v37671_v11 }
 0x5f9   :  { %29546 = vmatprep.subr.bf16.mxu1 %v37671_v11 }
 0x5fb   :  { %29407 = vmatpush3.bf16.msra.mxu0 %v38032_v63  ;;  %v38056_v63 = vld [vmem:[#allocation53_spill] sm:$0xff] }
 0x5fc   :  { %29548 = vmatpush3.bf16.msra.mxu1 %v38054_v42  ;;  %29408 = vmatprep.subr.bf16.mxu0 %v37671_v11 }
 0x5fd   :  { %29549 = vmatprep.subr.bf16.mxu1 %v37671_v11 }
 0x5fe   :  { %24472 = vmatmul.mubr.msk.f32.vlgmr.msra.gmra.mrb[4].mxu0 %vm9151_vm15, %v37814_v19 }
 0x5ff   :  { %29410 = vmatpush3.bf16.msra.mxu0 %v38033_v53  ;;  %24506 = vmatprep.mubr.msk.f32.mxu0 %vm31836_vm0, %v37732_v44  ;;  %v38057_v53 = vld [vmem:[#allocation56_spill] sm:$0xff] }
 0x600   :  { %29551 = vmatpush3.bf16.msra.mxu1 %v38055_v8  ;;  %29411 = vmatprep.subr.bf16.mxu0 %v37671_v11 }
 0x601   :  { %29552 = vmatprep.subr.bf16.mxu1 %v37671_v11 }
 0x603   :  { %29413 = vmatpush3.bf16.msra.mxu0 %v38034_v60  ;;  %24682 = vmatmul.mubr.msk.f32.vlgmr.msra.gmra.mrb[6].mxu1 %vm9805_vm1, %v37814_v19  ;;  %v38058_v60 = vld [vmem:[#allocation59_spill] sm:$0xff] }
 0x604   :  { %29554 = vmatpush3.bf16.msra.mxu1 %v38056_v63  ;;  %29414 = vmatprep.subr.bf16.mxu0 %v37671_v11 }
 0x605   :  { %29555 = vmatprep.subr.bf16.mxu1 %v37671_v11  ;;  %24716 = vmatprep.mubr.msk.f32.mxu1 %vm31836_vm0, %v37732_v44 }
 0x607   :  { %29416 = vmatpush3.bf16.msra.mxu0 %v38035_v2  ;;  %v38060_v2 = vld [vmem:[#allocation63_spill] sm:$0xff] }
 0x608   :  { %29557 = vmatpush3.bf16.msra.mxu1 %v38057_v53  ;;  %29417 = vmatprep.subr.bf16.mxu0 %v37671_v11 }
 0x609   :  { %29558 = vmatprep.subr.bf16.mxu1 %v37671_v11 }
 0x60b   :  { %29419 = vmatpush3.bf16.msra.mxu0 %v38036_v55  ;;  %v38061_v55 = vld [vmem:[#allocation65_spill] sm:$0xff] }
 0x60c   :  { %29560 = vmatpush3.bf16.msra.mxu1 %v38058_v60  ;;  %29420 = vmatprep.subr.bf16.mxu0 %v37671_v11 }
 0x60d   :  { %29561 = vmatprep.subr.bf16.mxu1 %v37671_v11 }
 0x60f   :  { %29422 = vmatpush3.bf16.msra.mxu0 %v38037_v34  ;;  %v38062_v34 = vld [vmem:[#allocation68_spill] sm:$0xff] }
 0x610   :  { %29563 = vmatpush3.bf16.msra.mxu1 %v38059_v5  ;;  %29423 = vmatprep.subr.bf16.mxu0 %v37671_v11 }
 0x611   :  { %29564 = vmatprep.subr.bf16.mxu1 %v37671_v11 }
 0x613   :  { %29425 = vmatpush3.bf16.msra.mxu0 %v38038_v3  ;;  %v38065_v3 = vand.u32 4294901760, %v34920_v13 }
 0x614   :  { %29566 = vmatpush3.bf16.msra.mxu1 %v38060_v2  ;;  %29426 = vmatprep.subr.bf16.mxu0 %v37671_v11 }
 0x615   :  { %29567 = vmatprep.subr.bf16.mxu1 %v37671_v11 }
 0x617   :  { %29428 = vmatpush3.bf16.msra.mxu0 %v38039_v0  ;;  %v38063_v0 = vld [vmem:[#allocation69_spill] sm:$0xff] }
 0x618   :  { %29569 = vmatpush3.bf16.msra.mxu1 %v38061_v55  ;;  %29429 = vmatprep.subr.bf16.mxu0 %v37671_v11 }
 0x619   :  { %29570 = vmatprep.subr.bf16.mxu1 %v37671_v11 }
 0x61b   :  { %29431 = vmatpush3.bf16.msra.mxu0 %v38040_v47  ;;  %v38064_v47 = vand.u32 4294901760, %v34909_v46 }
 0x61c   :  { %29572 = vmatpush3.bf16.msra.mxu1 %v38062_v34  ;;  %29432 = vmatprep.subr.bf16.mxu0 %v37671_v11 }
 0x61d   :  { %29573 = vmatprep.subr.bf16.mxu1 %v37671_v11 }
 0x61e   :  { %24507 = vmatmul.mubr.f32.vlgmr.msra.gmra.mrb[4].mxu0 %v34909_v46  ;;  %v38070_v46 = vld [vmem:[#allocation32_spill] sm:$0xff] }
 0x61f   :  { %29434 = vmatpush3.bf16.msra.mxu0 %v32865_v39  ;;  %24541 = vmatprep.mubr.msk.f32.mxu0 %vm31836_vm0, %v37732_v44 }
 0x620   :  { %29575 = vmatpush3.bf16.msra.mxu1 %v38063_v0  ;;  %29435 = vmatprep.subr.bf16.mxu0 %v37671_v11 }
 0x621   :  { %29576 = vmatprep.subr.bf16.mxu1 %v37671_v11 }
 0x623   :  { %29437 = vmatpush3.bf16.msra.mxu0 %v32883_v31  ;;  %24717 = vmatmul.mubr.f32.vlgmr.msra.gmra.mrb[6].mxu1 %v34920_v13  ;;  %v38068_v13 = vld [vmem:[#allocation72_spill] sm:$0xff] }
 0x624   :  { %29578 = vmatpush3.bf16.msra.mxu1 %v37733_v29  ;;  %29438 = vmatprep.subr.bf16.mxu0 %v37671_v11 }
 0x625   :  { %29579 = vmatprep.subr.bf16.mxu1 %v37671_v11  ;;  %24751 = vmatprep.mubr.msk.f32.mxu1 %vm31836_vm0, %v37732_v44 }
 0x627   :  { %29440 = vmatpush3.bf16.msra.mxu0 %v32905_v28 }
 0x628   :  { %29581 = vmatpush3.bf16.msra.mxu1 %v37735_v1  ;;  %29441 = vmatprep.subr.bf16.mxu0 %v37671_v11 }
 0x629   :  { %29582 = vmatprep.subr.bf16.mxu1 %v37671_v11 }
 0x62b   :  { %29443 = vmatpush3.bf16.msra.mxu0 %v37865_v49 }
 0x62c   :  { %29584 = vmatpush3.bf16.msra.mxu1 %v37866_v26  ;;  %29444 = vmatprep.subr.bf16.mxu0 %v37671_v11 }
 0x62d   :  { %29585 = vmatprep.subr.bf16.mxu1 %v37671_v11 }
 0x62f   :  { %29446 = vmatpush3.bf16.msra.mxu0 %v37867_v17 }
 0x630   :  { %29587 = vmatpush3.bf16.msra.mxu1 %v37868_v43  ;;  %29447 = vmatprep.subr.bf16.mxu0 %v37671_v11 }
 0x631   :  { %29588 = vmatprep.subr.bf16.mxu1 %v37671_v11 }
 0x633   :  { %29449 = vmatpush3.bf16.msra.mxu0 %v37869_v16 }
 0x634   :  { %29590 = vmatpush3.bf16.msra.mxu1 %v37870_v33  ;;  %29450 = vmatprep.subr.bf16.mxu0 %v37671_v11 }
 0x635   :  { %29591 = vmatprep.subr.bf16.mxu1 %v37671_v11 }
 0x637   :  { %29452 = vmatpush3.bf16.msra.mxu0 %v38023_v40 }
 0x638   :  { %29593 = vmatpush3.bf16.msra.mxu1 %v37872_v30  ;;  %29453 = vmatprep.subr.bf16.mxu0 %v37671_v11 }
 0x639   :  { %29594 = vmatprep.subr.bf16.mxu1 %v37671_v11 }
 0x63b   :  { %29455 = vmatpush3.bf16.msra.mxu0 %v38024_v45 }
 0x63c   :  { %29596 = vmatpush3.bf16.msra.mxu1 %v37968_v14  ;;  %29456 = vmatprep.subr.bf16.mxu0 %v37671_v11 }
 0x63d   :  { %29597 = vmatprep.subr.bf16.mxu1 %v37671_v11 }
 0x63e   :  { %24542 = vmatmul.mubr.f32.vlgmr.msra.gmra.mrb[4].mxu0 %v38064_v47  ;;  %v38067_v47 = vld [vmem:[#allocation70_spill] sm:$0xff] }
 0x63f   :  { %29458 = vmatpush3.bf16.msra.mxu0 %v38043_v27  ;;  %24576 = vmatprep.mubr.msk.f32.mxu0 %vm31836_vm0, %v37732_v44 }
 0x640   :  { %29599 = vmatpush3.bf16.msra.mxu1 %v37969_v7  ;;  %29459 = vmatprep.subr.bf16.mxu0 %v37671_v11 }
 0x641   :  { %29600 = vmatprep.subr.bf16.mxu1 %v37671_v11 }
 0x643   :  { %29461 = vmatpush3.bf16.msra.mxu0 %v38044_v50  ;;  %24752 = vmatmul.mubr.f32.vlgmr.msra.gmra.mrb[6].mxu1 %v38065_v3  ;;  %v38069_v3 = vld [vmem:[#allocation29_spill] sm:$0xff] }
 0x644   :  { %29602 = vmatpush3.bf16.msra.mxu1 %v38066_v20  ;;  %29462 = vmatprep.subr.bf16.mxu0 %v37671_v11 }
 0x645   :  { %29603 = vmatprep.subr.bf16.mxu1 %v37671_v11  ;;  %24786 = vmatprep.mubr.msk.f32.mxu1 %vm31836_vm0, %v37732_v44 }
 0x647   :  { %29464 = vmatpush3.bf16.msra.mxu0 %v38045_v22 }
 0x648   :  { %29605 = vmatpush3.bf16.msra.mxu1 %v38067_v47  ;;  %29465 = vmatprep.subr.bf16.mxu0 %v37671_v11 }
 0x649   :  { %29606 = vmatprep.subr.bf16.mxu1 %v37671_v11 }
 0x64b   :  { %29467 = vmatpush3.bf16.msra.mxu0 %v38046_v41  ;;  %v38071_v41 = vld [vmem:[#allocation66_spill] sm:$0xff] }
 0x64c   :  { %29608 = vmatpush3.bf16.msra.mxu1 %v38068_v13  ;;  %29468 = vmatprep.subr.bf16.mxu0 %v37671_v11 }
 0x64d   :  { %29609 = vmatprep.subr.bf16.mxu1 %v37671_v11 }
 0x64f   :  { %29470 = vmatpush3.bf16.msra.mxu0 %v38047_v37  ;;  %v38072_v37 = vld [vmem:[#allocation36_spill] sm:$0xff] }
 0x650   :  { %29611 = vmatpush3.bf16.msra.mxu1 %v38069_v3  ;;  %29471 = vmatprep.subr.bf16.mxu0 %v37671_v11 }
 0x651   :  { %29612 = vmatprep.subr.bf16.mxu1 %v37671_v11 }
 0x653   :  { %29473 = vmatpush3.bf16.msra.mxu0 %v38048_v62  ;;  %v35183_v62 = vsub.f32 %v18572_v38, %v18572_v38 }
 0x654   :  { %29614 = vmatpush3.bf16.msra.mxu1 %v38070_v46  ;;  %29474 = vmatprep.subr.bf16.mxu0 %v37671_v11 }
 0x655   :  { %29615 = vmatprep.subr.bf16.mxu1 %v37671_v11  ;;  %v37534_v50 = vand.u32 4294901760, %v35183_v62 }
 0x657   :  { %29476 = vmatpush3.bf16.msra.mxu0 %v38049_v6  ;;  %v38073_v6 = vld [vmem:[#allocation37_spill] sm:$0xff]  ;;  %v11834_v59 = vsub.f32 %v35183_v62, %v37534_v50 }
 0x658   :  { %29617 = vmatpush3.bf16.msra.mxu1 %v38071_v41  ;;  %29477 = vmatprep.subr.bf16.mxu0 %v37671_v11 }
 0x659   :  { %29618 = vmatprep.subr.bf16.mxu1 %v37671_v11  ;;  %v11835_v24 = vand.u32 4294901760, %v11834_v59  ;;  %v38075_v59 = vld [vmem:[#allocation19_spill] sm:$0xff] }
 0x65b   :  { %29479 = vmatpush3.bf16.msra.mxu0 %v38050_v57  ;;  %v35176_v57 = vpop.permute.xlu0 %9797 }
 0x65c   :  { %29620 = vmatpush3.bf16.msra.mxu1 %v38072_v37  ;;  %29480 = vmatprep.subr.bf16.mxu0 %v37671_v11  ;;  %vm9799_vm3 = vcmp.eq.s32.totalorder %v35176_v57, %v32537_v36  ;;  %v18571_v57 = vsel %vm11741_vm4, 1.0, %v37732_v44 }
 0x65d   :  { %29621 = vmatprep.subr.bf16.mxu1 %v37671_v11  ;;  %v18559_v22 = vsel %vm9799_vm3, 1.0, %v37732_v44 }
 0x65e   :  { %24577 = vmatmul.mubr.msk.f32.vlgmr.msra.gmra.mrb[4].mxu0 %vm9151_vm15, %v37814_v19  ;;  %v35194_v27 = vsub.f32 %v18559_v22, %v18559_v22 }
 0x65f   :  { %29482 = vmatpush3.bf16.msra.mxu0 %v32865_v39  ;;  %24611 = vmatprep.mubr.msk.f32.mxu0 %vm31836_vm0, %v37732_v44  ;;  %v35719_v18 = vpop.permute.xlu0 %13033 }
 0x660   :  { %29623 = vmatpush3.bf16.msra.mxu1 %v38073_v6  ;;  %29483 = vmatprep.subr.bf16.mxu0 %v37671_v11  ;;  %v37535_v48 = vand.u32 4294901760, %v35194_v27  ;;  %vm13035_vm6 = vcmp.eq.s32.totalorder %v35719_v18, %v32537_v36 }
 0x661   :  { %29624 = vmatprep.subr.bf16.mxu1 %v37671_v11 }
 0x662   :  { %v10533_v50 = vsub.f32 %v35194_v27, %v37535_v48  ;;  %v38080_v48 = vld [vmem:[#allocation35_spill] sm:$0xff] }
 0x663   :  { %29485 = vmatpush3.bf16.msra.mxu0 %v32883_v31  ;;  %24787 = vmatmul.mubr.msk.f32.vlgmr.msra.gmra.mrb[6].mxu1 %vm9805_vm1, %v37814_v19 }
 0x664   :  { %29626 = vmatpush3.bf16.msra.mxu1 %v37733_v29  ;;  %29486 = vmatprep.subr.bf16.mxu0 %v37671_v11 }
 0x665   :  { %29627 = vmatprep.subr.bf16.mxu1 %v37671_v11  ;;  %24821 = vmatprep.mubr.msk.f32.mxu1 %vm31836_vm0, %v37732_v44 }
 0x667   :  { %29488 = vmatpush3.bf16.msra.mxu0 %v32905_v28 }
 0x668   :  { %29629 = vmatpush3.bf16.msra.mxu1 %v37735_v1  ;;  %29489 = vmatprep.subr.bf16.mxu0 %v37671_v11 }
 0x669   :  { %29630 = vmatprep.subr.bf16.mxu1 %v37671_v11 }
 0x66b   :  { %29491 = vmatpush3.bf16.msra.mxu0 %v37865_v49 }
 0x66c   :  { %29632 = vmatpush3.bf16.msra.mxu1 %v37866_v26  ;;  %29492 = vmatprep.subr.bf16.mxu0 %v37671_v11 }
 0x66d   :  { %29633 = vmatprep.subr.bf16.mxu1 %v37671_v11 }
 0x66f   :  { %29494 = vmatpush3.bf16.msra.mxu0 %v37867_v17 }
 0x670   :  { %29635 = vmatpush3.bf16.msra.mxu1 %v37868_v43  ;;  %29495 = vmatprep.subr.bf16.mxu0 %v37671_v11 }
 0x671   :  { %29636 = vmatprep.subr.bf16.mxu1 %v37671_v11 }
 0x673   :  { %29497 = vmatpush3.bf16.msra.mxu0 %v37869_v16 }
 0x674   :  { %29638 = vmatpush3.bf16.msra.mxu1 %v37870_v33  ;;  %29498 = vmatprep.subr.bf16.mxu0 %v37671_v11 }
 0x675   :  { %29639 = vmatprep.subr.bf16.mxu1 %v37671_v11 }
 0x677   :  { %29500 = vmatpush3.bf16.msra.mxu0 %v38023_v40 }
 0x678   :  { %29641 = vmatpush3.bf16.msra.mxu1 %v37872_v30  ;;  %29501 = vmatprep.subr.bf16.mxu0 %v37671_v11 }
 0x679   :  { %29642 = vmatprep.subr.bf16.mxu1 %v37671_v11 }
 0x67b   :  { %29503 = vmatpush3.bf16.msra.mxu0 %v38024_v45 }
 0x67c   :  { %29644 = vmatpush3.bf16.msra.mxu1 %v37968_v14  ;;  %29936 = vmatprep.subr.bf16.mxu0 %v37671_v11 }
 0x67d   :  { %29645 = vmatprep.subr.bf16.mxu1 %v37671_v11 }
 0x67e   :  { %24612 = vmatmul.mubr.msk.f32.vlgmr.msra.gmra.mrb[4].mxu0 %vm9151_vm15, %v37814_v19 }
 0x67f   :  { %29938 = vmatpush3.bf16.msra.mxu0 %v37733_v29  ;;  %25276 = vmatprep.mubr.msk.f32.mxu0 %vm31836_vm0, %v37732_v44 }
 0x680   :  { %29647 = vmatpush3.bf16.msra.mxu1 %v37969_v7  ;;  %29939 = vmatprep.subr.bf16.mxu0 %v37671_v11 }
 0x681   :  { %29648 = vmatprep.subr.bf16.mxu1 %v37671_v11 }
 0x683   :  { %29941 = vmatpush3.bf16.msra.mxu0 %v37735_v1  ;;  %24822 = vmatmul.mubr.msk.f32.vlgmr.msra.gmra.mrb[6].mxu1 %vm9805_vm1, %v37814_v19 }
 0x684   :  { %29650 = vmatpush3.bf16.msra.mxu1 %v37910_v56  ;;  %29942 = vmatprep.subr.bf16.mxu0 %v37671_v11 }
 0x685   :  { %29651 = vmatprep.subr.bf16.mxu1 %v37671_v11  ;;  %24856 = vmatprep.mubr.msk.f32.mxu1 %vm31836_vm0, %v37732_v44 }
 0x687   :  { %29944 = vmatpush3.bf16.msra.mxu0 %v37866_v26 }
 0x688   :  { %29653 = vmatpush3.bf16.msra.mxu1 %v37911_v58  ;;  %29945 = vmatprep.subr.bf16.mxu0 %v37671_v11 }
 0x689   :  { %29654 = vmatprep.subr.bf16.mxu1 %v37671_v11 }
 0x68b   :  { %29947 = vmatpush3.bf16.msra.mxu0 %v37868_v43 }
 0x68c   :  { %29656 = vmatpush3.bf16.msra.mxu1 %v37912_v51  ;;  %29948 = vmatprep.subr.bf16.mxu0 %v37671_v11 }
 0x68d   :  { %29657 = vmatprep.subr.bf16.mxu1 %v37671_v11 }
 0x68f   :  { %29950 = vmatpush3.bf16.msra.mxu0 %v37870_v33 }
 0x690   :  { %29659 = vmatpush3.bf16.msra.mxu1 %v37913_v4  ;;  %29951 = vmatprep.subr.bf16.mxu0 %v37671_v11 }
 0x691   :  { %29660 = vmatprep.subr.bf16.mxu1 %v37671_v11 }
 0x693   :  { %29953 = vmatpush3.bf16.msra.mxu0 %v37872_v30 }
 0x694   :  { %29662 = vmatpush3.bf16.msra.mxu1 %v37914_v52  ;;  %29954 = vmatprep.subr.bf16.mxu0 %v37671_v11 }
 0x695   :  { %29663 = vmatprep.subr.bf16.mxu1 %v37671_v11 }
 0x696   :  { %v35200_v38 = vpop.f32.mrb[4].mxu1 }
 0x697   :  { %38074 = vst [vmem:[#allocation8_spill] sm:$0xff] %v35200_v38  ;;  %v23983_v23 = vpop.f32.mrb[5].mxu1  ;;  %29956 = vmatpush3.bf16.msra.mxu0 %v37968_v14  ;;  %v17570_v22 = vmul.f32 %v33791_v12, %v35200_v38  ;;  %v38081_v38 = vld [vmem:[#allocation39_spill] sm:$0xff] }
 0x698   :  { %29665 = vmatpush3.bf16.msra.mxu1 %v37915_v25  ;;  %29957 = vmatprep.subr.bf16.mxu0 %v37671_v11  ;;  %v10534_v23 = vand.u32 4294901760, %v10533_v50  ;;  %v38078_v50 = vld [vmem:[#allocation26_spill] sm:$0xff] }
 0x699   :  { %17571 = vadd.xlane.f32.xlu1 %v17570_v22  ;;  %29666 = vmatprep.subr.bf16.mxu1 %v37671_v11  ;;  %v38076_v22 = vld [vmem:[#allocation23_spill] sm:$0xff] }
 0x69b   :  { %29959 = vmatpush3.bf16.msra.mxu0 %v37969_v7 }
 0x69c   :  { %29668 = vmatpush3.bf16.msra.mxu1 %v37916_v9  ;;  %29960 = vmatprep.subr.bf16.mxu0 %v37671_v11 }
 0x69d   :  { %29669 = vmatprep.subr.bf16.mxu1 %v37671_v11 }
 0x69e   :  { %25277 = vmatmul.mubr.f32.vlgmr.msra.gmra.mrb[6].mxu0 %v11835_v24  ;;  %v38077_v24 = vld [vmem:[#allocation24_spill] sm:$0xff] }
 0x69f   :  { %29962 = vmatpush3.bf16.msra.mxu0 %v37970_v35  ;;  %25311 = vmatprep.mubr.msk.f32.mxu0 %vm31836_vm0, %v37732_v44 }
 0x6a0   :  { %29671 = vmatpush3.bf16.msra.mxu1 %v38075_v59  ;;  %29963 = vmatprep.subr.bf16.mxu0 %v37671_v11 }
 0x6a1   :  { %29672 = vmatprep.subr.bf16.mxu1 %v37671_v11 }
 0x6a3   :  { %29965 = vmatpush3.bf16.msra.mxu0 %v37971_v54  ;;  %24857 = vmatmul.mubr.f32.vlgmr.msra.gmra.mrb[6].mxu1 %v10534_v23  ;;  %v38079_v23 = vld [vmem:[#allocation28_spill] sm:$0xff] }
 0x6a4   :  { %29674 = vmatpush3.bf16.msra.mxu1 %v38076_v22  ;;  %29966 = vmatprep.subr.bf16.mxu0 %v37671_v11 }
 0x6a5   :  { %29675 = vmatprep.subr.bf16.mxu1 %v37671_v11  ;;  %24891 = vmatprep.mubr.msk.f32.mxu1 %vm31836_vm0, %v37732_v44 }
 0x6a7   :  { %29968 = vmatpush3.bf16.msra.mxu0 %v37972_v61 }
 0x6a8   :  { %29677 = vmatpush3.bf16.msra.mxu1 %v38077_v24  ;;  %29969 = vmatprep.subr.bf16.mxu0 %v37671_v11 }
 0x6a9   :  { %29678 = vmatprep.subr.bf16.mxu1 %v37671_v11 }
 0x6ab   :  { %29971 = vmatpush3.bf16.msra.mxu0 %v38051_v21  ;;  %v38094_v21 = vld [vmem:[#allocation7_spill] sm:$0xff] }
 0x6ac   :  { %29680 = vmatpush3.bf16.msra.mxu1 %v38078_v50  ;;  %29972 = vmatprep.subr.bf16.mxu0 %v37671_v11 }
 0x6ad   :  { %29681 = vmatprep.subr.bf16.mxu1 %v37671_v11 }
 0x6af   :  { %29974 = vmatpush3.bf16.msra.mxu0 %v38052_v15  ;;  %v38082_v15 = vld [vmem:[#allocation46_spill] sm:$0xff] }
 0x6b0   :  { %29683 = vmatpush3.bf16.msra.mxu1 %v38079_v23  ;;  %29975 = vmatprep.subr.bf16.mxu0 %v37671_v11 }
 0x6b1   :  { %29684 = vmatprep.subr.bf16.mxu1 %v37671_v11 }
 0x6b3   :  { %29977 = vmatpush3.bf16.msra.mxu0 %v38053_v32  ;;  %v38087_v32 = vld [vmem:[#allocation58_spill] sm:$0xff] }
 0x6b4   :  { %29686 = vmatpush3.bf16.msra.mxu1 %v38080_v48  ;;  %29978 = vmatprep.subr.bf16.mxu0 %v37671_v11 }
 0x6b5   :  { %29687 = vmatprep.subr.bf16.mxu1 %v37671_v11 }
 0x6b7   :  { %29980 = vmatpush3.bf16.msra.mxu0 %v38054_v42  ;;  %v38083_v42 = vld [vmem:[#allocation52_spill] sm:$0xff] }
 0x6b8   :  { %29689 = vmatpush3.bf16.msra.mxu1 %v38081_v38  ;;  %29981 = vmatprep.subr.bf16.mxu0 %v37671_v11 }
 0x6b9   :  { %29690 = vmatprep.subr.bf16.mxu1 %v37671_v11 }
 0x6bb   :  { %29983 = vmatpush3.bf16.msra.mxu0 %v38055_v8  ;;  %v38084_v8 = vld [vmem:[#allocation47_spill] sm:$0xff] }
 0x6bc   :  { %29692 = vmatpush3.bf16.msra.mxu1 %v38082_v15  ;;  %29984 = vmatprep.subr.bf16.mxu0 %v37671_v11 }
 0x6bd   :  { %29693 = vmatprep.subr.bf16.mxu1 %v37671_v11 }
 0x6be   :  { %25312 = vmatmul.mubr.msk.f32.vlgmr.msra.gmra.mrb[6].mxu0 %vm11747_vm2, %v37814_v19 }
 0x6bf   :  { %29986 = vmatpush3.bf16.msra.mxu0 %v38056_v63  ;;  %25346 = vmatprep.mubr.msk.f32.mxu0 %vm31836_vm0, %v37732_v44  ;;  %v38085_v63 = vld [vmem:[#allocation50_spill] sm:$0xff] }
 0x6c0   :  { %29695 = vmatpush3.bf16.msra.mxu1 %v38083_v42  ;;  %29987 = vmatprep.subr.bf16.mxu0 %v37671_v11 }
 0x6c1   :  { %29696 = vmatprep.subr.bf16.mxu1 %v37671_v11 }
 0x6c3   :  { %29989 = vmatpush3.bf16.msra.mxu0 %v38057_v53  ;;  %24892 = vmatmul.mubr.msk.f32.vlgmr.msra.gmra.mrb[6].mxu1 %vm9799_vm3, %v37814_v19  ;;  %v38086_v53 = vld [vmem:[#allocation55_spill] sm:$0xff] }
 0x6c4   :  { %29698 = vmatpush3.bf16.msra.mxu1 %v38084_v8  ;;  %29990 = vmatprep.subr.bf16.mxu0 %v37671_v11 }
 0x6c5   :  { %29699 = vmatprep.subr.bf16.mxu1 %v37671_v11  ;;  %24926 = vmatprep.mubr.msk.f32.mxu1 %vm31836_vm0, %v37732_v44 }
 0x6c7   :  { %29992 = vmatpush3.bf16.msra.mxu0 %v38058_v60  ;;  %v38088_v60 = vld [vmem:[#allocation60_spill] sm:$0xff] }
 0x6c8   :  { %29701 = vmatpush3.bf16.msra.mxu1 %v38085_v63  ;;  %29993 = vmatprep.subr.bf16.mxu0 %v37671_v11 }
 0x6c9   :  { %29702 = vmatprep.subr.bf16.mxu1 %v37671_v11 }
 0x6cb   :  { %29995 = vmatpush3.bf16.msra.mxu0 %v38059_v5  ;;  %v38089_v5 = vld [vmem:[#allocation62_spill] sm:$0xff] }
 0x6cc   :  { %29704 = vmatpush3.bf16.msra.mxu1 %v38086_v53  ;;  %29996 = vmatprep.subr.bf16.mxu0 %v37671_v11 }
 0x6cd   :  { %29705 = vmatprep.subr.bf16.mxu1 %v37671_v11 }
 0x6cf   :  { %29998 = vmatpush3.bf16.msra.mxu0 %v38060_v2  ;;  %v38090_v2 = vld [vmem:[#allocation64_spill] sm:$0xff] }
 0x6d0   :  { %29707 = vmatpush3.bf16.msra.mxu1 %v38087_v32  ;;  %29999 = vmatprep.subr.bf16.mxu0 %v37671_v11 }
 0x6d1   :  { %29708 = vmatprep.subr.bf16.mxu1 %v37671_v11 }
 0x6d3   :  { %30001 = vmatpush3.bf16.msra.mxu0 %v38061_v55  ;;  %v38093_v55 = vand.u32 4294901760, %v35194_v27 }
 0x6d4   :  { %29710 = vmatpush3.bf16.msra.mxu1 %v38088_v60  ;;  %30002 = vmatprep.subr.bf16.mxu0 %v37671_v11 }
 0x6d5   :  { %29711 = vmatprep.subr.bf16.mxu1 %v37671_v11 }
 0x6d7   :  { %30004 = vmatpush3.bf16.msra.mxu0 %v38062_v34  ;;  %v38091_v34 = vld [vmem:[#allocation67_spill] sm:$0xff] }
 0x6d8   :  { %29713 = vmatpush3.bf16.msra.mxu1 %v38089_v5  ;;  %30005 = vmatprep.subr.bf16.mxu0 %v37671_v11 }
 0x6d9   :  { %29714 = vmatprep.subr.bf16.mxu1 %v37671_v11 }
 0x6db   :  { %30007 = vmatpush3.bf16.msra.mxu0 %v38063_v0  ;;  %v38092_v0 = vand.u32 4294901760, %v35183_v62 }
 0x6dc   :  { %29716 = vmatpush3.bf16.msra.mxu1 %v38090_v2  ;;  %30008 = vmatprep.subr.bf16.mxu0 %v37671_v11 }
 0x6dd   :  { %29717 = vmatprep.subr.bf16.mxu1 %v37671_v11 }
 0x6de   :  { %25347 = vmatmul.mubr.f32.vlgmr.msra.gmra.mrb[6].mxu0 %v35183_v62  ;;  %v38098_v62 = vld [vmem:[#allocation73_spill] sm:$0xff] }
 0x6df   :  { %30010 = vmatpush3.bf16.msra.mxu0 %v37733_v29  ;;  %25381 = vmatprep.mubr.msk.f32.mxu0 %vm31836_vm0, %v37732_v44 }
 0x6e0   :  { %29719 = vmatpush3.bf16.msra.mxu1 %v38091_v34  ;;  %30011 = vmatprep.subr.bf16.mxu0 %v37671_v11 }
 0x6e1   :  { %29720 = vmatprep.subr.bf16.mxu1 %v37671_v11 }
 0x6e3   :  { %30013 = vmatpush3.bf16.msra.mxu0 %v37735_v1  ;;  %24927 = vmatmul.mubr.f32.vlgmr.msra.gmra.mrb[6].mxu1 %v35194_v27  ;;  %v38097_v27 = vld [vmem:[#allocation71_spill] sm:$0xff] }
 0x6e4   :  { %29722 = vmatpush3.bf16.msra.mxu1 %v37910_v56  ;;  %30014 = vmatprep.subr.bf16.mxu0 %v37671_v11 }
 0x6e5   :  { %29723 = vmatprep.subr.bf16.mxu1 %v37671_v11  ;;  %24961 = vmatprep.mubr.msk.f32.mxu1 %vm31836_vm0, %v37732_v44 }
 0x6e7   :  { %30016 = vmatpush3.bf16.msra.mxu0 %v37866_v26 }
 0x6e8   :  { %29725 = vmatpush3.bf16.msra.mxu1 %v37911_v58  ;;  %30017 = vmatprep.subr.bf16.mxu0 %v37671_v11 }
 0x6e9   :  { %29726 = vmatprep.subr.bf16.mxu1 %v37671_v11 }
 0x6eb   :  { %30019 = vmatpush3.bf16.msra.mxu0 %v37868_v43 }
 0x6ec   :  { %29728 = vmatpush3.bf16.msra.mxu1 %v37912_v51  ;;  %30020 = vmatprep.subr.bf16.mxu0 %v37671_v11 }
 0x6ed   :  { %29729 = vmatprep.subr.bf16.mxu1 %v37671_v11 }
 0x6ef   :  { %30022 = vmatpush3.bf16.msra.mxu0 %v37870_v33 }
 0x6f0   :  { %29731 = vmatpush3.bf16.msra.mxu1 %v37913_v4  ;;  %30023 = vmatprep.subr.bf16.mxu0 %v37671_v11 }
 0x6f1   :  { %29732 = vmatprep.subr.bf16.mxu1 %v37671_v11 }
 0x6f3   :  { %30025 = vmatpush3.bf16.msra.mxu0 %v37872_v30 }
 0x6f4   :  { %29734 = vmatpush3.bf16.msra.mxu1 %v37914_v52  ;;  %30026 = vmatprep.subr.bf16.mxu0 %v37671_v11 }
 0x6f5   :  { %29735 = vmatprep.subr.bf16.mxu1 %v37671_v11 }
 0x6f7   :  { %30028 = vmatpush3.bf16.msra.mxu0 %v37968_v14 }
 0x6f8   :  { %29737 = vmatpush3.bf16.msra.mxu1 %v37915_v25  ;;  %30029 = vmatprep.subr.bf16.mxu0 %v37671_v11 }
 0x6f9   :  { %29738 = vmatprep.subr.bf16.mxu1 %v37671_v11 }
 0x6fb   :  { %30031 = vmatpush3.bf16.msra.mxu0 %v37969_v7 }
 0x6fc   :  { %29740 = vmatpush3.bf16.msra.mxu1 %v37916_v9  ;;  %30032 = vmatprep.subr.bf16.mxu0 %v37671_v11 }
 0x6fd   :  { %29741 = vmatprep.subr.bf16.mxu1 %v37671_v11 }
 0x6fe   :  { %25382 = vmatmul.mubr.f32.vlgmr.msra.gmra.mrb[6].mxu0 %v38092_v0  ;;  %v38095_v0 = vld [vmem:[#allocation9_spill] sm:$0xff] }
 0x6ff   :  { %30034 = vmatpush3.bf16.msra.mxu0 %v38066_v20  ;;  %25416 = vmatprep.mubr.msk.f32.mxu0 %vm31836_vm0, %v37732_v44 }
 0x700   :  { %29743 = vmatpush3.bf16.msra.mxu1 %v38075_v59  ;;  %30035 = vmatprep.subr.bf16.mxu0 %v37671_v11 }
 0x701   :  { %29744 = vmatprep.subr.bf16.mxu1 %v37671_v11 }
 0x703   :  { %30037 = vmatpush3.bf16.msra.mxu0 %v38067_v47  ;;  %24962 = vmatmul.mubr.f32.vlgmr.msra.gmra.mrb[6].mxu1 %v38093_v55  ;;  %v38096_v55 = vld [vmem:[#allocation20_spill] sm:$0xff] }
 0x704   :  { %29746 = vmatpush3.bf16.msra.mxu1 %v38094_v21  ;;  %30038 = vmatprep.subr.bf16.mxu0 %v37671_v11 }
 0x705   :  { %29747 = vmatprep.subr.bf16.mxu1 %v37671_v11  ;;  %24996 = vmatprep.mubr.msk.f32.mxu1 %vm31836_vm0, %v37732_v44 }
 0x707   :  { %30040 = vmatpush3.bf16.msra.mxu0 %v38068_v13 }
 0x708   :  { %29749 = vmatpush3.bf16.msra.mxu1 %v38095_v0  ;;  %30041 = vmatprep.subr.bf16.mxu0 %v37671_v11 }
 0x709   :  { %29750 = vmatprep.subr.bf16.mxu1 %v37671_v11 }
 0x70b   :  { %30043 = vmatpush3.bf16.msra.mxu0 %v38069_v3  ;;  %v38099_v3 = vld [vmem:[#allocation31_spill] sm:$0xff] }
 0x70c   :  { %29752 = vmatpush3.bf16.msra.mxu1 %v38096_v55  ;;  %30044 = vmatprep.subr.bf16.mxu0 %v37671_v11 }
 0x70d   :  { %29753 = vmatprep.subr.bf16.mxu1 %v37671_v11 }
 0x70f   :  { %30046 = vmatpush3.bf16.msra.mxu0 %v38070_v46  ;;  %v38100_v46 = vld [vmem:[#allocation33_spill] sm:$0xff] }
 0x710   :  { %29755 = vmatpush3.bf16.msra.mxu1 %v38097_v27  ;;  %30047 = vmatprep.subr.bf16.mxu0 %v37671_v11 }
 0x711   :  { %29756 = vmatprep.subr.bf16.mxu1 %v37671_v11 }
 0x713   :  { %30049 = vmatpush3.bf16.msra.mxu0 %v38071_v41  ;;  %v35461_v41 = vsub.f32 %v18571_v57, %v18571_v57 }
 0x714   :  { %29758 = vmatpush3.bf16.msra.mxu1 %v38098_v62  ;;  %30050 = vmatprep.subr.bf16.mxu0 %v37671_v11 }
 0x715   :  { %29759 = vmatprep.subr.bf16.mxu1 %v37671_v11  ;;  %v37562_v20 = vand.u32 4294901760, %v35461_v41 }
 0x717   :  { %30052 = vmatpush3.bf16.msra.mxu0 %v38072_v37  ;;  %v38101_v37 = vld [vmem:[#allocation34_spill] sm:$0xff]  ;;  %v12475_v35 = vsub.f32 %v35461_v41, %v37562_v20 }
 0x718   :  { %29761 = vmatpush3.bf16.msra.mxu1 %v38099_v3  ;;  %30053 = vmatprep.subr.bf16.mxu0 %v37671_v11 }
 0x719   :  { %29762 = vmatprep.subr.bf16.mxu1 %v37671_v11 }
 0x71b   :  { %30055 = vmatpush3.bf16.msra.mxu0 %v38073_v6  ;;  %v35454_v6 = vpop.permute.xlu1 %11091 }
 0x71c   :  { %29764 = vmatpush3.bf16.msra.mxu1 %v38100_v46  ;;  %30056 = vmatprep.subr.bf16.mxu0 %v37671_v11  ;;  %vm11093_vm5 = vcmp.eq.s32.totalorder %v35454_v6, %v32537_v36  ;;  %v18579_v6 = vsel %vm13035_vm6, 1.0, %v37732_v44 }
 0x71d   :  { %29765 = vmatprep.subr.bf16.mxu1 %v37671_v11  ;;  %v18567_v13 = vsel %vm11093_vm5, 1.0, %v37732_v44 }
 0x71e   :  { %25417 = vmatmul.mubr.msk.f32.vlgmr.msra.gmra.mrb[6].mxu0 %vm11747_vm2, %v37814_v19  ;;  %v35476_v54 = vsub.f32 %v18567_v13, %v18567_v13  ;;  %v12476_v13 = vand.u32 4294901760, %v12475_v35  ;;  %v38103_v35 = vld [vmem:[#allocation49_spill] sm:$0xff] }
 0x71f   :  { %30058 = vmatpush3.bf16.msra.mxu0 %v37733_v29  ;;  %25451 = vmatprep.mubr.msk.f32.mxu0 %vm31836_vm0, %v37732_v44 }
 0x720   :  { %29767 = vmatpush3.bf16.msra.mxu1 %v38101_v37  ;;  %30059 = vmatprep.subr.bf16.mxu0 %v37671_v11 }
 0x721   :  { %29768 = vmatprep.subr.bf16.mxu1 %v37671_v11 }
 0x723   :  { %30061 = vmatpush3.bf16.msra.mxu0 %v37735_v1  ;;  %24997 = vmatmul.mubr.msk.f32.vlgmr.msra.gmra.mrb[6].mxu1 %vm9799_vm3, %v37814_v19 }
 0x724   :  { %29770 = vmatpush3.bf16.msra.mxu1 %v37910_v56  ;;  %30062 = vmatprep.subr.bf16.mxu0 %v37671_v11 }
 0x725   :  { %29771 = vmatprep.subr.bf16.mxu1 %v37671_v11  ;;  %25031 = vmatprep.mubr.msk.f32.mxu1 %vm31836_vm0, %v37732_v44 }
 0x727   :  { %30064 = vmatpush3.bf16.msra.mxu0 %v37866_v26 }
 0x728   :  { %29773 = vmatpush3.bf16.msra.mxu1 %v37911_v58  ;;  %30065 = vmatprep.subr.bf16.mxu0 %v37671_v11 }
 0x729   :  { %29774 = vmatprep.subr.bf16.mxu1 %v37671_v11 }
 0x72b   :  { %30067 = vmatpush3.bf16.msra.mxu0 %v37868_v43 }
 0x72c   :  { %29776 = vmatpush3.bf16.msra.mxu1 %v37912_v51  ;;  %30068 = vmatprep.subr.bf16.mxu0 %v37671_v11 }
 0x72d   :  { %29777 = vmatprep.subr.bf16.mxu1 %v37671_v11 }
 0x72f   :  { %30070 = vmatpush3.bf16.msra.mxu0 %v37870_v33 }
 0x730   :  { %29779 = vmatpush3.bf16.msra.mxu1 %v37913_v4  ;;  %30071 = vmatprep.subr.bf16.mxu0 %v37671_v11 }
 0x731   :  { %29780 = vmatprep.subr.bf16.mxu1 %v37671_v11 }
 0x733   :  { %30073 = vmatpush3.bf16.msra.mxu0 %v37872_v30 }
 0x734   :  { %29782 = vmatpush3.bf16.msra.mxu1 %v37914_v52  ;;  %30074 = vmatprep.subr.bf16.mxu0 %v37671_v11 }
 0x735   :  { %29783 = vmatprep.subr.bf16.mxu1 %v37671_v11 }
 0x737   :  { %30076 = vmatpush3.bf16.msra.mxu0 %v37968_v14 }
 0x738   :  { %29785 = vmatpush3.bf16.msra.mxu1 %v37915_v25  ;;  %30077 = vmatprep.subr.bf16.mxu0 %v37671_v11 }
 0x739   :  { %29786 = vmatprep.subr.bf16.mxu1 %v37671_v11 }
 0x73b   :  { %30079 = vmatpush3.bf16.msra.mxu0 %v37969_v7 }
 0x73c   :  { %29788 = vmatpush3.bf16.msra.mxu1 %v37916_v9  ;;  %30080 = vmatprep.subr.bf16.mxu0 %v37671_v11 }
 0x73d   :  { %29789 = vmatprep.subr.bf16.mxu1 %v37671_v11 }
 0x73e   :  { %25452 = vmatmul.mubr.msk.f32.vlgmr.msra.gmra.mrb[6].mxu0 %vm11747_vm2, %v37814_v19 }
 0x73f   :  { %30082 = vmatpush3.bf16.msra.mxu0 %v37910_v56  ;;  %25486 = vmatprep.mubr.msk.f32.mxu0 %vm31836_vm0, %v37732_v44 }
 0x740   :  { %29791 = vmatpush3.bf16.msra.mxu1 %v38075_v59  ;;  %30083 = vmatprep.subr.bf16.mxu0 %v37671_v11 }
 0x741   :  { %29792 = vmatprep.subr.bf16.mxu1 %v37671_v11 }
 0x743   :  { %30085 = vmatpush3.bf16.msra.mxu0 %v37911_v58  ;;  %25032 = vmatmul.mubr.msk.f32.vlgmr.msra.gmra.mrb[6].mxu1 %vm9799_vm3, %v37814_v19 }
 0x744   :  { %29794 = vmatpush3.bf16.msra.mxu1 %v32865_v39  ;;  %30086 = vmatprep.subr.bf16.mxu0 %v37671_v11 }
 0x745   :  { %29795 = vmatprep.subr.bf16.mxu1 %v37671_v11  ;;  %25066 = vmatprep.mubr.msk.f32.mxu1 %vm31836_vm0, %v37732_v44 }
 0x747   :  { %30088 = vmatpush3.bf16.msra.mxu0 %v37912_v51 }
 0x748   :  { %29797 = vmatpush3.bf16.msra.mxu1 %v32883_v31  ;;  %30089 = vmatprep.subr.bf16.mxu0 %v37671_v11 }
 0x749   :  { %29798 = vmatprep.subr.bf16.mxu1 %v37671_v11 }
 0x74b   :  { %30091 = vmatpush3.bf16.msra.mxu0 %v37913_v4 }
 0x74c   :  { %29800 = vmatpush3.bf16.msra.mxu1 %v32905_v28  ;;  %30092 = vmatprep.subr.bf16.mxu0 %v37671_v11 }
 0x74d   :  { %29801 = vmatprep.subr.bf16.mxu1 %v37671_v11 }
 0x74f   :  { %30094 = vmatpush3.bf16.msra.mxu0 %v37914_v52 }
 0x750   :  { %29803 = vmatpush3.bf16.msra.mxu1 %v37865_v49  ;;  %30095 = vmatprep.subr.bf16.mxu0 %v37671_v11 }
 0x751   :  { %v35470_v47 = vpop.f32.mrb[4].mxu0  ;;  %29804 = vmatprep.subr.bf16.mxu1 %v37671_v11 }
 0x752   :  { %38102 = vst [vmem:[#allocation10_spill] sm:$0xff] %v35470_v47  ;;  %v24613_v61 = vpop.f32.mrb[5].mxu0  ;;  %v17573_v57 = vmul.f32 %v33791_v12, %v35470_v47  ;;  %v38108_v47 = vld [vmem:[#allocation78_spill] sm:$0xff] }
 0x753   :  { %30097 = vmatpush3.bf16.msra.mxu0 %v37915_v25  ;;  %v37563_v61 = vand.u32 4294901760, %v35476_v54 }
 0x754   :  { %29806 = vmatpush3.bf16.msra.mxu1 %v37867_v17  ;;  %17574 = vadd.xlane.f32.xlu0 %v17573_v57 }
 0x755   :  { %30098 = vmatprep.subr.bf16.mxu0 %v37671_v11  ;;  %29807 = vmatprep.subr.bf16.mxu1 %v37671_v11  ;;  %v11180_v57 = vsub.f32 %v35476_v54, %v37563_v61  ;;  %v38107_v61 = vld [vmem:[#allocation77_spill] sm:$0xff] }
 0x757   :  { %30100 = vmatpush3.bf16.msra.mxu0 %v37916_v9  ;;  %v11181_v20 = vand.u32 4294901760, %v11180_v57  ;;  %v38106_v57 = vld [vmem:[#allocation76_spill] sm:$0xff] }
 0x758   :  { %29809 = vmatpush3.bf16.msra.mxu1 %v37869_v16  ;;  %30101 = vmatprep.subr.bf16.mxu0 %v37671_v11 }
 0x759   :  { %29810 = vmatprep.subr.bf16.mxu1 %v37671_v11 }
 0x75b   :  { %30103 = vmatpush3.bf16.msra.mxu0 %v38075_v59 }
 0x75c   :  { %29812 = vmatpush3.bf16.msra.mxu1 %v38023_v40  ;;  %30104 = vmatprep.subr.bf16.mxu0 %v37671_v11 }
 0x75d   :  { %29813 = vmatprep.subr.bf16.mxu1 %v37671_v11 }
 0x75e   :  { %25487 = vmatmul.mubr.f32.vlgmr.msra.gmra.mrb[6].mxu0 %v12476_v13  ;;  %v38105_v13 = vld [vmem:[#allocation75_spill] sm:$0xff] }
 0x75f   :  { %30106 = vmatpush3.bf16.msra.mxu0 %v38076_v22  ;;  %25521 = vmatprep.mubr.msk.f32.mxu0 %vm31836_vm0, %v37732_v44 }
 0x760   :  { %29815 = vmatpush3.bf16.msra.mxu1 %v38024_v45  ;;  %30107 = vmatprep.subr.bf16.mxu0 %v37671_v11 }
 0x761   :  { %29816 = vmatprep.subr.bf16.mxu1 %v37671_v11 }
 0x763   :  { %30109 = vmatpush3.bf16.msra.mxu0 %v38077_v24  ;;  %25067 = vmatmul.mubr.f32.vlgmr.msra.gmra.mrb[6].mxu1 %v11181_v20  ;;  %v38104_v20 = vld [vmem:[#allocation74_spill] sm:$0xff] }
 0x764   :  { %29818 = vmatpush3.bf16.msra.mxu1 %v38025_v10  ;;  %30110 = vmatprep.subr.bf16.mxu0 %v37671_v11 }
 0x765   :  { %29819 = vmatprep.subr.bf16.mxu1 %v37671_v11  ;;  %25101 = vmatprep.mubr.msk.f32.mxu1 %vm31836_vm0, %v37732_v44 }
 0x767   :  { %30112 = vmatpush3.bf16.msra.mxu0 %v38078_v50 }
 0x768   :  { %29821 = vmatpush3.bf16.msra.mxu1 %v38103_v35  ;;  %30113 = vmatprep.subr.bf16.mxu0 %v37671_v11 }
 0x769   :  { %29822 = vmatprep.subr.bf16.mxu1 %v37671_v11 }
 0x76b   :  { %30115 = vmatpush3.bf16.msra.mxu0 %v38079_v23 }
 0x76c   :  { %29824 = vmatpush3.bf16.msra.mxu1 %v38104_v20  ;;  %30116 = vmatprep.subr.bf16.mxu0 %v37671_v11 }
 0x76d   :  { %29825 = vmatprep.subr.bf16.mxu1 %v37671_v11 }
 0x76f   :  { %30118 = vmatpush3.bf16.msra.mxu0 %v38080_v48  ;;  %v38120_v48 = vld [vmem:[#allocation40_spill] sm:$0xff] }
 0x770   :  { %29827 = vmatpush3.bf16.msra.mxu1 %v38105_v13  ;;  %30119 = vmatprep.subr.bf16.mxu0 %v37671_v11 }
 0x771   :  { %29828 = vmatprep.subr.bf16.mxu1 %v37671_v11 }
 0x773   :  { %30121 = vmatpush3.bf16.msra.mxu0 %v38081_v38  ;;  %v38113_v38 = vld [vmem:[#allocation83_spill] sm:$0xff] }
 0x774   :  { %29830 = vmatpush3.bf16.msra.mxu1 %v38106_v57  ;;  %30122 = vmatprep.subr.bf16.mxu0 %v37671_v11 }
 0x775   :  { %29831 = vmatprep.subr.bf16.mxu1 %v37671_v11 }
 0x777   :  { %30124 = vmatpush3.bf16.msra.mxu0 %v38082_v15  ;;  %v38109_v15 = vld [vmem:[#allocation79_spill] sm:$0xff] }
 0x778   :  { %29833 = vmatpush3.bf16.msra.mxu1 %v38107_v61  ;;  %30125 = vmatprep.subr.bf16.mxu0 %v37671_v11 }
 0x779   :  { %29834 = vmatprep.subr.bf16.mxu1 %v37671_v11 }
 0x77b   :  { %30127 = vmatpush3.bf16.msra.mxu0 %v38083_v42  ;;  %v38110_v42 = vld [vmem:[#allocation80_spill] sm:$0xff] }
 0x77c   :  { %29836 = vmatpush3.bf16.msra.mxu1 %v38108_v47  ;;  %30128 = vmatprep.subr.bf16.mxu0 %v37671_v11 }
 0x77d   :  { %29837 = vmatprep.subr.bf16.mxu1 %v37671_v11 }
 0x77e   :  { %25522 = vmatmul.mubr.msk.f32.vlgmr.msra.gmra.mrb[6].mxu0 %vm11741_vm4, %v37814_v19 }
 0x77f   :  { %30130 = vmatpush3.bf16.msra.mxu0 %v38084_v8  ;;  %25556 = vmatprep.mubr.msk.f32.mxu0 %vm31836_vm0, %v37732_v44  ;;  %v38111_v8 = vld [vmem:[#allocation81_spill] sm:$0xff] }
 0x780   :  { %29839 = vmatpush3.bf16.msra.mxu1 %v38109_v15  ;;  %30131 = vmatprep.subr.bf16.mxu0 %v37671_v11 }
 0x781   :  { %29840 = vmatprep.subr.bf16.mxu1 %v37671_v11 }
 0x783   :  { %30133 = vmatpush3.bf16.msra.mxu0 %v38085_v63  ;;  %25102 = vmatmul.mubr.msk.f32.vlgmr.msra.gmra.mrb[6].mxu1 %vm11093_vm5, %v37814_v19  ;;  %v38112_v63 = vld [vmem:[#allocation82_spill] sm:$0xff] }
 0x784   :  { %29842 = vmatpush3.bf16.msra.mxu1 %v38110_v42  ;;  %30134 = vmatprep.subr.bf16.mxu0 %v37671_v11 }
 0x785   :  { %29843 = vmatprep.subr.bf16.mxu1 %v37671_v11  ;;  %25136 = vmatprep.mubr.msk.f32.mxu1 %vm31836_vm0, %v37732_v44 }
 0x787   :  { %30136 = vmatpush3.bf16.msra.mxu0 %v38086_v53  ;;  %v38114_v53 = vld [vmem:[#allocation84_spill] sm:$0xff] }
 0x788   :  { %29845 = vmatpush3.bf16.msra.mxu1 %v38111_v8  ;;  %30137 = vmatprep.subr.bf16.mxu0 %v37671_v11 }
 0x789   :  { %29846 = vmatprep.subr.bf16.mxu1 %v37671_v11 }
 0x78b   :  { %30139 = vmatpush3.bf16.msra.mxu0 %v38087_v32  ;;  %v38115_v32 = vld [vmem:[#allocation85_spill] sm:$0xff] }
 0x78c   :  { %29848 = vmatpush3.bf16.msra.mxu1 %v38112_v63  ;;  %30140 = vmatprep.subr.bf16.mxu0 %v37671_v11 }
 0x78d   :  { %29849 = vmatprep.subr.bf16.mxu1 %v37671_v11 }
 0x78f   :  { %30142 = vmatpush3.bf16.msra.mxu0 %v38088_v60  ;;  %v38116_v60 = vld [vmem:[#allocation86_spill] sm:$0xff] }
 0x790   :  { %29851 = vmatpush3.bf16.msra.mxu1 %v38113_v38  ;;  %30143 = vmatprep.subr.bf16.mxu0 %v37671_v11 }
 0x791   :  { %29852 = vmatprep.subr.bf16.mxu1 %v37671_v11 }
 0x793   :  { %30145 = vmatpush3.bf16.msra.mxu0 %v38089_v5  ;;  %v38119_v5 = vand.u32 4294901760, %v35476_v54 }
 0x794   :  { %29854 = vmatpush3.bf16.msra.mxu1 %v38114_v53  ;;  %30146 = vmatprep.subr.bf16.mxu0 %v37671_v11 }
 0x795   :  { %29855 = vmatprep.subr.bf16.mxu1 %v37671_v11 }
 0x797   :  { %30148 = vmatpush3.bf16.msra.mxu0 %v38090_v2  ;;  %v38117_v2 = vld [vmem:[#allocation87_spill] sm:$0xff] }
 0x798   :  { %29857 = vmatpush3.bf16.msra.mxu1 %v38115_v32  ;;  %30149 = vmatprep.subr.bf16.mxu0 %v37671_v11 }
 0x799   :  { %29858 = vmatprep.subr.bf16.mxu1 %v37671_v11 }
 0x79b   :  { %30151 = vmatpush3.bf16.msra.mxu0 %v38091_v34  ;;  %v38118_v34 = vand.u32 4294901760, %v35461_v41 }
 0x79c   :  { %29860 = vmatpush3.bf16.msra.mxu1 %v38116_v60  ;;  %30152 = vmatprep.subr.bf16.mxu0 %v37671_v11 }
 0x79d   :  { %29861 = vmatprep.subr.bf16.mxu1 %v37671_v11 }
 0x79e   :  { %25557 = vmatmul.mubr.f32.vlgmr.msra.gmra.mrb[6].mxu0 %v35461_v41  ;;  %v38124_v41 = vld [vmem:[#allocation43_spill] sm:$0xff] }
 0x79f   :  { %30154 = vmatpush3.bf16.msra.mxu0 %v37910_v56  ;;  %25591 = vmatprep.mubr.msk.f32.mxu0 %vm31836_vm0, %v37732_v44 }
 0x7a0   :  { %29863 = vmatpush3.bf16.msra.mxu1 %v38117_v2  ;;  %30155 = vmatprep.subr.bf16.mxu0 %v37671_v11 }
 0x7a1   :  { %29864 = vmatprep.subr.bf16.mxu1 %v37671_v11 }
 0x7a3   :  { %30157 = vmatpush3.bf16.msra.mxu0 %v37911_v58  ;;  %25137 = vmatmul.mubr.f32.vlgmr.msra.gmra.mrb[6].mxu1 %v35476_v54  ;;  %v38122_v54 = vld [vmem:[#allocation42_spill] sm:$0xff] }
 0x7a4   :  { %29866 = vmatpush3.bf16.msra.mxu1 %v32865_v39  ;;  %30158 = vmatprep.subr.bf16.mxu0 %v37671_v11 }
 0x7a5   :  { %29867 = vmatprep.subr.bf16.mxu1 %v37671_v11  ;;  %25171 = vmatprep.mubr.msk.f32.mxu1 %vm31836_vm0, %v37732_v44 }
 0x7a7   :  { %30160 = vmatpush3.bf16.msra.mxu0 %v37912_v51 }
 0x7a8   :  { %29869 = vmatpush3.bf16.msra.mxu1 %v32883_v31  ;;  %30161 = vmatprep.subr.bf16.mxu0 %v37671_v11 }
 0x7a9   :  { %29870 = vmatprep.subr.bf16.mxu1 %v37671_v11 }
 0x7ab   :  { %30163 = vmatpush3.bf16.msra.mxu0 %v37913_v4 }
 0x7ac   :  { %29872 = vmatpush3.bf16.msra.mxu1 %v32905_v28  ;;  %30164 = vmatprep.subr.bf16.mxu0 %v37671_v11 }
 0x7ad   :  { %29873 = vmatprep.subr.bf16.mxu1 %v37671_v11 }
 0x7af   :  { %30166 = vmatpush3.bf16.msra.mxu0 %v37914_v52 }
 0x7b0   :  { %29875 = vmatpush3.bf16.msra.mxu1 %v37865_v49  ;;  %30167 = vmatprep.subr.bf16.mxu0 %v37671_v11 }
 0x7b1   :  { %29876 = vmatprep.subr.bf16.mxu1 %v37671_v11 }
 0x7b3   :  { %30169 = vmatpush3.bf16.msra.mxu0 %v37915_v25 }
 0x7b4   :  { %29878 = vmatpush3.bf16.msra.mxu1 %v37867_v17  ;;  %30170 = vmatprep.subr.bf16.mxu0 %v37671_v11 }
 0x7b5   :  { %29879 = vmatprep.subr.bf16.mxu1 %v37671_v11 }
 0x7b7   :  { %30172 = vmatpush3.bf16.msra.mxu0 %v37916_v9 }
 0x7b8   :  { %29881 = vmatpush3.bf16.msra.mxu1 %v37869_v16  ;;  %30173 = vmatprep.subr.bf16.mxu0 %v37671_v11 }
 0x7b9   :  { %29882 = vmatprep.subr.bf16.mxu1 %v37671_v11 }
 0x7bb   :  { %30175 = vmatpush3.bf16.msra.mxu0 %v38075_v59 }
 0x7bc   :  { %29884 = vmatpush3.bf16.msra.mxu1 %v38023_v40  ;;  %30176 = vmatprep.subr.bf16.mxu0 %v37671_v11 }
 0x7bd   :  { %29885 = vmatprep.subr.bf16.mxu1 %v37671_v11 }
 0x7be   :  { %25592 = vmatmul.mubr.f32.vlgmr.msra.gmra.mrb[6].mxu0 %v38118_v34  ;;  %v38121_v34 = vld [vmem:[#allocation11_spill] sm:$0xff] }
 0x7bf   :  { %30178 = vmatpush3.bf16.msra.mxu0 %v38094_v21  ;;  %25626 = vmatprep.mubr.msk.f32.mxu0 %vm31836_vm0, %v37732_v44 }
 0x7c0   :  { %29887 = vmatpush3.bf16.msra.mxu1 %v38024_v45  ;;  %30179 = vmatprep.subr.bf16.mxu0 %v37671_v11 }
 0x7c1   :  { %29888 = vmatprep.subr.bf16.mxu1 %v37671_v11 }
 0x7c3   :  { %30181 = vmatpush3.bf16.msra.mxu0 %v38095_v0  ;;  %25172 = vmatmul.mubr.f32.vlgmr.msra.gmra.mrb[6].mxu1 %v38119_v5  ;;  %v38123_v5 = vld [vmem:[#allocation13_spill] sm:$0xff] }
 0x7c4   :  { %29890 = vmatpush3.bf16.msra.mxu1 %v38120_v48  ;;  %30182 = vmatprep.subr.bf16.mxu0 %v37671_v11 }
 0x7c5   :  { %29891 = vmatprep.subr.bf16.mxu1 %v37671_v11  ;;  %25206 = vmatprep.mubr.msk.f32.mxu1 %vm31836_vm0, %v37732_v44 }
 0x7c7   :  { %30184 = vmatpush3.bf16.msra.mxu0 %v38096_v55 }
 0x7c8   :  { %29893 = vmatpush3.bf16.msra.mxu1 %v38121_v34  ;;  %30185 = vmatprep.subr.bf16.mxu0 %v37671_v11 }
 0x7c9   :  { %29894 = vmatprep.subr.bf16.mxu1 %v37671_v11 }
 0x7cb   :  { %30187 = vmatpush3.bf16.msra.mxu0 %v38097_v27  ;;  %v38125_v27 = vld [vmem:[#allocation15_spill] sm:$0xff] }
 0x7cc   :  { %29896 = vmatpush3.bf16.msra.mxu1 %v38122_v54  ;;  %30188 = vmatprep.subr.bf16.mxu0 %v37671_v11 }
 0x7cd   :  { %29897 = vmatprep.subr.bf16.mxu1 %v37671_v11 }
 0x7cf   :  { %30190 = vmatpush3.bf16.msra.mxu0 %v38098_v62  ;;  %v38126_v62 = vld [vmem:[#allocation17_spill] sm:$0xff] }
 0x7d0   :  { %29899 = vmatpush3.bf16.msra.mxu1 %v38123_v5  ;;  %30191 = vmatprep.subr.bf16.mxu0 %v37671_v11 }
 0x7d1   :  { %29900 = vmatprep.subr.bf16.mxu1 %v37671_v11 }
 0x7d3   :  { %30193 = vmatpush3.bf16.msra.mxu0 %v38099_v3  ;;  %v35739_v3 = vsub.f32 %v18579_v6, %v18579_v6 }
 0x7d4   :  { %29902 = vmatpush3.bf16.msra.mxu1 %v38124_v41  ;;  %30194 = vmatprep.subr.bf16.mxu0 %v37671_v11 }
 0x7d5   :  { %29903 = vmatprep.subr.bf16.mxu1 %v37671_v11  ;;  %v37588_v0 = vand.u32 4294901760, %v35739_v3 }
 0x7d7   :  { %30196 = vmatpush3.bf16.msra.mxu0 %v38100_v46  ;;  %v38127_v46 = vld [vmem:[#allocation88_spill] sm:$0xff]  ;;  %v13122_v6 = vsub.f32 %v35739_v3, %v37588_v0 }
 0x7d8   :  { %29905 = vmatpush3.bf16.msra.mxu1 %v38125_v27  ;;  %30197 = vmatprep.subr.bf16.mxu0 %v37671_v11 }
 0x7d9   :  { %29906 = vmatprep.subr.bf16.mxu1 %v37671_v11 }
 0x7db   :  { %30199 = vmatpush3.bf16.msra.mxu0 %v38101_v37  ;;  %v35732_v37 = vpop.permute.xlu1 %13687 }
 0x7dc   :  { %29908 = vmatpush3.bf16.msra.mxu1 %v38126_v62  ;;  %30200 = vmatprep.subr.bf16.mxu0 %v37671_v11  ;;  %vm13689_vm7 = vcmp.eq.s32.totalorder %v35732_v37, %v32537_v36 }
 0x7dd   :  { %29909 = vmatprep.subr.bf16.mxu1 %v37671_v11  ;;  %v18584_v55 = vsel %vm13689_vm7, 1.0, %v37732_v44 }
 0x7de   :  { %25627 = vmatmul.mubr.msk.f32.vlgmr.msra.gmra.mrb[6].mxu0 %vm11741_vm4, %v37814_v19  ;;  %v35750_v21 = vsub.f32 %v18584_v55, %v18584_v55  ;;  %v13123_v55 = vand.u32 4294901760, %v13122_v6  ;;  %v38128_v6 = vld [vmem:[#allocation25_spill] sm:$0xff] }
 0x7df   :  { %30202 = vmatpush3.bf16.msra.mxu0 %v37910_v56  ;;  %25661 = vmatprep.mubr.msk.f32.mxu0 %vm31836_vm0, %v37732_v44  ;;  %v35993_v18 = vpop.permute.xlu1 %15629 }
 0x7e0   :  { %29911 = vmatpush3.bf16.msra.mxu1 %v38127_v46  ;;  %30203 = vmatprep.subr.bf16.mxu0 %v37671_v11  ;;  %v37589_v23 = vand.u32 4294901760, %v35750_v21  ;;  %vm15631_vm8 = vcmp.eq.s32.totalorder %v35993_v18, %v32537_v36  ;;  %v38178_v18 = vld [vmem:[#allocation45_spill] sm:$0xff] }
 0x7e1   :  { %29912 = vmatprep.subr.bf16.mxu1 %v37671_v11  ;;  %v18596_v37 = vsel %vm15631_vm8, 1.0, %v37732_v44 }
 0x7e2   :  { %v13776_v50 = vsub.f32 %v35750_v21, %v37589_v23  ;;  %v38132_v23 = vld [vmem:[#allocation41_spill] sm:$0xff] }
 0x7e3   :  { %30205 = vmatpush3.bf16.msra.mxu0 %v37911_v58  ;;  %25207 = vmatmul.mubr.msk.f32.vlgmr.msra.gmra.mrb[6].mxu1 %vm11093_vm5, %v37814_v19 }
 0x7e4   :  { %29914 = vmatpush3.bf16.msra.mxu1 %v32865_v39  ;;  %30206 = vmatprep.subr.bf16.mxu0 %v37671_v11  ;;  %v13777_v0 = vand.u32 4294901760, %v13776_v50  ;;  %v38129_v50 = vld [vmem:[#allocation27_spill] sm:$0xff] }
 0x7e5   :  { %29915 = vmatprep.subr.bf16.mxu1 %v37671_v11  ;;  %25241 = vmatprep.mubr.msk.f32.mxu1 %vm31836_vm0, %v37732_v44 }
 0x7e7   :  { %30208 = vmatpush3.bf16.msra.mxu0 %v37912_v51 }
 0x7e8   :  { %29917 = vmatpush3.bf16.msra.mxu1 %v32883_v31  ;;  %30209 = vmatprep.subr.bf16.mxu0 %v37671_v11 }
 0x7e9   :  { %29918 = vmatprep.subr.bf16.mxu1 %v37671_v11 }
 0x7eb   :  { %30211 = vmatpush3.bf16.msra.mxu0 %v37913_v4 }
 0x7ec   :  { %29920 = vmatpush3.bf16.msra.mxu1 %v32905_v28  ;;  %30212 = vmatprep.subr.bf16.mxu0 %v37671_v11 }
 0x7ed   :  { %29921 = vmatprep.subr.bf16.mxu1 %v37671_v11 }
 0x7ef   :  { %30214 = vmatpush3.bf16.msra.mxu0 %v37914_v52 }
 0x7f0   :  { %29923 = vmatpush3.bf16.msra.mxu1 %v37865_v49  ;;  %30215 = vmatprep.subr.bf16.mxu0 %v37671_v11 }
 0x7f1   :  { %29924 = vmatprep.subr.bf16.mxu1 %v37671_v11 }
 0x7f3   :  { %30217 = vmatpush3.bf16.msra.mxu0 %v37915_v25 }
 0x7f4   :  { %29926 = vmatpush3.bf16.msra.mxu1 %v37867_v17  ;;  %30218 = vmatprep.subr.bf16.mxu0 %v37671_v11 }
 0x7f5   :  { %29927 = vmatprep.subr.bf16.mxu1 %v37671_v11 }
 0x7f7   :  { %30220 = vmatpush3.bf16.msra.mxu0 %v37916_v9 }
 0x7f8   :  { %29929 = vmatpush3.bf16.msra.mxu1 %v37869_v16  ;;  %30221 = vmatprep.subr.bf16.mxu0 %v37671_v11 }
 0x7f9   :  { %29930 = vmatprep.subr.bf16.mxu1 %v37671_v11 }
 0x7fb   :  { %30223 = vmatpush3.bf16.msra.mxu0 %v38075_v59 }
 0x7fc   :  { %29932 = vmatpush3.bf16.msra.mxu1 %v38023_v40  ;;  %30224 = vmatprep.subr.bf16.mxu0 %v37671_v11 }
 0x7fd   :  { %29933 = vmatprep.subr.bf16.mxu1 %v37671_v11 }
 0x7fe   :  { %25662 = vmatmul.mubr.msk.f32.vlgmr.msra.gmra.mrb[6].mxu0 %vm11741_vm4, %v37814_v19 }
 0x7ff   :  { %30226 = vmatpush3.bf16.msra.mxu0 %v32865_v39  ;;  %25696 = vmatprep.mubr.msk.f32.mxu0 %vm31836_vm0, %v37732_v44 }
 0x800   :  { %29935 = vmatpush3.bf16.msra.mxu1 %v38024_v45  ;;  %30227 = vmatprep.subr.bf16.mxu0 %v37671_v11 }
 0x801   :  { %30368 = vmatprep.subr.bf16.mxu1 %v37671_v11 }
 0x803   :  { %25242 = vmatmul.mubr.msk.f32.vlgmr.msra.gmra.mrb[6].mxu1 %vm11093_vm5, %v37814_v19  ;;  %30229 = vmatpush3.bf16.msra.mxu0 %v32883_v31 }
 0x804   :  { %30370 = vmatpush3.bf16.msra.mxu1 %v37733_v29  ;;  %30230 = vmatprep.subr.bf16.mxu0 %v37671_v11 }
 0x805   :  { %30371 = vmatprep.subr.bf16.mxu1 %v37671_v11  ;;  %25906 = vmatprep.mubr.msk.f32.mxu1 %vm31836_vm0, %v37732_v44 }
 0x807   :  { %30232 = vmatpush3.bf16.msra.mxu0 %v32905_v28 }
 0x808   :  { %30373 = vmatpush3.bf16.msra.mxu1 %v37735_v1  ;;  %30233 = vmatprep.subr.bf16.mxu0 %v37671_v11 }
 0x809   :  { %30374 = vmatprep.subr.bf16.mxu1 %v37671_v11 }
 0x80b   :  { %30235 = vmatpush3.bf16.msra.mxu0 %v37865_v49 }
 0x80c   :  { %30376 = vmatpush3.bf16.msra.mxu1 %v37866_v26  ;;  %30236 = vmatprep.subr.bf16.mxu0 %v37671_v11 }
 0x80d   :  { %30377 = vmatprep.subr.bf16.mxu1 %v37671_v11 }
 0x80f   :  { %30238 = vmatpush3.bf16.msra.mxu0 %v37867_v17 }
 0x810   :  { %30379 = vmatpush3.bf16.msra.mxu1 %v37868_v43  ;;  %30239 = vmatprep.subr.bf16.mxu0 %v37671_v11 }
 0x811   :  { %30380 = vmatprep.subr.bf16.mxu1 %v37671_v11 }
 0x813   :  { %30241 = vmatpush3.bf16.msra.mxu0 %v37869_v16 }
 0x814   :  { %30382 = vmatpush3.bf16.msra.mxu1 %v37870_v33  ;;  %30242 = vmatprep.subr.bf16.mxu0 %v37671_v11 }
 0x815   :  { %30383 = vmatprep.subr.bf16.mxu1 %v37671_v11 }
 0x817   :  { %30244 = vmatpush3.bf16.msra.mxu0 %v38023_v40 }
 0x818   :  { %30385 = vmatpush3.bf16.msra.mxu1 %v37872_v30  ;;  %30245 = vmatprep.subr.bf16.mxu0 %v37671_v11 }
 0x819   :  { %30386 = vmatprep.subr.bf16.mxu1 %v37671_v11 }
 0x81b   :  { %30247 = vmatpush3.bf16.msra.mxu0 %v38024_v45 }
 0x81c   :  { %30388 = vmatpush3.bf16.msra.mxu1 %v37968_v14  ;;  %30248 = vmatprep.subr.bf16.mxu0 %v37671_v11 }
 0x81d   :  { %30389 = vmatprep.subr.bf16.mxu1 %v37671_v11 }
 0x81e   :  { %25697 = vmatmul.mubr.f32.vlgmr.msra.gmra.mrb[6].mxu0 %v13123_v55  ;;  %v38131_v55 = vld [vmem:[#allocation38_spill] sm:$0xff] }
 0x81f   :  { %30250 = vmatpush3.bf16.msra.mxu0 %v38025_v10  ;;  %25731 = vmatprep.mubr.msk.f32.mxu0 %vm31836_vm0, %v37732_v44 }
 0x820   :  { %30391 = vmatpush3.bf16.msra.mxu1 %v37969_v7  ;;  %30251 = vmatprep.subr.bf16.mxu0 %v37671_v11 }
 0x821   :  { %30392 = vmatprep.subr.bf16.mxu1 %v37671_v11 }
 0x823   :  { %30253 = vmatpush3.bf16.msra.mxu0 %v38103_v35  ;;  %25907 = vmatmul.mubr.f32.vlgmr.msra.gmra.mrb[8].mxu1 %v13777_v0  ;;  %v38130_v0 = vld [vmem:[#allocation30_spill] sm:$0xff] }
 0x824   :  { %30394 = vmatpush3.bf16.msra.mxu1 %v38128_v6  ;;  %30254 = vmatprep.subr.bf16.mxu0 %v37671_v11 }
 0x825   :  { %30395 = vmatprep.subr.bf16.mxu1 %v37671_v11  ;;  %25941 = vmatprep.mubr.msk.f32.mxu1 %vm31836_vm0, %v37732_v44 }
 0x827   :  { %30256 = vmatpush3.bf16.msra.mxu0 %v38104_v20  ;;  %v38146_v20 = vld [vmem:[#allocation18_spill] sm:$0xff] }
 0x828   :  { %30397 = vmatpush3.bf16.msra.mxu1 %v38129_v50  ;;  %30257 = vmatprep.subr.bf16.mxu0 %v37671_v11 }
 0x829   :  { %30398 = vmatprep.subr.bf16.mxu1 %v37671_v11 }
 0x82b   :  { %30259 = vmatpush3.bf16.msra.mxu0 %v38105_v13  ;;  %v38133_v13 = vld [vmem:[#allocation51_spill] sm:$0xff] }
 0x82c   :  { %30400 = vmatpush3.bf16.msra.mxu1 %v38130_v0  ;;  %30260 = vmatprep.subr.bf16.mxu0 %v37671_v11 }
 0x82d   :  { %30401 = vmatprep.subr.bf16.mxu1 %v37671_v11 }
 0x82f   :  { %30262 = vmatpush3.bf16.msra.mxu0 %v38106_v57  ;;  %v38134_v57 = vld [vmem:[#allocation54_spill] sm:$0xff] }
 0x830   :  { %30403 = vmatpush3.bf16.msra.mxu1 %v38131_v55  ;;  %30263 = vmatprep.subr.bf16.mxu0 %v37671_v11 }
 0x831   :  { %30404 = vmatprep.subr.bf16.mxu1 %v37671_v11 }
 0x833   :  { %30265 = vmatpush3.bf16.msra.mxu0 %v38107_v61  ;;  %v38139_v61 = vld [vmem:[#allocation61_spill] sm:$0xff] }
 0x834   :  { %30406 = vmatpush3.bf16.msra.mxu1 %v38132_v23  ;;  %30266 = vmatprep.subr.bf16.mxu0 %v37671_v11 }
 0x835   :  { %30407 = vmatprep.subr.bf16.mxu1 %v37671_v11 }
 0x837   :  { %30268 = vmatpush3.bf16.msra.mxu0 %v38108_v47  ;;  %v38135_v47 = vld [vmem:[#allocation57_spill] sm:$0xff] }
 0x838   :  { %30409 = vmatpush3.bf16.msra.mxu1 %v38133_v13  ;;  %30269 = vmatprep.subr.bf16.mxu0 %v37671_v11 }
 0x839   :  { %30410 = vmatprep.subr.bf16.mxu1 %v37671_v11 }
 0x83b   :  { %30271 = vmatpush3.bf16.msra.mxu0 %v38109_v15  ;;  %v38136_v15 = vld [vmem:[#allocation53_spill] sm:$0xff] }
 0x83c   :  { %30412 = vmatpush3.bf16.msra.mxu1 %v38134_v57  ;;  %30272 = vmatprep.subr.bf16.mxu0 %v37671_v11 }
 0x83d   :  { %30413 = vmatprep.subr.bf16.mxu1 %v37671_v11 }
 0x83e   :  { %25732 = vmatmul.mubr.msk.f32.vlgmr.msra.gmra.mrb[6].mxu0 %vm13035_vm6, %v37814_v19 }
 0x83f   :  { %30274 = vmatpush3.bf16.msra.mxu0 %v38110_v42  ;;  %25766 = vmatprep.mubr.msk.f32.mxu0 %vm31836_vm0, %v37732_v44  ;;  %v38137_v42 = vld [vmem:[#allocation56_spill] sm:$0xff] }
 0x840   :  { %30415 = vmatpush3.bf16.msra.mxu1 %v38135_v47  ;;  %30275 = vmatprep.subr.bf16.mxu0 %v37671_v11 }
 0x841   :  { %30416 = vmatprep.subr.bf16.mxu1 %v37671_v11 }
 0x843   :  { %30277 = vmatpush3.bf16.msra.mxu0 %v38111_v8  ;;  %25942 = vmatmul.mubr.msk.f32.vlgmr.msra.gmra.mrb[8].mxu1 %vm13689_vm7, %v37814_v19  ;;  %v38138_v8 = vld [vmem:[#allocation59_spill] sm:$0xff] }
 0x844   :  { %30418 = vmatpush3.bf16.msra.mxu1 %v38136_v15  ;;  %30278 = vmatprep.subr.bf16.mxu0 %v37671_v11 }
 0x845   :  { %30419 = vmatprep.subr.bf16.mxu1 %v37671_v11  ;;  %25976 = vmatprep.mubr.msk.f32.mxu1 %vm31836_vm0, %v37732_v44 }
 0x847   :  { %30280 = vmatpush3.bf16.msra.mxu0 %v38112_v63  ;;  %v38140_v63 = vld [vmem:[#allocation63_spill] sm:$0xff] }
 0x848   :  { %30421 = vmatpush3.bf16.msra.mxu1 %v38137_v42  ;;  %30281 = vmatprep.subr.bf16.mxu0 %v37671_v11 }
 0x849   :  { %30422 = vmatprep.subr.bf16.mxu1 %v37671_v11 }
 0x84b   :  { %30283 = vmatpush3.bf16.msra.mxu0 %v38113_v38  ;;  %v38141_v38 = vld [vmem:[#allocation65_spill] sm:$0xff] }
 0x84c   :  { %30424 = vmatpush3.bf16.msra.mxu1 %v38138_v8  ;;  %30284 = vmatprep.subr.bf16.mxu0 %v37671_v11 }
 0x84d   :  { %30425 = vmatprep.subr.bf16.mxu1 %v37671_v11 }
 0x84f   :  { %30286 = vmatpush3.bf16.msra.mxu0 %v38114_v53  ;;  %v38142_v53 = vld [vmem:[#allocation68_spill] sm:$0xff] }
 0x850   :  { %30427 = vmatpush3.bf16.msra.mxu1 %v38139_v61  ;;  %30287 = vmatprep.subr.bf16.mxu0 %v37671_v11 }
 0x851   :  { %30428 = vmatprep.subr.bf16.mxu1 %v37671_v11 }
 0x853   :  { %30289 = vmatpush3.bf16.msra.mxu0 %v38115_v32  ;;  %v38145_v32 = vand.u32 4294901760, %v35750_v21 }
 0x854   :  { %30430 = vmatpush3.bf16.msra.mxu1 %v38140_v63  ;;  %30290 = vmatprep.subr.bf16.mxu0 %v37671_v11 }
 0x855   :  { %30431 = vmatprep.subr.bf16.mxu1 %v37671_v11 }
 0x857   :  { %30292 = vmatpush3.bf16.msra.mxu0 %v38116_v60  ;;  %v38143_v60 = vld [vmem:[#allocation69_spill] sm:$0xff] }
 0x858   :  { %30433 = vmatpush3.bf16.msra.mxu1 %v38141_v38  ;;  %30293 = vmatprep.subr.bf16.mxu0 %v37671_v11 }
 0x859   :  { %30434 = vmatprep.subr.bf16.mxu1 %v37671_v11 }
 0x85b   :  { %30295 = vmatpush3.bf16.msra.mxu0 %v38117_v2  ;;  %v38144_v2 = vand.u32 4294901760, %v35739_v3 }
 0x85c   :  { %30436 = vmatpush3.bf16.msra.mxu1 %v38142_v53  ;;  %30296 = vmatprep.subr.bf16.mxu0 %v37671_v11 }
 0x85d   :  { %30437 = vmatprep.subr.bf16.mxu1 %v37671_v11 }
 0x85e   :  { %25767 = vmatmul.mubr.f32.vlgmr.msra.gmra.mrb[6].mxu0 %v35739_v3  ;;  %v38150_v3 = vld [vmem:[#allocation32_spill] sm:$0xff] }
 0x85f   :  { %30298 = vmatpush3.bf16.msra.mxu0 %v32865_v39  ;;  %25801 = vmatprep.mubr.msk.f32.mxu0 %vm31836_vm0, %v37732_v44 }
 0x860   :  { %30439 = vmatpush3.bf16.msra.mxu1 %v38143_v60  ;;  %30299 = vmatprep.subr.bf16.mxu0 %v37671_v11 }
 0x861   :  { %30440 = vmatprep.subr.bf16.mxu1 %v37671_v11 }
 0x863   :  { %30301 = vmatpush3.bf16.msra.mxu0 %v32883_v31  ;;  %25977 = vmatmul.mubr.f32.vlgmr.msra.gmra.mrb[8].mxu1 %v35750_v21  ;;  %v38148_v21 = vld [vmem:[#allocation72_spill] sm:$0xff] }
 0x864   :  { %30442 = vmatpush3.bf16.msra.mxu1 %v37733_v29  ;;  %30302 = vmatprep.subr.bf16.mxu0 %v37671_v11 }
 0x865   :  { %30443 = vmatprep.subr.bf16.mxu1 %v37671_v11  ;;  %26011 = vmatprep.mubr.msk.f32.mxu1 %vm31836_vm0, %v37732_v44 }
 0x867   :  { %30304 = vmatpush3.bf16.msra.mxu0 %v32905_v28 }
 0x868   :  { %30445 = vmatpush3.bf16.msra.mxu1 %v37735_v1  ;;  %30305 = vmatprep.subr.bf16.mxu0 %v37671_v11 }
 0x869   :  { %30446 = vmatprep.subr.bf16.mxu1 %v37671_v11 }
 0x86b   :  { %30307 = vmatpush3.bf16.msra.mxu0 %v37865_v49 }
 0x86c   :  { %30448 = vmatpush3.bf16.msra.mxu1 %v37866_v26  ;;  %30308 = vmatprep.subr.bf16.mxu0 %v37671_v11 }
 0x86d   :  { %30449 = vmatprep.subr.bf16.mxu1 %v37671_v11 }
 0x86f   :  { %30310 = vmatpush3.bf16.msra.mxu0 %v37867_v17 }
 0x870   :  { %30451 = vmatpush3.bf16.msra.mxu1 %v37868_v43  ;;  %30311 = vmatprep.subr.bf16.mxu0 %v37671_v11 }
 0x871   :  { %30452 = vmatprep.subr.bf16.mxu1 %v37671_v11 }
 0x873   :  { %30313 = vmatpush3.bf16.msra.mxu0 %v37869_v16 }
 0x874   :  { %30454 = vmatpush3.bf16.msra.mxu1 %v37870_v33  ;;  %30314 = vmatprep.subr.bf16.mxu0 %v37671_v11 }
 0x875   :  { %30455 = vmatprep.subr.bf16.mxu1 %v37671_v11 }
 0x877   :  { %30316 = vmatpush3.bf16.msra.mxu0 %v38023_v40 }
 0x878   :  { %30457 = vmatpush3.bf16.msra.mxu1 %v37872_v30  ;;  %30317 = vmatprep.subr.bf16.mxu0 %v37671_v11 }
 0x879   :  { %30458 = vmatprep.subr.bf16.mxu1 %v37671_v11 }
 0x87b   :  { %30319 = vmatpush3.bf16.msra.mxu0 %v38024_v45 }
 0x87c   :  { %30460 = vmatpush3.bf16.msra.mxu1 %v37968_v14  ;;  %30320 = vmatprep.subr.bf16.mxu0 %v37671_v11 }
 0x87d   :  { %30461 = vmatprep.subr.bf16.mxu1 %v37671_v11 }
 0x87e   :  { %25802 = vmatmul.mubr.f32.vlgmr.msra.gmra.mrb[6].mxu0 %v38144_v2  ;;  %v38147_v2 = vld [vmem:[#allocation70_spill] sm:$0xff] }
 0x87f   :  { %30322 = vmatpush3.bf16.msra.mxu0 %v38120_v48  ;;  %25836 = vmatprep.mubr.msk.f32.mxu0 %vm31836_vm0, %v37732_v44 }
 0x880   :  { %30463 = vmatpush3.bf16.msra.mxu1 %v37969_v7  ;;  %30323 = vmatprep.subr.bf16.mxu0 %v37671_v11 }
 0x881   :  { %30464 = vmatprep.subr.bf16.mxu1 %v37671_v11 }
 0x883   :  { %30325 = vmatpush3.bf16.msra.mxu0 %v38121_v34  ;;  %26012 = vmatmul.mubr.f32.vlgmr.msra.gmra.mrb[8].mxu1 %v38145_v32  ;;  %v38149_v32 = vld [vmem:[#allocation29_spill] sm:$0xff] }
 0x884   :  { %30466 = vmatpush3.bf16.msra.mxu1 %v38146_v20  ;;  %30326 = vmatprep.subr.bf16.mxu0 %v37671_v11 }
 0x885   :  { %30467 = vmatprep.subr.bf16.mxu1 %v37671_v11  ;;  %26046 = vmatprep.mubr.msk.f32.mxu1 %vm31836_vm0, %v37732_v44 }
 0x887   :  { %30328 = vmatpush3.bf16.msra.mxu0 %v38122_v54 }
 0x888   :  { %30469 = vmatpush3.bf16.msra.mxu1 %v38147_v2  ;;  %30329 = vmatprep.subr.bf16.mxu0 %v37671_v11 }
 0x889   :  { %30470 = vmatprep.subr.bf16.mxu1 %v37671_v11 }
 0x88b   :  { %30331 = vmatpush3.bf16.msra.mxu0 %v38123_v5  ;;  %v38151_v5 = vld [vmem:[#allocation66_spill] sm:$0xff] }
 0x88c   :  { %30472 = vmatpush3.bf16.msra.mxu1 %v38148_v21  ;;  %30332 = vmatprep.subr.bf16.mxu0 %v37671_v11 }
 0x88d   :  { %30473 = vmatprep.subr.bf16.mxu1 %v37671_v11 }
 0x88f   :  { %30334 = vmatpush3.bf16.msra.mxu0 %v38124_v41  ;;  %v38152_v41 = vld [vmem:[#allocation36_spill] sm:$0xff] }
 0x890   :  { %30475 = vmatpush3.bf16.msra.mxu1 %v38149_v32  ;;  %30335 = vmatprep.subr.bf16.mxu0 %v37671_v11 }
 0x891   :  { %30476 = vmatprep.subr.bf16.mxu1 %v37671_v11 }
 0x893   :  { %30337 = vmatpush3.bf16.msra.mxu0 %v38125_v27  ;;  %v36013_v27 = vsub.f32 %v18596_v37, %v18596_v37 }
 0x894   :  { %30478 = vmatpush3.bf16.msra.mxu1 %v38150_v3  ;;  %30338 = vmatprep.subr.bf16.mxu0 %v37671_v11 }
 0x895   :  { %30479 = vmatprep.subr.bf16.mxu1 %v37671_v11  ;;  %v37616_v34 = vand.u32 4294901760, %v36013_v27 }
 0x897   :  { %30340 = vmatpush3.bf16.msra.mxu0 %v38126_v62  ;;  %v38153_v62 = vld [vmem:[#allocation37_spill] sm:$0xff]  ;;  %v15718_v35 = vsub.f32 %v36013_v27, %v37616_v34 }
 0x898   :  { %30481 = vmatpush3.bf16.msra.mxu1 %v38151_v5  ;;  %30341 = vmatprep.subr.bf16.mxu0 %v37671_v11 }
 0x899   :  { %30482 = vmatprep.subr.bf16.mxu1 %v37671_v11 }
 0x89b   :  { %30343 = vmatpush3.bf16.msra.mxu0 %v38127_v46  ;;  %v36006_v46 = vpop.permute.xlu0 %13681 }
 0x89c   :  { %30484 = vmatpush3.bf16.msra.mxu1 %v38152_v41  ;;  %30344 = vmatprep.subr.bf16.mxu0 %v37671_v11  ;;  %vm13683_vm9 = vcmp.eq.s32.totalorder %v36006_v46, %v32537_v36 }
 0x89d   :  { %30485 = vmatprep.subr.bf16.mxu1 %v37671_v11  ;;  %v18583_v54 = vsel %vm13683_vm9, 1.0, %v37732_v44 }
 0x89e   :  { %25837 = vmatmul.mubr.msk.f32.vlgmr.msra.gmra.mrb[6].mxu0 %vm13035_vm6, %v37814_v19  ;;  %v36024_v48 = vsub.f32 %v18583_v54, %v18583_v54 }
 0x89f   :  { %30346 = vmatpush3.bf16.msra.mxu0 %v32865_v39  ;;  %25871 = vmatprep.mubr.msk.f32.mxu0 %vm31836_vm0, %v37732_v44 }
 0x8a0   :  { %30487 = vmatpush3.bf16.msra.mxu1 %v38153_v62  ;;  %30347 = vmatprep.subr.bf16.mxu0 %v37671_v11  ;;  %v14416_v10 = vand.u32 4294901760, %v36024_v48 }
 0x8a1   :  { %30488 = vmatprep.subr.bf16.mxu1 %v37671_v11 }
 0x8a2   :  { %v14417_v34 = vsub.f32 %v36024_v48, %v14416_v10 }
 0x8a3   :  { %30349 = vmatpush3.bf16.msra.mxu0 %v32883_v31  ;;  %26047 = vmatmul.mubr.msk.f32.vlgmr.msra.gmra.mrb[8].mxu1 %vm13689_vm7, %v37814_v19 }
 0x8a4   :  { %30490 = vmatpush3.bf16.msra.mxu1 %v37733_v29  ;;  %30350 = vmatprep.subr.bf16.mxu0 %v37671_v11 }
 0x8a5   :  { %30491 = vmatprep.subr.bf16.mxu1 %v37671_v11  ;;  %26081 = vmatprep.mubr.msk.f32.mxu1 %vm31836_vm0, %v37732_v44 }
 0x8a7   :  { %30352 = vmatpush3.bf16.msra.mxu0 %v32905_v28 }
 0x8a8   :  { %30493 = vmatpush3.bf16.msra.mxu1 %v37735_v1  ;;  %30353 = vmatprep.subr.bf16.mxu0 %v37671_v11 }
 0x8a9   :  { %30494 = vmatprep.subr.bf16.mxu1 %v37671_v11 }
 0x8ab   :  { %30355 = vmatpush3.bf16.msra.mxu0 %v37865_v49 }
 0x8ac   :  { %30496 = vmatpush3.bf16.msra.mxu1 %v37866_v26  ;;  %30356 = vmatprep.subr.bf16.mxu0 %v37671_v11 }
 0x8ad   :  { %30497 = vmatprep.subr.bf16.mxu1 %v37671_v11 }
 0x8af   :  { %30358 = vmatpush3.bf16.msra.mxu0 %v37867_v17 }
 0x8b0   :  { %30499 = vmatpush3.bf16.msra.mxu1 %v37868_v43  ;;  %30359 = vmatprep.subr.bf16.mxu0 %v37671_v11 }
 0x8b1   :  { %30500 = vmatprep.subr.bf16.mxu1 %v37671_v11 }
 0x8b3   :  { %30361 = vmatpush3.bf16.msra.mxu0 %v37869_v16 }
 0x8b4   :  { %30502 = vmatpush3.bf16.msra.mxu1 %v37870_v33  ;;  %30362 = vmatprep.subr.bf16.mxu0 %v37671_v11 }
 0x8b5   :  { %30503 = vmatprep.subr.bf16.mxu1 %v37671_v11 }
 0x8b7   :  { %30364 = vmatpush3.bf16.msra.mxu0 %v38023_v40  ;;  %v15719_v40 = vand.u32 4294901760, %v15718_v35  ;;  %v38155_v35 = vld [vmem:[#allocation28_spill] sm:$0xff] }
 0x8b8   :  { %30505 = vmatpush3.bf16.msra.mxu1 %v37872_v30  ;;  %30365 = vmatprep.subr.bf16.mxu0 %v37671_v11 }
 0x8b9   :  { %30506 = vmatprep.subr.bf16.mxu1 %v37671_v11 }
 0x8bb   :  { %30367 = vmatpush3.bf16.msra.mxu0 %v38024_v45 }
 0x8bc   :  { %30508 = vmatpush3.bf16.msra.mxu1 %v37968_v14  ;;  %30800 = vmatprep.subr.bf16.mxu0 %v37671_v11 }
 0x8bd   :  { %30509 = vmatprep.subr.bf16.mxu1 %v37671_v11 }
 0x8be   :  { %25872 = vmatmul.mubr.msk.f32.vlgmr.msra.gmra.mrb[6].mxu0 %vm13035_vm6, %v37814_v19 }
 0x8bf   :  { %30802 = vmatpush3.bf16.msra.mxu0 %v37733_v29  ;;  %26536 = vmatprep.mubr.msk.f32.mxu0 %vm31836_vm0, %v37732_v44 }
 0x8c0   :  { %30511 = vmatpush3.bf16.msra.mxu1 %v37969_v7  ;;  %30803 = vmatprep.subr.bf16.mxu0 %v37671_v11 }
 0x8c1   :  { %30512 = vmatprep.subr.bf16.mxu1 %v37671_v11 }
 0x8c3   :  { %30805 = vmatpush3.bf16.msra.mxu0 %v37735_v1  ;;  %26082 = vmatmul.mubr.msk.f32.vlgmr.msra.gmra.mrb[8].mxu1 %vm13689_vm7, %v37814_v19 }
 0x8c4   :  { %30514 = vmatpush3.bf16.msra.mxu1 %v37910_v56  ;;  %30806 = vmatprep.subr.bf16.mxu0 %v37671_v11 }
 0x8c5   :  { %30515 = vmatprep.subr.bf16.mxu1 %v37671_v11  ;;  %26116 = vmatprep.mubr.msk.f32.mxu1 %vm31836_vm0, %v37732_v44 }
 0x8c7   :  { %30808 = vmatpush3.bf16.msra.mxu0 %v37866_v26 }
 0x8c8   :  { %30517 = vmatpush3.bf16.msra.mxu1 %v37911_v58  ;;  %30809 = vmatprep.subr.bf16.mxu0 %v37671_v11 }
 0x8c9   :  { %30518 = vmatprep.subr.bf16.mxu1 %v37671_v11 }
 0x8cb   :  { %30811 = vmatpush3.bf16.msra.mxu0 %v37868_v43 }
 0x8cc   :  { %30520 = vmatpush3.bf16.msra.mxu1 %v37912_v51  ;;  %30812 = vmatprep.subr.bf16.mxu0 %v37671_v11 }
 0x8cd   :  { %30521 = vmatprep.subr.bf16.mxu1 %v37671_v11 }
 0x8cf   :  { %30814 = vmatpush3.bf16.msra.mxu0 %v37870_v33 }
 0x8d0   :  { %30523 = vmatpush3.bf16.msra.mxu1 %v37913_v4  ;;  %30815 = vmatprep.subr.bf16.mxu0 %v37671_v11 }
 0x8d1   :  { %30524 = vmatprep.subr.bf16.mxu1 %v37671_v11 }
 0x8d3   :  { %30817 = vmatpush3.bf16.msra.mxu0 %v37872_v30 }
 0x8d4   :  { %30526 = vmatpush3.bf16.msra.mxu1 %v37914_v52  ;;  %30818 = vmatprep.subr.bf16.mxu0 %v37671_v11 }
 0x8d5   :  { %30527 = vmatprep.subr.bf16.mxu1 %v37671_v11 }
 0x8d6   :  { %v36030_v37 = vpop.f32.mrb[6].mxu1 }
 0x8d7   :  { %v25243_v45 = vpop.f32.mrb[7].mxu1  ;;  %30820 = vmatpush3.bf16.msra.mxu0 %v37968_v14  ;;  %v17576_v54 = vmul.f32 %v33791_v12, %v36030_v37 }
 0x8d8   :  { %30529 = vmatpush3.bf16.msra.mxu1 %v37915_v25  ;;  %30821 = vmatprep.subr.bf16.mxu0 %v37671_v11  ;;  %v14418_v45 = vand.u32 4294901760, %v14417_v34  ;;  %v38156_v34 = vld [vmem:[#allocation35_spill] sm:$0xff] }
 0x8d9   :  { %17577 = vadd.xlane.f32.xlu1 %v17576_v54  ;;  %30530 = vmatprep.subr.bf16.mxu1 %v37671_v11  ;;  %v38179_v54 = vld [vmem:[#allocation48_spill] sm:$0xff] }
 0x8db   :  { %30823 = vmatpush3.bf16.msra.mxu0 %v37969_v7 }
 0x8dc   :  { %30532 = vmatpush3.bf16.msra.mxu1 %v37916_v9  ;;  %30824 = vmatprep.subr.bf16.mxu0 %v37671_v11 }
 0x8dd   :  { %30533 = vmatprep.subr.bf16.mxu1 %v37671_v11 }
 0x8de   :  { %26537 = vmatmul.mubr.f32.vlgmr.msra.gmra.mrb[8].mxu0 %v15719_v40  ;;  %v38154_v40 = vld [vmem:[#allocation26_spill] sm:$0xff] }
 0x8df   :  { %30826 = vmatpush3.bf16.msra.mxu0 %v38128_v6  ;;  %26571 = vmatprep.mubr.msk.f32.mxu0 %vm31836_vm0, %v37732_v44  ;;  %v38157_v6 = vld [vmem:[#allocation39_spill] sm:$0xff] }
 0x8e0   :  { %30535 = vmatpush3.bf16.msra.mxu1 %v38075_v59  ;;  %30827 = vmatprep.subr.bf16.mxu0 %v37671_v11 }
 0x8e1   :  { %30536 = vmatprep.subr.bf16.mxu1 %v37671_v11 }
 0x8e3   :  { %30829 = vmatpush3.bf16.msra.mxu0 %v38129_v50  ;;  %26117 = vmatmul.mubr.f32.vlgmr.msra.gmra.mrb[8].mxu1 %v14418_v45  ;;  %v38174_v50 = vld [vmem:[#allocation31_spill] sm:$0xff] }
 0x8e4   :  { %30538 = vmatpush3.bf16.msra.mxu1 %v38076_v22  ;;  %30830 = vmatprep.subr.bf16.mxu0 %v37671_v11  ;;  %v38182_v45 = vld [vmem:[#allocation75_spill] sm:$0xff] }
 0x8e5   :  { %30539 = vmatprep.subr.bf16.mxu1 %v37671_v11  ;;  %26151 = vmatprep.mubr.msk.f32.mxu1 %vm31836_vm0, %v37732_v44 }
 0x8e7   :  { %30832 = vmatpush3.bf16.msra.mxu0 %v38130_v0  ;;  %v38175_v0 = vld [vmem:[#allocation33_spill] sm:$0xff] }
 0x8e8   :  { %30541 = vmatpush3.bf16.msra.mxu1 %v38077_v24  ;;  %30833 = vmatprep.subr.bf16.mxu0 %v37671_v11 }
 0x8e9   :  { %30542 = vmatprep.subr.bf16.mxu1 %v37671_v11 }
 0x8eb   :  { %30835 = vmatpush3.bf16.msra.mxu0 %v38131_v55 }
 0x8ec   :  { %30544 = vmatpush3.bf16.msra.mxu1 %v38154_v40  ;;  %30836 = vmatprep.subr.bf16.mxu0 %v37671_v11 }
 0x8ed   :  { %30545 = vmatprep.subr.bf16.mxu1 %v37671_v11 }
 0x8ef   :  { %30838 = vmatpush3.bf16.msra.mxu0 %v38132_v23  ;;  %v38158_v23 = vld [vmem:[#allocation46_spill] sm:$0xff] }
 0x8f0   :  { %30547 = vmatpush3.bf16.msra.mxu1 %v38155_v35  ;;  %30839 = vmatprep.subr.bf16.mxu0 %v37671_v11 }
 0x8f1   :  { %30548 = vmatprep.subr.bf16.mxu1 %v37671_v11 }
 0x8f3   :  { %30841 = vmatpush3.bf16.msra.mxu0 %v38133_v13  ;;  %v38159_v13 = vld [vmem:[#allocation52_spill] sm:$0xff] }
 0x8f4   :  { %30550 = vmatpush3.bf16.msra.mxu1 %v38156_v34  ;;  %30842 = vmatprep.subr.bf16.mxu0 %v37671_v11 }
 0x8f5   :  { %30551 = vmatprep.subr.bf16.mxu1 %v37671_v11 }
 0x8f7   :  { %30844 = vmatpush3.bf16.msra.mxu0 %v38134_v57  ;;  %v38163_v57 = vld [vmem:[#allocation58_spill] sm:$0xff] }
 0x8f8   :  { %30553 = vmatpush3.bf16.msra.mxu1 %v38157_v6  ;;  %30845 = vmatprep.subr.bf16.mxu0 %v37671_v11 }
 0x8f9   :  { %30554 = vmatprep.subr.bf16.mxu1 %v37671_v11 }
 0x8fb   :  { %30847 = vmatpush3.bf16.msra.mxu0 %v38135_v47  ;;  %v38160_v47 = vld [vmem:[#allocation47_spill] sm:$0xff] }
 0x8fc   :  { %30556 = vmatpush3.bf16.msra.mxu1 %v38158_v23  ;;  %30848 = vmatprep.subr.bf16.mxu0 %v37671_v11 }
 0x8fd   :  { %30557 = vmatprep.subr.bf16.mxu1 %v37671_v11 }
 0x8fe   :  { %26572 = vmatmul.mubr.msk.f32.vlgmr.msra.gmra.mrb[8].mxu0 %vm15631_vm8, %v37814_v19 }
 0x8ff   :  { %30850 = vmatpush3.bf16.msra.mxu0 %v38136_v15  ;;  %26606 = vmatprep.mubr.msk.f32.mxu0 %vm31836_vm0, %v37732_v44  ;;  %v38161_v15 = vld [vmem:[#allocation50_spill] sm:$0xff] }
 0x900   :  { %30559 = vmatpush3.bf16.msra.mxu1 %v38159_v13  ;;  %30851 = vmatprep.subr.bf16.mxu0 %v37671_v11 }
 0x901   :  { %30560 = vmatprep.subr.bf16.mxu1 %v37671_v11 }
 0x903   :  { %30853 = vmatpush3.bf16.msra.mxu0 %v38137_v42  ;;  %26152 = vmatmul.mubr.msk.f32.vlgmr.msra.gmra.mrb[8].mxu1 %vm13683_vm9, %v37814_v19  ;;  %v38162_v42 = vld [vmem:[#allocation55_spill] sm:$0xff] }
 0x904   :  { %30562 = vmatpush3.bf16.msra.mxu1 %v38160_v47  ;;  %30854 = vmatprep.subr.bf16.mxu0 %v37671_v11 }
 0x905   :  { %30563 = vmatprep.subr.bf16.mxu1 %v37671_v11  ;;  %26186 = vmatprep.mubr.msk.f32.mxu1 %vm31836_vm0, %v37732_v44 }
 0x907   :  { %30856 = vmatpush3.bf16.msra.mxu0 %v38138_v8  ;;  %v38164_v8 = vld [vmem:[#allocation60_spill] sm:$0xff] }
 0x908   :  { %30565 = vmatpush3.bf16.msra.mxu1 %v38161_v15  ;;  %30857 = vmatprep.subr.bf16.mxu0 %v37671_v11 }
 0x909   :  { %30566 = vmatprep.subr.bf16.mxu1 %v37671_v11 }
 0x90b   :  { %30859 = vmatpush3.bf16.msra.mxu0 %v38139_v61  ;;  %v38165_v61 = vld [vmem:[#allocation62_spill] sm:$0xff] }
 0x90c   :  { %30568 = vmatpush3.bf16.msra.mxu1 %v38162_v42  ;;  %30860 = vmatprep.subr.bf16.mxu0 %v37671_v11 }
 0x90d   :  { %30569 = vmatprep.subr.bf16.mxu1 %v37671_v11 }
 0x90f   :  { %30862 = vmatpush3.bf16.msra.mxu0 %v38140_v63  ;;  %v38166_v63 = vld [vmem:[#allocation64_spill] sm:$0xff] }
 0x910   :  { %30571 = vmatpush3.bf16.msra.mxu1 %v38163_v57  ;;  %30863 = vmatprep.subr.bf16.mxu0 %v37671_v11 }
 0x911   :  { %30572 = vmatprep.subr.bf16.mxu1 %v37671_v11 }
 0x913   :  { %30865 = vmatpush3.bf16.msra.mxu0 %v38141_v38  ;;  %v38169_v38 = vld [vmem:[#allocation7_spill] sm:$0xff] }
 0x914   :  { %30574 = vmatpush3.bf16.msra.mxu1 %v38164_v8  ;;  %30866 = vmatprep.subr.bf16.mxu0 %v37671_v11 }
 0x915   :  { %30575 = vmatprep.subr.bf16.mxu1 %v37671_v11 }
 0x917   :  { %30868 = vmatpush3.bf16.msra.mxu0 %v38142_v53  ;;  %v38167_v53 = vld [vmem:[#allocation67_spill] sm:$0xff] }
 0x918   :  { %30577 = vmatpush3.bf16.msra.mxu1 %v38165_v61  ;;  %30869 = vmatprep.subr.bf16.mxu0 %v37671_v11 }
 0x919   :  { %30578 = vmatprep.subr.bf16.mxu1 %v37671_v11 }
 0x91b   :  { %30871 = vmatpush3.bf16.msra.mxu0 %v38143_v60  ;;  %v38168_v60 = vand.u32 4294901760, %v36013_v27 }
 0x91c   :  { %30580 = vmatpush3.bf16.msra.mxu1 %v38166_v63  ;;  %30872 = vmatprep.subr.bf16.mxu0 %v37671_v11 }
 0x91d   :  { %30581 = vmatprep.subr.bf16.mxu1 %v37671_v11 }
 0x91e   :  { %26607 = vmatmul.mubr.f32.vlgmr.msra.gmra.mrb[8].mxu0 %v36013_v27  ;;  %v38170_v27 = vld [vmem:[#allocation9_spill] sm:$0xff] }
 0x91f   :  { %30874 = vmatpush3.bf16.msra.mxu0 %v37733_v29  ;;  %26641 = vmatprep.mubr.msk.f32.mxu0 %vm31836_vm0, %v37732_v44 }
 0x920   :  { %30583 = vmatpush3.bf16.msra.mxu1 %v38167_v53  ;;  %30875 = vmatprep.subr.bf16.mxu0 %v37671_v11 }
 0x921   :  { %30584 = vmatprep.subr.bf16.mxu1 %v37671_v11 }
 0x923   :  { %30877 = vmatpush3.bf16.msra.mxu0 %v37735_v1  ;;  %26187 = vmatmul.mubr.f32.vlgmr.msra.gmra.mrb[8].mxu1 %v36024_v48  ;;  %v38172_v48 = vld [vmem:[#allocation71_spill] sm:$0xff] }
 0x924   :  { %30586 = vmatpush3.bf16.msra.mxu1 %v37910_v56  ;;  %30878 = vmatprep.subr.bf16.mxu0 %v37671_v11 }
 0x925   :  { %30587 = vmatprep.subr.bf16.mxu1 %v37671_v11  ;;  %26221 = vmatprep.mubr.msk.f32.mxu1 %vm31836_vm0, %v37732_v44 }
 0x927   :  { %30880 = vmatpush3.bf16.msra.mxu0 %v37866_v26 }
 0x928   :  { %30589 = vmatpush3.bf16.msra.mxu1 %v37911_v58  ;;  %30881 = vmatprep.subr.bf16.mxu0 %v37671_v11 }
 0x929   :  { %30590 = vmatprep.subr.bf16.mxu1 %v37671_v11 }
 0x92b   :  { %30883 = vmatpush3.bf16.msra.mxu0 %v37868_v43 }
 0x92c   :  { %30592 = vmatpush3.bf16.msra.mxu1 %v37912_v51  ;;  %30884 = vmatprep.subr.bf16.mxu0 %v37671_v11 }
 0x92d   :  { %30593 = vmatprep.subr.bf16.mxu1 %v37671_v11 }
 0x92f   :  { %30886 = vmatpush3.bf16.msra.mxu0 %v37870_v33 }
 0x930   :  { %30595 = vmatpush3.bf16.msra.mxu1 %v37913_v4  ;;  %30887 = vmatprep.subr.bf16.mxu0 %v37671_v11 }
 0x931   :  { %30596 = vmatprep.subr.bf16.mxu1 %v37671_v11 }
 0x933   :  { %30889 = vmatpush3.bf16.msra.mxu0 %v37872_v30 }
 0x934   :  { %30598 = vmatpush3.bf16.msra.mxu1 %v37914_v52  ;;  %30890 = vmatprep.subr.bf16.mxu0 %v37671_v11 }
 0x935   :  { %30599 = vmatprep.subr.bf16.mxu1 %v37671_v11 }
 0x937   :  { %30892 = vmatpush3.bf16.msra.mxu0 %v37968_v14 }
 0x938   :  { %30601 = vmatpush3.bf16.msra.mxu1 %v37915_v25  ;;  %30893 = vmatprep.subr.bf16.mxu0 %v37671_v11 }
 0x939   :  { %30602 = vmatprep.subr.bf16.mxu1 %v37671_v11 }
 0x93b   :  { %30895 = vmatpush3.bf16.msra.mxu0 %v37969_v7 }
 0x93c   :  { %30604 = vmatpush3.bf16.msra.mxu1 %v37916_v9  ;;  %30896 = vmatprep.subr.bf16.mxu0 %v37671_v11 }
 0x93d   :  { %30605 = vmatprep.subr.bf16.mxu1 %v37671_v11 }
 0x93e   :  { %26642 = vmatmul.mubr.f32.vlgmr.msra.gmra.mrb[8].mxu0 %v38168_v60  ;;  %v38197_v60 = vld [vmem:[#allocation42_spill] sm:$0xff] }
 0x93f   :  { %30898 = vmatpush3.bf16.msra.mxu0 %v38146_v20  ;;  %26676 = vmatprep.mubr.msk.f32.mxu0 %vm31836_vm0, %v37732_v44  ;;  %v38173_v20 = vld [vmem:[#allocation73_spill] sm:$0xff] }
 0x940   :  { %30607 = vmatpush3.bf16.msra.mxu1 %v38075_v59  ;;  %30899 = vmatprep.subr.bf16.mxu0 %v37671_v11 }
 0x941   :  { %30608 = vmatprep.subr.bf16.mxu1 %v37671_v11 }
 0x943   :  { %30901 = vmatpush3.bf16.msra.mxu0 %v38147_v2  ;;  %26222 = vmatmul.mubr.f32.vlgmr.msra.gmra.mrb[8].mxu1 %v14416_v10  ;;  %v38171_v10 = vld [vmem:[#allocation20_spill] sm:$0xff] }
 0x944   :  { %30610 = vmatpush3.bf16.msra.mxu1 %v38169_v38  ;;  %30902 = vmatprep.subr.bf16.mxu0 %v37671_v11 }
 0x945   :  { %30611 = vmatprep.subr.bf16.mxu1 %v37671_v11  ;;  %26256 = vmatprep.mubr.msk.f32.mxu1 %vm31836_vm0, %v37732_v44 }
 0x947   :  { %30904 = vmatpush3.bf16.msra.mxu0 %v38148_v21 }
 0x948   :  { %30613 = vmatpush3.bf16.msra.mxu1 %v38170_v27  ;;  %30905 = vmatprep.subr.bf16.mxu0 %v37671_v11 }
 0x949   :  { %30614 = vmatprep.subr.bf16.mxu1 %v37671_v11 }
 0x94b   :  { %30907 = vmatpush3.bf16.msra.mxu0 %v38149_v32  ;;  %v38177_v32 = vld [vmem:[#allocation44_spill] sm:$0xff] }
 0x94c   :  { %30616 = vmatpush3.bf16.msra.mxu1 %v38171_v10  ;;  %30908 = vmatprep.subr.bf16.mxu0 %v37671_v11 }
 0x94d   :  { %30617 = vmatprep.subr.bf16.mxu1 %v37671_v11 }
 0x94f   :  { %30910 = vmatpush3.bf16.msra.mxu0 %v38150_v3 }
 0x950   :  { %30619 = vmatpush3.bf16.msra.mxu1 %v38172_v48  ;;  %30911 = vmatprep.subr.bf16.mxu0 %v37671_v11 }
 0x951   :  { %30620 = vmatprep.subr.bf16.mxu1 %v37671_v11 }
 0x953   :  { %30913 = vmatpush3.bf16.msra.mxu0 %v38151_v5  ;;  %v38176_v5 = vld [vmem:[#allocation34_spill] sm:$0xff] }
 0x954   :  { %30622 = vmatpush3.bf16.msra.mxu1 %v38173_v20  ;;  %30914 = vmatprep.subr.bf16.mxu0 %v37671_v11 }
 0x955   :  { %30623 = vmatprep.subr.bf16.mxu1 %v37671_v11 }
 0x957   :  { %30916 = vmatpush3.bf16.msra.mxu0 %v38152_v41 }
 0x958   :  { %30625 = vmatpush3.bf16.msra.mxu1 %v38174_v50  ;;  %30917 = vmatprep.subr.bf16.mxu0 %v37671_v11 }
 0x959   :  { %30626 = vmatprep.subr.bf16.mxu1 %v37671_v11 }
 0x95b   :  { %30919 = vmatpush3.bf16.msra.mxu0 %v38153_v62 }
 0x95c   :  { %30628 = vmatpush3.bf16.msra.mxu1 %v38175_v0  ;;  %30920 = vmatprep.subr.bf16.mxu0 %v37671_v11 }
 0x95d   :  { %30629 = vmatprep.subr.bf16.mxu1 %v37671_v11 }
 0x95e   :  { %26677 = vmatmul.mubr.msk.f32.vlgmr.msra.gmra.mrb[8].mxu0 %vm15631_vm8, %v37814_v19 }
 0x95f   :  { %30922 = vmatpush3.bf16.msra.mxu0 %v37733_v29  ;;  %26711 = vmatprep.mubr.msk.f32.mxu0 %vm31836_vm0, %v37732_v44  ;;  %v36271_v29 = vpop.permute.xlu1 %15623 }
 0x960   :  { %30631 = vmatpush3.bf16.msra.mxu1 %v38176_v5  ;;  %30923 = vmatprep.subr.bf16.mxu0 %v37671_v11  ;;  %vm15625_vm10 = vcmp.eq.s32.totalorder %v36271_v29, %v32537_v36 }
 0x961   :  { %30632 = vmatprep.subr.bf16.mxu1 %v37671_v11 }
 0x963   :  { %30925 = vmatpush3.bf16.msra.mxu0 %v37735_v1  ;;  %26257 = vmatmul.mubr.msk.f32.vlgmr.msra.gmra.mrb[8].mxu1 %vm13683_vm9, %v37814_v19  ;;  %v18595_v1 = vsel %vm15625_vm10, 1.0, %v37732_v44 }
 0x964   :  { %30634 = vmatpush3.bf16.msra.mxu1 %v37910_v56  ;;  %30926 = vmatprep.subr.bf16.mxu0 %v37671_v11 }
 0x965   :  { %30635 = vmatprep.subr.bf16.mxu1 %v37671_v11  ;;  %26291 = vmatprep.mubr.msk.f32.mxu1 %vm31836_vm0, %v37732_v44 }
 0x967   :  { %30928 = vmatpush3.bf16.msra.mxu0 %v37866_v26  ;;  %v36284_v26 = vpop.permute.xlu1 %14975 }
 0x968   :  { %30637 = vmatpush3.bf16.msra.mxu1 %v37911_v58  ;;  %30929 = vmatprep.subr.bf16.mxu0 %v37671_v11  ;;  %vm14977_vm11 = vcmp.eq.s32.totalorder %v36284_v26, %v32537_v36 }
 0x969   :  { %30638 = vmatprep.subr.bf16.mxu1 %v37671_v11 }
 0x96b   :  { %30931 = vmatpush3.bf16.msra.mxu0 %v37868_v43  ;;  %v36291_v43 = vsub.f32 %v18595_v1, %v18595_v1 }
 0x96c   :  { %30640 = vmatpush3.bf16.msra.mxu1 %v37912_v51  ;;  %30932 = vmatprep.subr.bf16.mxu0 %v37671_v11 }
 0x96d   :  { %30641 = vmatprep.subr.bf16.mxu1 %v37671_v11 }
 0x96f   :  { %30934 = vmatpush3.bf16.msra.mxu0 %v37870_v33 }
 0x970   :  { %30643 = vmatpush3.bf16.msra.mxu1 %v37913_v4  ;;  %30935 = vmatprep.subr.bf16.mxu0 %v37671_v11 }
 0x971   :  { %30644 = vmatprep.subr.bf16.mxu1 %v37671_v11 }
 0x973   :  { %30937 = vmatpush3.bf16.msra.mxu0 %v37872_v30  ;;  %v18591_v30 = vsel %vm14977_vm11, 1.0, %v37732_v44 }
 0x974   :  { %30646 = vmatpush3.bf16.msra.mxu1 %v37914_v52  ;;  %30938 = vmatprep.subr.bf16.mxu0 %v37671_v11  ;;  %v36306_v62 = vsub.f32 %v18591_v30, %v18591_v30 }
 0x975   :  { %30647 = vmatprep.subr.bf16.mxu1 %v37671_v11 }
 0x976   :  { %v15063_v55 = vand.u32 4294901760, %v36306_v62 }
 0x977   :  { %30940 = vmatpush3.bf16.msra.mxu0 %v37968_v14 }
 0x978   :  { %30649 = vmatpush3.bf16.msra.mxu1 %v37915_v25  ;;  %30941 = vmatprep.subr.bf16.mxu0 %v37671_v11  ;;  %v15064_v21 = vsub.f32 %v36306_v62, %v15063_v55 }
 0x979   :  { %30650 = vmatprep.subr.bf16.mxu1 %v37671_v11 }
 0x97a   :  { %v15065_v3 = vand.u32 4294901760, %v15064_v21 }
 0x97b   :  { %30943 = vmatpush3.bf16.msra.mxu0 %v37969_v7  ;;  %v16358_v7 = vand.u32 4294901760, %v36291_v43 }
 0x97c   :  { %30652 = vmatpush3.bf16.msra.mxu1 %v37916_v9  ;;  %30944 = vmatprep.subr.bf16.mxu0 %v37671_v11 }
 0x97d   :  { %30653 = vmatprep.subr.bf16.mxu1 %v37671_v11  ;;  %v16359_v41 = vsub.f32 %v36291_v43, %v16358_v7 }
 0x97e   :  { %26712 = vmatmul.mubr.msk.f32.vlgmr.msra.gmra.mrb[8].mxu0 %vm15631_vm8, %v37814_v19 }
 0x97f   :  { %30946 = vmatpush3.bf16.msra.mxu0 %v37910_v56  ;;  %26746 = vmatprep.mubr.msk.f32.mxu0 %vm31836_vm0, %v37732_v44  ;;  %v16360_v2 = vand.u32 4294901760, %v16359_v41 }
 0x980   :  { %30655 = vmatpush3.bf16.msra.mxu1 %v38075_v59  ;;  %30947 = vmatprep.subr.bf16.mxu0 %v37671_v11 }
 0x981   :  { %30656 = vmatprep.subr.bf16.mxu1 %v37671_v11 }
 0x983   :  { %30949 = vmatpush3.bf16.msra.mxu0 %v37911_v58  ;;  %26292 = vmatmul.mubr.msk.f32.vlgmr.msra.gmra.mrb[8].mxu1 %vm13683_vm9, %v37814_v19 }
 0x984   :  { %30658 = vmatpush3.bf16.msra.mxu1 %v32865_v39  ;;  %30950 = vmatprep.subr.bf16.mxu0 %v37671_v11 }
 0x985   :  { %30659 = vmatprep.subr.bf16.mxu1 %v37671_v11  ;;  %26326 = vmatprep.mubr.msk.f32.mxu1 %vm31836_vm0, %v37732_v44 }
 0x987   :  { %30952 = vmatpush3.bf16.msra.mxu0 %v37912_v51 }
 0x988   :  { %30661 = vmatpush3.bf16.msra.mxu1 %v32883_v31  ;;  %30953 = vmatprep.subr.bf16.mxu0 %v37671_v11 }
 0x989   :  { %30662 = vmatprep.subr.bf16.mxu1 %v37671_v11 }
 0x98b   :  { %30955 = vmatpush3.bf16.msra.mxu0 %v37913_v4 }
 0x98c   :  { %30664 = vmatpush3.bf16.msra.mxu1 %v32905_v28  ;;  %30956 = vmatprep.subr.bf16.mxu0 %v37671_v11 }
 0x98d   :  { %30665 = vmatprep.subr.bf16.mxu1 %v37671_v11 }
 0x98f   :  { %30958 = vmatpush3.bf16.msra.mxu0 %v37914_v52 }
 0x990   :  { %30667 = vmatpush3.bf16.msra.mxu1 %v37865_v49  ;;  %30959 = vmatprep.subr.bf16.mxu0 %v37671_v11 }
 0x991   :  { %v36300_v33 = vpop.f32.mrb[6].mxu0  ;;  %30668 = vmatprep.subr.bf16.mxu1 %v37671_v11 }
 0x992   :  { %v25873_v14 = vpop.f32.mrb[7].mxu0  ;;  %v17579_v46 = vmul.f32 %v33791_v12, %v36300_v33 }
 0x993   :  { %30961 = vmatpush3.bf16.msra.mxu0 %v37915_v25 }
 0x994   :  { %30670 = vmatpush3.bf16.msra.mxu1 %v37867_v17  ;;  %17580 = vadd.xlane.f32.xlu0 %v17579_v46 }
 0x995   :  { %30962 = vmatprep.subr.bf16.mxu0 %v37671_v11  ;;  %30671 = vmatprep.subr.bf16.mxu1 %v37671_v11 }
 0x997   :  { %30964 = vmatpush3.bf16.msra.mxu0 %v37916_v9 }
 0x998   :  { %30673 = vmatpush3.bf16.msra.mxu1 %v37869_v16  ;;  %30965 = vmatprep.subr.bf16.mxu0 %v37671_v11 }
 0x999   :  { %30674 = vmatprep.subr.bf16.mxu1 %v37671_v11 }
 0x99b   :  { %30967 = vmatpush3.bf16.msra.mxu0 %v38075_v59 }
 0x99c   :  { %30676 = vmatpush3.bf16.msra.mxu1 %v38177_v32  ;;  %30968 = vmatprep.subr.bf16.mxu0 %v37671_v11 }
 0x99d   :  { %30677 = vmatprep.subr.bf16.mxu1 %v37671_v11 }
 0x99e   :  { %26747 = vmatmul.mubr.f32.vlgmr.msra.gmra.mrb[8].mxu0 %v16360_v2 }
 0x99f   :  { %30970 = vmatpush3.bf16.msra.mxu0 %v38076_v22  ;;  %26781 = vmatprep.mubr.msk.f32.mxu0 %vm31836_vm0, %v37732_v44  ;;  %v38180_v22 = vld [vmem:[#allocation49_spill] sm:$0xff] }
 0x9a0   :  { %30679 = vmatpush3.bf16.msra.mxu1 %v38178_v18  ;;  %30971 = vmatprep.subr.bf16.mxu0 %v37671_v11 }
 0x9a1   :  { %30680 = vmatprep.subr.bf16.mxu1 %v37671_v11 }
 0x9a3   :  { %30973 = vmatpush3.bf16.msra.mxu0 %v38077_v24  ;;  %26327 = vmatmul.mubr.f32.vlgmr.msra.gmra.mrb[8].mxu1 %v15065_v3  ;;  %v38181_v24 = vld [vmem:[#allocation74_spill] sm:$0xff] }
 0x9a4   :  { %30682 = vmatpush3.bf16.msra.mxu1 %v38179_v54  ;;  %30974 = vmatprep.subr.bf16.mxu0 %v37671_v11 }
 0x9a5   :  { %30683 = vmatprep.subr.bf16.mxu1 %v37671_v11  ;;  %26361 = vmatprep.mubr.msk.f32.mxu1 %vm31836_vm0, %v37732_v44 }
 0x9a7   :  { %30976 = vmatpush3.bf16.msra.mxu0 %v38154_v40  ;;  %v38183_v40 = vld [vmem:[#allocation76_spill] sm:$0xff] }
 0x9a8   :  { %30685 = vmatpush3.bf16.msra.mxu1 %v38180_v22  ;;  %30977 = vmatprep.subr.bf16.mxu0 %v37671_v11 }
 0x9a9   :  { %30686 = vmatprep.subr.bf16.mxu1 %v37671_v11 }
 0x9ab   :  { %30979 = vmatpush3.bf16.msra.mxu0 %v38155_v35  ;;  %v38184_v35 = vld [vmem:[#allocation77_spill] sm:$0xff] }
 0x9ac   :  { %30688 = vmatpush3.bf16.msra.mxu1 %v38181_v24  ;;  %30980 = vmatprep.subr.bf16.mxu0 %v37671_v11 }
 0x9ad   :  { %30689 = vmatprep.subr.bf16.mxu1 %v37671_v11 }
 0x9af   :  { %30982 = vmatpush3.bf16.msra.mxu0 %v38156_v34  ;;  %v38185_v34 = vld [vmem:[#allocation78_spill] sm:$0xff] }
 0x9b0   :  { %30691 = vmatpush3.bf16.msra.mxu1 %v38182_v45  ;;  %30983 = vmatprep.subr.bf16.mxu0 %v37671_v11 }
 0x9b1   :  { %30692 = vmatprep.subr.bf16.mxu1 %v37671_v11 }
 0x9b3   :  { %30985 = vmatpush3.bf16.msra.mxu0 %v38157_v6  ;;  %v38186_v6 = vld [vmem:[#allocation79_spill] sm:$0xff] }
 0x9b4   :  { %30694 = vmatpush3.bf16.msra.mxu1 %v38183_v40  ;;  %30986 = vmatprep.subr.bf16.mxu0 %v37671_v11 }
 0x9b5   :  { %30695 = vmatprep.subr.bf16.mxu1 %v37671_v11 }
 0x9b7   :  { %30988 = vmatpush3.bf16.msra.mxu0 %v38158_v23  ;;  %v38187_v23 = vld [vmem:[#allocation80_spill] sm:$0xff] }
 0x9b8   :  { %30697 = vmatpush3.bf16.msra.mxu1 %v38184_v35  ;;  %30989 = vmatprep.subr.bf16.mxu0 %v37671_v11 }
 0x9b9   :  { %30698 = vmatprep.subr.bf16.mxu1 %v37671_v11 }
 0x9bb   :  { %30991 = vmatpush3.bf16.msra.mxu0 %v38159_v13  ;;  %v38188_v13 = vld [vmem:[#allocation81_spill] sm:$0xff] }
 0x9bc   :  { %30700 = vmatpush3.bf16.msra.mxu1 %v38185_v34  ;;  %30992 = vmatprep.subr.bf16.mxu0 %v37671_v11 }
 0x9bd   :  { %30701 = vmatprep.subr.bf16.mxu1 %v37671_v11 }
 0x9be   :  { %26782 = vmatmul.mubr.msk.f32.vlgmr.msra.gmra.mrb[8].mxu0 %vm15625_vm10, %v37814_v19 }
 0x9bf   :  { %30994 = vmatpush3.bf16.msra.mxu0 %v38160_v47  ;;  %26816 = vmatprep.mubr.msk.f32.mxu0 %vm31836_vm0, %v37732_v44  ;;  %v38189_v47 = vld [vmem:[#allocation82_spill] sm:$0xff] }
 0x9c0   :  { %30703 = vmatpush3.bf16.msra.mxu1 %v38186_v6  ;;  %30995 = vmatprep.subr.bf16.mxu0 %v37671_v11 }
 0x9c1   :  { %30704 = vmatprep.subr.bf16.mxu1 %v37671_v11 }
 0x9c3   :  { %30997 = vmatpush3.bf16.msra.mxu0 %v38161_v15  ;;  %26362 = vmatmul.mubr.msk.f32.vlgmr.msra.gmra.mrb[8].mxu1 %vm14977_vm11, %v37814_v19  ;;  %v38190_v15 = vld [vmem:[#allocation83_spill] sm:$0xff] }
 0x9c4   :  { %30706 = vmatpush3.bf16.msra.mxu1 %v38187_v23  ;;  %30998 = vmatprep.subr.bf16.mxu0 %v37671_v11 }
 0x9c5   :  { %30707 = vmatprep.subr.bf16.mxu1 %v37671_v11  ;;  %26396 = vmatprep.mubr.msk.f32.mxu1 %vm31836_vm0, %v37732_v44 }
 0x9c7   :  { %31000 = vmatpush3.bf16.msra.mxu0 %v38162_v42  ;;  %v38191_v42 = vld [vmem:[#allocation84_spill] sm:$0xff] }
 0x9c8   :  { %30709 = vmatpush3.bf16.msra.mxu1 %v38188_v13  ;;  %31001 = vmatprep.subr.bf16.mxu0 %v37671_v11 }
 0x9c9   :  { %30710 = vmatprep.subr.bf16.mxu1 %v37671_v11 }
 0x9cb   :  { %31003 = vmatpush3.bf16.msra.mxu0 %v38163_v57  ;;  %v38192_v57 = vld [vmem:[#allocation85_spill] sm:$0xff] }
 0x9cc   :  { %30712 = vmatpush3.bf16.msra.mxu1 %v38189_v47  ;;  %31004 = vmatprep.subr.bf16.mxu0 %v37671_v11 }
 0x9cd   :  { %30713 = vmatprep.subr.bf16.mxu1 %v37671_v11 }
 0x9cf   :  { %31006 = vmatpush3.bf16.msra.mxu0 %v38164_v8  ;;  %v38193_v8 = vld [vmem:[#allocation86_spill] sm:$0xff] }
 0x9d0   :  { %30715 = vmatpush3.bf16.msra.mxu1 %v38190_v15  ;;  %31007 = vmatprep.subr.bf16.mxu0 %v37671_v11 }
 0x9d1   :  { %30716 = vmatprep.subr.bf16.mxu1 %v37671_v11 }
 0x9d3   :  { %31009 = vmatpush3.bf16.msra.mxu0 %v38165_v61  ;;  %v38194_v61 = vld [vmem:[#allocation87_spill] sm:$0xff] }
 0x9d4   :  { %30718 = vmatpush3.bf16.msra.mxu1 %v38191_v42  ;;  %31010 = vmatprep.subr.bf16.mxu0 %v37671_v11 }
 0x9d5   :  { %30719 = vmatprep.subr.bf16.mxu1 %v37671_v11 }
 0x9d7   :  { %31012 = vmatpush3.bf16.msra.mxu0 %v38166_v63  ;;  %v38195_v63 = vld [vmem:[#allocation40_spill] sm:$0xff] }
 0x9d8   :  { %30721 = vmatpush3.bf16.msra.mxu1 %v38192_v57  ;;  %31013 = vmatprep.subr.bf16.mxu0 %v37671_v11 }
 0x9d9   :  { %30722 = vmatprep.subr.bf16.mxu1 %v37671_v11 }
 0x9db   :  { %31015 = vmatpush3.bf16.msra.mxu0 %v38167_v53  ;;  %v38196_v53 = vld [vmem:[#allocation11_spill] sm:$0xff] }
 0x9dc   :  { %30724 = vmatpush3.bf16.msra.mxu1 %v38193_v8  ;;  %31016 = vmatprep.subr.bf16.mxu0 %v37671_v11 }
 0x9dd   :  { %30725 = vmatprep.subr.bf16.mxu1 %v37671_v11 }
 0x9de   :  { %26817 = vmatmul.mubr.f32.vlgmr.msra.gmra.mrb[8].mxu0 %v36291_v43 }
 0x9df   :  { %31018 = vmatpush3.bf16.msra.mxu0 %v37910_v56  ;;  %26851 = vmatprep.mubr.msk.f32.mxu0 %vm31836_vm0, %v37732_v44 }
 0x9e0   :  { %30727 = vmatpush3.bf16.msra.mxu1 %v38194_v61  ;;  %31019 = vmatprep.subr.bf16.mxu0 %v37671_v11 }
 0x9e1   :  { %30728 = vmatprep.subr.bf16.mxu1 %v37671_v11 }
 0x9e3   :  { %31021 = vmatpush3.bf16.msra.mxu0 %v37911_v58  ;;  %26397 = vmatmul.mubr.f32.vlgmr.msra.gmra.mrb[8].mxu1 %v36306_v62 }
 0x9e4   :  { %30730 = vmatpush3.bf16.msra.mxu1 %v32865_v39  ;;  %31022 = vmatprep.subr.bf16.mxu0 %v37671_v11 }
 0x9e5   :  { %30731 = vmatprep.subr.bf16.mxu1 %v37671_v11  ;;  %26431 = vmatprep.mubr.msk.f32.mxu1 %vm31836_vm0, %v37732_v44 }
 0x9e7   :  { %31024 = vmatpush3.bf16.msra.mxu0 %v37912_v51 }
 0x9e8   :  { %30733 = vmatpush3.bf16.msra.mxu1 %v32883_v31  ;;  %31025 = vmatprep.subr.bf16.mxu0 %v37671_v11 }
 0x9e9   :  { %30734 = vmatprep.subr.bf16.mxu1 %v37671_v11 }
 0x9eb   :  { %31027 = vmatpush3.bf16.msra.mxu0 %v37913_v4 }
 0x9ec   :  { %30736 = vmatpush3.bf16.msra.mxu1 %v32905_v28  ;;  %31028 = vmatprep.subr.bf16.mxu0 %v37671_v11 }
 0x9ed   :  { %30737 = vmatprep.subr.bf16.mxu1 %v37671_v11 }
 0x9ef   :  { %31030 = vmatpush3.bf16.msra.mxu0 %v37914_v52 }
 0x9f0   :  { %30739 = vmatpush3.bf16.msra.mxu1 %v37865_v49  ;;  %31031 = vmatprep.subr.bf16.mxu0 %v37671_v11 }
 0x9f1   :  { %30740 = vmatprep.subr.bf16.mxu1 %v37671_v11 }
 0x9f3   :  { %31033 = vmatpush3.bf16.msra.mxu0 %v37915_v25 }
 0x9f4   :  { %30742 = vmatpush3.bf16.msra.mxu1 %v37867_v17  ;;  %31034 = vmatprep.subr.bf16.mxu0 %v37671_v11 }
 0x9f5   :  { %30743 = vmatprep.subr.bf16.mxu1 %v37671_v11 }
 0x9f7   :  { %31036 = vmatpush3.bf16.msra.mxu0 %v37916_v9 }
 0x9f8   :  { %30745 = vmatpush3.bf16.msra.mxu1 %v37869_v16  ;;  %31037 = vmatprep.subr.bf16.mxu0 %v37671_v11 }
 0x9f9   :  { %30746 = vmatprep.subr.bf16.mxu1 %v37671_v11 }
 0x9fb   :  { %31039 = vmatpush3.bf16.msra.mxu0 %v38075_v59 }
 0x9fc   :  { %30748 = vmatpush3.bf16.msra.mxu1 %v38177_v32  ;;  %31040 = vmatprep.subr.bf16.mxu0 %v37671_v11 }
 0x9fd   :  { %30749 = vmatprep.subr.bf16.mxu1 %v37671_v11 }
 0x9fe   :  { %26852 = vmatmul.mubr.f32.vlgmr.msra.gmra.mrb[8].mxu0 %v16358_v7 }
 0x9ff   :  { %31042 = vmatpush3.bf16.msra.mxu0 %v38169_v38  ;;  %26886 = vmatprep.mubr.msk.f32.mxu0 %vm31836_vm0, %v37732_v44  ;;  %v38198_v38 = vld [vmem:[#allocation13_spill] sm:$0xff] }
 0xa00   :  { %30751 = vmatpush3.bf16.msra.mxu1 %v38178_v18  ;;  %31043 = vmatprep.subr.bf16.mxu0 %v37671_v11 }
 0xa01   :  { %30752 = vmatprep.subr.bf16.mxu1 %v37671_v11 }
 0xa03   :  { %31045 = vmatpush3.bf16.msra.mxu0 %v38170_v27  ;;  %26432 = vmatmul.mubr.f32.vlgmr.msra.gmra.mrb[8].mxu1 %v15063_v55  ;;  %v38199_v27 = vld [vmem:[#allocation43_spill] sm:$0xff] }
 0xa04   :  { %30754 = vmatpush3.bf16.msra.mxu1 %v38195_v63  ;;  %31046 = vmatprep.subr.bf16.mxu0 %v37671_v11 }
 0xa05   :  { %30755 = vmatprep.subr.bf16.mxu1 %v37671_v11  ;;  %26466 = vmatprep.mubr.msk.f32.mxu1 %vm31836_vm0, %v37732_v44 }
 0xa07   :  { %31048 = vmatpush3.bf16.msra.mxu0 %v38171_v10  ;;  %v38200_v10 = vld [vmem:[#allocation15_spill] sm:$0xff] }
 0xa08   :  { %30757 = vmatpush3.bf16.msra.mxu1 %v38196_v53  ;;  %31049 = vmatprep.subr.bf16.mxu0 %v37671_v11 }
 0xa09   :  { %30758 = vmatprep.subr.bf16.mxu1 %v37671_v11 }
 0xa0b   :  { %31051 = vmatpush3.bf16.msra.mxu0 %v38172_v48  ;;  %v38201_v48 = vld [vmem:[#allocation17_spill] sm:$0xff] }
 0xa0c   :  { %30760 = vmatpush3.bf16.msra.mxu1 %v38197_v60  ;;  %31052 = vmatprep.subr.bf16.mxu0 %v37671_v11 }
 0xa0d   :  { %30761 = vmatprep.subr.bf16.mxu1 %v37671_v11 }
 0xa0f   :  { %31054 = vmatpush3.bf16.msra.mxu0 %v38173_v20  ;;  %v38202_v20 = vld [vmem:[#allocation88_spill] sm:$0xff] }
 0xa10   :  { %30763 = vmatpush3.bf16.msra.mxu1 %v38198_v38  ;;  %31055 = vmatprep.subr.bf16.mxu0 %v37671_v11 }
 0xa11   :  { %30764 = vmatprep.subr.bf16.mxu1 %v37671_v11 }
 0xa13   :  { %31057 = vmatpush3.bf16.msra.mxu0 %v38174_v50 }
 0xa14   :  { %30766 = vmatpush3.bf16.msra.mxu1 %v38199_v27  ;;  %31058 = vmatprep.subr.bf16.mxu0 %v37671_v11 }
 0xa15   :  { %30767 = vmatprep.subr.bf16.mxu1 %v37671_v11 }
 0xa17   :  { %31060 = vmatpush3.bf16.msra.mxu0 %v38175_v0 }
 0xa18   :  { %30769 = vmatpush3.bf16.msra.mxu1 %v38200_v10  ;;  %31061 = vmatprep.subr.bf16.mxu0 %v37671_v11 }
 0xa19   :  { %30770 = vmatprep.subr.bf16.mxu1 %v37671_v11 }
 0xa1b   :  { %31063 = vmatpush3.bf16.msra.mxu0 %v38176_v5 }
 0xa1c   :  { %30772 = vmatpush3.bf16.msra.mxu1 %v38201_v48  ;;  %31064 = vmatprep.subr.bf16.mxu0 %v37671_v11 }
 0xa1d   :  { %30773 = vmatprep.subr.bf16.mxu1 %v37671_v11 }
 0xa1e   :  { %26887 = vmatmul.mubr.msk.f32.vlgmr.msra.gmra.mrb[8].mxu0 %vm15625_vm10, %v37814_v19 }
 0xa1f   :  { %31066 = vmatpush3.bf16.msra.mxu0 %v37910_v56  ;;  %26921 = vmatprep.mubr.msk.f32.mxu0 %vm31836_vm0, %v37732_v44 }
 0xa20   :  { %30775 = vmatpush3.bf16.msra.mxu1 %v38202_v20  ;;  %31067 = vmatprep.subr.bf16.mxu0 %v37671_v11 }
 0xa21   :  { %30776 = vmatprep.subr.bf16.mxu1 %v37671_v11 }
 0xa23   :  { %31069 = vmatpush3.bf16.msra.mxu0 %v37911_v58  ;;  %26467 = vmatmul.mubr.msk.f32.vlgmr.msra.gmra.mrb[8].mxu1 %vm14977_vm11, %v37814_v19 }
 0xa24   :  { %30778 = vmatpush3.bf16.msra.mxu1 %v32865_v39  ;;  %31070 = vmatprep.subr.bf16.mxu0 %v37671_v11 }
 0xa25   :  { %30779 = vmatprep.subr.bf16.mxu1 %v37671_v11  ;;  %26501 = vmatprep.mubr.msk.f32.mxu1 %vm31836_vm0, %v37732_v44 }
 0xa27   :  { %31072 = vmatpush3.bf16.msra.mxu0 %v37912_v51 }
 0xa28   :  { %30781 = vmatpush3.bf16.msra.mxu1 %v32883_v31  ;;  %31073 = vmatprep.subr.bf16.mxu0 %v37671_v11 }
 0xa29   :  { %30782 = vmatprep.subr.bf16.mxu1 %v37671_v11 }
 0xa2b   :  { %31075 = vmatpush3.bf16.msra.mxu0 %v37913_v4 }
 0xa2c   :  { %30784 = vmatpush3.bf16.msra.mxu1 %v32905_v28  ;;  %31076 = vmatprep.subr.bf16.mxu0 %v37671_v11 }
 0xa2d   :  { %30785 = vmatprep.subr.bf16.mxu1 %v37671_v11 }
 0xa2f   :  { %31078 = vmatpush3.bf16.msra.mxu0 %v37914_v52  ;;  %v17566_v52 = vpop.xlane.xlu1 %17565 }
 0xa30   :  { %30787 = vmatpush3.bf16.msra.mxu1 %v37865_v49  ;;  %31079 = vmatprep.subr.bf16.mxu0 %v37671_v11 }
 0xa31   :  { %30788 = vmatprep.subr.bf16.mxu1 %v37671_v11 }
 0xa33   :  { %31081 = vmatpush3.bf16.msra.mxu0 %v37915_v25  ;;  %v17572_v50 = vpop.xlane.xlu1 %17571 }
 0xa34   :  { %30790 = vmatpush3.bf16.msra.mxu1 %v37867_v17  ;;  %31082 = vmatprep.subr.bf16.mxu0 %v37671_v11 }
 0xa35   :  { %30791 = vmatprep.subr.bf16.mxu1 %v37671_v11 }
 0xa37   :  { %31084 = vmatpush3.bf16.msra.mxu0 %v37916_v9  ;;  %v36547_v9 = vpop.permute.xlu0 %16917  ;;  %v17578_v5 = vpop.xlane.xlu1 %17577 }
 0xa38   :  { %30793 = vmatpush3.bf16.msra.mxu1 %v37869_v16  ;;  %31085 = vmatprep.subr.bf16.mxu0 %v37671_v11  ;;  %vm16919_vm12 = vcmp.eq.s32.totalorder %v36547_v9, %v32537_v36 }
 0xa39   :  { %30794 = vmatprep.subr.bf16.mxu1 %v37671_v11  ;;  %v18603_v25 = vsel %vm16919_vm12, 1.0, %v37732_v44 }
 0xa3a   :  { %v36559_v56 = vsub.f32 %v18603_v25, %v18603_v25 }
 0xa3b   :  { %31087 = vmatpush3.bf16.msra.mxu0 %v38075_v59  ;;  %v17569_v59 = vpop.xlane.xlu0 %17568 }
 0xa3c   :  { %30796 = vmatpush3.bf16.msra.mxu1 %v38177_v32  ;;  %31088 = vmatprep.subr.bf16.mxu0 %v37671_v11  ;;  %v17005_v58 = vand.u32 4294901760, %v36559_v56  ;;  %v17588_v0 = vmax.f32 %v17566_v52, %v17569_v59 }
 0xa3d   :  { %30797 = vmatprep.subr.bf16.mxu1 %v37671_v11 }
 0xa3e   :  { %26922 = vmatmul.mubr.msk.f32.vlgmr.msra.gmra.mrb[8].mxu0 %vm15625_vm10, %v37814_v19  ;;  %v17006_v51 = vsub.f32 %v36559_v56, %v17005_v58 }
 0xa3f   :  { %31090 = vmatpush3.bf16.msra.mxu0 %v32865_v39  ;;  %26956 = vmatprep.mubr.msk.f32.mxu0 %vm31836_vm0, %v37732_v44  ;;  %v17575_v36 = vpop.xlane.xlu0 %17574 }
 0xa40   :  { %30799 = vmatpush3.bf16.msra.mxu1 %v38178_v18  ;;  %31091 = vmatprep.subr.bf16.mxu0 %v37671_v11  ;;  %v17007_v4 = vand.u32 4294901760, %v17006_v51 }
 0xa41   :  { %31232 = vmatprep.subr.bf16.mxu1 %v37671_v11 }
 0xa43   :  { %26502 = vmatmul.mubr.msk.f32.vlgmr.msra.gmra.mrb[8].mxu1 %vm14977_vm11, %v37814_v19  ;;  %31093 = vmatpush3.bf16.msra.mxu0 %v32883_v31  ;;  %v17581_v1 = vpop.xlane.xlu0 %17580 }
 0xa44   :  { %31094 = vmatprep.subr.bf16.mxu0 %v37671_v11  ;;  %27166 = vmatprep.mubr.msk.f32.mxu1 %vm31836_vm0, %v37732_v44 }
 0xa47   :  { %31096 = vmatpush3.bf16.msra.mxu0 %v32905_v28 }
 0xa48   :  { %31097 = vmatprep.subr.bf16.mxu0 %v37671_v11 }
 0xa4b   :  { %31099 = vmatpush3.bf16.msra.mxu0 %v37865_v49 }
 0xa4c   :  { %31100 = vmatprep.subr.bf16.mxu0 %v37671_v11 }
 0xa4f   :  { %31102 = vmatpush3.bf16.msra.mxu0 %v37867_v17 }
 0xa50   :  { %31103 = vmatprep.subr.bf16.mxu0 %v37671_v11 }
 0xa53   :  { %31105 = vmatpush3.bf16.msra.mxu0 %v37869_v16 }
 0xa54   :  { %31106 = vmatprep.subr.bf16.mxu0 %v37671_v11 }
 0xa57   :  { %31108 = vmatpush3.bf16.msra.mxu0 %v38177_v32 }
 0xa58   :  { %31109 = vmatprep.subr.bf16.mxu0 %v37671_v11 }
 0xa5b   :  { %31111 = vmatpush3.bf16.msra.mxu0 %v38178_v18 }
 0xa5c   :  { %31112 = vmatprep.subr.bf16.mxu0 %v37671_v11 }
 0xa5e   :  { %26957 = vmatmul.mubr.f32.vlgmr.msra.gmra.mrb[8].mxu0 %v17007_v4  ;;  %v38204_v4 = vld [vmem:[#allocation6_spill] sm:$0xff] }
 0xa5f   :  { %31114 = vmatpush3.bf16.msra.mxu0 %v38179_v54  ;;  %26991 = vmatprep.mubr.msk.f32.mxu0 %vm31836_vm0, %v37732_v44 }
 0xa60   :  { %31115 = vmatprep.subr.bf16.mxu0 %v37671_v11 }
 0xa63   :  { %31117 = vmatpush3.bf16.msra.mxu0 %v38180_v22 }
 0xa64   :  { %31118 = vmatprep.subr.bf16.mxu0 %v37671_v11 }
 0xa67   :  { %31120 = vmatpush3.bf16.msra.mxu0 %v38181_v24 }
 0xa68   :  { %31121 = vmatprep.subr.bf16.mxu0 %v37671_v11 }
 0xa6b   :  { %31123 = vmatpush3.bf16.msra.mxu0 %v38182_v45 }
 0xa6c   :  { %31124 = vmatprep.subr.bf16.mxu0 %v37671_v11 }
 0xa6f   :  { %31126 = vmatpush3.bf16.msra.mxu0 %v38183_v40 }
 0xa70   :  { %31127 = vmatprep.subr.bf16.mxu0 %v37671_v11 }
 0xa73   :  { %31129 = vmatpush3.bf16.msra.mxu0 %v38184_v35 }
 0xa74   :  { %31130 = vmatprep.subr.bf16.mxu0 %v37671_v11 }
 0xa77   :  { %31132 = vmatpush3.bf16.msra.mxu0 %v38185_v34 }
 0xa78   :  { %31133 = vmatprep.subr.bf16.mxu0 %v37671_v11 }
 0xa7b   :  { %31135 = vmatpush3.bf16.msra.mxu0 %v38186_v6 }
 0xa7c   :  { %31136 = vmatprep.subr.bf16.mxu0 %v37671_v11 }
 0xa7e   :  { %26992 = vmatmul.mubr.msk.f32.vlgmr.msra.gmra.mrb[8].mxu0 %vm16919_vm12, %v37814_v19 }
 0xa7f   :  { %31138 = vmatpush3.bf16.msra.mxu0 %v38187_v23  ;;  %27026 = vmatprep.mubr.msk.f32.mxu0 %vm31836_vm0, %v37732_v44 }
 0xa80   :  { %31139 = vmatprep.subr.bf16.mxu0 %v37671_v11 }
 0xa83   :  { %31141 = vmatpush3.bf16.msra.mxu0 %v38188_v13 }
 0xa84   :  { %31142 = vmatprep.subr.bf16.mxu0 %v37671_v11 }
 0xa87   :  { %31144 = vmatpush3.bf16.msra.mxu0 %v38189_v47 }
 0xa88   :  { %31145 = vmatprep.subr.bf16.mxu0 %v37671_v11 }
 0xa8b   :  { %31147 = vmatpush3.bf16.msra.mxu0 %v38190_v15 }
 0xa8c   :  { %31148 = vmatprep.subr.bf16.mxu0 %v37671_v11 }
 0xa8f   :  { %31150 = vmatpush3.bf16.msra.mxu0 %v38191_v42 }
 0xa90   :  { %31151 = vmatprep.subr.bf16.mxu0 %v37671_v11 }
 0xa93   :  { %31153 = vmatpush3.bf16.msra.mxu0 %v38192_v57 }
 0xa94   :  { %31154 = vmatprep.subr.bf16.mxu0 %v37671_v11 }
 0xa97   :  { %31156 = vmatpush3.bf16.msra.mxu0 %v38193_v8 }
 0xa98   :  { %31157 = vmatprep.subr.bf16.mxu0 %v37671_v11 }
 0xa9b   :  { %31159 = vmatpush3.bf16.msra.mxu0 %v38194_v61 }
 0xa9c   :  { %31160 = vmatprep.subr.bf16.mxu0 %v37671_v11 }
 0xa9e   :  { %27027 = vmatmul.mubr.f32.vlgmr.msra.gmra.mrb[8].mxu0 %v36559_v56 }
 0xa9f   :  { %31162 = vmatpush3.bf16.msra.mxu0 %v32865_v39  ;;  %27061 = vmatprep.mubr.msk.f32.mxu0 %vm31836_vm0, %v37732_v44 }
 0xaa0   :  { %31163 = vmatprep.subr.bf16.mxu0 %v37671_v11 }
 0xaa3   :  { %31165 = vmatpush3.bf16.msra.mxu0 %v32883_v31 }
 0xaa4   :  { %31166 = vmatprep.subr.bf16.mxu0 %v37671_v11 }
 0xaa7   :  { %31168 = vmatpush3.bf16.msra.mxu0 %v32905_v28 }
 0xaa8   :  { %31169 = vmatprep.subr.bf16.mxu0 %v37671_v11 }
 0xaab   :  { %31171 = vmatpush3.bf16.msra.mxu0 %v37865_v49 }
 0xaac   :  { %31172 = vmatprep.subr.bf16.mxu0 %v37671_v11 }
 0xaaf   :  { %31174 = vmatpush3.bf16.msra.mxu0 %v37867_v17 }
 0xab0   :  { %31175 = vmatprep.subr.bf16.mxu0 %v37671_v11 }
 0xab3   :  { %31177 = vmatpush3.bf16.msra.mxu0 %v37869_v16 }
 0xab4   :  { %31178 = vmatprep.subr.bf16.mxu0 %v37671_v11 }
 0xab7   :  { %31180 = vmatpush3.bf16.msra.mxu0 %v38177_v32 }
 0xab8   :  { %31181 = vmatprep.subr.bf16.mxu0 %v37671_v11 }
 0xabb   :  { %31183 = vmatpush3.bf16.msra.mxu0 %v38178_v18 }
 0xabc   :  { %31184 = vmatprep.subr.bf16.mxu0 %v37671_v11 }
 0xabe   :  { %27062 = vmatmul.mubr.f32.vlgmr.msra.gmra.mrb[8].mxu0 %v17005_v58  ;;  %v38203_v58 = vld [vmem:[#allocation5_spill] sm:$0xff] }
 0xabf   :  { %31186 = vmatpush3.bf16.msra.mxu0 %v38195_v63  ;;  %27096 = vmatprep.mubr.msk.f32.mxu0 %vm31836_vm0, %v37732_v44 }
 0xac0   :  { %31187 = vmatprep.subr.bf16.mxu0 %v37671_v11 }
 0xac3   :  { %31189 = vmatpush3.bf16.msra.mxu0 %v38196_v53 }
 0xac4   :  { %31190 = vmatprep.subr.bf16.mxu0 %v37671_v11 }
 0xac7   :  { %31192 = vmatpush3.bf16.msra.mxu0 %v38197_v60 }
 0xac8   :  { %31193 = vmatprep.subr.bf16.mxu0 %v37671_v11 }
 0xacb   :  { %31195 = vmatpush3.bf16.msra.mxu0 %v38198_v38 }
 0xacc   :  { %31196 = vmatprep.subr.bf16.mxu0 %v37671_v11 }
 0xacf   :  { %31198 = vmatpush3.bf16.msra.mxu0 %v38199_v27 }
 0xad0   :  { %31199 = vmatprep.subr.bf16.mxu0 %v37671_v11 }
 0xad3   :  { %31201 = vmatpush3.bf16.msra.mxu0 %v38200_v10 }
 0xad4   :  { %31202 = vmatprep.subr.bf16.mxu0 %v37671_v11 }
 0xad7   :  { %31204 = vmatpush3.bf16.msra.mxu0 %v38201_v48 }
 0xad8   :  { %31205 = vmatprep.subr.bf16.mxu0 %v37671_v11 }
 0xadb   :  { %31207 = vmatpush3.bf16.msra.mxu0 %v38202_v20 }
 0xadc   :  { %31208 = vmatprep.subr.bf16.mxu0 %v37671_v11 }
 0xade   :  { %27097 = vmatmul.mubr.msk.f32.vlgmr.msra.gmra.mrb[8].mxu0 %vm16919_vm12, %v37814_v19 }
 0xadf   :  { %31210 = vmatpush3.bf16.msra.mxu0 %v32865_v39  ;;  %27131 = vmatprep.mubr.msk.f32.mxu0 %vm31836_vm0, %v37732_v44 }
 0xae0   :  { %31211 = vmatprep.subr.bf16.mxu0 %v37671_v11 }
 0xae3   :  { %31213 = vmatpush3.bf16.msra.mxu0 %v32883_v31 }
 0xae4   :  { %31214 = vmatprep.subr.bf16.mxu0 %v37671_v11 }
 0xae7   :  { %31216 = vmatpush3.bf16.msra.mxu0 %v32905_v28 }
 0xae8   :  { %31217 = vmatprep.subr.bf16.mxu0 %v37671_v11 }
 0xaeb   :  { %31219 = vmatpush3.bf16.msra.mxu0 %v37865_v49 }
 0xaec   :  { %31220 = vmatprep.subr.bf16.mxu0 %v37671_v11 }
 0xaef   :  { %31222 = vmatpush3.bf16.msra.mxu0 %v37867_v17 }
 0xaf0   :  { %31223 = vmatprep.subr.bf16.mxu0 %v37671_v11 }
 0xaf3   :  { %31225 = vmatpush3.bf16.msra.mxu0 %v37869_v16 }
 0xaf4   :  { %31226 = vmatprep.subr.bf16.mxu0 %v37671_v11 }
 0xaf7   :  { %31228 = vmatpush3.bf16.msra.mxu0 %v38177_v32 }
 0xaf8   :  { %31229 = vmatprep.subr.bf16.mxu0 %v37671_v11 }
 0xafb   :  { %31231 = vmatpush3.bf16.msra.mxu0 %v38178_v18 }
 0xafe   :  { %27132 = vmatmul.mubr.msk.f32.vlgmr.msra.gmra.mrb[8].mxu0 %vm16919_vm12, %v37814_v19  ;;  %v17589_v19 = vmax.f32 %v17588_v0, %v17572_v50  ;;  %v38206_v0 = vld [vmem:[#allocation10_spill] sm:$0xff] }
 0xb00   :  { %v17590_v29 = vmax.f32 %v17589_v19, %v17575_v36 }
 0xb02   :  { %v17591_v26 = vmax.f32 %v17590_v29, %v17578_v5 }
 0xb04   :  { %v17592_v30 = vmax.f32 %v17591_v26, %v17581_v1 }
 0xb16   :  { %v36673_v31 = vpop.f32.mrb[8].mxu1 }
 0xb17   :  { %v26503_v28 = vpop.f32.mrb[9].mxu1  ;;  %v17582_v39 = vmul.f32 %v33791_v12, %v36673_v31 }
 0xb19   :  { %17583 = vadd.xlane.f32.xlu1 %v17582_v39 }
 0xba6   :  { %v17584_v43 = vpop.xlane.xlu1 %17583 }
 0xba7   :  { %v17593_v7 = vmax.f32 %v17592_v30, %v17584_v43 }
 0xbd1   :  { %v36677_v49 = vpop.f32.mrb[8].mxu0 }
 0xbd2   :  { %v27133_v17 = vpop.f32.mrb[9].mxu0  ;;  %v17585_v16 = vmul.f32 %v33791_v12, %v36677_v49 }
 0xbd4   :  { %17586 = vadd.xlane.f32.xlu0 %v17585_v16  ;;  %v38205_v16 = vld [vmem:[#allocation8_spill] sm:$0xff] }
 0xc61   :  { %v17587_v14 = vpop.xlane.xlu0 %17586 }
 0xc62   :  { %v17594_v46 = vmax.f32 %v17593_v7, %v17587_v14 }
 0xc64   :  { %v17595_v62 = vsub.f32 %v17566_v52, %v17594_v46  ;;  %v17598_v41 = vsub.f32 %v17569_v59, %v17594_v46  ;;  %v17601_v55 = vsub.f32 %v17572_v50, %v17594_v46  ;;  %v17604_v2 = vsub.f32 %v17575_v36, %v17594_v46 }
 0xc65   :  { %v17607_v18 = vsub.f32 %v17578_v5, %v17594_v46  ;;  %v17610_v22 = vsub.f32 %v17581_v1, %v17594_v46  ;;  %v17613_v45 = vsub.f32 %v17584_v43, %v17594_v46  ;;  %v17616_v35 = vsub.f32 %v17587_v14, %v17594_v46 }
 0xc66   :  { %v17596_v21 = vmul.f32 1.442695, %v17595_v62  ;;  %v17599_v32 = vmul.f32 1.442695, %v17598_v41  ;;  %v17602_v3 = vmul.f32 1.442695, %v17601_v55 }
 0xc67   :  { %v17605_v54 = vmul.f32 1.442695, %v17604_v2  ;;  %v17608_v24 = vmul.f32 1.442695, %v17607_v18  ;;  %v17611_v40 = vmul.f32 1.442695, %v17610_v22 }
 0xc68   :  { %31750 = vpow2.f32 %v17596_v21  ;;  %v17614_v34 = vmul.f32 1.442695, %v17613_v45  ;;  %v17617_v6 = vmul.f32 1.442695, %v17616_v35 }
 0xc69   :  { %31752 = vpow2.f32 %v17599_v32 }
 0xc6a   :  { %31754 = vpow2.f32 %v17602_v3 }
 0xc6b   :  { %31756 = vpow2.f32 %v17605_v54 }
 0xc6c   :  { %31758 = vpow2.f32 %v17608_v24 }
 0xc6d   :  { %31760 = vpow2.f32 %v17611_v40 }
 0xc6e   :  { %31762 = vpow2.f32 %v17614_v34 }
 0xc6f   :  { %31764 = vpow2.f32 %v17617_v6 }
 0xc72   :  { %v31751_v23 = vpop.eup %31750 }
 0xc73   :  { %v31753_v13 = vpop.eup %31752 }
 0xc74   :  { %v17619_v47 = vadd.f32 %v31753_v13, %v31751_v23  ;;  %v31755_v15 = vpop.eup %31754 }
 0xc75   :  { %v31757_v57 = vpop.eup %31756 }
 0xc76   :  { %v17620_v42 = vadd.f32 %v31755_v15, %v17619_v47  ;;  %v31759_v61 = vpop.eup %31758 }
 0xc77   :  { %v31761_v53 = vpop.eup %31760 }
 0xc78   :  { %v17621_v8 = vadd.f32 %v31757_v57, %v17620_v42  ;;  %v31763_v38 = vpop.eup %31762 }
 0xc79   :  { %v31765_v10 = vpop.eup %31764 }
 0xc7a   :  { %v17622_v63 = vadd.f32 %v31759_v61, %v17621_v8 }
 0xc7c   :  { %v17623_v60 = vadd.f32 %v31761_v53, %v17622_v63 }
 0xc7e   :  { %v17624_v27 = vadd.f32 %v31763_v38, %v17623_v60 }
 0xc80   :  { %v17625_v48 = vadd.f32 %v31765_v10, %v17624_v27 }
 0xc82   :  { %31766 = vrcp.f32 %v17625_v48 }
 0xc8c   :  { %v31767_v20 = vpop.eup %31766 }
 0xc8d   :  { %v17628_v9 = vmul.f32 %v31767_v20, %v31751_v23  ;;  %v17630_v25 = vmul.f32 %v31767_v20, %v31753_v13  ;;  %v17633_v56 = vmul.f32 %v31767_v20, %v31755_v15  ;;  %v17636_v39 = vmul.f32 %v31767_v20, %v31757_v57 }
 0xc8e   :  { %v17639_v59 = vmul.f32 %v31767_v20, %v31759_v61  ;;  %v17642_v19 = vmul.f32 %v31767_v20, %v31761_v53  ;;  %v17645_v1 = vmul.f32 %v31767_v20, %v31763_v38  ;;  %v17648_v30 = vmul.f32 %v31767_v20, %v31765_v10 }
 0xc8f   :  { %v17629_v51 = vmul.f32 %v17628_v9, %v38203_v58  ;;  %v17631_v28 = vmul.f32 %v17630_v25, %v38204_v4  ;;  %v17634_v52 = vmul.f32 %v17633_v56, %v38205_v16  ;;  %v17637_v36 = vmul.f32 %v17636_v39, %v38206_v0 }
 0xc90   :  { %v17640_v29 = vmul.f32 %v17639_v59, %v36030_v37  ;;  %v17643_v43 = vmul.f32 %v17642_v19, %v36300_v33  ;;  %v17646_v14 = vmul.f32 %v17645_v1, %v36673_v31  ;;  %v17649_v62 = vmul.f32 %v17648_v30, %v36677_v49 }
 0xc91   :  { %v17632_v17 = vadd.f32 %v17631_v28, %v17629_v51 }
 0xc93   :  { %v17635_v50 = vadd.f32 %v17634_v52, %v17632_v17 }
 0xc95   :  { %v17638_v5 = vadd.f32 %v17637_v36, %v17635_v50 }
 0xc97   :  { %v17641_v26 = vadd.f32 %v17640_v29, %v17638_v5 }
 0xc99   :  { %v17644_v7 = vadd.f32 %v17643_v43, %v17641_v26 }
 0xc9b   :  { %v17647_v46 = vadd.f32 %v17646_v14, %v17644_v7 }
 0xc9d   :  { %v17650_v41 = vadd.f32 %v17649_v62, %v17647_v46 }
 0xc9f   :  { %v36690_v55 = vadd.f32 %v33791_v12, %v17650_v41 }
 0xca1   :  { %v17655_v2 = vmul.f32 %v36690_v55, %v38204_v4  ;;  %v17652_v21 = vmul.f32 %v36690_v55, %v38203_v58  ;;  %v17661_v32 = vmul.f32 %v36690_v55, %v38206_v0  ;;  %v17658_v3 = vmul.f32 %v36690_v55, %v38205_v16 }
 0xca2   :  { %v17667_v12 = vmul.f32 %v36690_v55, %v36300_v33  ;;  %v17664_v18 = vmul.f32 %v36690_v55, %v36030_v37  ;;  %v17673_v54 = vmul.f32 %v36690_v55, %v36677_v49  ;;  %v17670_v22 = vmul.f32 %v36690_v55, %v36673_v31 }
 0xca3   :  { %17656 = vadd.xlane.f32.xlu0 %v17655_v2  ;;  %17653 = vadd.xlane.f32.xlu1 %v17652_v21 }
 0xca7   :  { %17662 = vadd.xlane.f32.xlu0 %v17661_v32  ;;  %17659 = vadd.xlane.f32.xlu1 %v17658_v3 }
 0xcab   :  { %17668 = vadd.xlane.f32.xlu0 %v17667_v12  ;;  %17665 = vadd.xlane.f32.xlu1 %v17664_v18 }
 0xcaf   :  { %17674 = vadd.xlane.f32.xlu0 %v17673_v54  ;;  %17671 = vadd.xlane.f32.xlu1 %v17670_v22 }
 0xd30   :  { %v17657_v24 = vpop.xlane.xlu0 %17656  ;;  %v17654_v45 = vpop.xlane.xlu1 %17653 }
 0xd31   :  { %v17676_v40 = vmax.f32 %v17654_v45, %v17657_v24 }
 0xd34   :  { %v17663_v35 = vpop.xlane.xlu0 %17662  ;;  %v17660_v34 = vpop.xlane.xlu1 %17659 }
 0xd35   :  { %v17677_v6 = vmax.f32 %v17676_v40, %v17660_v34 }
 0xd37   :  { %v17678_v23 = vmax.f32 %v17677_v6, %v17663_v35 }
 0xd38   :  { %v17669_v13 = vpop.xlane.xlu0 %17668  ;;  %v17666_v47 = vpop.xlane.xlu1 %17665 }
 0xd39   :  { %v17679_v15 = vmax.f32 %v17678_v23, %v17666_v47 }
 0xd3b   :  { %v17680_v42 = vmax.f32 %v17679_v15, %v17669_v13 }
 0xd3c   :  { %v17672_v57 = vpop.xlane.xlu1 %17671  ;;  %v17675_v61 = vpop.xlane.xlu0 %17674 }
 0xd3d   :  { %v17681_v8 = vmax.f32 %v17680_v42, %v17672_v57 }
 0xd3f   :  { %v17682_v63 = vmax.f32 %v17681_v8, %v17675_v61 }
 0xd41   :  { %v17683_v53 = vsub.f32 %v17654_v45, %v17682_v63  ;;  %v17686_v60 = vsub.f32 %v17657_v24, %v17682_v63  ;;  %v17689_v38 = vsub.f32 %v17660_v34, %v17682_v63  ;;  %v17692_v27 = vsub.f32 %v17663_v35, %v17682_v63 }
 0xd42   :  { %v17695_v9 = vsub.f32 %v17666_v47, %v17682_v63  ;;  %v17698_v56 = vsub.f32 %v17669_v13, %v17682_v63  ;;  %v17701_v28 = vsub.f32 %v17672_v57, %v17682_v63  ;;  %v17704_v17 = vsub.f32 %v17675_v61, %v17682_v63 }
 0xd43   :  { %v17684_v10 = vmul.f32 1.442695, %v17683_v53  ;;  %v17687_v48 = vmul.f32 1.442695, %v17686_v60  ;;  %v17690_v20 = vmul.f32 1.442695, %v17689_v38 }
 0xd44   :  { %v17693_v25 = vmul.f32 1.442695, %v17692_v27  ;;  %v17696_v51 = vmul.f32 1.442695, %v17695_v9  ;;  %v17699_v39 = vmul.f32 1.442695, %v17698_v56 }
 0xd45   :  { %31768 = vpow2.f32 %v17684_v10  ;;  %v17702_v52 = vmul.f32 1.442695, %v17701_v28  ;;  %v17705_v59 = vmul.f32 1.442695, %v17704_v17  ;;  %v17829_v28 = vld [vmem:[%s37096_s3 + $0x8] sm:$0xff] }
 0xd46   :  { %31770 = vpow2.f32 %v17687_v48  ;;  %v17855_v17 = vand.u32 4294901760, %v17829_v28 }
 0xd47   :  { %31772 = vpow2.f32 %v17690_v20 }
 0xd48   :  { %31774 = vpow2.f32 %v17693_v25 }
 0xd49   :  { %31776 = vpow2.f32 %v17696_v51  ;;  %v17828_v51 = vld [vmem:[%s37096_s3] sm:$0xff] }
 0xd4a   :  { %31778 = vpow2.f32 %v17699_v39  ;;  %v17852_v39 = vand.u32 4294901760, %v17828_v51 }
 0xd4b   :  { %31780 = vpow2.f32 %v17702_v52 }
 0xd4c   :  { %31782 = vpow2.f32 %v17705_v59  ;;  %v36741_v52 = vpack.c.bf16 %v17855_v17, %v17852_v39  ;;  %v17830_v59 = vld [vmem:[%s37096_s3 + $0x10] sm:$0xff] }
 0xd4e   :  { %31234 = vmatpush3.bf16.msra.mxu1 %v36741_v52 }
 0xd4f   :  { %v31769_v50 = vpop.eup %31768  ;;  %31235 = vmatprep.subr.bf16.mxu1 %v37671_v11 }
 0xd50   :  { %v31771_v36 = vpop.eup %31770 }
 0xd51   :  { %v17707_v19 = vadd.f32 %v31771_v36, %v31769_v50  ;;  %v31773_v5 = vpop.eup %31772 }
 0xd52   :  { %v31775_v1 = vpop.eup %31774 }
 0xd53   :  { %v17708_v29 = vadd.f32 %v31773_v5, %v17707_v19  ;;  %v31777_v43 = vpop.eup %31776 }
 0xd54   :  { %v31779_v7 = vpop.eup %31778 }
 0xd55   :  { %v17709_v26 = vadd.f32 %v31775_v1, %v17708_v29  ;;  %v31781_v46 = vpop.eup %31780  ;;  %v17832_v29 = vld [vmem:[%s37096_s3 + $0x20] sm:$0xff] }
 0xd56   :  { %v31783_v41 = vpop.eup %31782 }
 0xd57   :  { %v17710_v30 = vadd.f32 %v31777_v43, %v17709_v26  ;;  %v17864_v26 = vand.u32 4294901760, %v17832_v29 }
 0xd59   :  { %v17711_v14 = vadd.f32 %v31779_v7, %v17710_v30 }
 0xd5b   :  { %v17712_v62 = vadd.f32 %v31781_v46, %v17711_v14  ;;  %v17835_v14 = vld [vmem:[%s37096_s3 + $0x38] sm:$0xff] }
 0xd5d   :  { %v17713_v2 = vadd.f32 %v31783_v41, %v17712_v62  ;;  %v17873_v62 = vand.u32 4294901760, %v17835_v14 }
 0xd5f   :  { %31784 = vrcp.f32 %v17713_v2  ;;  %v36773_v2 = vsub.f32 %v17829_v28, %v17855_v17 }
 0xd61   :  { %v37631_v17 = vand.u32 4294901760, %v36773_v2 }
 0xd69   :  { %v31785_v21 = vpop.eup %31784 }
 0xd6a   :  { %v17716_v32 = vmul.f32 %v31785_v21, %v31769_v50  ;;  %v17718_v3 = vmul.f32 %v31785_v21, %v31771_v36  ;;  %v17721_v12 = vmul.f32 %v31785_v21, %v31773_v5  ;;  %v17724_v22 = vmul.f32 %v31785_v21, %v31775_v1  ;;  %v17831_v50 = vld [vmem:[%s37096_s3 + $0x18] sm:$0xff]  ;;  %v17833_v1 = vld [vmem:[%s37096_s3 + $0x28] sm:$0xff] }
 0xd6b   :  { %v17727_v40 = vmul.f32 %v31785_v21, %v31777_v43  ;;  %v17730_v6 = vmul.f32 %v31785_v21, %v31779_v7  ;;  %v17733_v47 = vmul.f32 %v31785_v21, %v31781_v46  ;;  %v17736_v57 = vmul.f32 %v31785_v21, %v31783_v41  ;;  %v17834_v7 = vld [vmem:[%s37096_s3 + $0x30] sm:$0xff] }
 0xd6c   :  { %v17717_v18 = vmul.f32 %v17716_v32, %v38203_v58  ;;  %v17719_v54 = vmul.f32 %v17718_v3, %v38204_v4  ;;  %v17722_v45 = vmul.f32 %v17721_v12, %v38205_v16  ;;  %v17725_v34 = vmul.f32 %v17724_v22, %v38206_v0  ;;  %v17836_v3 = vld [vmem:[%s37096_s3 + $0x40] sm:$0xff]  ;;  %v17837_v12 = vld [vmem:[%s37096_s3 + $0x48] sm:$0xff] }
 0xd6d   :  { %v17728_v13 = vmul.f32 %v17727_v40, %v36030_v37  ;;  %v17731_v42 = vmul.f32 %v17730_v6, %v36300_v33  ;;  %v17734_v61 = vmul.f32 %v17733_v47, %v36673_v31  ;;  %v17737_v53 = vmul.f32 %v17736_v57, %v36677_v49  ;;  %v17839_v40 = vld [vmem:[%s37096_s3 + $0x58] sm:$0xff] }
 0xd6e   :  { %v17720_v24 = vadd.f32 %v17719_v54, %v17717_v18  ;;  %v17858_v36 = vand.u32 4294901760, %v17830_v59  ;;  %v17861_v19 = vand.u32 4294901760, %v17831_v50  ;;  %v17867_v43 = vand.u32 4294901760, %v17833_v1  ;;  %v17838_v18 = vld [vmem:[%s37096_s3 + $0x50] sm:$0xff] }
 0xd6f   :  { %v17870_v46 = vand.u32 4294901760, %v17834_v7  ;;  %v36771_v41 = vsub.f32 %v17828_v51, %v17852_v39  ;;  %v36788_v54 = vsub.f32 %v17832_v29, %v17864_v26  ;;  %v36805_v6 = vsub.f32 %v17835_v14, %v17873_v62 }
 0xd70   :  { %v17723_v35 = vadd.f32 %v17722_v45, %v17720_v24  ;;  %v36751_v5 = vpack.c.bf16 %v17861_v19, %v17858_v36  ;;  %v36761_v30 = vpack.c.bf16 %v17867_v43, %v17864_v26  ;;  %v36775_v21 = vsub.f32 %v17830_v59, %v17858_v36 }
 0xd71   :  { %v36777_v32 = vsub.f32 %v17831_v50, %v17861_v19  ;;  %v36790_v22 = vsub.f32 %v17833_v1, %v17867_v43  ;;  %v36792_v24 = vpack.c.bf16 %v17873_v62, %v17870_v46  ;;  %v36794_v45 = vsub.f32 %v17834_v7, %v17870_v46 }
 0xd72   :  { %v17726_v23 = vadd.f32 %v17725_v34, %v17723_v35  ;;  %31237 = vmatpush3.bf16.msra.mxu1 %v36751_v5  ;;  %v17840_v35 = vld [vmem:[%s37096_s3 + $0x60] sm:$0xff]  ;;  %v17841_v34 = vld [vmem:[%s37096_s3 + $0x68] sm:$0xff]  ;;  %v17882_v47 = vand.u32 4294901760, %v17838_v18  ;;  %v37632_v39 = vand.u32 4294901760, %v36771_v41  ;;  %v17953_v36 = vsub.f32 %v36773_v2, %v37631_v17 }
 0xd73   :  { %31238 = vmatprep.subr.bf16.mxu1 %v37671_v11  ;;  %v17888_v57 = vand.u32 4294901760, %v17840_v35  ;;  %v37630_v1 = vand.u32 4294901760, %v36775_v21  ;;  %v37629_v26 = vand.u32 4294901760, %v36777_v32 }
 0xd74   :  { %v17729_v15 = vadd.f32 %v17728_v13, %v17726_v23  ;;  %v17876_v23 = vand.u32 4294901760, %v17836_v3  ;;  %v17879_v13 = vand.u32 4294901760, %v17837_v12  ;;  %v17946_v50 = vsub.f32 %v36771_v41, %v37632_v39 }
 0xd75   :  { %v17954_v29 = vand.u32 4294901760, %v17953_v36  ;;  %v17960_v7 = vsub.f32 %v36775_v21, %v37630_v1  ;;  %v17967_v14 = vsub.f32 %v36777_v32, %v37629_v26 }
 0xd76   :  { %v17732_v8 = vadd.f32 %v17731_v42, %v17729_v15  ;;  %31240 = vmatpush3.bf16.msra.mxu1 %v36761_v30  ;;  %v17842_v15 = vld [vmem:[%s37096_s3 + $0x70] sm:$0xff]  ;;  %v17885_v42 = vand.u32 4294901760, %v17839_v40  ;;  %v17947_v19 = vand.u32 4294901760, %v17946_v50 }
 0xd77   :  { %31241 = vmatprep.subr.bf16.mxu1 %v37671_v11  ;;  %v17961_v46 = vand.u32 4294901760, %v17960_v7  ;;  %v17968_v62 = vand.u32 4294901760, %v17967_v14 }
 0xd78   :  { %v17735_v63 = vadd.f32 %v17734_v61, %v17732_v8  ;;  %v17891_v8 = vand.u32 4294901760, %v17841_v34  ;;  %v17843_v61 = vld [vmem:[%s37096_s3 + $0x78] sm:$0xff]  ;;  %v36857_v43 = vpack.c.bf16 %v17954_v29, %v17947_v19 }
 0xd7a   :  { %v17738_v60 = vadd.f32 %v17737_v53, %v17735_v63  ;;  %31243 = vmatpush3.bf16.msra.mxu1 %v36792_v24  ;;  %v17894_v63 = vand.u32 4294901760, %v17842_v15  ;;  %v36815_v53 = vpack.c.bf16 %v17879_v13, %v17876_v23  ;;  %v36838_v28 = vpack.c.bf16 %v17891_v8, %v17888_v57 }
 0xd7b   :  { %31244 = vmatprep.subr.bf16.mxu1 %v37671_v11 }
 0xd7c   :  { %v36717_v38 = vadd.f32 %v17738_v60, %v36690_v55  ;;  %v36817_v60 = vsub.f32 %v17836_v3, %v17876_v23  ;;  %38208 = vst [vmem:[#allocation14_spill] sm:$0xff] %v36838_v28  ;;  %v37628_v3 = vand.u32 4294901760, %v36788_v54 }
 0xd7e   :  { %v17743_v27 = vmul.f32 %v36717_v38, %v38204_v4  ;;  %v17740_v10 = vmul.f32 %v36717_v38, %v38203_v58  ;;  %v17749_v48 = vmul.f32 %v36717_v38, %v38206_v0  ;;  %v17746_v20 = vmul.f32 %v36717_v38, %v38205_v16  ;;  %31246 = vmatpush3.bf16.msra.mxu1 %v36815_v53 }
 0xd7f   :  { %v17755_v55 = vmul.f32 %v36717_v38, %v36300_v33  ;;  %v17752_v9 = vmul.f32 %v36717_v38, %v36030_v37  ;;  %v17761_v25 = vmul.f32 %v36717_v38, %v36677_v49  ;;  %v17758_v56 = vmul.f32 %v36717_v38, %v36673_v31  ;;  %31247 = vmatprep.subr.bf16.mxu1 %v37671_v11 }
 0xd80   :  { %17744 = vadd.xlane.f32.xlu0 %v17743_v27  ;;  %17741 = vadd.xlane.f32.xlu1 %v17740_v10  ;;  %v36819_v27 = vsub.f32 %v17837_v12, %v17879_v13  ;;  %v36821_v10 = vsub.f32 %v17838_v18, %v17882_v47  ;;  %v37627_v12 = vand.u32 4294901760, %v36790_v22  ;;  %v36867_v18 = vpack.c.bf16 %v17968_v62, %v17961_v46 }
 0xd81   :  { %v37626_v13 = vand.u32 4294901760, %v36794_v45 }
 0xd82   :  { %v37619_v14 = vand.u32 4294901760, %v36821_v10 }
 0xd84   :  { %17750 = vadd.xlane.f32.xlu0 %v17749_v48  ;;  %17747 = vadd.xlane.f32.xlu1 %v17746_v20  ;;  %v36823_v48 = vsub.f32 %v17839_v40, %v17885_v42  ;;  %v36825_v20 = vsub.f32 %v17840_v35, %v17888_v57  ;;  %v17974_v40 = vsub.f32 %v36788_v54, %v37628_v3 }
 0xd85   :  { %v17981_v35 = vsub.f32 %v36790_v22, %v37627_v12 }
 0xd86   :  { %v37618_v46 = vand.u32 4294901760, %v36823_v48 }
 0xd87   :  { %v17982_v23 = vand.u32 4294901760, %v17981_v35 }
 0xd88   :  { %17756 = vadd.xlane.f32.xlu0 %v17755_v55  ;;  %17753 = vadd.xlane.f32.xlu1 %v17752_v9  ;;  %v36827_v55 = vsub.f32 %v17841_v34, %v17891_v8  ;;  %v17897_v9 = vand.u32 4294901760, %v17843_v61  ;;  %v17975_v34 = vand.u32 4294901760, %v17974_v40  ;;  %v18016_v40 = vsub.f32 %v36821_v10, %v37619_v14 }
 0xd89   :  { %v18023_v35 = vsub.f32 %v36823_v48, %v37618_v46 }
 0xd8a   :  { %v36835_v51 = vsub.f32 %v17843_v61, %v17897_v9  ;;  %v36844_v59 = vpack.c.bf16 %v17897_v9, %v17894_v63  ;;  %v37622_v9 = vand.u32 4294901760, %v36819_v27 }
 0xd8c   :  { %17762 = vadd.xlane.f32.xlu0 %v17761_v25  ;;  %17759 = vadd.xlane.f32.xlu1 %v17758_v56  ;;  %v36829_v25 = vsub.f32 %v17842_v15, %v17894_v63  ;;  %v36832_v56 = vpack.c.bf16 %v17885_v42, %v17882_v47  ;;  %38209 = vst [vmem:[#allocation16_spill] sm:$0xff] %v36844_v59  ;;  %v37625_v47 = vand.u32 4294901760, %v36805_v6  ;;  %v37624_v63 = vand.u32 4294901760, %v36817_v60 }
 0xd8d   :  { %v36877_v15 = vpack.c.bf16 %v17982_v23, %v17975_v34  ;;  %v17988_v42 = vsub.f32 %v36794_v45, %v37626_v13  ;;  %v18009_v19 = vsub.f32 %v36819_v27, %v37622_v9  ;;  %v18017_v34 = vand.u32 4294901760, %v18016_v40 }
 0xd8e   :  { %38207 = vst [vmem:[#allocation12_spill] sm:$0xff] %v36832_v56  ;;  %31249 = vmatpush3.bf16.msra.mxu1 %v36832_v56  ;;  %v17995_v57 = vsub.f32 %v36805_v6, %v37625_v47  ;;  %v18002_v36 = vsub.f32 %v36817_v60, %v37624_v63  ;;  %v18024_v23 = vand.u32 4294901760, %v18023_v35  ;;  %v37623_v40 = vand.u32 4294901760, %v36835_v51 }
 0xd8f   :  { %31250 = vmatprep.subr.bf16.mxu1 %v37671_v11  ;;  %v17989_v8 = vand.u32 4294901760, %v17988_v42  ;;  %v18010_v7 = vand.u32 4294901760, %v18009_v19  ;;  %v37617_v42 = vand.u32 4294901760, %v36825_v20 }
 0xd90   :  { %v17996_v61 = vand.u32 4294901760, %v17995_v57  ;;  %v18003_v29 = vand.u32 4294901760, %v18002_v36  ;;  %v37620_v57 = vand.u32 4294901760, %v36827_v55 }
 0xd92   :  { %31252 = vmatpush3.bf16.msra.mxu1 %v36838_v28  ;;  %v36887_v50 = vpack.c.bf16 %v17996_v61, %v17989_v8  ;;  %v36897_v62 = vpack.c.bf16 %v18010_v7, %v18003_v29  ;;  %v36907_v8 = vpack.c.bf16 %v18024_v23, %v18017_v34  ;;  %v18030_v61 = vsub.f32 %v36825_v20, %v37617_v42 }
 0xd93   :  { %31253 = vmatprep.subr.bf16.mxu1 %v37671_v11  ;;  %v18037_v36 = vsub.f32 %v36827_v55, %v37620_v57  ;;  %v37621_v7 = vand.u32 4294901760, %v36829_v25  ;;  %v18051_v23 = vsub.f32 %v36835_v51, %v37623_v40 }
 0xd94   :  { %v18031_v19 = vand.u32 4294901760, %v18030_v61 }
 0xd95   :  { %v18038_v29 = vand.u32 4294901760, %v18037_v36  ;;  %v18044_v34 = vsub.f32 %v36829_v25, %v37621_v7  ;;  %v18052_v46 = vand.u32 4294901760, %v18051_v23 }
 0xd96   :  { %31255 = vmatpush3.bf16.msra.mxu1 %v36844_v59 }
 0xd97   :  { %31256 = vmatprep.subr.bf16.mxu1 %v37671_v11  ;;  %v36917_v35 = vpack.c.bf16 %v18038_v29, %v18031_v19  ;;  %v18045_v42 = vand.u32 4294901760, %v18044_v34 }
 0xd99   :  { %v36925_v14 = vpack.c.bf16 %v18052_v46, %v18045_v42 }
 0xe0d   :  { %v17745_v29 = vpop.xlane.xlu0 %17744  ;;  %v17742_v57 = vpop.xlane.xlu1 %17741 }
 0xe0e   :  { %v17764_v9 = vmax.f32 %v17742_v57, %v17745_v29 }
 0xe11   :  { %v17751_v40 = vpop.xlane.xlu0 %17750  ;;  %v17748_v34 = vpop.xlane.xlu1 %17747 }
 0xe12   :  { %v17765_v23 = vmax.f32 %v17764_v9, %v17748_v34 }
 0xe14   :  { %v17766_v42 = vmax.f32 %v17765_v23, %v17751_v40 }
 0xe15   :  { %v17757_v63 = vpop.xlane.xlu0 %17756  ;;  %v17754_v47 = vpop.xlane.xlu1 %17753 }
 0xe16   :  { %v17767_v13 = vmax.f32 %v17766_v42, %v17754_v47 }
 0xe18   :  { %v17768_v3 = vmax.f32 %v17767_v13, %v17757_v63 }
 0xe19   :  { %v17760_v26 = vpop.xlane.xlu1 %17759  ;;  %v17763_v17 = vpop.xlane.xlu0 %17762 }
 0xe1a   :  { %v17769_v1 = vmax.f32 %v17768_v3, %v17760_v26 }
 0xe1c   :  { %v17770_v7 = vmax.f32 %v17769_v1, %v17763_v17 }
 0xe1e   :  { %v17771_v19 = vsub.f32 %v17742_v57, %v17770_v7  ;;  %v17774_v9 = vsub.f32 %v17745_v29, %v17770_v7  ;;  %v17777_v36 = vsub.f32 %v17748_v34, %v17770_v7  ;;  %v17780_v61 = vsub.f32 %v17751_v40, %v17770_v7 }
 0xe1f   :  { %v17783_v28 = vsub.f32 %v17754_v47, %v17770_v7  ;;  %v17786_v3 = vsub.f32 %v17757_v63, %v17770_v7  ;;  %v17789_v56 = vsub.f32 %v17760_v26, %v17770_v7  ;;  %v17792_v57 = vsub.f32 %v17763_v17, %v17770_v7 }
 0xe20   :  { %v17772_v46 = vmul.f32 1.442695, %v17771_v19  ;;  %v17775_v23 = vmul.f32 1.442695, %v17774_v9  ;;  %v17778_v59 = vmul.f32 1.442695, %v17777_v36 }
 0xe21   :  { %v17781_v13 = vmul.f32 1.442695, %v17780_v61  ;;  %v17784_v12 = vmul.f32 1.442695, %v17783_v28  ;;  %v17787_v1 = vmul.f32 1.442695, %v17786_v3 }
 0xe22   :  { %31786 = vpow2.f32 %v17772_v46  ;;  %v17790_v29 = vmul.f32 1.442695, %v17789_v56  ;;  %v17793_v40 = vmul.f32 1.442695, %v17792_v57 }
 0xe23   :  { %31788 = vpow2.f32 %v17775_v23 }
 0xe24   :  { %31790 = vpow2.f32 %v17778_v59 }
 0xe25   :  { %31792 = vpow2.f32 %v17781_v13 }
 0xe26   :  { %31794 = vpow2.f32 %v17784_v12 }
 0xe27   :  { %31796 = vpow2.f32 %v17787_v1 }
 0xe28   :  { %31798 = vpow2.f32 %v17790_v29 }
 0xe29   :  { %31800 = vpow2.f32 %v17793_v40 }
 0xe2c   :  { %v31787_v19 = vpop.eup %31786 }
 0xe2d   :  { %v31789_v34 = vpop.eup %31788 }
 0xe2e   :  { %v17795_v9 = vadd.f32 %v31789_v34, %v31787_v19  ;;  %v31791_v36 = vpop.eup %31790 }
 0xe2f   :  { %v31793_v46 = vpop.eup %31792 }
 0xe30   :  { %v17796_v47 = vadd.f32 %v31791_v36, %v17795_v9  ;;  %v31795_v63 = vpop.eup %31794 }
 0xe31   :  { %v31797_v28 = vpop.eup %31796 }
 0xe32   :  { %v17797_v61 = vadd.f32 %v31793_v46, %v17796_v47  ;;  %v31799_v23 = vpop.eup %31798 }
 0xe33   :  { %v31801_v17 = vpop.eup %31800 }
 0xe34   :  { %v17798_v59 = vadd.f32 %v31795_v63, %v17797_v61 }
 0xe36   :  { %v17799_v26 = vadd.f32 %v31797_v28, %v17798_v59 }
 0xe38   :  { %v17800_v13 = vadd.f32 %v31799_v23, %v17799_v26 }
 0xe3a   :  { %v17801_v12 = vadd.f32 %v31801_v17, %v17800_v13 }
 0xe3c   :  { %31802 = vrcp.f32 %v17801_v12 }
 0xe46   :  { %v31803_v56 = vpop.eup %31802 }
 0xe47   :  { %v17804_v7 = vmul.f32 %v31803_v56, %v31787_v19  ;;  %v17806_v3 = vmul.f32 %v31803_v56, %v31789_v34  ;;  %v17809_v1 = vmul.f32 %v31803_v56, %v31791_v36  ;;  %v17812_v40 = vmul.f32 %v31803_v56, %v31793_v46 }
 0xe48   :  { %v17815_v61 = vmul.f32 %v31803_v56, %v31795_v63  ;;  %v17818_v26 = vmul.f32 %v31803_v56, %v31797_v28  ;;  %v17821_v12 = vmul.f32 %v31803_v56, %v31799_v23  ;;  %v17824_v36 = vmul.f32 %v31803_v56, %v31801_v17 }
 0xe49   :  { %v17805_v57 = vmul.f32 %v17804_v7, %v38203_v58  ;;  %v17807_v29 = vmul.f32 %v17806_v3, %v38204_v4  ;;  %v17810_v47 = vmul.f32 %v17809_v1, %v38205_v16  ;;  %v17813_v59 = vmul.f32 %v17812_v40, %v38206_v0 }
 0xe4a   :  { %v17816_v13 = vmul.f32 %v17815_v61, %v36030_v37  ;;  %v17819_v34 = vmul.f32 %v17818_v26, %v36300_v33  ;;  %v17822_v4 = vmul.f32 %v17821_v12, %v36673_v31  ;;  %v17825_v7 = vmul.f32 %v17824_v36, %v36677_v49 }
 0xe4b   :  { %v17808_v9 = vadd.f32 %v17807_v29, %v17805_v57  ;;  %v38210_v33 = vpack.c.bf16 %v36773_v2, %v36771_v41  ;;  %v38211_v31 = vpack.c.bf16 %v36777_v32, %v36775_v21  ;;  %v38212_v49 = vpack.c.bf16 %v36790_v22, %v36788_v54 }
 0xe4c   :  { %v38223_v17 = vand.u32 4294901760, %v36775_v21  ;;  %v38224_v56 = vand.u32 4294901760, %v36777_v32  ;;  %v38227_v29 = vand.u32 4294901760, %v36794_v45  ;;  %v38228_v21 = vand.u32 4294901760, %v36805_v6 }
 0xe4d   :  { %v17811_v42 = vadd.f32 %v17810_v47, %v17808_v9  ;;  %v38229_v40 = vand.u32 4294901760, %v36817_v60  ;;  %v38230_v9 = vand.u32 4294901760, %v36819_v27 }
 0xe4e   :  { %v31332_v1 = vpack.c.bf16 %v38224_v56, %v38223_v17  ;;  %v31338_v32 = vpack.c.bf16 %v38228_v21, %v38227_v29 }
 0xe4f   :  { %v17814_v39 = vadd.f32 %v17813_v59, %v17811_v42  ;;  %v31341_v47 = vpack.c.bf16 %v38230_v9, %v38229_v40 }
 0xe51   :  { %v17817_v19 = vadd.f32 %v17816_v13, %v17814_v39  ;;  %v38214_v39 = vpack.c.bf16 %v36819_v27, %v36817_v60  ;;  %v38235_v60 = vand.u32 4294901760, %v36829_v25  ;;  %v38236_v27 = vand.u32 4294901760, %v36835_v51 }
 0xe53   :  { %v17820_v58 = vadd.f32 %v17819_v34, %v17817_v19  ;;  %v31350_v26 = vpack.c.bf16 %v38236_v27, %v38235_v60 }
 0xe55   :  { %v17823_v46 = vadd.f32 %v17822_v4, %v17820_v58 }
 0xe57   :  { %v17826_v16 = vadd.f32 %v17825_v7, %v17823_v46 }
 0xe59   :  { %v17827_v63 = vadd.f32 %v17826_v16, %v36717_v38  ;;  %v38213_v38 = vpack.c.bf16 %v36805_v6, %v36794_v45  ;;  %v38233_v45 = vand.u32 4294901760, %v36825_v20  ;;  %v38234_v6 = vand.u32 4294901760, %v36827_v55 }
 0xe5b   :  { %v36952_v3 = vand.u32 4294901760, %v17827_v63  ;;  %v31347_v59 = vpack.c.bf16 %v38234_v6, %v38233_v45 }
 0xe5d   :  { %v17933_v0 = vsub.f32 %v17827_v63, %v36952_v3 }
 0xe5f   :  { %v17934_v42 = vand.u32 4294901760, %v17933_v0 }
 0xe61   :  { %v17935_v37 = vsub.f32 %v17933_v0, %v17934_v42 }
 0xe63   :  { %v17936_v28 = vand.u32 4294901760, %v17935_v37 }
 0xe65   :  { %27167 = vmatmul.mubr.f32.vlgmr.msra.gmra.mrb[10].mxu1 %v17936_v28 }
 0xe66   :  { %31258 = vmatpush3.bf16.msra.mxu1 %v36857_v43  ;;  %27201 = vmatprep.mubr.msk.f32.mxu1 %vm31836_vm0, %v37732_v44  ;;  %v38215_v43 = vpack.c.bf16 %v36823_v48, %v36821_v10 }
 0xe67   :  { %31259 = vmatprep.subr.bf16.mxu1 %v37671_v11 }
 0xe6a   :  { %31261 = vmatpush3.bf16.msra.mxu1 %v36867_v18  ;;  %v38216_v18 = vpack.c.bf16 %v36827_v55, %v36825_v20 }
 0xe6b   :  { %31262 = vmatprep.subr.bf16.mxu1 %v37671_v11 }
 0xe6e   :  { %31264 = vmatpush3.bf16.msra.mxu1 %v36877_v15  ;;  %v38217_v15 = vpack.c.bf16 %v36835_v51, %v36829_v25 }
 0xe6f   :  { %31265 = vmatprep.subr.bf16.mxu1 %v37671_v11 }
 0xe72   :  { %31267 = vmatpush3.bf16.msra.mxu1 %v36887_v50  ;;  %v38218_v50 = vld [vmem:[#allocation12_spill] sm:$0xff] }
 0xe73   :  { %31268 = vmatprep.subr.bf16.mxu1 %v37671_v11 }
 0xe76   :  { %31270 = vmatpush3.bf16.msra.mxu1 %v36897_v62  ;;  %v38220_v62 = vld [vmem:[#allocation16_spill] sm:$0xff] }
 0xe77   :  { %31271 = vmatprep.subr.bf16.mxu1 %v37671_v11 }
 0xe7a   :  { %31273 = vmatpush3.bf16.msra.mxu1 %v36907_v8  ;;  %v38221_v8 = vand.u32 4294901760, %v36771_v41  ;;  %v38225_v41 = vand.u32 4294901760, %v36788_v54  ;;  %v38231_v54 = vand.u32 4294901760, %v36821_v10 }
 0xe7b   :  { %31274 = vmatprep.subr.bf16.mxu1 %v37671_v11 }
 0xe7e   :  { %31276 = vmatpush3.bf16.msra.mxu1 %v36917_v35  ;;  %v38222_v35 = vand.u32 4294901760, %v36773_v2  ;;  %v38226_v2 = vand.u32 4294901760, %v36790_v22  ;;  %v38232_v22 = vand.u32 4294901760, %v36823_v48 }
 0xe7f   :  { %31277 = vmatprep.subr.bf16.mxu1 %v37671_v11 }
 0xe80   :  { %v31329_v23 = vpack.c.bf16 %v38222_v35, %v38221_v8  ;;  %v31335_v57 = vpack.c.bf16 %v38226_v2, %v38225_v41  ;;  %v31344_v61 = vpack.c.bf16 %v38232_v22, %v38231_v54 }
 0xe82   :  { %31279 = vmatpush3.bf16.msra.mxu1 %v36925_v14  ;;  %v38219_v14 = vld [vmem:[#allocation14_spill] sm:$0xff] }
 0xe83   :  { %31280 = vmatprep.subr.bf16.mxu1 %v37671_v11 }
 0xe85   :  { %27202 = vmatmul.mubr.f32.vlgmr.msra.gmra.mrb[10].mxu1 %v36952_v3 }
 0xe86   :  { %31282 = vmatpush3.bf16.msra.mxu1 %v38210_v33  ;;  %27236 = vmatprep.mubr.msk.f32.mxu1 %vm31836_vm0, %v37732_v44 }
 0xe87   :  { %31283 = vmatprep.subr.bf16.mxu1 %v37671_v11 }
 0xe8a   :  { %31285 = vmatpush3.bf16.msra.mxu1 %v38211_v31 }
 0xe8b   :  { %31286 = vmatprep.subr.bf16.mxu1 %v37671_v11 }
 0xe8e   :  { %31288 = vmatpush3.bf16.msra.mxu1 %v38212_v49 }
 0xe8f   :  { %31289 = vmatprep.subr.bf16.mxu1 %v37671_v11 }
 0xe92   :  { %31291 = vmatpush3.bf16.msra.mxu1 %v38213_v38 }
 0xe93   :  { %31292 = vmatprep.subr.bf16.mxu1 %v37671_v11 }
 0xe96   :  { %31294 = vmatpush3.bf16.msra.mxu1 %v38214_v39 }
 0xe97   :  { %31295 = vmatprep.subr.bf16.mxu1 %v37671_v11 }
 0xe9a   :  { %31297 = vmatpush3.bf16.msra.mxu1 %v38215_v43 }
 0xe9b   :  { %31298 = vmatprep.subr.bf16.mxu1 %v37671_v11 }
 0xe9e   :  { %31300 = vmatpush3.bf16.msra.mxu1 %v38216_v18 }
 0xe9f   :  { %31301 = vmatprep.subr.bf16.mxu1 %v37671_v11 }
 0xea2   :  { %31303 = vmatpush3.bf16.msra.mxu1 %v38217_v15 }
 0xea3   :  { %31304 = vmatprep.subr.bf16.mxu1 %v37671_v11 }
 0xea5   :  { %27237 = vmatmul.mubr.f32.vlgmr.msra.gmra.mrb[10].mxu1 %v17933_v0 }
 0xea6   :  { %31306 = vmatpush3.bf16.msra.mxu1 %v36741_v52  ;;  %27271 = vmatprep.mubr.msk.f32.mxu1 %vm31836_vm0, %v37732_v44 }
 0xea7   :  { %31307 = vmatprep.subr.bf16.mxu1 %v37671_v11 }
 0xeaa   :  { %31309 = vmatpush3.bf16.msra.mxu1 %v36751_v5 }
 0xeab   :  { %31310 = vmatprep.subr.bf16.mxu1 %v37671_v11 }
 0xeae   :  { %31312 = vmatpush3.bf16.msra.mxu1 %v36761_v30 }
 0xeaf   :  { %31313 = vmatprep.subr.bf16.mxu1 %v37671_v11 }
 0xeb2   :  { %31315 = vmatpush3.bf16.msra.mxu1 %v36792_v24 }
 0xeb3   :  { %31316 = vmatprep.subr.bf16.mxu1 %v37671_v11 }
 0xeb6   :  { %31318 = vmatpush3.bf16.msra.mxu1 %v36815_v53 }
 0xeb7   :  { %31319 = vmatprep.subr.bf16.mxu1 %v37671_v11 }
 0xeba   :  { %31321 = vmatpush3.bf16.msra.mxu1 %v38218_v50 }
 0xebb   :  { %31322 = vmatprep.subr.bf16.mxu1 %v37671_v11 }
 0xebe   :  { %31324 = vmatpush3.bf16.msra.mxu1 %v38219_v14 }
 0xebf   :  { %31325 = vmatprep.subr.bf16.mxu1 %v37671_v11 }
 0xec2   :  { %31327 = vmatpush3.bf16.msra.mxu1 %v38220_v62 }
 0xec3   :  { %31328 = vmatprep.subr.bf16.mxu1 %v37671_v11 }
 0xec5   :  { %27272 = vmatmul.mubr.f32.vlgmr.msra.gmra.mrb[10].mxu1 %v17934_v42 }
 0xec6   :  { %31330 = vmatpush3.bf16.msra.mxu1 %v31329_v23  ;;  %27306 = vmatprep.mubr.msk.f32.mxu1 %vm31836_vm0, %v37732_v44 }
 0xec7   :  { %31331 = vmatprep.subr.bf16.mxu1 %v37671_v11 }
 0xeca   :  { %31333 = vmatpush3.bf16.msra.mxu1 %v31332_v1 }
 0xecb   :  { %31334 = vmatprep.subr.bf16.mxu1 %v37671_v11 }
 0xece   :  { %31336 = vmatpush3.bf16.msra.mxu1 %v31335_v57 }
 0xecf   :  { %31337 = vmatprep.subr.bf16.mxu1 %v37671_v11 }
 0xed2   :  { %31339 = vmatpush3.bf16.msra.mxu1 %v31338_v32 }
 0xed3   :  { %31340 = vmatprep.subr.bf16.mxu1 %v37671_v11 }
 0xed6   :  { %31342 = vmatpush3.bf16.msra.mxu1 %v31341_v47 }
 0xed7   :  { %31343 = vmatprep.subr.bf16.mxu1 %v37671_v11 }
 0xeda   :  { %31345 = vmatpush3.bf16.msra.mxu1 %v31344_v61 }
 0xedb   :  { %31346 = vmatprep.subr.bf16.mxu1 %v37671_v11 }
 0xede   :  { %31348 = vmatpush3.bf16.msra.mxu1 %v31347_v59 }
 0xedf   :  { %31349 = vmatprep.subr.bf16.mxu1 %v37671_v11 }
 0xee2   :  { %31351 = vmatpush3.bf16.msra.mxu1 %v31350_v26 }
 0xee3   :  { %31352 = vmatprep.subr.bf16.mxu1 %v37671_v11 }
 0xee5   :  { %27307 = vmatmul.mubr.f32.vlgmr.msra.gmra.mrb[10].mxu1 %v36952_v3 }
 0xee6   :  { %31354 = vmatpush3.bf16.msra.mxu1 %v36741_v52  ;;  %27341 = vmatprep.mubr.msk.f32.mxu1 %vm31836_vm0, %v37732_v44  ;;  %v18607_v44 = vld [vmem:[%s37097_s4] ss:$0 sm:$0xff]  ;;  %vm18492_vm0 = vcmask 31744  }
 0xee7   :  { %31355 = vmatprep.subr.bf16.mxu1 %v37671_v11 }
 0xeea   :  { %31357 = vmatpush3.bf16.msra.mxu1 %v36751_v5 }
 0xeeb   :  { %31358 = vmatprep.subr.bf16.mxu1 %v37671_v11 }
 0xeee   :  { %31360 = vmatpush3.bf16.msra.mxu1 %v36761_v30 }
 0xeef   :  { %31361 = vmatprep.subr.bf16.mxu1 %v37671_v11 }
 0xef2   :  { %31363 = vmatpush3.bf16.msra.mxu1 %v36792_v24 }
 0xef3   :  { %31364 = vmatprep.subr.bf16.mxu1 %v37671_v11 }
 0xef6   :  { %31366 = vmatpush3.bf16.msra.mxu1 %v36815_v53 }
 0xef7   :  { %31367 = vmatprep.subr.bf16.mxu1 %v37671_v11 }
 0xefa   :  { %31369 = vmatpush3.bf16.msra.mxu1 %v38218_v50 }
 0xefb   :  { %31370 = vmatprep.subr.bf16.mxu1 %v37671_v11 }
 0xefe   :  { %31372 = vmatpush3.bf16.msra.mxu1 %v38219_v14 }
 0xeff   :  { %31373 = vmatprep.subr.bf16.mxu1 %v37671_v11 }
 0xf02   :  { %31375 = vmatpush3.bf16.msra.mxu1 %v38220_v62 }
 0xf05   :  { %27342 = vmatmul.mubr.f32.vlgmr.msra.gmra.mrb[10].mxu1 %v36952_v3 }
 0xfd8   :  { %v18488_v52 = vpop.f32.mrb[10].mxu1 }
 0xfd9   :  { %v31377_v5 = vadd.f32 %v18607_v44, %v18488_v52  ;;  %v27343_v30 = vpop.f32.mrb[11].mxu1 }
 0xfdb   :  { %18493 = vst.msk [vmem:[%s37098_s5] sm:$0xff] %vm18492_vm0, %v31377_v5 }
 0xfdc   :  { %18498 = vsyncpa [#allocation3], 1 }

</bundles_post_ra>
